<compile_context>
chip_gen: v7x
topology: tpu7x:2x2x1
jax: 0.10.0
libtpu: 0.0.40
codegen_flags: <defaults>
</compile_context>

<pallas_src>
import jax
import jax.numpy as jnp
from jax.experimental import pallas as pl
from jax.experimental.pallas import tpu as pltpu


_VMEM_LIMIT = 32 * 1024 * 1024  # per-core; conservative for v7x's 64 MiB/TC
_LANE = 128


def _round_up(x, m):
    return (x + m - 1) // m * m


def _pick_block_m(m, target):
    """Block size (multiple of 16 for bf16 sublane packing) and padded M
    extent.  Forces >= 2 grid steps when M is big enough so both v7x
    TensorCores get work under dimension_semantics=("parallel",)."""
    m16 = _round_up(max(m, 16), 16)
    bm = min(_round_up(target, 16), m16)
    if m16 // bm < 2 and m16 >= 32:
        bm = _round_up((m16 + 1) // 2, 16)
    return bm, _round_up(m16, bm)


# ----------------------------- Pallas kernels ------------------------------

def _conv_gemm_pool_kernel(x_ref, w_ref, b_ref, o_ref):
    """Fused conv-as-GEMM + bias + ReLU + 2x2 max-pool.

    x_ref: (4, bm, K) bf16 -- slab s holds the im2col patches of pool-window
           position s (dh*2+dw) for bm pooled output pixels; K = C_in*k*k,
           unpadded (full-extent BlockSpec dim).
    w_ref: (K, 128) bf16, b_ref: (1, 128) f32, o_ref: (bm, 128) bf16.
    max_s(relu(x_s@W + b)) == relu(max_s(x_s@W) + b) (monotonicity), so the
    pool is a lane-dense elementwise max over the 4 aligned GEMM result slabs.
    The (4,bm,K)->(4*bm,K) merge is a no-op relayout (bm % 16 == 0) and lets
    one long vmatmul stream run against a single resident RHS.
    """
    s, bm, kk = x_ref.shape
    r = jnp.dot(x_ref[...].reshape(s * bm, kk), w_ref[...],
                preferred_element_type=jnp.float32)
    pooled = jnp.maximum(jnp.maximum(r[0 * bm:1 * bm], r[1 * bm:2 * bm]),
                         jnp.maximum(r[2 * bm:3 * bm], r[3 * bm:4 * bm]))
    o_ref[...] = jnp.maximum(pooled + b_ref[...], 0.0).astype(o_ref.dtype)


def _fc_stack_kernel(x_ref, w1_ref, b1_ref, w2_ref, b2_ref, w3_ref, b3_ref,
                     o_ref):
    """Fused fc1+relu -> fc2+relu -> fc3.  All weights VMEM resident; bf16
    only feeds the MXU, bias/ReLU epilogues run in f32."""
    h = jnp.dot(x_ref[...], w1_ref[...], preferred_element_type=jnp.float32)
    h = jnp.maximum(h + b1_ref[...], 0.0)
    h = jnp.dot(h.astype(jnp.bfloat16), w2_ref[...],
                preferred_element_type=jnp.float32)
    h = jnp.maximum(h + b2_ref[...], 0.0)
    h = jnp.dot(h.astype(jnp.bfloat16), w3_ref[...],
                preferred_element_type=jnp.float32)
    o_ref[...] = h + b3_ref[...]


# ------------------------------ JAX glue ----------------------------------

def _im2col_pool_groups(x_nhwc, k):
    """Valid k x k patches, flattened in PyTorch's (C_in, kh, kw) order, then
    regrouped so the 4 positions of each 2x2 pool window form the leading
    axis.  Returns (4, N*Hp*Wp, C*k*k) and (Hp, Wp).  Pure layout glue on
    unpadded bf16 data."""
    n, h, w, c = x_nhwc.shape
    ho, wo = h - k + 1, w - k + 1
    hp, wp = ho // 2, wo // 2
    cols = [x_nhwc[:, i:i + ho, j:j + wo, :] for i in range(k) for j in range(k)]
    p = jnp.stack(cols, axis=3)                      # (N, Ho, Wo, k*k, C)
    p = p.transpose(0, 1, 2, 4, 3)                   # (N, Ho, Wo, C, k*k)
    p = p.reshape(n, ho, wo, c * k * k)              # K order = (C_in, kh, kw)
    p = p.reshape(n, hp, 2, wp, 2, c * k * k)
    p = p.transpose(2, 4, 0, 1, 3, 5)                # (dh, dw, N, Hp, Wp, K)
    return p.reshape(4, n * hp * wp, c * k * k), (hp, wp)


def conv_relu_pool(x_nhwc, wmat, bpad, *, c_out, k, block_m_target=1024):
    """Conv2d(valid, stride 1) + ReLU + MaxPool2d(2,2) via one fused kernel.
    x_nhwc bf16; wmat (C_in*k*k, 128) bf16 / bpad (1, 128) f32 pre-packed."""
    n, _, _, c = x_nhwc.shape
    kk = c * k * k
    assert wmat.shape == (kk, _LANE) and c_out <= _LANE
    p, (hp, wp) = _im2col_pool_groups(x_nhwc, k)     # (4, M, K) bf16, K unpadded
    m = n * hp * wp
    block_m, m_pad = _pick_block_m(m, block_m_target)
    p = jnp.pad(p, ((0, 0), (0, m_pad - m), (0, 0)))

    out = pl.pallas_call(
        _conv_gemm_pool_kernel,
        out_shape=jax.ShapeDtypeStruct((m_pad, _LANE), jnp.bfloat16),
        grid_spec=pltpu.PrefetchScalarGridSpec(
            num_scalar_prefetch=0,
            grid=(m_pad // block_m,),
            in_specs=[
                pl.BlockSpec((4, block_m, kk), lambda i: (0, i, 0)),
                pl.BlockSpec((kk, _LANE), lambda i: (0, 0)),
                pl.BlockSpec((1, _LANE), lambda i: (0, 0)),
            ],
            out_specs=pl.BlockSpec((block_m, _LANE), lambda i: (i, 0)),
        ),
        compiler_params=pltpu.CompilerParams(
            dimension_semantics=("parallel",),
            vmem_limit_bytes=_VMEM_LIMIT),
    )(p, wmat, bpad)
    return out[:m, :c_out].reshape(n, hp, wp, c_out)


def fc_stack(flat, fc_packed, *, out_dim=15, block_m_target=256):
    """fc1+relu -> fc2+relu -> fc3 in one fused kernel.  flat: (N, 2704) bf16,
    weights pre-packed with output lanes zero-padded to 128."""
    n, k0 = flat.shape
    w1, b1, w2, b2, w3, b3 = fc_packed
    assert w1.shape[0] == k0
    block_m, m_pad = _pick_block_m(n, block_m_target)
    x = jnp.pad(flat, ((0, m_pad - n), (0, 0)))

    out = pl.pallas_call(
        _fc_stack_kernel,
        out_shape=jax.ShapeDtypeStruct((m_pad, _LANE), jnp.float32),
        grid_spec=pltpu.PrefetchScalarGridSpec(
            num_scalar_prefetch=0,
            grid=(m_pad // block_m,),
            in_specs=[
                pl.BlockSpec((block_m, k0), lambda i: (i, 0)),
                pl.BlockSpec((k0, _LANE), lambda i: (0, 0)),
                pl.BlockSpec((1, _LANE), lambda i: (0, 0)),
                pl.BlockSpec((_LANE, _LANE), lambda i: (0, 0)),
                pl.BlockSpec((1, _LANE), lambda i: (0, 0)),
                pl.BlockSpec((_LANE, _LANE), lambda i: (0, 0)),
                pl.BlockSpec((1, _LANE), lambda i: (0, 0)),
            ],
            out_specs=pl.BlockSpec((block_m, _LANE), lambda i: (i, 0)),
        ),
        compiler_params=pltpu.CompilerParams(
            dimension_semantics=("parallel",),
            vmem_limit_bytes=_VMEM_LIMIT),
    )(x, w1, b1, w2, b2, w3, b3)
    return out[:n, :out_dim]


def pack_params(params):
    """One-time packing of all weights into MXU-friendly layouts (bf16, output
    lanes zero-padded to 128, biases zero-padded in f32).  Run OUTSIDE the
    jitted forward so no weight re-pad/re-transpose/re-cast traffic happens
    per call."""
    def conv_pack(w, b):
        c_out, c_in, k, _ = w.shape
        kk = c_in * k * k
        wmat = jnp.pad(w.reshape(c_out, kk).T,                 # (K, C_out)
                       ((0, 0), (0, _LANE - c_out))).astype(jnp.bfloat16)
        bp = jnp.pad(b, (0, _LANE - c_out)).reshape(1, _LANE).astype(jnp.float32)
        return wmat, bp

    def fc_pack(w, b, k_pad):
        out_dim, in_dim = w.shape
        wp = jnp.pad(w.T, ((0, k_pad - in_dim), (0, _LANE - out_dim))
                     ).astype(jnp.bfloat16)
        bp = jnp.pad(b, (0, _LANE - out_dim)).reshape(1, _LANE).astype(jnp.float32)
        return wp, bp

    c1w, c1b = conv_pack(params["conv1_w"], params["conv1_b"])
    c2w, c2b = conv_pack(params["conv2_w"], params["conv2_b"])
    f1w, f1b = fc_pack(params["fc1_w"], params["fc1_b"],
                       params["fc1_w"].shape[1])                # K stays 2704
    f2w, f2b = fc_pack(params["fc2_w"], params["fc2_b"], _LANE)
    f3w, f3b = fc_pack(params["fc3_w"], params["fc3_b"], _LANE)
    return {"conv1_w": c1w, "conv1_b": c1b,
            "conv2_w": c2w, "conv2_b": c2b,
            "fc": (f1w, f1b, f2w, f2b, f3w, f3b)}


def neuralnet_forward(x_nchw, packed):
    """Forward pass matching NeuralNet.forward; `packed` = pack_params(...)."""
    n = x_nchw.shape[0]
    x = jnp.transpose(x_nchw, (0, 2, 3, 1)).astype(jnp.bfloat16)   # NHWC bf16

    # conv1 (1->6, 5x5) + relu + pool  -> (N, 30, 30, 6) bf16
    y1 = conv_relu_pool(x, packed["conv1_w"], packed["conv1_b"], c_out=6, k=5)
    # conv2 (6->16, 5x5) + relu + pool -> (N, 13, 13, 16) bf16
    y2 = conv_relu_pool(y1, packed["conv2_w"], packed["conv2_b"], c_out=16, k=5)

    # flatten exactly like x.view(-1, 16*13*13) on NCHW
    flat = jnp.transpose(y2, (0, 3, 1, 2)).reshape(n, 16 * 13 * 13)

    # fused fc1+relu -> fc2+relu -> fc3
    return fc_stack(flat, packed["fc"], out_dim=15)                # (N, 15) f32


def init_params(key):
    ks = jax.random.split(key, 5)
    scale = 0.05
    return {
        "conv1_w": scale * jax.random.normal(ks[0], (6, 1, 5, 5), jnp.float32),
        "conv1_b": jnp.zeros((6,), jnp.float32),
        "conv2_w": scale * jax.random.normal(ks[1], (16, 6, 5, 5), jnp.float32),
        "conv2_b": jnp.zeros((16,), jnp.float32),
        "fc1_w": scale * jax.random.normal(ks[2], (120, 16 * 13 * 13), jnp.float32),
        "fc1_b": jnp.zeros((120,), jnp.float32),
        "fc2_w": scale * jax.random.normal(ks[3], (84, 120), jnp.float32),
        "fc2_b": jnp.zeros((84,), jnp.float32),
        "fc3_w": scale * jax.random.normal(ks[4], (15, 84), jnp.float32),
        "fc3_b": jnp.zeros((15,), jnp.float32),
    }


if __name__ == "__main__":
    key = jax.random.PRNGKey(0)
    k_params, k_input = jax.random.split(key)
    params = init_params(k_params)
    packed = pack_params(params)           # one-time weight packing, outside jit
    # fc1's 16*13*13 input pins the spatial size to 64x64 (NCHW, 1 channel).
    x = jax.random.normal(k_input, (2, 1, 64, 64), jnp.float32)

    fwd = jax.jit(neuralnet_forward)
    out = jax.block_until_ready(fwd(x, packed))
    assert out.shape == (2, 15), out.shape
    assert out.dtype == jnp.float32
    print("KERNEL_OK")
</pallas_src>

<mosaic_0001>
module attributes {stable_mosaic.version = 11 : i64} {
  func.func @_conv_gemm_pool_kernel(%arg0: i32, %arg1: memref<4x912x25xbf16, #tpu.memory_space<vmem>>, %arg2: memref<25x128xbf16, #tpu.memory_space<vmem>>, %arg3: memref<1x128xf32, #tpu.memory_space<vmem>>, %arg4: memref<912x128xbf16, #tpu.memory_space<vmem>>) attributes {dimension_semantics = [#tpu.dimension_semantics<parallel>], iteration_bounds = array<i64: 2>, scalar_prefetch = 0 : i64, scratch_operands = 0 : i64, tpu.core_type = #tpu.core_type<tc>, window_params = [{transform_indices = @transform_0, window_bounds = array<i64: 4, 912, 25>}, {pipeline_mode = #tpu.pipeline_mode<synchronous>, transform_indices = @transform_1, window_bounds = array<i64: 25, 128>}, {pipeline_mode = #tpu.pipeline_mode<synchronous>, transform_indices = @transform_2, window_bounds = array<i64: 1, 128>}, {transform_indices = @transform_3, window_bounds = array<i64: 912, 128>}]} {
    %c0 = arith.constant 0 : index
    %c0_0 = arith.constant 0 : index
    %c0_1 = arith.constant 0 : index
    %0 = vector.load %arg1[%c0, %c0_0, %c0_1] : memref<4x912x25xbf16, #tpu.memory_space<vmem>>, vector<4x912x25xbf16>
    %1 = vector.shape_cast %0 : vector<4x912x25xbf16> to vector<3648x25xbf16>
    %c0_2 = arith.constant 0 : index
    %c0_3 = arith.constant 0 : index
    %2 = vector.load %arg2[%c0_2, %c0_3] : memref<25x128xbf16, #tpu.memory_space<vmem>>, vector<25x128xbf16>
    %cst = arith.constant dense<0.000000e+00> : vector<3648x128xf32>
    %3 = tpu.matmul %1, %2, %cst {dimension_numbers = #tpu.dot_dimension_numbers<[1], [0], [0], [1], [0, 0, 1, 1], [], []>} : vector<3648x25xbf16>, vector<25x128xbf16>, vector<3648x128xf32> -> vector<3648x128xf32>
    %4 = vector.extract_strided_slice %3 {offsets = [0, 0], sizes = [912, 128], strides = [1, 1]} : vector<3648x128xf32> to vector<912x128xf32>
    %5 = vector.extract_strided_slice %3 {offsets = [912, 0], sizes = [912, 128], strides = [1, 1]} : vector<3648x128xf32> to vector<912x128xf32>
    %6 = arith.maximumf %4, %5 : vector<912x128xf32>
    %7 = vector.extract_strided_slice %3 {offsets = [1824, 0], sizes = [912, 128], strides = [1, 1]} : vector<3648x128xf32> to vector<912x128xf32>
    %8 = vector.extract_strided_slice %3 {offsets = [2736, 0], sizes = [912, 128], strides = [1, 1]} : vector<3648x128xf32> to vector<912x128xf32>
    %9 = arith.maximumf %7, %8 : vector<912x128xf32>
    %10 = arith.maximumf %6, %9 : vector<912x128xf32>
    %c0_4 = arith.constant 0 : index
    %c0_5 = arith.constant 0 : index
    %11 = vector.load %arg3[%c0_4, %c0_5] : memref<1x128xf32, #tpu.memory_space<vmem>>, vector<1x128xf32>
    %12 = vector.broadcast %11 : vector<1x128xf32> to vector<912x128xf32>
    %13 = arith.addf %10, %12 : vector<912x128xf32>
    %cst_6 = arith.constant 0.000000e+00 : f32
    %14 = vector.broadcast %cst_6 : f32 to vector<912x128xf32>
    %15 = arith.maximumf %13, %14 : vector<912x128xf32>
    %16 = arith.truncf %15 : vector<912x128xf32> to vector<912x128xbf16>
    %c0_7 = arith.constant 0 : index
    %c0_8 = arith.constant 0 : index
    %17 = vector.load %arg4[%c0_7, %c0_8] : memref<912x128xbf16, #tpu.memory_space<vmem>>, vector<912x128xbf16>
    tpu.vector_store %arg4[%c0_7, %c0_8], %16 {strides = array<i32>} : memref<912x128xbf16, #tpu.memory_space<vmem>>, vector<912x128xbf16>,
    return
  }
  func.func @transform_0(%arg0: i32) -> (i32, i32, i32) {
    %c0_i32 = arith.constant 0 : i32
    %c0_i32_0 = arith.constant 0 : i32
    %c0_i32_1 = arith.constant 0 : i32
    return %c0_i32, %arg0, %c0_i32_0 : i32, i32, i32
  }
  func.func @transform_1(%arg0: i32) -> (i32, i32) {
    %c0_i32 = arith.constant 0 : i32
    %c0_i32_0 = arith.constant 0 : i32
    %c0_i32_1 = arith.constant 0 : i32
    return %c0_i32, %c0_i32_0 : i32, i32
  }
  func.func @transform_2(%arg0: i32) -> (i32, i32) {
    %c0_i32 = arith.constant 0 : i32
    %c0_i32_0 = arith.constant 0 : i32
    %c0_i32_1 = arith.constant 0 : i32
    return %c0_i32, %c0_i32_0 : i32, i32
  }
  func.func @transform_3(%arg0: i32) -> (i32, i32) {
    %c0_i32 = arith.constant 0 : i32
    %c0_i32_0 = arith.constant 0 : i32
    return %arg0, %c0_i32 : i32, i32
  }
}

module attributes {stable_mosaic.version = 11 : i64} {
  func.func @_conv_gemm_pool_kernel(%arg0: i32, %arg1: memref<4x176x150xbf16, #tpu.memory_space<vmem>>, %arg2: memref<150x128xbf16, #tpu.memory_space<vmem>>, %arg3: memref<1x128xf32, #tpu.memory_space<vmem>>, %arg4: memref<176x128xbf16, #tpu.memory_space<vmem>>) attributes {dimension_semantics = [#tpu.dimension_semantics<parallel>], iteration_bounds = array<i64: 2>, scalar_prefetch = 0 : i64, scratch_operands = 0 : i64, tpu.core_type = #tpu.core_type<tc>, window_params = [{transform_indices = @transform_0, window_bounds = array<i64: 4, 176, 150>}, {pipeline_mode = #tpu.pipeline_mode<synchronous>, transform_indices = @transform_1, window_bounds = array<i64: 150, 128>}, {pipeline_mode = #tpu.pipeline_mode<synchronous>, transform_indices = @transform_2, window_bounds = array<i64: 1, 128>}, {transform_indices = @transform_3, window_bounds = array<i64: 176, 128>}]} {
    %c0 = arith.constant 0 : index
    %c0_0 = arith.constant 0 : index
    %c0_1 = arith.constant 0 : index
    %0 = vector.load %arg1[%c0, %c0_0, %c0_1] : memref<4x176x150xbf16, #tpu.memory_space<vmem>>, vector<4x176x150xbf16>
    %1 = vector.shape_cast %0 : vector<4x176x150xbf16> to vector<704x150xbf16>
    %c0_2 = arith.constant 0 : index
    %c0_3 = arith.constant 0 : index
    %2 = vector.load %arg2[%c0_2, %c0_3] : memref<150x128xbf16, #tpu.memory_space<vmem>>, vector<150x128xbf16>
    %cst = arith.constant dense<0.000000e+00> : vector<704x128xf32>
    %3 = tpu.matmul %1, %2, %cst {dimension_numbers = #tpu.dot_dimension_numbers<[1], [0], [0], [1], [0, 0, 1, 1], [], []>} : vector<704x150xbf16>, vector<150x128xbf16>, vector<704x128xf32> -> vector<704x128xf32>
    %4 = vector.extract_strided_slice %3 {offsets = [0, 0], sizes = [176, 128], strides = [1, 1]} : vector<704x128xf32> to vector<176x128xf32>
    %5 = vector.extract_strided_slice %3 {offsets = [176, 0], sizes = [176, 128], strides = [1, 1]} : vector<704x128xf32> to vector<176x128xf32>
    %6 = arith.maximumf %4, %5 : vector<176x128xf32>
    %7 = vector.extract_strided_slice %3 {offsets = [352, 0], sizes = [176, 128], strides = [1, 1]} : vector<704x128xf32> to vector<176x128xf32>
    %8 = vector.extract_strided_slice %3 {offsets = [528, 0], sizes = [176, 128], strides = [1, 1]} : vector<704x128xf32> to vector<176x128xf32>
    %9 = arith.maximumf %7, %8 : vector<176x128xf32>
    %10 = arith.maximumf %6, %9 : vector<176x128xf32>
    %c0_4 = arith.constant 0 : index
    %c0_5 = arith.constant 0 : index
    %11 = vector.load %arg3[%c0_4, %c0_5] : memref<1x128xf32, #tpu.memory_space<vmem>>, vector<1x128xf32>
    %12 = vector.broadcast %11 : vector<1x128xf32> to vector<176x128xf32>
    %13 = arith.addf %10, %12 : vector<176x128xf32>
    %cst_6 = arith.constant 0.000000e+00 : f32
    %14 = vector.broadcast %cst_6 : f32 to vector<176x128xf32>
    %15 = arith.maximumf %13, %14 : vector<176x128xf32>
    %16 = arith.truncf %15 : vector<176x128xf32> to vector<176x128xbf16>
    %c0_7 = arith.constant 0 : index
    %c0_8 = arith.constant 0 : index
    %17 = vector.load %arg4[%c0_7, %c0_8] : memref<176x128xbf16, #tpu.memory_space<vmem>>, vector<176x128xbf16>
    tpu.vector_store %arg4[%c0_7, %c0_8], %16 {strides = array<i32>} : memref<176x128xbf16, #tpu.memory_space<vmem>>, vector<176x128xbf16>,
    return
  }
  func.func @transform_0(%arg0: i32) -> (i32, i32, i32) {
    %c0_i32 = arith.constant 0 : i32
    %c0_i32_0 = arith.constant 0 : i32
    %c0_i32_1 = arith.constant 0 : i32
    return %c0_i32, %arg0, %c0_i32_0 : i32, i32, i32
  }
  func.func @transform_1(%arg0: i32) -> (i32, i32) {
    %c0_i32 = arith.constant 0 : i32
    %c0_i32_0 = arith.constant 0 : i32
    %c0_i32_1 = arith.constant 0 : i32
    return %c0_i32, %c0_i32_0 : i32, i32
  }
  func.func @transform_2(%arg0: i32) -> (i32, i32) {
    %c0_i32 = arith.constant 0 : i32
    %c0_i32_0 = arith.constant 0 : i32
    %c0_i32_1 = arith.constant 0 : i32
    return %c0_i32, %c0_i32_0 : i32, i32
  }
  func.func @transform_3(%arg0: i32) -> (i32, i32) {
    %c0_i32 = arith.constant 0 : i32
    %c0_i32_0 = arith.constant 0 : i32
    return %arg0, %c0_i32 : i32, i32
  }
}

module attributes {stable_mosaic.version = 11 : i64} {
  func.func @_fc_stack_kernel(%arg0: i32, %arg1: memref<16x2704xbf16, #tpu.memory_space<vmem>>, %arg2: memref<2704x128xbf16, #tpu.memory_space<vmem>>, %arg3: memref<1x128xf32, #tpu.memory_space<vmem>>, %arg4: memref<128x128xbf16, #tpu.memory_space<vmem>>, %arg5: memref<1x128xf32, #tpu.memory_space<vmem>>, %arg6: memref<128x128xbf16, #tpu.memory_space<vmem>>, %arg7: memref<1x128xf32, #tpu.memory_space<vmem>>, %arg8: memref<16x128xf32, #tpu.memory_space<vmem>>) attributes {dimension_semantics = [#tpu.dimension_semantics<parallel>], iteration_bounds = array<i64: 1>, scalar_prefetch = 0 : i64, scratch_operands = 0 : i64, tpu.core_type = #tpu.core_type<tc>, window_params = [{transform_indices = @transform_0, window_bounds = array<i64: 16, 2704>}, {pipeline_mode = #tpu.pipeline_mode<synchronous>, transform_indices = @transform_1, window_bounds = array<i64: 2704, 128>}, {pipeline_mode = #tpu.pipeline_mode<synchronous>, transform_indices = @transform_2, window_bounds = array<i64: 1, 128>}, {pipeline_mode = #tpu.pipeline_mode<synchronous>, transform_indices = @transform_3, window_bounds = array<i64: 128, 128>}, {pipeline_mode = #tpu.pipeline_mode<synchronous>, transform_indices = @transform_4, window_bounds = array<i64: 1, 128>}, {pipeline_mode = #tpu.pipeline_mode<synchronous>, transform_indices = @transform_5, window_bounds = array<i64: 128, 128>}, {pipeline_mode = #tpu.pipeline_mode<synchronous>, transform_indices = @transform_6, window_bounds = array<i64: 1, 128>}, {transform_indices = @transform_7, window_bounds = array<i64: 16, 128>}]} {
    %c0 = arith.constant 0 : index
    %c0_0 = arith.constant 0 : index
    %0 = vector.load %arg1[%c0, %c0_0] : memref<16x2704xbf16, #tpu.memory_space<vmem>>, vector<16x2704xbf16>
    %c0_1 = arith.constant 0 : index
    %c0_2 = arith.constant 0 : index
    %1 = vector.load %arg2[%c0_1, %c0_2] : memref<2704x128xbf16, #tpu.memory_space<vmem>>, vector<2704x128xbf16>
    %cst = arith.constant dense<0.000000e+00> : vector<16x128xf32>
    %2 = tpu.matmul %0, %1, %cst {dimension_numbers = #tpu.dot_dimension_numbers<[1], [0], [0], [1], [0, 0, 1, 1], [], []>} : vector<16x2704xbf16>, vector<2704x128xbf16>, vector<16x128xf32> -> vector<16x128xf32>
    %c0_3 = arith.constant 0 : index
    %c0_4 = arith.constant 0 : index
    %3 = vector.load %arg3[%c0_3, %c0_4] : memref<1x128xf32, #tpu.memory_space<vmem>>, vector<1x128xf32>
    %4 = vector.broadcast %3 : vector<1x128xf32> to vector<16x128xf32>
    %5 = arith.addf %2, %4 : vector<16x128xf32>
    %cst_5 = arith.constant 0.000000e+00 : f32
    %6 = vector.broadcast %cst_5 : f32 to vector<16x128xf32>
    %7 = arith.maximumf %5, %6 : vector<16x128xf32>
    %8 = arith.truncf %7 : vector<16x128xf32> to vector<16x128xbf16>
    %c0_6 = arith.constant 0 : index
    %c0_7 = arith.constant 0 : index
    %9 = vector.load %arg4[%c0_6, %c0_7] : memref<128x128xbf16, #tpu.memory_space<vmem>>, vector<128x128xbf16>
    %cst_8 = arith.constant dense<0.000000e+00> : vector<16x128xf32>
    %10 = tpu.matmul %8, %9, %cst_8 {dimension_numbers = #tpu.dot_dimension_numbers<[1], [0], [0], [1], [0, 0, 1, 1], [], []>} : vector<16x128xbf16>, vector<128x128xbf16>, vector<16x128xf32> -> vector<16x128xf32>
    %c0_9 = arith.constant 0 : index
    %c0_10 = arith.constant 0 : index
    %11 = vector.load %arg5[%c0_9, %c0_10] : memref<1x128xf32, #tpu.memory_space<vmem>>, vector<1x128xf32>
    %12 = vector.broadcast %11 : vector<1x128xf32> to vector<16x128xf32>
    %13 = arith.addf %10, %12 : vector<16x128xf32>
    %cst_11 = arith.constant 0.000000e+00 : f32
    %14 = vector.broadcast %cst_11 : f32 to vector<16x128xf32>
    %15 = arith.maximumf %13, %14 : vector<16x128xf32>
    %16 = arith.truncf %15 : vector<16x128xf32> to vector<16x128xbf16>
    %c0_12 = arith.constant 0 : index
    %c0_13 = arith.constant 0 : index
    %17 = vector.load %arg6[%c0_12, %c0_13] : memref<128x128xbf16, #tpu.memory_space<vmem>>, vector<128x128xbf16>
    %cst_14 = arith.constant dense<0.000000e+00> : vector<16x128xf32>
    %18 = tpu.matmul %16, %17, %cst_14 {dimension_numbers = #tpu.dot_dimension_numbers<[1], [0], [0], [1], [0, 0, 1, 1], [], []>} : vector<16x128xbf16>, vector<128x128xbf16>, vector<16x128xf32> -> vector<16x128xf32>
    %c0_15 = arith.constant 0 : index
    %c0_16 = arith.constant 0 : index
    %19 = vector.load %arg7[%c0_15, %c0_16] : memref<1x128xf32, #tpu.memory_space<vmem>>, vector<1x128xf32>
    %20 = vector.broadcast %19 : vector<1x128xf32> to vector<16x128xf32>
    %21 = arith.addf %18, %20 : vector<16x128xf32>
    %c0_17 = arith.constant 0 : index
    %c0_18 = arith.constant 0 : index
    %22 = vector.load %arg8[%c0_17, %c0_18] : memref<16x128xf32, #tpu.memory_space<vmem>>, vector<16x128xf32>
    tpu.vector_store %arg8[%c0_17, %c0_18], %21 {strides = array<i32>} : memref<16x128xf32, #tpu.memory_space<vmem>>, vector<16x128xf32>,
    return
  }
  func.func @transform_0(%arg0: i32) -> (i32, i32) {
    %c0_i32 = arith.constant 0 : i32
    %c0_i32_0 = arith.constant 0 : i32
    return %arg0, %c0_i32 : i32, i32
  }
  func.func @transform_1(%arg0: i32) -> (i32, i32) {
    %c0_i32 = arith.constant 0 : i32
    %c0_i32_0 = arith.constant 0 : i32
    %c0_i32_1 = arith.constant 0 : i32
    return %c0_i32, %c0_i32_0 : i32, i32
  }
  func.func @transform_2(%arg0: i32) -> (i32, i32) {
    %c0_i32 = arith.constant 0 : i32
    %c0_i32_0 = arith.constant 0 : i32
    %c0_i32_1 = arith.constant 0 : i32
    return %c0_i32, %c0_i32_0 : i32, i32
  }
  func.func @transform_3(%arg0: i32) -> (i32, i32) {
    %c0_i32 = arith.constant 0 : i32
    %c0_i32_0 = arith.constant 0 : i32
    %c0_i32_1 = arith.constant 0 : i32
    return %c0_i32, %c0_i32_0 : i32, i32
  }
  func.func @transform_4(%arg0: i32) -> (i32, i32) {
    %c0_i32 = arith.constant 0 : i32
    %c0_i32_0 = arith.constant 0 : i32
    %c0_i32_1 = arith.constant 0 : i32
    return %c0_i32, %c0_i32_0 : i32, i32
  }
  func.func @transform_5(%arg0: i32) -> (i32, i32) {
    %c0_i32 = arith.constant 0 : i32
    %c0_i32_0 = arith.constant 0 : i32
    %c0_i32_1 = arith.constant 0 : i32
    return %c0_i32, %c0_i32_0 : i32, i32
  }
  func.func @transform_6(%arg0: i32) -> (i32, i32) {
    %c0_i32 = arith.constant 0 : i32
    %c0_i32_0 = arith.constant 0 : i32
    %c0_i32_1 = arith.constant 0 : i32
    return %c0_i32, %c0_i32_0 : i32, i32
  }
  func.func @transform_7(%arg0: i32) -> (i32, i32) {
    %c0_i32 = arith.constant 0 : i32
    %c0_i32_0 = arith.constant 0 : i32
    return %arg0, %c0_i32 : i32, i32
  }
}

</mosaic_0001>

<bundles_post_ra>
// kernel: neuralnet_forward.3
= control target key start
LH: loop header
LB: loop body
LE: loop exit
PB: predicated region body
PF: predicated region fallthrough
CT: control target
= control target key end

     0   :  { %s9440_s12 = smov 0   ;;  %s9442_s13 = smov 0   ;;  %s11284_s0 = inlined_call_operand.vmem [shape: bf16[4,1824,25], index: 0, kind: input, shape index: {}]   ;;  %s11285_s1 = inlined_call_operand.vmem [shape: bf16[25,128], index: 1, kind: input, shape index: {}]   ;;  %s11286_s2 = inlined_call_operand.vmem [shape: f32[1,128], index: 2, kind: input, shape index: {}]   ;;  %s11287_s3 = inlined_call_operand.vmem [shape: bf16[1824,128], index: 3, kind: output, shape index: {}]  }
   0x1   :  { %s9444_s14 = smov 0  }
   0x2 LB: > { %s7405_s15 = sadd.s32 4294967295, %s9417_s14   ;;  %s9457_s16 = sadd.s32 1, %s9417_s14   ;;  %s9417_s14 = sphi %s9444_s14, %s11650_s14   ;;  %s9413_s13 = sphi %s9442_s13, %s11649_s13   ;;  %s9409_s12 = sphi %s9440_s12, %s11648_s12  }
   0x3   : > { %s17_s17 = ssub.s32 %s9417_s14, %s9457_s16  ;;  %s20_s18 = sadd.s32 1, %s9413_s13 }
   0x4   : > { %p18_p0 = scmp.eq.s32.totalorder %s17_s17, 0  ;;  %p27_p1 = scmp.ne.s32.totalorder %s9413_s13, %s9409_s12 }
   0x5   : > { %p28_p2 = scmp.eq.s32.totalorder %s9417_s14, 0  ;;  %p7408_p4 = scmp.ge.s32.totalorder %s9417_s14, 2 }
   0x6   : > { %s9466_s19 = scalar_select %p18_p0, %s9413_s13, %s20_s18  }
   0x7   : > { %p29_p3 = por %p28_p2, %p27_p1  ;;  %127 = sbr.rel (%p7408_p4) target bundleno = 133 (0x85), region = 24 }
   0xe   : > { %130 = sbr.rel (!%p29_p3) target bundleno = 133 (0x85), region = 28  ;;  %s132_s20 = sand.u32 (%p29_p3), 1, %s9413_s13  }
   0xf   : > { %s7987_s21 = smul.u32 (%p29_p3), 456, %s9417_s14 }
  0x10   : > { %s9137_s22 = smul.u32 (%p29_p3), 1824, %s132_s20 }
  0x11   : > { %s9474_s25 = scalar_lea.vmem (%p29_p3), %s11284_s0, %s7987_s21 }
  0x12   : > { %v153_v0 = vld [vmem:[%s9474_s25] sm:$0xff] (%p29_p3)   ;;  %v157_v1 = vld [vmem:[%s9474_s25 + $0x8] sm:$0xff] (%p29_p3)   ;;  %v161_v2 = vld [vmem:[%s9474_s25 + $0x10] sm:$0xff] (%p29_p3)   ;;  %s9479_s26 = scalar_lea.vmem (%p29_p3), [#allocation2], %s9137_s22 }
  0x13   : > { %154 = vst [vmem:[%s9479_s26] sm:$0xff] (%p29_p3), %v153_v0   ;;  %158 = vst [vmem:[%s9479_s26 + $0x8] sm:$0xff] (%p29_p3), %v157_v1   ;;  %v165_v3 = vld [vmem:[%s9474_s25 + $0x18] sm:$0xff] (%p29_p3)   ;;  %v169_v4 = vld [vmem:[%s9474_s25 + $0x20] sm:$0xff] (%p29_p3)  }
  0x14   : > { %162 = vst [vmem:[%s9479_s26 + $0x10] sm:$0xff] (%p29_p3), %v161_v2   ;;  %v173_v5 = vld [vmem:[%s9474_s25 + $0x28] sm:$0xff] (%p29_p3)   ;;  %166 = vst [vmem:[%s9479_s26 + $0x18] sm:$0xff] (%p29_p3), %v165_v3   ;;  %v177_v6 = vld [vmem:[%s9474_s25 + $0x30] sm:$0xff] (%p29_p3)  }
  0x15   : > { %170 = vst [vmem:[%s9479_s26 + $0x20] sm:$0xff] %v169_v4   ;;  %174 = vst [vmem:[%s9479_s26 + $0x28] sm:$0xff] %v173_v5   ;;  %v181_v7 = vld [vmem:[%s9474_s25 + $0x38] sm:$0xff]   ;;  %v185_v8 = vld [vmem:[%s9474_s25 + $0x40] sm:$0xff]  }
  0x16   : > { %178 = vst [vmem:[%s9479_s26 + $0x30] sm:$0xff] %v177_v6   ;;  %182 = vst [vmem:[%s9479_s26 + $0x38] sm:$0xff] %v181_v7   ;;  %v189_v9 = vld [vmem:[%s9474_s25 + $0x48] sm:$0xff]   ;;  %v193_v10 = vld [vmem:[%s9474_s25 + $0x50] sm:$0xff]  }
  0x17   : > { %186 = vst [vmem:[%s9479_s26 + $0x40] sm:$0xff] %v185_v8   ;;  %v197_v11 = vld [vmem:[%s9474_s25 + $0x58] sm:$0xff]   ;;  %190 = vst [vmem:[%s9479_s26 + $0x48] sm:$0xff] %v189_v9   ;;  %v201_v12 = vld [vmem:[%s9474_s25 + $0x60] sm:$0xff]  }
  0x18   : > { %194 = vst [vmem:[%s9479_s26 + $0x50] sm:$0xff] %v193_v10   ;;  %198 = vst [vmem:[%s9479_s26 + $0x58] sm:$0xff] %v197_v11   ;;  %v205_v13 = vld [vmem:[%s9474_s25 + $0x68] sm:$0xff]   ;;  %v209_v14 = vld [vmem:[%s9474_s25 + $0x70] sm:$0xff]  }
  0x19   : > { %202 = vst [vmem:[%s9479_s26 + $0x60] sm:$0xff] %v201_v12   ;;  %206 = vst [vmem:[%s9479_s26 + $0x68] sm:$0xff] %v205_v13   ;;  %v213_v15 = vld [vmem:[%s9474_s25 + $0x78] sm:$0xff]   ;;  %v217_v16 = vld [vmem:[%s9474_s25 + $0x80] sm:$0xff]  }
  0x1a   : > { %210 = vst [vmem:[%s9479_s26 + $0x70] sm:$0xff] %v209_v14   ;;  %v221_v17 = vld [vmem:[%s9474_s25 + $0x88] sm:$0xff]   ;;  %214 = vst [vmem:[%s9479_s26 + $0x78] sm:$0xff] %v213_v15   ;;  %v225_v18 = vld [vmem:[%s9474_s25 + $0x90] sm:$0xff]  }
  0x1b   : > { %218 = vst [vmem:[%s9479_s26 + $0x80] sm:$0xff] %v217_v16   ;;  %222 = vst [vmem:[%s9479_s26 + $0x88] sm:$0xff] %v221_v17   ;;  %v229_v19 = vld [vmem:[%s9474_s25 + $0x98] sm:$0xff]   ;;  %v233_v20 = vld [vmem:[%s9474_s25 + $0xa0] sm:$0xff]  }
  0x1c   : > { %226 = vst [vmem:[%s9479_s26 + $0x90] sm:$0xff] %v225_v18   ;;  %230 = vst [vmem:[%s9479_s26 + $0x98] sm:$0xff] %v229_v19   ;;  %v237_v21 = vld [vmem:[%s9474_s25 + $0xa8] sm:$0xff]   ;;  %v241_v22 = vld [vmem:[%s9474_s25 + $0xb0] sm:$0xff]  }
  0x1d   : > { %234 = vst [vmem:[%s9479_s26 + $0xa0] sm:$0xff] %v233_v20   ;;  %v245_v23 = vld [vmem:[%s9474_s25 + $0xb8] sm:$0xff]   ;;  %238 = vst [vmem:[%s9479_s26 + $0xa8] sm:$0xff] %v237_v21   ;;  %v249_v24 = vld [vmem:[%s9474_s25 + $0xc0] sm:$0xff]  }
  0x1e   : > { %242 = vst [vmem:[%s9479_s26 + $0xb0] sm:$0xff] %v241_v22   ;;  %246 = vst [vmem:[%s9479_s26 + $0xb8] sm:$0xff] %v245_v23   ;;  %v253_v25 = vld [vmem:[%s9474_s25 + $0xc8] sm:$0xff]   ;;  %v257_v26 = vld [vmem:[%s9474_s25 + $0xd0] sm:$0xff]  }
  0x1f   : > { %250 = vst [vmem:[%s9479_s26 + $0xc0] sm:$0xff] %v249_v24   ;;  %254 = vst [vmem:[%s9479_s26 + $0xc8] sm:$0xff] %v253_v25   ;;  %v261_v27 = vld [vmem:[%s9474_s25 + $0xd8] sm:$0xff]   ;;  %v265_v28 = vld [vmem:[%s9474_s25 + $0xe0] sm:$0xff]  }
  0x20   : > { %258 = vst [vmem:[%s9479_s26 + $0xd0] sm:$0xff] %v257_v26   ;;  %v269_v29 = vld [vmem:[%s9474_s25 + $0xe8] sm:$0xff]   ;;  %262 = vst [vmem:[%s9479_s26 + $0xd8] sm:$0xff] %v261_v27   ;;  %v273_v30 = vld [vmem:[%s9474_s25 + $0xf0] sm:$0xff]  }
  0x21   : > { %266 = vst [vmem:[%s9479_s26 + $0xe0] sm:$0xff] %v265_v28   ;;  %270 = vst [vmem:[%s9479_s26 + $0xe8] sm:$0xff] %v269_v29   ;;  %v277_v31 = vld [vmem:[%s9474_s25 + $0xf8] sm:$0xff]   ;;  %v281_v32 = vld [vmem:[%s9474_s25 + $0x100] sm:$0xff]  }
  0x22   : > { %274 = vst [vmem:[%s9479_s26 + $0xf0] sm:$0xff] %v273_v30   ;;  %278 = vst [vmem:[%s9479_s26 + $0xf8] sm:$0xff] %v277_v31   ;;  %v285_v33 = vld [vmem:[%s9474_s25 + $0x108] sm:$0xff]   ;;  %v289_v34 = vld [vmem:[%s9474_s25 + $0x110] sm:$0xff]  }
  0x23   : > { %282 = vst [vmem:[%s9479_s26 + $0x100] sm:$0xff] %v281_v32   ;;  %v293_v35 = vld [vmem:[%s9474_s25 + $0x118] sm:$0xff]   ;;  %286 = vst [vmem:[%s9479_s26 + $0x108] sm:$0xff] %v285_v33   ;;  %v297_v36 = vld [vmem:[%s9474_s25 + $0x120] sm:$0xff]  }
  0x24   : > { %290 = vst [vmem:[%s9479_s26 + $0x110] sm:$0xff] %v289_v34   ;;  %294 = vst [vmem:[%s9479_s26 + $0x118] sm:$0xff] %v293_v35   ;;  %v301_v37 = vld [vmem:[%s9474_s25 + $0x128] sm:$0xff]   ;;  %v305_v38 = vld [vmem:[%s9474_s25 + $0x130] sm:$0xff]  }
  0x25   : > { %298 = vst [vmem:[%s9479_s26 + $0x120] sm:$0xff] %v297_v36   ;;  %302 = vst [vmem:[%s9479_s26 + $0x128] sm:$0xff] %v301_v37   ;;  %v309_v39 = vld [vmem:[%s9474_s25 + $0x138] sm:$0xff]   ;;  %v313_v40 = vld [vmem:[%s9474_s25 + $0x140] sm:$0xff]  }
  0x26   : > { %306 = vst [vmem:[%s9479_s26 + $0x130] sm:$0xff] %v305_v38   ;;  %v317_v41 = vld [vmem:[%s9474_s25 + $0x148] sm:$0xff]   ;;  %310 = vst [vmem:[%s9479_s26 + $0x138] sm:$0xff] %v309_v39   ;;  %v321_v42 = vld [vmem:[%s9474_s25 + $0x150] sm:$0xff]  }
  0x27   : > { %314 = vst [vmem:[%s9479_s26 + $0x140] sm:$0xff] %v313_v40   ;;  %318 = vst [vmem:[%s9479_s26 + $0x148] sm:$0xff] %v317_v41   ;;  %v325_v43 = vld [vmem:[%s9474_s25 + $0x158] sm:$0xff]   ;;  %v329_v44 = vld [vmem:[%s9474_s25 + $0x160] sm:$0xff]  }
  0x28   : > { %322 = vst [vmem:[%s9479_s26 + $0x150] sm:$0xff] %v321_v42   ;;  %326 = vst [vmem:[%s9479_s26 + $0x158] sm:$0xff] %v325_v43   ;;  %v333_v45 = vld [vmem:[%s9474_s25 + $0x168] sm:$0xff]   ;;  %v337_v46 = vld [vmem:[%s9474_s25 + $0x170] sm:$0xff]  }
  0x29   : > { %330 = vst [vmem:[%s9479_s26 + $0x160] sm:$0xff] %v329_v44   ;;  %v341_v47 = vld [vmem:[%s9474_s25 + $0x178] sm:$0xff]   ;;  %334 = vst [vmem:[%s9479_s26 + $0x168] sm:$0xff] %v333_v45   ;;  %v345_v48 = vld [vmem:[%s9474_s25 + $0x180] sm:$0xff]  }
  0x2a   : > { %338 = vst [vmem:[%s9479_s26 + $0x170] sm:$0xff] %v337_v46   ;;  %342 = vst [vmem:[%s9479_s26 + $0x178] sm:$0xff] %v341_v47   ;;  %v349_v49 = vld [vmem:[%s9474_s25 + $0x188] sm:$0xff]   ;;  %v353_v50 = vld [vmem:[%s9474_s25 + $0x190] sm:$0xff]  }
  0x2b   : > { %346 = vst [vmem:[%s9479_s26 + $0x180] sm:$0xff] %v345_v48   ;;  %350 = vst [vmem:[%s9479_s26 + $0x188] sm:$0xff] %v349_v49   ;;  %v357_v51 = vld [vmem:[%s9474_s25 + $0x198] sm:$0xff]   ;;  %v361_v52 = vld [vmem:[%s9474_s25 + $0x1a0] sm:$0xff]  }
  0x2c   : > { %354 = vst [vmem:[%s9479_s26 + $0x190] sm:$0xff] %v353_v50   ;;  %v365_v53 = vld [vmem:[%s9474_s25 + $0x1a8] sm:$0xff]   ;;  %358 = vst [vmem:[%s9479_s26 + $0x198] sm:$0xff] %v357_v51   ;;  %v369_v54 = vld [vmem:[%s9474_s25 + $0x1b0] sm:$0xff]  }
  0x2d   : > { %362 = vst [vmem:[%s9479_s26 + $0x1a0] sm:$0xff] %v361_v52   ;;  %366 = vst [vmem:[%s9479_s26 + $0x1a8] sm:$0xff] %v365_v53   ;;  %v373_v55 = vld [vmem:[%s9474_s25 + $0x1b8] sm:$0xff]   ;;  %v377_v56 = vld [vmem:[%s9474_s25 + $0x1c0] sm:$0xff]  }
  0x2e   : > { %370 = vst [vmem:[%s9479_s26 + $0x1b0] sm:$0xff] %v369_v54   ;;  %374 = vst [vmem:[%s9479_s26 + $0x1b8] sm:$0xff] %v373_v55   ;;  %v381_v57 = vld [vmem:[%s9474_s25 + $0x390] sm:$0xff]   ;;  %v385_v58 = vld [vmem:[%s9474_s25 + $0x398] sm:$0xff]  }
  0x2f   : > { %378 = vst [vmem:[%s9479_s26 + $0x1c0] sm:$0xff] %v377_v56   ;;  %v389_v59 = vld [vmem:[%s9474_s25 + $0x3a0] sm:$0xff]   ;;  %382 = vst [vmem:[%s9479_s26 + $0x1c8] sm:$0xff] %v381_v57   ;;  %v393_v60 = vld [vmem:[%s9474_s25 + $0x3a8] sm:$0xff]  }
  0x30   : > { %386 = vst [vmem:[%s9479_s26 + $0x1d0] sm:$0xff] %v385_v58   ;;  %390 = vst [vmem:[%s9479_s26 + $0x1d8] sm:$0xff] %v389_v59   ;;  %v397_v61 = vld [vmem:[%s9474_s25 + $0x3b0] sm:$0xff]   ;;  %v401_v62 = vld [vmem:[%s9474_s25 + $0x3b8] sm:$0xff]  }
  0x31   : > { %394 = vst [vmem:[%s9479_s26 + $0x1e0] sm:$0xff] %v393_v60   ;;  %398 = vst [vmem:[%s9479_s26 + $0x1e8] sm:$0xff] %v397_v61   ;;  %v405_v63 = vld [vmem:[%s9474_s25 + $0x3c0] sm:$0xff]   ;;  %v409_v0 = vld [vmem:[%s9474_s25 + $0x3c8] sm:$0xff]  }
  0x32   : > { %402 = vst [vmem:[%s9479_s26 + $0x1f0] sm:$0xff] %v401_v62   ;;  %v413_v1 = vld [vmem:[%s9474_s25 + $0x3d0] sm:$0xff]   ;;  %406 = vst [vmem:[%s9479_s26 + $0x1f8] sm:$0xff] %v405_v63   ;;  %v417_v2 = vld [vmem:[%s9474_s25 + $0x3d8] sm:$0xff]  }
  0x33   : > { %410 = vst [vmem:[%s9479_s26 + $0x200] sm:$0xff] %v409_v0   ;;  %414 = vst [vmem:[%s9479_s26 + $0x208] sm:$0xff] %v413_v1   ;;  %v421_v3 = vld [vmem:[%s9474_s25 + $0x3e0] sm:$0xff]   ;;  %v425_v4 = vld [vmem:[%s9474_s25 + $0x3e8] sm:$0xff]  }
  0x34   : > { %418 = vst [vmem:[%s9479_s26 + $0x210] sm:$0xff] %v417_v2   ;;  %422 = vst [vmem:[%s9479_s26 + $0x218] sm:$0xff] %v421_v3   ;;  %v429_v5 = vld [vmem:[%s9474_s25 + $0x3f0] sm:$0xff]   ;;  %v433_v6 = vld [vmem:[%s9474_s25 + $0x3f8] sm:$0xff]  }
  0x35   : > { %426 = vst [vmem:[%s9479_s26 + $0x220] sm:$0xff] %v425_v4   ;;  %v437_v7 = vld [vmem:[%s9474_s25 + $0x400] sm:$0xff]   ;;  %430 = vst [vmem:[%s9479_s26 + $0x228] sm:$0xff] %v429_v5   ;;  %v441_v8 = vld [vmem:[%s9474_s25 + $0x408] sm:$0xff]  }
  0x36   : > { %434 = vst [vmem:[%s9479_s26 + $0x230] sm:$0xff] %v433_v6   ;;  %438 = vst [vmem:[%s9479_s26 + $0x238] sm:$0xff] %v437_v7   ;;  %v445_v9 = vld [vmem:[%s9474_s25 + $0x410] sm:$0xff]   ;;  %v449_v10 = vld [vmem:[%s9474_s25 + $0x418] sm:$0xff]  }
  0x37   : > { %442 = vst [vmem:[%s9479_s26 + $0x240] sm:$0xff] %v441_v8   ;;  %446 = vst [vmem:[%s9479_s26 + $0x248] sm:$0xff] %v445_v9   ;;  %v453_v11 = vld [vmem:[%s9474_s25 + $0x420] sm:$0xff]   ;;  %v457_v12 = vld [vmem:[%s9474_s25 + $0x428] sm:$0xff]  }
  0x38   : > { %450 = vst [vmem:[%s9479_s26 + $0x250] sm:$0xff] %v449_v10   ;;  %v461_v13 = vld [vmem:[%s9474_s25 + $0x430] sm:$0xff]   ;;  %454 = vst [vmem:[%s9479_s26 + $0x258] sm:$0xff] %v453_v11   ;;  %v465_v14 = vld [vmem:[%s9474_s25 + $0x438] sm:$0xff]  }
  0x39   : > { %458 = vst [vmem:[%s9479_s26 + $0x260] sm:$0xff] %v457_v12   ;;  %462 = vst [vmem:[%s9479_s26 + $0x268] sm:$0xff] %v461_v13   ;;  %v469_v15 = vld [vmem:[%s9474_s25 + $0x440] sm:$0xff]   ;;  %v473_v16 = vld [vmem:[%s9474_s25 + $0x448] sm:$0xff]  }
  0x3a   : > { %466 = vst [vmem:[%s9479_s26 + $0x270] sm:$0xff] %v465_v14   ;;  %470 = vst [vmem:[%s9479_s26 + $0x278] sm:$0xff] %v469_v15   ;;  %v477_v17 = vld [vmem:[%s9474_s25 + $0x450] sm:$0xff]   ;;  %v481_v18 = vld [vmem:[%s9474_s25 + $0x458] sm:$0xff]  }
  0x3b   : > { %474 = vst [vmem:[%s9479_s26 + $0x280] sm:$0xff] %v473_v16   ;;  %v485_v19 = vld [vmem:[%s9474_s25 + $0x460] sm:$0xff]   ;;  %478 = vst [vmem:[%s9479_s26 + $0x288] sm:$0xff] %v477_v17   ;;  %v489_v20 = vld [vmem:[%s9474_s25 + $0x468] sm:$0xff]  }
  0x3c   : > { %482 = vst [vmem:[%s9479_s26 + $0x290] sm:$0xff] %v481_v18   ;;  %486 = vst [vmem:[%s9479_s26 + $0x298] sm:$0xff] %v485_v19   ;;  %v493_v21 = vld [vmem:[%s9474_s25 + $0x470] sm:$0xff]   ;;  %v497_v22 = vld [vmem:[%s9474_s25 + $0x478] sm:$0xff]  }
  0x3d   : > { %490 = vst [vmem:[%s9479_s26 + $0x2a0] sm:$0xff] %v489_v20   ;;  %494 = vst [vmem:[%s9479_s26 + $0x2a8] sm:$0xff] %v493_v21   ;;  %v501_v23 = vld [vmem:[%s9474_s25 + $0x480] sm:$0xff]   ;;  %v505_v24 = vld [vmem:[%s9474_s25 + $0x488] sm:$0xff]  }
  0x3e   : > { %498 = vst [vmem:[%s9479_s26 + $0x2b0] sm:$0xff] %v497_v22   ;;  %v509_v25 = vld [vmem:[%s9474_s25 + $0x490] sm:$0xff]   ;;  %502 = vst [vmem:[%s9479_s26 + $0x2b8] sm:$0xff] %v501_v23   ;;  %v513_v26 = vld [vmem:[%s9474_s25 + $0x498] sm:$0xff]  }
  0x3f   : > { %506 = vst [vmem:[%s9479_s26 + $0x2c0] sm:$0xff] %v505_v24   ;;  %510 = vst [vmem:[%s9479_s26 + $0x2c8] sm:$0xff] %v509_v25   ;;  %v517_v27 = vld [vmem:[%s9474_s25 + $0x4a0] sm:$0xff]   ;;  %v521_v28 = vld [vmem:[%s9474_s25 + $0x4a8] sm:$0xff]  }
  0x40   : > { %514 = vst [vmem:[%s9479_s26 + $0x2d0] sm:$0xff] %v513_v26   ;;  %518 = vst [vmem:[%s9479_s26 + $0x2d8] sm:$0xff] %v517_v27   ;;  %v525_v29 = vld [vmem:[%s9474_s25 + $0x4b0] sm:$0xff]   ;;  %v529_v30 = vld [vmem:[%s9474_s25 + $0x4b8] sm:$0xff]  }
  0x41   : > { %522 = vst [vmem:[%s9479_s26 + $0x2e0] sm:$0xff] %v521_v28   ;;  %v533_v31 = vld [vmem:[%s9474_s25 + $0x4c0] sm:$0xff]   ;;  %526 = vst [vmem:[%s9479_s26 + $0x2e8] sm:$0xff] %v525_v29   ;;  %v537_v32 = vld [vmem:[%s9474_s25 + $0x4c8] sm:$0xff]  }
  0x42   : > { %530 = vst [vmem:[%s9479_s26 + $0x2f0] sm:$0xff] %v529_v30   ;;  %534 = vst [vmem:[%s9479_s26 + $0x2f8] sm:$0xff] %v533_v31   ;;  %v541_v33 = vld [vmem:[%s9474_s25 + $0x4d0] sm:$0xff]   ;;  %v545_v34 = vld [vmem:[%s9474_s25 + $0x4d8] sm:$0xff]  }
  0x43   : > { %538 = vst [vmem:[%s9479_s26 + $0x300] sm:$0xff] %v537_v32   ;;  %542 = vst [vmem:[%s9479_s26 + $0x308] sm:$0xff] %v541_v33   ;;  %v549_v35 = vld [vmem:[%s9474_s25 + $0x4e0] sm:$0xff]   ;;  %v553_v36 = vld [vmem:[%s9474_s25 + $0x4e8] sm:$0xff]  }
  0x44   : > { %546 = vst [vmem:[%s9479_s26 + $0x310] sm:$0xff] %v545_v34   ;;  %v557_v37 = vld [vmem:[%s9474_s25 + $0x4f0] sm:$0xff]   ;;  %550 = vst [vmem:[%s9479_s26 + $0x318] sm:$0xff] %v549_v35   ;;  %v561_v38 = vld [vmem:[%s9474_s25 + $0x4f8] sm:$0xff]  }
  0x45   : > { %554 = vst [vmem:[%s9479_s26 + $0x320] sm:$0xff] %v553_v36   ;;  %558 = vst [vmem:[%s9479_s26 + $0x328] sm:$0xff] %v557_v37   ;;  %v565_v39 = vld [vmem:[%s9474_s25 + $0x500] sm:$0xff]   ;;  %v569_v40 = vld [vmem:[%s9474_s25 + $0x508] sm:$0xff]  }
  0x46   : > { %562 = vst [vmem:[%s9479_s26 + $0x330] sm:$0xff] %v561_v38   ;;  %566 = vst [vmem:[%s9479_s26 + $0x338] sm:$0xff] %v565_v39   ;;  %v573_v41 = vld [vmem:[%s9474_s25 + $0x510] sm:$0xff]   ;;  %v577_v42 = vld [vmem:[%s9474_s25 + $0x518] sm:$0xff]  }
  0x47   : > { %570 = vst [vmem:[%s9479_s26 + $0x340] sm:$0xff] %v569_v40   ;;  %v581_v43 = vld [vmem:[%s9474_s25 + $0x520] sm:$0xff]   ;;  %574 = vst [vmem:[%s9479_s26 + $0x348] sm:$0xff] %v573_v41   ;;  %v585_v44 = vld [vmem:[%s9474_s25 + $0x528] sm:$0xff]  }
  0x48   : > { %578 = vst [vmem:[%s9479_s26 + $0x350] sm:$0xff] %v577_v42   ;;  %582 = vst [vmem:[%s9479_s26 + $0x358] sm:$0xff] %v581_v43   ;;  %v589_v45 = vld [vmem:[%s9474_s25 + $0x530] sm:$0xff]   ;;  %v593_v46 = vld [vmem:[%s9474_s25 + $0x538] sm:$0xff]  }
  0x49   : > { %586 = vst [vmem:[%s9479_s26 + $0x360] sm:$0xff] %v585_v44   ;;  %590 = vst [vmem:[%s9479_s26 + $0x368] sm:$0xff] %v589_v45   ;;  %v597_v47 = vld [vmem:[%s9474_s25 + $0x540] sm:$0xff]   ;;  %v601_v48 = vld [vmem:[%s9474_s25 + $0x548] sm:$0xff]  }
  0x4a   : > { %594 = vst [vmem:[%s9479_s26 + $0x370] sm:$0xff] %v593_v46   ;;  %v605_v49 = vld [vmem:[%s9474_s25 + $0x550] sm:$0xff]   ;;  %598 = vst [vmem:[%s9479_s26 + $0x378] sm:$0xff] %v597_v47   ;;  %v609_v50 = vld [vmem:[%s9474_s25 + $0x720] sm:$0xff]  }
  0x4b   : > { %602 = vst [vmem:[%s9479_s26 + $0x380] sm:$0xff] %v601_v48   ;;  %606 = vst [vmem:[%s9479_s26 + $0x388] sm:$0xff] %v605_v49   ;;  %v613_v51 = vld [vmem:[%s9474_s25 + $0x728] sm:$0xff]   ;;  %v617_v52 = vld [vmem:[%s9474_s25 + $0x730] sm:$0xff]  }
  0x4c   : > { %610 = vst [vmem:[%s9479_s26 + $0x390] sm:$0xff] %v609_v50   ;;  %614 = vst [vmem:[%s9479_s26 + $0x398] sm:$0xff] %v613_v51   ;;  %v621_v53 = vld [vmem:[%s9474_s25 + $0x738] sm:$0xff]   ;;  %v625_v54 = vld [vmem:[%s9474_s25 + $0x740] sm:$0xff]  }
  0x4d   : > { %618 = vst [vmem:[%s9479_s26 + $0x3a0] sm:$0xff] %v617_v52   ;;  %v629_v55 = vld [vmem:[%s9474_s25 + $0x748] sm:$0xff]   ;;  %622 = vst [vmem:[%s9479_s26 + $0x3a8] sm:$0xff] %v621_v53   ;;  %v633_v56 = vld [vmem:[%s9474_s25 + $0x750] sm:$0xff]  }
  0x4e   : > { %626 = vst [vmem:[%s9479_s26 + $0x3b0] sm:$0xff] %v625_v54   ;;  %630 = vst [vmem:[%s9479_s26 + $0x3b8] sm:$0xff] %v629_v55   ;;  %v637_v57 = vld [vmem:[%s9474_s25 + $0x758] sm:$0xff]   ;;  %v641_v58 = vld [vmem:[%s9474_s25 + $0x760] sm:$0xff]  }
  0x4f   : > { %634 = vst [vmem:[%s9479_s26 + $0x3c0] sm:$0xff] %v633_v56   ;;  %638 = vst [vmem:[%s9479_s26 + $0x3c8] sm:$0xff] %v637_v57   ;;  %v645_v59 = vld [vmem:[%s9474_s25 + $0x768] sm:$0xff]   ;;  %v649_v60 = vld [vmem:[%s9474_s25 + $0x770] sm:$0xff]  }
  0x50   : > { %642 = vst [vmem:[%s9479_s26 + $0x3d0] sm:$0xff] %v641_v58   ;;  %v653_v61 = vld [vmem:[%s9474_s25 + $0x778] sm:$0xff]   ;;  %646 = vst [vmem:[%s9479_s26 + $0x3d8] sm:$0xff] %v645_v59   ;;  %v657_v62 = vld [vmem:[%s9474_s25 + $0x780] sm:$0xff]  }
  0x51   : > { %650 = vst [vmem:[%s9479_s26 + $0x3e0] sm:$0xff] %v649_v60   ;;  %654 = vst [vmem:[%s9479_s26 + $0x3e8] sm:$0xff] %v653_v61   ;;  %v661_v63 = vld [vmem:[%s9474_s25 + $0x788] sm:$0xff]   ;;  %v665_v0 = vld [vmem:[%s9474_s25 + $0x790] sm:$0xff]  }
  0x52   : > { %658 = vst [vmem:[%s9479_s26 + $0x3f0] sm:$0xff] %v657_v62   ;;  %662 = vst [vmem:[%s9479_s26 + $0x3f8] sm:$0xff] %v661_v63   ;;  %v669_v1 = vld [vmem:[%s9474_s25 + $0x798] sm:$0xff]   ;;  %v673_v2 = vld [vmem:[%s9474_s25 + $0x7a0] sm:$0xff]  }
  0x53   : > { %666 = vst [vmem:[%s9479_s26 + $0x400] sm:$0xff] %v665_v0   ;;  %v677_v3 = vld [vmem:[%s9474_s25 + $0x7a8] sm:$0xff]   ;;  %670 = vst [vmem:[%s9479_s26 + $0x408] sm:$0xff] %v669_v1   ;;  %v681_v4 = vld [vmem:[%s9474_s25 + $0x7b0] sm:$0xff]  }
  0x54   : > { %674 = vst [vmem:[%s9479_s26 + $0x410] sm:$0xff] %v673_v2   ;;  %678 = vst [vmem:[%s9479_s26 + $0x418] sm:$0xff] %v677_v3   ;;  %v685_v5 = vld [vmem:[%s9474_s25 + $0x7b8] sm:$0xff]   ;;  %v689_v6 = vld [vmem:[%s9474_s25 + $0x7c0] sm:$0xff]  }
  0x55   : > { %682 = vst [vmem:[%s9479_s26 + $0x420] sm:$0xff] %v681_v4   ;;  %686 = vst [vmem:[%s9479_s26 + $0x428] sm:$0xff] %v685_v5   ;;  %v693_v7 = vld [vmem:[%s9474_s25 + $0x7c8] sm:$0xff]   ;;  %v697_v8 = vld [vmem:[%s9474_s25 + $0x7d0] sm:$0xff]  }
  0x56   : > { %690 = vst [vmem:[%s9479_s26 + $0x430] sm:$0xff] %v689_v6   ;;  %v701_v9 = vld [vmem:[%s9474_s25 + $0x7d8] sm:$0xff]   ;;  %694 = vst [vmem:[%s9479_s26 + $0x438] sm:$0xff] %v693_v7   ;;  %v705_v10 = vld [vmem:[%s9474_s25 + $0x7e0] sm:$0xff]  }
  0x57   : > { %698 = vst [vmem:[%s9479_s26 + $0x440] sm:$0xff] %v697_v8   ;;  %702 = vst [vmem:[%s9479_s26 + $0x448] sm:$0xff] %v701_v9   ;;  %v709_v11 = vld [vmem:[%s9474_s25 + $0x7e8] sm:$0xff]   ;;  %v713_v12 = vld [vmem:[%s9474_s25 + $0x7f0] sm:$0xff]  }
  0x58   : > { %706 = vst [vmem:[%s9479_s26 + $0x450] sm:$0xff] %v705_v10   ;;  %710 = vst [vmem:[%s9479_s26 + $0x458] sm:$0xff] %v709_v11   ;;  %v717_v13 = vld [vmem:[%s9474_s25 + $0x7f8] sm:$0xff]   ;;  %v721_v14 = vld [vmem:[%s9474_s25 + $0x800] sm:$0xff]  }
  0x59   : > { %714 = vst [vmem:[%s9479_s26 + $0x460] sm:$0xff] %v713_v12   ;;  %v725_v15 = vld [vmem:[%s9474_s25 + $0x808] sm:$0xff]   ;;  %718 = vst [vmem:[%s9479_s26 + $0x468] sm:$0xff] %v717_v13   ;;  %v729_v16 = vld [vmem:[%s9474_s25 + $0x810] sm:$0xff]  }
  0x5a   : > { %722 = vst [vmem:[%s9479_s26 + $0x470] sm:$0xff] %v721_v14   ;;  %726 = vst [vmem:[%s9479_s26 + $0x478] sm:$0xff] %v725_v15   ;;  %v733_v17 = vld [vmem:[%s9474_s25 + $0x818] sm:$0xff]   ;;  %v737_v18 = vld [vmem:[%s9474_s25 + $0x820] sm:$0xff]  }
  0x5b   : > { %730 = vst [vmem:[%s9479_s26 + $0x480] sm:$0xff] %v729_v16   ;;  %734 = vst [vmem:[%s9479_s26 + $0x488] sm:$0xff] %v733_v17   ;;  %v741_v19 = vld [vmem:[%s9474_s25 + $0x828] sm:$0xff]   ;;  %v745_v20 = vld [vmem:[%s9474_s25 + $0x830] sm:$0xff]  }
  0x5c   : > { %738 = vst [vmem:[%s9479_s26 + $0x490] sm:$0xff] %v737_v18   ;;  %v749_v21 = vld [vmem:[%s9474_s25 + $0x838] sm:$0xff]   ;;  %742 = vst [vmem:[%s9479_s26 + $0x498] sm:$0xff] %v741_v19   ;;  %v753_v22 = vld [vmem:[%s9474_s25 + $0x840] sm:$0xff]  }
  0x5d   : > { %746 = vst [vmem:[%s9479_s26 + $0x4a0] sm:$0xff] %v745_v20   ;;  %750 = vst [vmem:[%s9479_s26 + $0x4a8] sm:$0xff] %v749_v21   ;;  %v757_v23 = vld [vmem:[%s9474_s25 + $0x848] sm:$0xff]   ;;  %v761_v24 = vld [vmem:[%s9474_s25 + $0x850] sm:$0xff]  }
  0x5e   : > { %754 = vst [vmem:[%s9479_s26 + $0x4b0] sm:$0xff] %v753_v22   ;;  %758 = vst [vmem:[%s9479_s26 + $0x4b8] sm:$0xff] %v757_v23   ;;  %v765_v25 = vld [vmem:[%s9474_s25 + $0x858] sm:$0xff]   ;;  %v769_v26 = vld [vmem:[%s9474_s25 + $0x860] sm:$0xff]  }
  0x5f   : > { %762 = vst [vmem:[%s9479_s26 + $0x4c0] sm:$0xff] %v761_v24   ;;  %v773_v27 = vld [vmem:[%s9474_s25 + $0x868] sm:$0xff]   ;;  %766 = vst [vmem:[%s9479_s26 + $0x4c8] sm:$0xff] %v765_v25   ;;  %v777_v28 = vld [vmem:[%s9474_s25 + $0x870] sm:$0xff]  }
  0x60   : > { %770 = vst [vmem:[%s9479_s26 + $0x4d0] sm:$0xff] %v769_v26   ;;  %774 = vst [vmem:[%s9479_s26 + $0x4d8] sm:$0xff] %v773_v27   ;;  %v781_v29 = vld [vmem:[%s9474_s25 + $0x878] sm:$0xff]   ;;  %v785_v30 = vld [vmem:[%s9474_s25 + $0x880] sm:$0xff]  }
  0x61   : > { %778 = vst [vmem:[%s9479_s26 + $0x4e0] sm:$0xff] %v777_v28   ;;  %782 = vst [vmem:[%s9479_s26 + $0x4e8] sm:$0xff] %v781_v29   ;;  %v789_v31 = vld [vmem:[%s9474_s25 + $0x888] sm:$0xff]   ;;  %v793_v32 = vld [vmem:[%s9474_s25 + $0x890] sm:$0xff]  }
  0x62   : > { %786 = vst [vmem:[%s9479_s26 + $0x4f0] sm:$0xff] %v785_v30   ;;  %v797_v33 = vld [vmem:[%s9474_s25 + $0x898] sm:$0xff]   ;;  %790 = vst [vmem:[%s9479_s26 + $0x4f8] sm:$0xff] %v789_v31   ;;  %v801_v34 = vld [vmem:[%s9474_s25 + $0x8a0] sm:$0xff]  }
  0x63   : > { %794 = vst [vmem:[%s9479_s26 + $0x500] sm:$0xff] %v793_v32   ;;  %798 = vst [vmem:[%s9479_s26 + $0x508] sm:$0xff] %v797_v33   ;;  %v805_v35 = vld [vmem:[%s9474_s25 + $0x8a8] sm:$0xff]   ;;  %v809_v36 = vld [vmem:[%s9474_s25 + $0x8b0] sm:$0xff]  }
  0x64   : > { %802 = vst [vmem:[%s9479_s26 + $0x510] sm:$0xff] %v801_v34   ;;  %806 = vst [vmem:[%s9479_s26 + $0x518] sm:$0xff] %v805_v35   ;;  %v813_v37 = vld [vmem:[%s9474_s25 + $0x8b8] sm:$0xff]   ;;  %v817_v38 = vld [vmem:[%s9474_s25 + $0x8c0] sm:$0xff]  }
  0x65   : > { %810 = vst [vmem:[%s9479_s26 + $0x520] sm:$0xff] %v809_v36   ;;  %v821_v39 = vld [vmem:[%s9474_s25 + $0x8c8] sm:$0xff]   ;;  %814 = vst [vmem:[%s9479_s26 + $0x528] sm:$0xff] %v813_v37   ;;  %v825_v40 = vld [vmem:[%s9474_s25 + $0x8d0] sm:$0xff]  }
  0x66   : > { %818 = vst [vmem:[%s9479_s26 + $0x530] sm:$0xff] %v817_v38   ;;  %822 = vst [vmem:[%s9479_s26 + $0x538] sm:$0xff] %v821_v39   ;;  %v829_v41 = vld [vmem:[%s9474_s25 + $0x8d8] sm:$0xff]   ;;  %v833_v42 = vld [vmem:[%s9474_s25 + $0x8e0] sm:$0xff]  }
  0x67   : > { %826 = vst [vmem:[%s9479_s26 + $0x540] sm:$0xff] %v825_v40   ;;  %830 = vst [vmem:[%s9479_s26 + $0x548] sm:$0xff] %v829_v41   ;;  %v837_v43 = vld [vmem:[%s9474_s25 + $0xab0] sm:$0xff]   ;;  %v841_v44 = vld [vmem:[%s9474_s25 + $0xab8] sm:$0xff]  }
  0x68   : > { %834 = vst [vmem:[%s9479_s26 + $0x550] sm:$0xff] %v833_v42   ;;  %v845_v45 = vld [vmem:[%s9474_s25 + $0xac0] sm:$0xff]   ;;  %838 = vst [vmem:[%s9479_s26 + $0x558] sm:$0xff] %v837_v43   ;;  %v849_v46 = vld [vmem:[%s9474_s25 + $0xac8] sm:$0xff]  }
  0x69   : > { %842 = vst [vmem:[%s9479_s26 + $0x560] sm:$0xff] %v841_v44   ;;  %846 = vst [vmem:[%s9479_s26 + $0x568] sm:$0xff] %v845_v45   ;;  %v853_v47 = vld [vmem:[%s9474_s25 + $0xad0] sm:$0xff]   ;;  %v857_v48 = vld [vmem:[%s9474_s25 + $0xad8] sm:$0xff]  }
  0x6a   : > { %850 = vst [vmem:[%s9479_s26 + $0x570] sm:$0xff] %v849_v46   ;;  %854 = vst [vmem:[%s9479_s26 + $0x578] sm:$0xff] %v853_v47   ;;  %v861_v49 = vld [vmem:[%s9474_s25 + $0xae0] sm:$0xff]   ;;  %v865_v50 = vld [vmem:[%s9474_s25 + $0xae8] sm:$0xff]  }
  0x6b   : > { %858 = vst [vmem:[%s9479_s26 + $0x580] sm:$0xff] %v857_v48   ;;  %v869_v51 = vld [vmem:[%s9474_s25 + $0xaf0] sm:$0xff]   ;;  %862 = vst [vmem:[%s9479_s26 + $0x588] sm:$0xff] %v861_v49   ;;  %v873_v52 = vld [vmem:[%s9474_s25 + $0xaf8] sm:$0xff]  }
  0x6c   : > { %866 = vst [vmem:[%s9479_s26 + $0x590] sm:$0xff] %v865_v50   ;;  %870 = vst [vmem:[%s9479_s26 + $0x598] sm:$0xff] %v869_v51   ;;  %v877_v53 = vld [vmem:[%s9474_s25 + $0xb00] sm:$0xff]   ;;  %v881_v54 = vld [vmem:[%s9474_s25 + $0xb08] sm:$0xff]  }
  0x6d   : > { %874 = vst [vmem:[%s9479_s26 + $0x5a0] sm:$0xff] %v873_v52   ;;  %878 = vst [vmem:[%s9479_s26 + $0x5a8] sm:$0xff] %v877_v53   ;;  %v885_v55 = vld [vmem:[%s9474_s25 + $0xb10] sm:$0xff]   ;;  %v889_v56 = vld [vmem:[%s9474_s25 + $0xb18] sm:$0xff]  }
  0x6e   : > { %882 = vst [vmem:[%s9479_s26 + $0x5b0] sm:$0xff] %v881_v54   ;;  %v893_v57 = vld [vmem:[%s9474_s25 + $0xb20] sm:$0xff]   ;;  %886 = vst [vmem:[%s9479_s26 + $0x5b8] sm:$0xff] %v885_v55   ;;  %v897_v58 = vld [vmem:[%s9474_s25 + $0xb28] sm:$0xff]  }
  0x6f   : > { %890 = vst [vmem:[%s9479_s26 + $0x5c0] sm:$0xff] %v889_v56   ;;  %894 = vst [vmem:[%s9479_s26 + $0x5c8] sm:$0xff] %v893_v57   ;;  %v901_v59 = vld [vmem:[%s9474_s25 + $0xb30] sm:$0xff]   ;;  %v905_v60 = vld [vmem:[%s9474_s25 + $0xb38] sm:$0xff]  }
  0x70   : > { %898 = vst [vmem:[%s9479_s26 + $0x5d0] sm:$0xff] %v897_v58   ;;  %902 = vst [vmem:[%s9479_s26 + $0x5d8] sm:$0xff] %v901_v59   ;;  %v909_v61 = vld [vmem:[%s9474_s25 + $0xb40] sm:$0xff]   ;;  %v913_v62 = vld [vmem:[%s9474_s25 + $0xb48] sm:$0xff]  }
  0x71   : > { %906 = vst [vmem:[%s9479_s26 + $0x5e0] sm:$0xff] %v905_v60   ;;  %v917_v63 = vld [vmem:[%s9474_s25 + $0xb50] sm:$0xff]   ;;  %910 = vst [vmem:[%s9479_s26 + $0x5e8] sm:$0xff] %v909_v61   ;;  %v921_v0 = vld [vmem:[%s9474_s25 + $0xb58] sm:$0xff]  }
  0x72   : > { %914 = vst [vmem:[%s9479_s26 + $0x5f0] sm:$0xff] %v913_v62   ;;  %918 = vst [vmem:[%s9479_s26 + $0x5f8] sm:$0xff] %v917_v63   ;;  %v925_v1 = vld [vmem:[%s9474_s25 + $0xb60] sm:$0xff]   ;;  %v929_v2 = vld [vmem:[%s9474_s25 + $0xb68] sm:$0xff]  }
  0x73   : > { %922 = vst [vmem:[%s9479_s26 + $0x600] sm:$0xff] %v921_v0   ;;  %926 = vst [vmem:[%s9479_s26 + $0x608] sm:$0xff] %v925_v1   ;;  %v933_v3 = vld [vmem:[%s9474_s25 + $0xb70] sm:$0xff]   ;;  %v937_v4 = vld [vmem:[%s9474_s25 + $0xb78] sm:$0xff]  }
  0x74   : > { %930 = vst [vmem:[%s9479_s26 + $0x610] sm:$0xff] %v929_v2   ;;  %v941_v5 = vld [vmem:[%s9474_s25 + $0xb80] sm:$0xff]   ;;  %934 = vst [vmem:[%s9479_s26 + $0x618] sm:$0xff] %v933_v3   ;;  %v945_v6 = vld [vmem:[%s9474_s25 + $0xb88] sm:$0xff]  }
  0x75   : > { %938 = vst [vmem:[%s9479_s26 + $0x620] sm:$0xff] %v937_v4   ;;  %942 = vst [vmem:[%s9479_s26 + $0x628] sm:$0xff] %v941_v5   ;;  %v949_v7 = vld [vmem:[%s9474_s25 + $0xb90] sm:$0xff]   ;;  %v953_v8 = vld [vmem:[%s9474_s25 + $0xb98] sm:$0xff]  }
  0x76   : > { %946 = vst [vmem:[%s9479_s26 + $0x630] sm:$0xff] %v945_v6   ;;  %950 = vst [vmem:[%s9479_s26 + $0x638] sm:$0xff] %v949_v7   ;;  %v957_v9 = vld [vmem:[%s9474_s25 + $0xba0] sm:$0xff]   ;;  %v961_v10 = vld [vmem:[%s9474_s25 + $0xba8] sm:$0xff]  }
  0x77   : > { %954 = vst [vmem:[%s9479_s26 + $0x640] sm:$0xff] %v953_v8   ;;  %v965_v11 = vld [vmem:[%s9474_s25 + $0xbb0] sm:$0xff]   ;;  %958 = vst [vmem:[%s9479_s26 + $0x648] sm:$0xff] %v957_v9   ;;  %v969_v12 = vld [vmem:[%s9474_s25 + $0xbb8] sm:$0xff]  }
  0x78   : > { %962 = vst [vmem:[%s9479_s26 + $0x650] sm:$0xff] %v961_v10   ;;  %966 = vst [vmem:[%s9479_s26 + $0x658] sm:$0xff] %v965_v11   ;;  %v973_v13 = vld [vmem:[%s9474_s25 + $0xbc0] sm:$0xff]   ;;  %v977_v14 = vld [vmem:[%s9474_s25 + $0xbc8] sm:$0xff]  }
  0x79   : > { %970 = vst [vmem:[%s9479_s26 + $0x660] sm:$0xff] %v969_v12   ;;  %974 = vst [vmem:[%s9479_s26 + $0x668] sm:$0xff] %v973_v13   ;;  %v981_v15 = vld [vmem:[%s9474_s25 + $0xbd0] sm:$0xff]   ;;  %v985_v16 = vld [vmem:[%s9474_s25 + $0xbd8] sm:$0xff]  }
  0x7a   : > { %978 = vst [vmem:[%s9479_s26 + $0x670] sm:$0xff] %v977_v14   ;;  %v989_v17 = vld [vmem:[%s9474_s25 + $0xbe0] sm:$0xff]   ;;  %982 = vst [vmem:[%s9479_s26 + $0x678] sm:$0xff] %v981_v15   ;;  %v993_v18 = vld [vmem:[%s9474_s25 + $0xbe8] sm:$0xff]  }
  0x7b   : > { %986 = vst [vmem:[%s9479_s26 + $0x680] sm:$0xff] %v985_v16   ;;  %990 = vst [vmem:[%s9479_s26 + $0x688] sm:$0xff] %v989_v17   ;;  %v997_v19 = vld [vmem:[%s9474_s25 + $0xbf0] sm:$0xff]   ;;  %v1001_v20 = vld [vmem:[%s9474_s25 + $0xbf8] sm:$0xff]  }
  0x7c   : > { %994 = vst [vmem:[%s9479_s26 + $0x690] sm:$0xff] %v993_v18   ;;  %998 = vst [vmem:[%s9479_s26 + $0x698] sm:$0xff] %v997_v19   ;;  %v1005_v21 = vld [vmem:[%s9474_s25 + $0xc00] sm:$0xff]   ;;  %v1009_v22 = vld [vmem:[%s9474_s25 + $0xc08] sm:$0xff]  }
  0x7d   : > { %1002 = vst [vmem:[%s9479_s26 + $0x6a0] sm:$0xff] %v1001_v20   ;;  %v1013_v23 = vld [vmem:[%s9474_s25 + $0xc10] sm:$0xff]   ;;  %1006 = vst [vmem:[%s9479_s26 + $0x6a8] sm:$0xff] %v1005_v21   ;;  %v1017_v24 = vld [vmem:[%s9474_s25 + $0xc18] sm:$0xff]  }
  0x7e   : > { %1010 = vst [vmem:[%s9479_s26 + $0x6b0] sm:$0xff] %v1009_v22   ;;  %1014 = vst [vmem:[%s9479_s26 + $0x6b8] sm:$0xff] %v1013_v23   ;;  %v1021_v25 = vld [vmem:[%s9474_s25 + $0xc20] sm:$0xff]   ;;  %v1025_v26 = vld [vmem:[%s9474_s25 + $0xc28] sm:$0xff]  }
  0x7f   : > { %1018 = vst [vmem:[%s9479_s26 + $0x6c0] sm:$0xff] %v1017_v24   ;;  %1022 = vst [vmem:[%s9479_s26 + $0x6c8] sm:$0xff] %v1021_v25   ;;  %v1029_v27 = vld [vmem:[%s9474_s25 + $0xc30] sm:$0xff]   ;;  %v1033_v28 = vld [vmem:[%s9474_s25 + $0xc38] sm:$0xff]  }
  0x80   : > { %1026 = vst [vmem:[%s9479_s26 + $0x6d0] sm:$0xff] %v1025_v26   ;;  %v1037_v29 = vld [vmem:[%s9474_s25 + $0xc40] sm:$0xff]   ;;  %1030 = vst [vmem:[%s9479_s26 + $0x6d8] sm:$0xff] %v1029_v27   ;;  %v1041_v30 = vld [vmem:[%s9474_s25 + $0xc48] sm:$0xff]  }
  0x81   : > { %1034 = vst [vmem:[%s9479_s26 + $0x6e0] sm:$0xff] %v1033_v28   ;;  %1038 = vst [vmem:[%s9479_s26 + $0x6e8] sm:$0xff] %v1037_v29   ;;  %v1045_v31 = vld [vmem:[%s9474_s25 + $0xc50] sm:$0xff]   ;;  %v1049_v32 = vld [vmem:[%s9474_s25 + $0xc58] sm:$0xff]  }
  0x82   : > { %1042 = vst [vmem:[%s9479_s26 + $0x6f0] sm:$0xff] %v1041_v30   ;;  %1046 = vst [vmem:[%s9479_s26 + $0x6f8] sm:$0xff] %v1045_v31   ;;  %v1053_v33 = vld [vmem:[%s9474_s25 + $0xc60] sm:$0xff]   ;;  %v1057_v34 = vld [vmem:[%s9474_s25 + $0xc68] sm:$0xff]  }
  0x83   : > { %1050 = vst [vmem:[%s9479_s26 + $0x700] sm:$0xff] %v1049_v32   ;;  %v1061_v35 = vld [vmem:[%s9474_s25 + $0xc70] sm:$0xff]   ;;  %1054 = vst [vmem:[%s9479_s26 + $0x708] sm:$0xff] %v1053_v33  }
  0x84   : > { %1058 = vst [vmem:[%s9479_s26 + $0x710] sm:$0xff] %v1057_v34   ;;  %1062 = vst [vmem:[%s9479_s26 + $0x718] sm:$0xff] %v1061_v35  }
  0x85 PF: > { %p7410_p5 = scmp.ge.s32.totalorder %s9417_s14, 1  ;;  %p1998_p6 = scmp.lt.s32.totalorder %s9417_s14, 3 }
  0x87   : > { %p1999_p7 = pnand %p7410_p5, %p1998_p6 }
  0x89   : > { %2002 = sbr.rel (%p1999_p7) target bundleno = 828 (0x33c), region = 69 }
  0x90   : > { %v9164_v36 = vld [vmem:[%s11285_s1] sm:$0xff]   ;;  %vm4332_vm0 = vcmask 1043456   ;;  %v9165_v37 = vld [vmem:[%s11285_s1 + $0x8] sm:$0x1f]   ;;  %vm4333_vm1 = vcmask 1044480   ;;  %s2005_s4 = sand.u32 1, %s9409_s12  }
  0x91   : > { %8673 = vmatprep.subr.bf16.mxu0 %v9164_v36  ;;  %9133 = vmatprep.subr.bf16.mxu1 %v9164_v36  ;;  %v9419_v38 = vmov 65535   ;;  %s9138_s5 = smul.u32 1824, %s2005_s4  ;;  %vm3647_vm2 = vcmask 203776  }
  0x92   : > { %8674 = vmatpush3.bf16.msra.mxu0 %v9164_v36  ;;  %9135 = vmatpush3.bf16.msra.mxu1 %v9164_v36  ;;  %v4334_v39 = vsel %vm4332_vm0, 4294967295, %v9419_v38  ;;  %s2029_s7 = smul.u32 114, %s7405_s15 }
  0x93   : > { %v4335_v40 = vsel %vm4333_vm1, %v4334_v39, 0  ;;  %s9943_s6 = scalar_lea.vmem [#allocation2], %s9138_s5 }
  0x94   : > { %v4337_v41 = vand.u32 %v9165_v37, %v4335_v40  ;;  %v9166_v42 = vld [vmem:[%s9943_s6] sm:$0xff]   ;;  %v9167_v43 = vld [vmem:[%s9943_s6 + $0x390] sm:$0xff]   ;;  %v9168_v44 = vld [vmem:[%s9943_s6 + $0x8] sm:$0xff]   ;;  %p2030_p8 = scmp.lt.s32.totalorder %s2029_s7, 227 }
  0x95   : > { %8677 = vmatprep.mubr.msk.bf16.mxu0 %vm3647_vm2, %v9166_v42  ;;  %8905 = vmatprep.mubr.msk.bf16.mxu1 %vm3647_vm2, %v9167_v43  ;;  %v9169_v45 = vld [vmem:[%s9943_s6 + $0x398] sm:$0xff]   ;;  %v9170_v46 = vld [vmem:[%s9943_s6 + $0x10] sm:$0xff]   ;;  %v9171_v47 = vld [vmem:[%s9943_s6 + $0x3a0] sm:$0xff]  }
  0x96   : > { %8675 = vmatprep.subr.bf16.mxu0 %v4337_v41  ;;  %9134 = vmatprep.subr.bf16.mxu1 %v4337_v41  ;;  %v9172_v48 = vld [vmem:[%s9943_s6 + $0x18] sm:$0xff]   ;;  %v9173_v49 = vld [vmem:[%s9943_s6 + $0x3a8] sm:$0xff]   ;;  %v9174_v50 = vld [vmem:[%s9943_s6 + $0x20] sm:$0xff]   ;;  %s11652_s7 = smov (!%p2030_p8, %s2029_s7), 227 }
  0x97   : > { %8676 = vmatpush3.bf16.msra.mxu0 %v4337_v41  ;;  %9136 = vmatpush3.bf16.msra.mxu1 %v4337_v41  ;;  %v9175_v51 = vld [vmem:[%s9943_s6 + $0x3b0] sm:$0xff]   ;;  %v9176_v52 = vld [vmem:[%s9943_s6 + $0x28] sm:$0xff]   ;;  %v9177_v53 = vld [vmem:[%s9943_s6 + $0x3b8] sm:$0xff]   ;;  %s7411_s10 = sshll.u32 %s11652_s7, 2 }
  0x98   : > { %v9178_v54 = vld [vmem:[%s9943_s6 + $0x30] sm:$0xff]   ;;  %v9179_v55 = vld [vmem:[%s9943_s6 + $0x3c0] sm:$0xff]   ;;  %v9180_v56 = vld [vmem:[%s9943_s6 + $0x38] sm:$0xff]   ;;  %s10874_s14 = scalar_lea.vmem %s11287_s3, %s7411_s10 }
  0x99   : > { %v9181_v57 = vld [vmem:[%s9943_s6 + $0x3c8] sm:$0xff]   ;;  %v9182_v58 = vld [vmem:[%s9943_s6 + $0x40] sm:$0xff]   ;;  %v9183_v59 = vld [vmem:[%s9943_s6 + $0x3d0] sm:$0xff]  }
  0x9a   : > { %8678 = vmatmul.mubr.msk.bf16.vlgmr.msra.gmra.mrb[0].mxu0 %vm3647_vm2, %v9168_v44  ;;  %8906 = vmatmul.mubr.msk.bf16.vlgmr.msra.gmra.mrb[0].mxu1 %vm3647_vm2, %v9169_v45  ;;  %v9184_v60 = vld [vmem:[%s9943_s6 + $0x48] sm:$0xff]   ;;  %v9185_v61 = vld [vmem:[%s9943_s6 + $0x3d8] sm:$0xff]   ;;  %v9186_v62 = vld [vmem:[%s9943_s6 + $0x50] sm:$0xff]  }
  0x9b   : > { %8681 = vmatprep.mubr.msk.bf16.mxu0 %vm3647_vm2, %v9170_v46  ;;  %8909 = vmatprep.mubr.msk.bf16.mxu1 %vm3647_vm2, %v9171_v47  ;;  %v9187_v63 = vld [vmem:[%s9943_s6 + $0x3e0] sm:$0xff]   ;;  %v9188_v0 = vld [vmem:[%s9943_s6 + $0x58] sm:$0xff]   ;;  %v9189_v1 = vld [vmem:[%s9943_s6 + $0x3e8] sm:$0xff]  }
  0x9c   : > { %v9190_v2 = vld [vmem:[%s9943_s6 + $0x60] sm:$0xff]   ;;  %v9191_v3 = vld [vmem:[%s9943_s6 + $0x3f0] sm:$0xff]   ;;  %v9192_v4 = vld [vmem:[%s9943_s6 + $0x68] sm:$0xff]  }
  0x9d   : > { %v9193_v5 = vld [vmem:[%s9943_s6 + $0x3f8] sm:$0xff]   ;;  %v9194_v6 = vld [vmem:[%s9943_s6 + $0x70] sm:$0xff]   ;;  %v9195_v7 = vld [vmem:[%s9943_s6 + $0x400] sm:$0xff]  }
  0x9e   : > { %v9196_v8 = vld [vmem:[%s9943_s6 + $0x78] sm:$0xff]   ;;  %v9197_v9 = vld [vmem:[%s9943_s6 + $0x408] sm:$0xff]   ;;  %v9198_v10 = vld [vmem:[%s9943_s6 + $0x80] sm:$0xff]  }
  0x9f   : > { %v9199_v11 = vld [vmem:[%s9943_s6 + $0x410] sm:$0xff]   ;;  %v9200_v12 = vld [vmem:[%s9943_s6 + $0x88] sm:$0xff]   ;;  %v9201_v13 = vld [vmem:[%s9943_s6 + $0x418] sm:$0xff]  }
  0xa0   : > { %v9202_v14 = vld [vmem:[%s9943_s6 + $0x90] sm:$0xff]   ;;  %v9203_v15 = vld [vmem:[%s9943_s6 + $0x420] sm:$0xff]   ;;  %v9204_v16 = vld [vmem:[%s9943_s6 + $0x98] sm:$0xff]  }
  0xa1   : > { %v9205_v17 = vld [vmem:[%s9943_s6 + $0x428] sm:$0xff]   ;;  %v9206_v18 = vld [vmem:[%s9943_s6 + $0xa0] sm:$0xff]   ;;  %v9207_v19 = vld [vmem:[%s9943_s6 + $0x430] sm:$0xff]  }
  0xa2   : > { %8682 = vmatmul.mubr.msk.bf16.gmra.mrb[4].mxu0 %vm3647_vm2, %v9172_v48  ;;  %8910 = vmatmul.mubr.msk.bf16.gmra.mrb[4].mxu1 %vm3647_vm2, %v9173_v49  ;;  %v9208_v20 = vld [vmem:[%s9943_s6 + $0xa8] sm:$0xff]   ;;  %v9209_v21 = vld [vmem:[%s9943_s6 + $0x438] sm:$0xff]   ;;  %v9210_v22 = vld [vmem:[%s9943_s6 + $0xb0] sm:$0xff]  }
  0xa3   : > { %8685 = vmatprep.mubr.msk.bf16.mxu0 %vm3647_vm2, %v9174_v50  ;;  %8913 = vmatprep.mubr.msk.bf16.mxu1 %vm3647_vm2, %v9175_v51  ;;  %v9211_v23 = vld [vmem:[%s9943_s6 + $0x440] sm:$0xff]   ;;  %v9212_v24 = vld [vmem:[%s9943_s6 + $0xb8] sm:$0xff]   ;;  %v9213_v25 = vld [vmem:[%s9943_s6 + $0x448] sm:$0xff]  }
  0xa4   : > { %v9214_v26 = vld [vmem:[%s9943_s6 + $0xc0] sm:$0xff]   ;;  %v9215_v27 = vld [vmem:[%s9943_s6 + $0x450] sm:$0xff]   ;;  %v9216_v28 = vld [vmem:[%s9943_s6 + $0xc8] sm:$0xff]  }
  0xa5   : > { %v9217_v29 = vld [vmem:[%s9943_s6 + $0x458] sm:$0xff]   ;;  %v9218_v30 = vld [vmem:[%s9943_s6 + $0xd0] sm:$0xff]   ;;  %v9219_v31 = vld [vmem:[%s9943_s6 + $0x460] sm:$0xff]  }
  0xa6   : > { %v9220_v32 = vld [vmem:[%s9943_s6 + $0xd8] sm:$0xff]   ;;  %v9221_v33 = vld [vmem:[%s9943_s6 + $0x468] sm:$0xff]   ;;  %v9222_v34 = vld [vmem:[%s9943_s6 + $0xe0] sm:$0xff]  }
  0xa7   : > { %v9223_v35 = vld [vmem:[%s9943_s6 + $0x470] sm:$0xff]   ;;  %v9224_v36 = vld [vmem:[%s9943_s6 + $0xe8] sm:$0xff]   ;;  %v9225_v37 = vld [vmem:[%s9943_s6 + $0x478] sm:$0xff]  }
  0xa8   : > { %v9226_v38 = vld [vmem:[%s9943_s6 + $0xf0] sm:$0xff]   ;;  %v9227_v39 = vld [vmem:[%s9943_s6 + $0x480] sm:$0xff]   ;;  %v9228_v40 = vld [vmem:[%s9943_s6 + $0xf8] sm:$0xff]  }
  0xa9   : > { %v9229_v41 = vld [vmem:[%s9943_s6 + $0x488] sm:$0xff]   ;;  %v9230_v42 = vld [vmem:[%s9943_s6 + $0x100] sm:$0xff]   ;;  %v9231_v43 = vld [vmem:[%s9943_s6 + $0x490] sm:$0xff]  }
  0xaa   : > { %8686 = vmatmul.mubr.msk.bf16.gmra.mrb[8].mxu0 %vm3647_vm2, %v9176_v52  ;;  %8914 = vmatmul.mubr.msk.bf16.gmra.mrb[8].mxu1 %vm3647_vm2, %v9177_v53  ;;  %v9232_v44 = vld [vmem:[%s9943_s6 + $0x108] sm:$0xff]   ;;  %v9233_v45 = vld [vmem:[%s9943_s6 + $0x498] sm:$0xff]   ;;  %v9234_v46 = vld [vmem:[%s9943_s6 + $0x110] sm:$0xff]  }
  0xab   : > { %8689 = vmatprep.mubr.msk.bf16.mxu0 %vm3647_vm2, %v9178_v54  ;;  %8917 = vmatprep.mubr.msk.bf16.mxu1 %vm3647_vm2, %v9179_v55  ;;  %v9235_v47 = vld [vmem:[%s9943_s6 + $0x4a0] sm:$0xff]   ;;  %v9236_v48 = vld [vmem:[%s9943_s6 + $0x118] sm:$0xff]   ;;  %v9237_v49 = vld [vmem:[%s9943_s6 + $0x4a8] sm:$0xff]  }
  0xac   : > { %v9238_v50 = vld [vmem:[%s9943_s6 + $0x120] sm:$0xff]   ;;  %v9239_v51 = vld [vmem:[%s9943_s6 + $0x4b0] sm:$0xff]   ;;  %v9240_v52 = vld [vmem:[%s9943_s6 + $0x128] sm:$0xff]  }
  0xad   : > { %v9241_v53 = vld [vmem:[%s9943_s6 + $0x4b8] sm:$0xff]   ;;  %v9242_v54 = vld [vmem:[%s9943_s6 + $0x130] sm:$0xff]   ;;  %v9243_v55 = vld [vmem:[%s9943_s6 + $0x4c0] sm:$0xff]  }
  0xb2   : > { %8690 = vmatmul.mubr.msk.bf16.gmra.mrb[12].mxu0 %vm3647_vm2, %v9180_v56  ;;  %8918 = vmatmul.mubr.msk.bf16.gmra.mrb[12].mxu1 %vm3647_vm2, %v9181_v57  ;;  %v9244_v56 = vld [vmem:[%s9943_s6 + $0x138] sm:$0xff]   ;;  %v9245_v57 = vld [vmem:[%s9943_s6 + $0x4c8] sm:$0xff]  }
  0xb3   : > { %8693 = vmatprep.mubr.msk.bf16.mxu0 %vm3647_vm2, %v9182_v58  ;;  %8921 = vmatprep.mubr.msk.bf16.mxu1 %vm3647_vm2, %v9183_v59  ;;  %v9246_v58 = vld [vmem:[%s9943_s6 + $0x140] sm:$0xff]   ;;  %v9247_v59 = vld [vmem:[%s9943_s6 + $0x4d0] sm:$0xff]  }
  0xba   : > { %8694 = vmatmul.mubr.msk.bf16.gmra.mrb[16].mxu0 %vm3647_vm2, %v9184_v60  ;;  %8922 = vmatmul.mubr.msk.bf16.gmra.mrb[16].mxu1 %vm3647_vm2, %v9185_v61  ;;  %v9248_v60 = vld [vmem:[%s9943_s6 + $0x148] sm:$0xff]   ;;  %v9249_v61 = vld [vmem:[%s9943_s6 + $0x4d8] sm:$0xff]  }
  0xbb   : > { %8697 = vmatprep.mubr.msk.bf16.mxu0 %vm3647_vm2, %v9186_v62  ;;  %8925 = vmatprep.mubr.msk.bf16.mxu1 %vm3647_vm2, %v9187_v63  ;;  %v9250_v62 = vld [vmem:[%s9943_s6 + $0x150] sm:$0xff]   ;;  %v9251_v63 = vld [vmem:[%s9943_s6 + $0x4e0] sm:$0xff]  }
  0xc2   : > { %8698 = vmatmul.mubr.msk.bf16.gmra.mrb[20].mxu0 %vm3647_vm2, %v9188_v0  ;;  %8926 = vmatmul.mubr.msk.bf16.gmra.mrb[20].mxu1 %vm3647_vm2, %v9189_v1  ;;  %v9252_v0 = vld [vmem:[%s9943_s6 + $0x158] sm:$0xff]   ;;  %v9253_v1 = vld [vmem:[%s9943_s6 + $0x4e8] sm:$0xff]  }
  0xc3   : > { %8701 = vmatprep.mubr.msk.bf16.mxu0 %vm3647_vm2, %v9190_v2  ;;  %8929 = vmatprep.mubr.msk.bf16.mxu1 %vm3647_vm2, %v9191_v3  ;;  %v9254_v2 = vld [vmem:[%s9943_s6 + $0x160] sm:$0xff]   ;;  %v9255_v3 = vld [vmem:[%s9943_s6 + $0x4f0] sm:$0xff]  }
  0xca   : > { %8702 = vmatmul.mubr.msk.bf16.gmra.mrb[24].mxu0 %vm3647_vm2, %v9192_v4  ;;  %8930 = vmatmul.mubr.msk.bf16.gmra.mrb[24].mxu1 %vm3647_vm2, %v9193_v5  ;;  %v9256_v4 = vld [vmem:[%s9943_s6 + $0x168] sm:$0xff]   ;;  %v9257_v5 = vld [vmem:[%s9943_s6 + $0x4f8] sm:$0xff]  }
  0xcb   : > { %8705 = vmatprep.mubr.msk.bf16.mxu0 %vm3647_vm2, %v9194_v6  ;;  %8933 = vmatprep.mubr.msk.bf16.mxu1 %vm3647_vm2, %v9195_v7  ;;  %v9258_v6 = vld [vmem:[%s9943_s6 + $0x170] sm:$0xff]   ;;  %v9259_v7 = vld [vmem:[%s9943_s6 + $0x500] sm:$0xff]  }
  0xd2   : > { %8706 = vmatmul.mubr.msk.bf16.gmra.mrb[28].mxu0 %vm3647_vm2, %v9196_v8  ;;  %8934 = vmatmul.mubr.msk.bf16.gmra.mrb[28].mxu1 %vm3647_vm2, %v9197_v9  ;;  %v9260_v8 = vld [vmem:[%s9943_s6 + $0x178] sm:$0xff]   ;;  %v9261_v9 = vld [vmem:[%s9943_s6 + $0x508] sm:$0xff]  }
  0xd3   : > { %8709 = vmatprep.mubr.msk.bf16.mxu0 %vm3647_vm2, %v9198_v10  ;;  %8937 = vmatprep.mubr.msk.bf16.mxu1 %vm3647_vm2, %v9199_v11  ;;  %v9262_v10 = vld [vmem:[%s9943_s6 + $0x180] sm:$0xff]   ;;  %v9263_v11 = vld [vmem:[%s9943_s6 + $0x510] sm:$0xff]  }
  0xda   : > { %8710 = vmatmul.mubr.msk.bf16.gmra.mrb[32].mxu0 %vm3647_vm2, %v9200_v12  ;;  %8938 = vmatmul.mubr.msk.bf16.gmra.mrb[32].mxu1 %vm3647_vm2, %v9201_v13  ;;  %v9264_v12 = vld [vmem:[%s9943_s6 + $0x188] sm:$0xff]   ;;  %v9265_v13 = vld [vmem:[%s9943_s6 + $0x518] sm:$0xff]  }
  0xdb   : > { %8713 = vmatprep.mubr.msk.bf16.mxu0 %vm3647_vm2, %v9202_v14  ;;  %8941 = vmatprep.mubr.msk.bf16.mxu1 %vm3647_vm2, %v9203_v15  ;;  %v9266_v14 = vld [vmem:[%s9943_s6 + $0x190] sm:$0xff]   ;;  %v9267_v15 = vld [vmem:[%s9943_s6 + $0x520] sm:$0xff]  }
  0xe2   : > { %8714 = vmatmul.mubr.msk.bf16.gmra.mrb[36].mxu0 %vm3647_vm2, %v9204_v16  ;;  %8942 = vmatmul.mubr.msk.bf16.gmra.mrb[36].mxu1 %vm3647_vm2, %v9205_v17  ;;  %v9268_v16 = vld [vmem:[%s9943_s6 + $0x198] sm:$0xff]   ;;  %v9269_v17 = vld [vmem:[%s9943_s6 + $0x528] sm:$0xff]  }
  0xe3   : > { %8717 = vmatprep.mubr.msk.bf16.mxu0 %vm3647_vm2, %v9206_v18  ;;  %8945 = vmatprep.mubr.msk.bf16.mxu1 %vm3647_vm2, %v9207_v19  ;;  %v9270_v18 = vld [vmem:[%s9943_s6 + $0x1a0] sm:$0xff]   ;;  %v9271_v19 = vld [vmem:[%s9943_s6 + $0x530] sm:$0xff]  }
  0xea   : > { %8718 = vmatmul.mubr.msk.bf16.gmra.mrb[40].mxu0 %vm3647_vm2, %v9208_v20  ;;  %8946 = vmatmul.mubr.msk.bf16.gmra.mrb[40].mxu1 %vm3647_vm2, %v9209_v21  ;;  %v9272_v20 = vld [vmem:[%s9943_s6 + $0x1a8] sm:$0xff]   ;;  %v9273_v21 = vld [vmem:[%s9943_s6 + $0x538] sm:$0xff]  }
  0xeb   : > { %8721 = vmatprep.mubr.msk.bf16.mxu0 %vm3647_vm2, %v9210_v22  ;;  %8949 = vmatprep.mubr.msk.bf16.mxu1 %vm3647_vm2, %v9211_v23  ;;  %v9274_v22 = vld [vmem:[%s9943_s6 + $0x1b0] sm:$0xff]   ;;  %v9275_v23 = vld [vmem:[%s9943_s6 + $0x540] sm:$0xff]  }
  0xf2   : > { %8722 = vmatmul.mubr.msk.bf16.gmra.mrb[44].mxu0 %vm3647_vm2, %v9212_v24  ;;  %8950 = vmatmul.mubr.msk.bf16.gmra.mrb[44].mxu1 %vm3647_vm2, %v9213_v25 }
  0xf3   : > { %8725 = vmatprep.mubr.msk.bf16.mxu0 %vm3647_vm2, %v9214_v26  ;;  %8953 = vmatprep.mubr.msk.bf16.mxu1 %vm3647_vm2, %v9215_v27 }
  0xfa   : > { %8726 = vmatmul.mubr.msk.bf16.gmra.mrb[48].mxu0 %vm3647_vm2, %v9216_v28  ;;  %8954 = vmatmul.mubr.msk.bf16.gmra.mrb[48].mxu1 %vm3647_vm2, %v9217_v29  ;;  %v9276_v28 = vld [vmem:[%s9943_s6 + $0x1b8] sm:$0xff]   ;;  %v9277_v29 = vld [vmem:[%s9943_s6 + $0x548] sm:$0xff]  }
  0xfb   : > { %8729 = vmatprep.mubr.msk.bf16.mxu0 %vm3647_vm2, %v9218_v30  ;;  %8957 = vmatprep.mubr.msk.bf16.mxu1 %vm3647_vm2, %v9219_v31 }
 0x102   : > { %8730 = vmatmul.mubr.msk.bf16.gmra.mrb[52].mxu0 %vm3647_vm2, %v9220_v32  ;;  %8958 = vmatmul.mubr.msk.bf16.gmra.mrb[52].mxu1 %vm3647_vm2, %v9221_v33  ;;  %v9278_v32 = vld [vmem:[%s9943_s6 + $0x1c0] sm:$0xff]   ;;  %v9279_v33 = vld [vmem:[%s9943_s6 + $0x550] sm:$0xff]  }
 0x103   : > { %8733 = vmatprep.mubr.msk.bf16.mxu0 %vm3647_vm2, %v9222_v34  ;;  %8961 = vmatprep.mubr.msk.bf16.mxu1 %vm3647_vm2, %v9223_v35 }
 0x10a   : > { %8734 = vmatmul.mubr.msk.bf16.gmra.mrb[56].mxu0 %vm3647_vm2, %v9224_v36  ;;  %8962 = vmatmul.mubr.msk.bf16.gmra.mrb[56].mxu1 %vm3647_vm2, %v9225_v37 }
 0x10b   : > { %8737 = vmatprep.mubr.msk.bf16.mxu0 %vm3647_vm2, %v9226_v38  ;;  %8965 = vmatprep.mubr.msk.bf16.mxu1 %vm3647_vm2, %v9227_v39 }
 0x112   : > { %8738 = vmatmul.mubr.msk.bf16.gmra.mrb[60].mxu0 %vm3647_vm2, %v9228_v40  ;;  %8966 = vmatmul.mubr.msk.bf16.gmra.mrb[60].mxu1 %vm3647_vm2, %v9229_v41  ;;  %v9280_v40 = vld [vmem:[%s9943_s6 + $0x1c8] sm:$0xff]   ;;  %v9281_v41 = vld [vmem:[%s9943_s6 + $0x558] sm:$0xff]  }
 0x113   : > { %8741 = vmatprep.mubr.msk.bf16.mxu0 %vm3647_vm2, %v9230_v42  ;;  %8969 = vmatprep.mubr.msk.bf16.mxu1 %vm3647_vm2, %v9231_v43 }
 0x11a   : > { %8742 = vmatmul.mubr.msk.bf16.gmra.mrb[64].mxu0 %vm3647_vm2, %v9232_v44  ;;  %8970 = vmatmul.mubr.msk.bf16.gmra.mrb[64].mxu1 %vm3647_vm2, %v9233_v45  ;;  %v9282_v44 = vld [vmem:[%s9943_s6 + $0x1d0] sm:$0xff]   ;;  %v9283_v45 = vld [vmem:[%s9943_s6 + $0x560] sm:$0xff]  }
 0x11b   : > { %8745 = vmatprep.mubr.msk.bf16.mxu0 %vm3647_vm2, %v9234_v46  ;;  %8973 = vmatprep.mubr.msk.bf16.mxu1 %vm3647_vm2, %v9235_v47 }
 0x122   : > { %8746 = vmatmul.mubr.msk.bf16.gmra.mrb[68].mxu0 %vm3647_vm2, %v9236_v48  ;;  %8974 = vmatmul.mubr.msk.bf16.gmra.mrb[68].mxu1 %vm3647_vm2, %v9237_v49 }
 0x123   : > { %8749 = vmatprep.mubr.msk.bf16.mxu0 %vm3647_vm2, %v9238_v50  ;;  %8977 = vmatprep.mubr.msk.bf16.mxu1 %vm3647_vm2, %v9239_v51 }
 0x12a   : > { %8750 = vmatmul.mubr.msk.bf16.gmra.mrb[72].mxu0 %vm3647_vm2, %v9240_v52  ;;  %8978 = vmatmul.mubr.msk.bf16.gmra.mrb[72].mxu1 %vm3647_vm2, %v9241_v53  ;;  %v9284_v52 = vld [vmem:[%s9943_s6 + $0x1d8] sm:$0xff]   ;;  %v9285_v53 = vld [vmem:[%s9943_s6 + $0x568] sm:$0xff]  }
 0x12b   : > { %8753 = vmatprep.mubr.msk.bf16.mxu0 %vm3647_vm2, %v9242_v54  ;;  %8981 = vmatprep.mubr.msk.bf16.mxu1 %vm3647_vm2, %v9243_v55 }
 0x132   : > { %8754 = vmatmul.mubr.msk.bf16.gmra.mrb[76].mxu0 %vm3647_vm2, %v9244_v56  ;;  %8982 = vmatmul.mubr.msk.bf16.gmra.mrb[76].mxu1 %vm3647_vm2, %v9245_v57  ;;  %v9286_v56 = vld [vmem:[%s9943_s6 + $0x1e0] sm:$0xff]   ;;  %v9287_v57 = vld [vmem:[%s9943_s6 + $0x570] sm:$0xff]  }
 0x133   : > { %8757 = vmatprep.mubr.msk.bf16.mxu0 %vm3647_vm2, %v9246_v58  ;;  %8985 = vmatprep.mubr.msk.bf16.mxu1 %vm3647_vm2, %v9247_v59 }
 0x13a   : > { %8758 = vmatmul.mubr.msk.bf16.gmra.mrb[80].mxu0 %vm3647_vm2, %v9248_v60  ;;  %8986 = vmatmul.mubr.msk.bf16.gmra.mrb[80].mxu1 %vm3647_vm2, %v9249_v61 }
 0x13b   : > { %8761 = vmatprep.mubr.msk.bf16.mxu0 %vm3647_vm2, %v9250_v62  ;;  %8989 = vmatprep.mubr.msk.bf16.mxu1 %vm3647_vm2, %v9251_v63 }
 0x142   : > { %8762 = vmatmul.mubr.msk.bf16.gmra.mrb[84].mxu0 %vm3647_vm2, %v9252_v0  ;;  %8990 = vmatmul.mubr.msk.bf16.gmra.mrb[84].mxu1 %vm3647_vm2, %v9253_v1  ;;  %v9288_v0 = vld [vmem:[%s9943_s6 + $0x1e8] sm:$0xff]   ;;  %v9289_v1 = vld [vmem:[%s9943_s6 + $0x578] sm:$0xff]  }
 0x143   : > { %8765 = vmatprep.mubr.msk.bf16.mxu0 %vm3647_vm2, %v9254_v2  ;;  %8993 = vmatprep.mubr.msk.bf16.mxu1 %vm3647_vm2, %v9255_v3 }
 0x14a   : > { %8766 = vmatmul.mubr.msk.bf16.gmra.mrb[88].mxu0 %vm3647_vm2, %v9256_v4  ;;  %8994 = vmatmul.mubr.msk.bf16.gmra.mrb[88].mxu1 %vm3647_vm2, %v9257_v5  ;;  %v9290_v4 = vld [vmem:[%s9943_s6 + $0x1f0] sm:$0xff]   ;;  %v9291_v5 = vld [vmem:[%s9943_s6 + $0x580] sm:$0xff]  }
 0x14b   : > { %8769 = vmatprep.mubr.msk.bf16.mxu0 %vm3647_vm2, %v9258_v6  ;;  %8997 = vmatprep.mubr.msk.bf16.mxu1 %vm3647_vm2, %v9259_v7 }
 0x152   : > { %8770 = vmatmul.mubr.msk.bf16.gmra.mrb[92].mxu0 %vm3647_vm2, %v9260_v8  ;;  %8998 = vmatmul.mubr.msk.bf16.gmra.mrb[92].mxu1 %vm3647_vm2, %v9261_v9 }
 0x153   : > { %8773 = vmatprep.mubr.msk.bf16.mxu0 %vm3647_vm2, %v9262_v10  ;;  %9001 = vmatprep.mubr.msk.bf16.mxu1 %vm3647_vm2, %v9263_v11 }
 0x15a   : > { %8774 = vmatmul.mubr.msk.bf16.gmra.mrb[96].mxu0 %vm3647_vm2, %v9264_v12  ;;  %9002 = vmatmul.mubr.msk.bf16.gmra.mrb[96].mxu1 %vm3647_vm2, %v9265_v13  ;;  %v9292_v12 = vld [vmem:[%s9943_s6 + $0x1f8] sm:$0xff]   ;;  %v9293_v13 = vld [vmem:[%s9943_s6 + $0x588] sm:$0xff]  }
 0x15b   : > { %8777 = vmatprep.mubr.msk.bf16.mxu0 %vm3647_vm2, %v9266_v14  ;;  %9005 = vmatprep.mubr.msk.bf16.mxu1 %vm3647_vm2, %v9267_v15 }
 0x162   : > { %8778 = vmatmul.mubr.msk.bf16.gmra.mrb[100].mxu0 %vm3647_vm2, %v9268_v16  ;;  %9006 = vmatmul.mubr.msk.bf16.gmra.mrb[100].mxu1 %vm3647_vm2, %v9269_v17  ;;  %v9294_v16 = vld [vmem:[%s9943_s6 + $0x200] sm:$0xff]   ;;  %v9295_v17 = vld [vmem:[%s9943_s6 + $0x590] sm:$0xff]  }
 0x163   : > { %8781 = vmatprep.mubr.msk.bf16.mxu0 %vm3647_vm2, %v9270_v18  ;;  %9009 = vmatprep.mubr.msk.bf16.mxu1 %vm3647_vm2, %v9271_v19 }
 0x16a   : > { %8782 = vmatmul.mubr.msk.bf16.gmra.mrb[104].mxu0 %vm3647_vm2, %v9272_v20  ;;  %9010 = vmatmul.mubr.msk.bf16.gmra.mrb[104].mxu1 %vm3647_vm2, %v9273_v21 }
 0x16b   : > { %8785 = vmatprep.mubr.msk.bf16.mxu0 %vm3647_vm2, %v9274_v22  ;;  %9013 = vmatprep.mubr.msk.bf16.mxu1 %vm3647_vm2, %v9275_v23 }
 0x16d   : > { %v10165_v24 = vpop.f32.mrb[0].mxu0  ;;  %v10167_v25 = vpop.f32.mrb[0].mxu1 }
 0x16e   : > { %v10169_v26 = vpop.f32.mrb[1].mxu0  ;;  %v10171_v27 = vpop.f32.mrb[1].mxu1 }
 0x16f   : > { %v10175_v30 = vpop.f32.mrb[2].mxu0  ;;  %v10177_v31 = vpop.f32.mrb[2].mxu1 }
 0x170   : > { %v10181_v34 = vpop.f32.mrb[3].mxu0  ;;  %v10183_v35 = vpop.f32.mrb[3].mxu1 }
 0x172   : > { %8786 = vmatmul.mubr.msk.bf16.gmra.mrb[108].mxu0 %vm3647_vm2, %v9276_v28  ;;  %9014 = vmatmul.mubr.msk.bf16.gmra.mrb[108].mxu1 %vm3647_vm2, %v9277_v29  ;;  %v9296_v28 = vld [vmem:[%s9943_s6 + $0x208] sm:$0xff]   ;;  %v9297_v29 = vld [vmem:[%s9943_s6 + $0x598] sm:$0xff]  }
 0x173   : > { %8789 = vmatprep.mubr.msk.bf16.mxu0 %vm3647_vm2, %v9278_v32  ;;  %9017 = vmatprep.mubr.msk.bf16.mxu1 %vm3647_vm2, %v9279_v33 }
 0x175   : > { %v10189_v36 = vpop.f32.mrb[4].mxu0  ;;  %v10191_v37 = vpop.f32.mrb[4].mxu1 }
 0x176   : > { %v10193_v38 = vpop.f32.mrb[5].mxu0  ;;  %v10195_v39 = vpop.f32.mrb[5].mxu1 }
 0x177   : > { %v10199_v42 = vpop.f32.mrb[6].mxu0  ;;  %v10201_v43 = vpop.f32.mrb[6].mxu1 }
 0x178   : > { %v10205_v46 = vpop.f32.mrb[7].mxu0  ;;  %v10207_v47 = vpop.f32.mrb[7].mxu1 }
 0x17a   : > { %8790 = vmatmul.mubr.msk.bf16.gmra.mrb[112].mxu0 %vm3647_vm2, %v9280_v40  ;;  %9018 = vmatmul.mubr.msk.bf16.gmra.mrb[112].mxu1 %vm3647_vm2, %v9281_v41  ;;  %v9298_v40 = vld [vmem:[%s9943_s6 + $0x210] sm:$0xff]   ;;  %v9299_v41 = vld [vmem:[%s9943_s6 + $0x5a0] sm:$0xff]  }
 0x17b   : > { %8793 = vmatprep.mubr.msk.bf16.mxu0 %vm3647_vm2, %v9282_v44  ;;  %9021 = vmatprep.mubr.msk.bf16.mxu1 %vm3647_vm2, %v9283_v45 }
 0x17d   : > { %v10213_v48 = vpop.f32.mrb[8].mxu0  ;;  %v10215_v49 = vpop.f32.mrb[8].mxu1 }
 0x17e   : > { %v10217_v50 = vpop.f32.mrb[9].mxu0  ;;  %v10219_v51 = vpop.f32.mrb[9].mxu1 }
 0x17f   : > { %v10223_v54 = vpop.f32.mrb[10].mxu0  ;;  %v10225_v55 = vpop.f32.mrb[10].mxu1 }
 0x180   : > { %v10229_v58 = vpop.f32.mrb[11].mxu0  ;;  %v10231_v59 = vpop.f32.mrb[11].mxu1 }
 0x182   : > { %8794 = vmatmul.mubr.msk.bf16.gmra.mrb[116].mxu0 %vm3647_vm2, %v9284_v52  ;;  %9022 = vmatmul.mubr.msk.bf16.gmra.mrb[116].mxu1 %vm3647_vm2, %v9285_v53 }
 0x183   : > { %8797 = vmatprep.mubr.msk.bf16.mxu0 %vm3647_vm2, %v9286_v56  ;;  %9025 = vmatprep.mubr.msk.bf16.mxu1 %vm3647_vm2, %v9287_v57 }
 0x185   : > { %v10237_v60 = vpop.f32.mrb[12].mxu0  ;;  %v10239_v61 = vpop.f32.mrb[12].mxu1 }
 0x186   : > { %v10241_v62 = vpop.f32.mrb[13].mxu0  ;;  %v10243_v63 = vpop.f32.mrb[13].mxu1 }
 0x187   : > { %v10247_v2 = vpop.f32.mrb[14].mxu0  ;;  %v10249_v3 = vpop.f32.mrb[14].mxu1 }
 0x188   : > { %v10253_v6 = vpop.f32.mrb[15].mxu0  ;;  %v10255_v7 = vpop.f32.mrb[15].mxu1 }
 0x18a   : > { %8798 = vmatmul.mubr.msk.bf16.gmra.mrb[120].mxu0 %vm3647_vm2, %v9288_v0  ;;  %9026 = vmatmul.mubr.msk.bf16.gmra.mrb[120].mxu1 %vm3647_vm2, %v9289_v1  ;;  %v9300_v0 = vld [vmem:[%s9943_s6 + $0x218] sm:$0xff]   ;;  %v9301_v1 = vld [vmem:[%s9943_s6 + $0x5a8] sm:$0xff]  }
 0x18b   : > { %8801 = vmatprep.mubr.msk.bf16.mxu0 %vm3647_vm2, %v9290_v4  ;;  %9029 = vmatprep.mubr.msk.bf16.mxu1 %vm3647_vm2, %v9291_v5 }
 0x18d   : > { %v10261_v8 = vpop.f32.mrb[16].mxu0  ;;  %v10263_v9 = vpop.f32.mrb[16].mxu1 }
 0x18e   : > { %v10265_v10 = vpop.f32.mrb[17].mxu0  ;;  %v10267_v11 = vpop.f32.mrb[17].mxu1 }
 0x18f   : > { %v10271_v14 = vpop.f32.mrb[18].mxu0  ;;  %v10273_v15 = vpop.f32.mrb[18].mxu1 }
 0x190   : > { %v10277_v18 = vpop.f32.mrb[19].mxu0  ;;  %v10279_v19 = vpop.f32.mrb[19].mxu1 }
 0x192   : > { %8802 = vmatmul.mubr.msk.bf16.gmra.mrb[124].mxu0 %vm3647_vm2, %v9292_v12  ;;  %9030 = vmatmul.mubr.msk.bf16.gmra.mrb[124].mxu1 %vm3647_vm2, %v9293_v13  ;;  %v9302_v12 = vld [vmem:[%s9943_s6 + $0x220] sm:$0xff]   ;;  %v9303_v13 = vld [vmem:[%s9943_s6 + $0x5b0] sm:$0xff]  }
 0x193   : > { %8805 = vmatprep.mubr.msk.bf16.mxu0 %vm3647_vm2, %v9294_v16  ;;  %9033 = vmatprep.mubr.msk.bf16.mxu1 %vm3647_vm2, %v9295_v17 }
 0x195   : > { %v10285_v20 = vpop.f32.mrb[20].mxu0  ;;  %v10287_v21 = vpop.f32.mrb[20].mxu1 }
 0x196   : > { %v10289_v22 = vpop.f32.mrb[21].mxu0  ;;  %v10291_v23 = vpop.f32.mrb[21].mxu1 }
 0x197   : > { %v10295_v32 = vpop.f32.mrb[22].mxu0  ;;  %v10297_v33 = vpop.f32.mrb[22].mxu1 }
 0x198   : > { %11288 = vst [vmem:[#allocation3_spill] sm:$0xff] %v10295_v32  ;;  %11289 = vst [vmem:[#allocation4_spill] sm:$0xff] %v10297_v33  ;;  %v10301_v44 = vpop.f32.mrb[23].mxu0  ;;  %v10303_v45 = vpop.f32.mrb[23].mxu1  ;;  %v9391_v33 = vld [vmem:[%s9943_s6 + $0x710] sm:$0xff]  }
 0x19a   : > { %8806 = vmatmul.mubr.msk.bf16.gmra.mrb[128].mxu0 %vm3647_vm2, %v9296_v28  ;;  %9034 = vmatmul.mubr.msk.bf16.gmra.mrb[128].mxu1 %vm3647_vm2, %v9297_v29 }
 0x19b   : > { %8809 = vmatprep.mubr.msk.bf16.mxu0 %vm3647_vm2, %v9298_v40  ;;  %9037 = vmatprep.mubr.msk.bf16.mxu1 %vm3647_vm2, %v9299_v41 }
 0x19d   : > { %v10309_v52 = vpop.f32.mrb[24].mxu0  ;;  %v10311_v53 = vpop.f32.mrb[24].mxu1 }
 0x19e   : > { %11290 = vst [vmem:[#allocation5_spill] sm:$0xff] %v10309_v52  ;;  %11291 = vst [vmem:[#allocation6_spill] sm:$0xff] %v10311_v53  ;;  %v10313_v56 = vpop.f32.mrb[25].mxu0  ;;  %v10315_v57 = vpop.f32.mrb[25].mxu1 }
 0x19f   : > { %v10319_v4 = vpop.f32.mrb[26].mxu0  ;;  %v10321_v5 = vpop.f32.mrb[26].mxu1 }
 0x1a0   : > { %11292 = vst [vmem:[#allocation7_spill] sm:$0xff] %v10319_v4  ;;  %11293 = vst [vmem:[#allocation8_spill] sm:$0xff] %v10321_v5  ;;  %v10325_v16 = vpop.f32.mrb[27].mxu0  ;;  %v10327_v17 = vpop.f32.mrb[27].mxu1  ;;  %v9304_v5 = vld [vmem:[%s9943_s6 + $0x228] sm:$0xff]   ;;  %v9305_v4 = vld [vmem:[%s9943_s6 + $0x5b8] sm:$0xff]  }
 0x1a1   : > { %11294 = vst [vmem:[#allocation9_spill] sm:$0xff] %v10325_v16  ;;  %11295 = vst [vmem:[#allocation10_spill] sm:$0xff] %v10327_v17 }
 0x1a2   : > { %8810 = vmatmul.mubr.msk.bf16.gmra.mrb[132].mxu0 %vm3647_vm2, %v9300_v0  ;;  %9038 = vmatmul.mubr.msk.bf16.gmra.mrb[132].mxu1 %vm3647_vm2, %v9301_v1  ;;  %v9306_v1 = vld [vmem:[%s9943_s6 + $0x230] sm:$0xff]  }
 0x1a3   : > { %8813 = vmatprep.mubr.msk.bf16.mxu0 %vm3647_vm2, %v9302_v12  ;;  %9041 = vmatprep.mubr.msk.bf16.mxu1 %vm3647_vm2, %v9303_v13  ;;  %v9307_v12 = vld [vmem:[%s9943_s6 + $0x5c0] sm:$0xff]  }
 0x1a5   : > { %v10333_v28 = vpop.f32.mrb[28].mxu0  ;;  %v10335_v29 = vpop.f32.mrb[28].mxu1 }
 0x1a6   : > { %11296 = vst [vmem:[#allocation11_spill] sm:$0xff] %v10333_v28  ;;  %11297 = vst [vmem:[#allocation12_spill] sm:$0xff] %v10335_v29  ;;  %v10337_v40 = vpop.f32.mrb[29].mxu0  ;;  %v10339_v41 = vpop.f32.mrb[29].mxu1 }
 0x1a7   : > { %11298 = vst [vmem:[#allocation13_spill] sm:$0xff] %v10337_v40  ;;  %11299 = vst [vmem:[#allocation14_spill] sm:$0xff] %v10339_v41  ;;  %v10343_v53 = vpop.f32.mrb[30].mxu0  ;;  %v10345_v0 = vpop.f32.mrb[30].mxu1  ;;  %v9308_v41 = vld [vmem:[%s9943_s6 + $0x238] sm:$0xff]   ;;  %v9386_v40 = vld [vmem:[%s9943_s6 + $0x370] sm:$0xff]  }
 0x1a8   : > { %11300 = vst [vmem:[#allocation15_spill] sm:$0xff] %v10343_v53  ;;  %11301 = vst [vmem:[#allocation16_spill] sm:$0xff] %v10345_v0  ;;  %v10349_v13 = vpop.f32.mrb[31].mxu0  ;;  %v10351_v28 = vpop.f32.mrb[31].mxu1 }
 0x1a9   : > { %11302 = vst [vmem:[#allocation17_spill] sm:$0xff] %v10349_v13  ;;  %11303 = vst [vmem:[#allocation18_spill] sm:$0xff] %v10351_v28  ;;  %v9309_v13 = vld [vmem:[%s9943_s6 + $0x5c8] sm:$0xff]  }
 0x1aa   : > { %8814 = vmatmul.mubr.msk.bf16.gmra.mrb[136].mxu0 %vm3647_vm2, %v9304_v5  ;;  %9042 = vmatmul.mubr.msk.bf16.gmra.mrb[136].mxu1 %vm3647_vm2, %v9305_v4  ;;  %v9310_v4 = vld [vmem:[%s9943_s6 + $0x240] sm:$0xff]  }
 0x1ab   : > { %8817 = vmatprep.mubr.msk.bf16.mxu0 %vm3647_vm2, %v9306_v1  ;;  %9045 = vmatprep.mubr.msk.bf16.mxu1 %vm3647_vm2, %v9307_v12  ;;  %v9311_v1 = vld [vmem:[%s9943_s6 + $0x5d0] sm:$0xff]  }
 0x1ad   : > { %v10357_v29 = vpop.f32.mrb[32].mxu0  ;;  %v10359_v53 = vpop.f32.mrb[32].mxu1 }
 0x1ae   : > { %11304 = vst [vmem:[#allocation19_spill] sm:$0xff] %v10357_v29  ;;  %11305 = vst [vmem:[#allocation20_spill] sm:$0xff] %v10359_v53  ;;  %v10361_v0 = vpop.f32.mrb[33].mxu0  ;;  %v10363_v52 = vpop.f32.mrb[33].mxu1 }
 0x1af   : > { %11306 = vst [vmem:[#allocation21_spill] sm:$0xff] %v10361_v0  ;;  %11307 = vst [vmem:[#allocation22_spill] sm:$0xff] %v10363_v52  ;;  %v10367_v28 = vpop.f32.mrb[34].mxu0  ;;  %v10369_v5 = vpop.f32.mrb[34].mxu1  ;;  %v9312_v0 = vld [vmem:[%s9943_s6 + $0x248] sm:$0xff]  }
 0x1b0   : > { %11308 = vst [vmem:[#allocation23_spill] sm:$0xff] %v10367_v28  ;;  %11309 = vst [vmem:[#allocation24_spill] sm:$0xff] %v10369_v5  ;;  %v10373_v12 = vpop.f32.mrb[35].mxu0  ;;  %v10375_v29 = vpop.f32.mrb[35].mxu1 }
 0x1b1   : > { %11310 = vst [vmem:[#allocation25_spill] sm:$0xff] %v10373_v12  ;;  %11311 = vst [vmem:[#allocation26_spill] sm:$0xff] %v10375_v29  ;;  %v9313_v12 = vld [vmem:[%s9943_s6 + $0x5d8] sm:$0xff]  }
 0x1b2   : > { %8818 = vmatmul.mubr.msk.bf16.gmra.mrb[140].mxu0 %vm3647_vm2, %v9308_v41  ;;  %9046 = vmatmul.mubr.msk.bf16.gmra.mrb[140].mxu1 %vm3647_vm2, %v9309_v13  ;;  %v9314_v13 = vld [vmem:[%s9943_s6 + $0x250] sm:$0xff]  }
 0x1b3   : > { %8821 = vmatprep.mubr.msk.bf16.mxu0 %vm3647_vm2, %v9310_v4  ;;  %9049 = vmatprep.mubr.msk.bf16.mxu1 %vm3647_vm2, %v9311_v1  ;;  %v9315_v4 = vld [vmem:[%s9943_s6 + $0x5e0] sm:$0xff]  }
 0x1b5   : > { %v10381_v53 = vpop.f32.mrb[36].mxu0  ;;  %v10383_v28 = vpop.f32.mrb[36].mxu1 }
 0x1b6   : > { %11312 = vst [vmem:[#allocation27_spill] sm:$0xff] %v10381_v53  ;;  %11313 = vst [vmem:[#allocation28_spill] sm:$0xff] %v10383_v28  ;;  %v10385_v5 = vpop.f32.mrb[37].mxu0  ;;  %v10387_v52 = vpop.f32.mrb[37].mxu1 }
 0x1b7   : > { %11314 = vst [vmem:[#allocation29_spill] sm:$0xff] %v10385_v5  ;;  %11315 = vst [vmem:[#allocation30_spill] sm:$0xff] %v10387_v52  ;;  %v10391_v29 = vpop.f32.mrb[38].mxu0  ;;  %v10393_v41 = vpop.f32.mrb[38].mxu1  ;;  %v9316_v5 = vld [vmem:[%s9943_s6 + $0x258] sm:$0xff]  }
 0x1b8   : > { %11316 = vst [vmem:[#allocation31_spill] sm:$0xff] %v10391_v29  ;;  %11317 = vst [vmem:[#allocation32_spill] sm:$0xff] %v10393_v41  ;;  %v10397_v1 = vpop.f32.mrb[39].mxu0  ;;  %v10399_v53 = vpop.f32.mrb[39].mxu1 }
 0x1b9   : > { %11318 = vst [vmem:[#allocation33_spill] sm:$0xff] %v10397_v1  ;;  %11319 = vst [vmem:[#allocation34_spill] sm:$0xff] %v10399_v53  ;;  %v9317_v1 = vld [vmem:[%s9943_s6 + $0x5e8] sm:$0xff]  }
 0x1ba   : > { %8822 = vmatmul.mubr.msk.bf16.gmra.mrb[144].mxu0 %vm3647_vm2, %v9312_v0  ;;  %9050 = vmatmul.mubr.msk.bf16.gmra.mrb[144].mxu1 %vm3647_vm2, %v9313_v12  ;;  %v9318_v12 = vld [vmem:[%s9943_s6 + $0x260] sm:$0xff]  }
 0x1bb   : > { %8825 = vmatprep.mubr.msk.bf16.mxu0 %vm3647_vm2, %v9314_v13  ;;  %9053 = vmatprep.mubr.msk.bf16.mxu1 %vm3647_vm2, %v9315_v4  ;;  %v9319_v13 = vld [vmem:[%s9943_s6 + $0x5f0] sm:$0xff]  }
 0x1bd   : > { %v10405_v28 = vpop.f32.mrb[40].mxu0  ;;  %v10407_v29 = vpop.f32.mrb[40].mxu1 }
 0x1be   : > { %11320 = vst [vmem:[#allocation35_spill] sm:$0xff] %v10405_v28  ;;  %11321 = vst [vmem:[#allocation36_spill] sm:$0xff] %v10407_v29  ;;  %v10409_v41 = vpop.f32.mrb[41].mxu0  ;;  %v10411_v52 = vpop.f32.mrb[41].mxu1 }
 0x1bf   : > { %11322 = vst [vmem:[#allocation37_spill] sm:$0xff] %v10409_v41  ;;  %11323 = vst [vmem:[#allocation38_spill] sm:$0xff] %v10411_v52  ;;  %v10415_v53 = vpop.f32.mrb[42].mxu0  ;;  %v10417_v0 = vpop.f32.mrb[42].mxu1  ;;  %v9320_v41 = vld [vmem:[%s9943_s6 + $0x268] sm:$0xff]  }
 0x1c0   : > { %11324 = vst [vmem:[#allocation39_spill] sm:$0xff] %v10415_v53  ;;  %11325 = vst [vmem:[#allocation40_spill] sm:$0xff] %v10417_v0  ;;  %v10421_v4 = vpop.f32.mrb[43].mxu0  ;;  %v10423_v28 = vpop.f32.mrb[43].mxu1 }
 0x1c1   : > { %11326 = vst [vmem:[#allocation41_spill] sm:$0xff] %v10421_v4  ;;  %11327 = vst [vmem:[#allocation42_spill] sm:$0xff] %v10423_v28  ;;  %v9321_v4 = vld [vmem:[%s9943_s6 + $0x5f8] sm:$0xff]  }
 0x1c2   : > { %8826 = vmatmul.mubr.msk.bf16.gmra.mrb[148].mxu0 %vm3647_vm2, %v9316_v5  ;;  %9054 = vmatmul.mubr.msk.bf16.gmra.mrb[148].mxu1 %vm3647_vm2, %v9317_v1  ;;  %v9322_v1 = vld [vmem:[%s9943_s6 + $0x270] sm:$0xff]  }
 0x1c3   : > { %8829 = vmatprep.mubr.msk.bf16.mxu0 %vm3647_vm2, %v9318_v12  ;;  %9057 = vmatprep.mubr.msk.bf16.mxu1 %vm3647_vm2, %v9319_v13  ;;  %v9323_v12 = vld [vmem:[%s9943_s6 + $0x600] sm:$0xff]  }
 0x1c5   : > { %v10429_v29 = vpop.f32.mrb[44].mxu0  ;;  %v10431_v53 = vpop.f32.mrb[44].mxu1 }
 0x1c6   : > { %11328 = vst [vmem:[#allocation43_spill] sm:$0xff] %v10429_v29  ;;  %11329 = vst [vmem:[#allocation44_spill] sm:$0xff] %v10431_v53  ;;  %v10433_v0 = vpop.f32.mrb[45].mxu0  ;;  %v10435_v52 = vpop.f32.mrb[45].mxu1 }
 0x1c7   : > { %11330 = vst [vmem:[#allocation45_spill] sm:$0xff] %v10433_v0  ;;  %11331 = vst [vmem:[#allocation46_spill] sm:$0xff] %v10435_v52  ;;  %v10439_v28 = vpop.f32.mrb[46].mxu0  ;;  %v10441_v5 = vpop.f32.mrb[46].mxu1  ;;  %v9324_v0 = vld [vmem:[%s9943_s6 + $0x278] sm:$0xff]  }
 0x1c8   : > { %11332 = vst [vmem:[#allocation47_spill] sm:$0xff] %v10439_v28  ;;  %11333 = vst [vmem:[#allocation48_spill] sm:$0xff] %v10441_v5  ;;  %v10445_v13 = vpop.f32.mrb[47].mxu0  ;;  %v10447_v29 = vpop.f32.mrb[47].mxu1 }
 0x1c9   : > { %11334 = vst [vmem:[#allocation49_spill] sm:$0xff] %v10445_v13  ;;  %11335 = vst [vmem:[#allocation50_spill] sm:$0xff] %v10447_v29  ;;  %v9325_v13 = vld [vmem:[%s9943_s6 + $0x608] sm:$0xff]  }
 0x1ca   : > { %8830 = vmatmul.mubr.msk.bf16.gmra.mrb[152].mxu0 %vm3647_vm2, %v9320_v41  ;;  %9058 = vmatmul.mubr.msk.bf16.gmra.mrb[152].mxu1 %vm3647_vm2, %v9321_v4  ;;  %v9326_v4 = vld [vmem:[%s9943_s6 + $0x280] sm:$0xff]  }
 0x1cb   : > { %8833 = vmatprep.mubr.msk.bf16.mxu0 %vm3647_vm2, %v9322_v1  ;;  %9061 = vmatprep.mubr.msk.bf16.mxu1 %vm3647_vm2, %v9323_v12  ;;  %v9327_v1 = vld [vmem:[%s9943_s6 + $0x610] sm:$0xff]  }
 0x1cd   : > { %v10453_v53 = vpop.f32.mrb[48].mxu0  ;;  %v10455_v28 = vpop.f32.mrb[48].mxu1 }
 0x1ce   : > { %11336 = vst [vmem:[#allocation51_spill] sm:$0xff] %v10453_v53  ;;  %11337 = vst [vmem:[#allocation52_spill] sm:$0xff] %v10455_v28  ;;  %v10457_v5 = vpop.f32.mrb[49].mxu0  ;;  %v10459_v52 = vpop.f32.mrb[49].mxu1 }
 0x1cf   : > { %11338 = vst [vmem:[#allocation53_spill] sm:$0xff] %v10457_v5  ;;  %11339 = vst [vmem:[#allocation54_spill] sm:$0xff] %v10459_v52  ;;  %v10463_v29 = vpop.f32.mrb[50].mxu0  ;;  %v10465_v41 = vpop.f32.mrb[50].mxu1  ;;  %v9328_v5 = vld [vmem:[%s9943_s6 + $0x288] sm:$0xff]  }
 0x1d0   : > { %11340 = vst [vmem:[#allocation55_spill] sm:$0xff] %v10463_v29  ;;  %11341 = vst [vmem:[#allocation56_spill] sm:$0xff] %v10465_v41  ;;  %v10469_v12 = vpop.f32.mrb[51].mxu0  ;;  %v10471_v53 = vpop.f32.mrb[51].mxu1 }
 0x1d1   : > { %11342 = vst [vmem:[#allocation57_spill] sm:$0xff] %v10469_v12  ;;  %11343 = vst [vmem:[#allocation58_spill] sm:$0xff] %v10471_v53  ;;  %v9329_v12 = vld [vmem:[%s9943_s6 + $0x618] sm:$0xff]  }
 0x1d2   : > { %8834 = vmatmul.mubr.msk.bf16.gmra.mrb[156].mxu0 %vm3647_vm2, %v9324_v0  ;;  %9062 = vmatmul.mubr.msk.bf16.gmra.mrb[156].mxu1 %vm3647_vm2, %v9325_v13  ;;  %v9330_v13 = vld [vmem:[%s9943_s6 + $0x290] sm:$0xff]  }
 0x1d3   : > { %8837 = vmatprep.mubr.msk.bf16.mxu0 %vm3647_vm2, %v9326_v4  ;;  %9065 = vmatprep.mubr.msk.bf16.mxu1 %vm3647_vm2, %v9327_v1  ;;  %v9331_v4 = vld [vmem:[%s9943_s6 + $0x620] sm:$0xff]  }
 0x1d5   : > { %v10477_v28 = vpop.f32.mrb[52].mxu0  ;;  %v10479_v29 = vpop.f32.mrb[52].mxu1 }
 0x1d6   : > { %11344 = vst [vmem:[#allocation59_spill] sm:$0xff] %v10477_v28  ;;  %11345 = vst [vmem:[#allocation60_spill] sm:$0xff] %v10479_v29  ;;  %v10481_v41 = vpop.f32.mrb[53].mxu0  ;;  %v10483_v52 = vpop.f32.mrb[53].mxu1 }
 0x1d7   : > { %11346 = vst [vmem:[#allocation61_spill] sm:$0xff] %v10481_v41  ;;  %11347 = vst [vmem:[#allocation62_spill] sm:$0xff] %v10483_v52  ;;  %v10487_v53 = vpop.f32.mrb[54].mxu0  ;;  %v10489_v0 = vpop.f32.mrb[54].mxu1  ;;  %v9332_v41 = vld [vmem:[%s9943_s6 + $0x298] sm:$0xff]  }
 0x1d8   : > { %11348 = vst [vmem:[#allocation63_spill] sm:$0xff] %v10487_v53  ;;  %11349 = vst [vmem:[#allocation64_spill] sm:$0xff] %v10489_v0  ;;  %v10493_v1 = vpop.f32.mrb[55].mxu0  ;;  %v10495_v28 = vpop.f32.mrb[55].mxu1 }
 0x1d9   : > { %11350 = vst [vmem:[#allocation65_spill] sm:$0xff] %v10493_v1  ;;  %11351 = vst [vmem:[#allocation66_spill] sm:$0xff] %v10495_v28  ;;  %v9333_v1 = vld [vmem:[%s9943_s6 + $0x628] sm:$0xff]  }
 0x1da   : > { %8838 = vmatmul.mubr.msk.bf16.gmra.mrb[160].mxu0 %vm3647_vm2, %v9328_v5  ;;  %9066 = vmatmul.mubr.msk.bf16.gmra.mrb[160].mxu1 %vm3647_vm2, %v9329_v12  ;;  %v9334_v12 = vld [vmem:[%s9943_s6 + $0x2a0] sm:$0xff]  }
 0x1db   : > { %8841 = vmatprep.mubr.msk.bf16.mxu0 %vm3647_vm2, %v9330_v13  ;;  %9069 = vmatprep.mubr.msk.bf16.mxu1 %vm3647_vm2, %v9331_v4  ;;  %v9335_v13 = vld [vmem:[%s9943_s6 + $0x630] sm:$0xff]  }
 0x1dd   : > { %v10501_v29 = vpop.f32.mrb[56].mxu0  ;;  %v10503_v53 = vpop.f32.mrb[56].mxu1 }
 0x1de   : > { %11352 = vst [vmem:[#allocation67_spill] sm:$0xff] %v10501_v29  ;;  %11353 = vst [vmem:[#allocation68_spill] sm:$0xff] %v10503_v53  ;;  %v10505_v0 = vpop.f32.mrb[57].mxu0  ;;  %v10507_v52 = vpop.f32.mrb[57].mxu1 }
 0x1df   : > { %11354 = vst [vmem:[#allocation69_spill] sm:$0xff] %v10505_v0  ;;  %11355 = vst [vmem:[#allocation70_spill] sm:$0xff] %v10507_v52  ;;  %v10511_v28 = vpop.f32.mrb[58].mxu0  ;;  %v10513_v5 = vpop.f32.mrb[58].mxu1  ;;  %v9336_v0 = vld [vmem:[%s9943_s6 + $0x2a8] sm:$0xff]  }
 0x1e0   : > { %11356 = vst [vmem:[#allocation71_spill] sm:$0xff] %v10511_v28  ;;  %11357 = vst [vmem:[#allocation72_spill] sm:$0xff] %v10513_v5  ;;  %v10517_v4 = vpop.f32.mrb[59].mxu0  ;;  %v10519_v29 = vpop.f32.mrb[59].mxu1 }
 0x1e1   : > { %11358 = vst [vmem:[#allocation73_spill] sm:$0xff] %v10517_v4  ;;  %11359 = vst [vmem:[#allocation74_spill] sm:$0xff] %v10519_v29  ;;  %v9337_v4 = vld [vmem:[%s9943_s6 + $0x638] sm:$0xff]  }
 0x1e2   : > { %8842 = vmatmul.mubr.msk.bf16.gmra.mrb[164].mxu0 %vm3647_vm2, %v9332_v41  ;;  %9070 = vmatmul.mubr.msk.bf16.gmra.mrb[164].mxu1 %vm3647_vm2, %v9333_v1  ;;  %v9338_v1 = vld [vmem:[%s9943_s6 + $0x2b0] sm:$0xff]  }
 0x1e3   : > { %8845 = vmatprep.mubr.msk.bf16.mxu0 %vm3647_vm2, %v9334_v12  ;;  %9073 = vmatprep.mubr.msk.bf16.mxu1 %vm3647_vm2, %v9335_v13  ;;  %v9339_v12 = vld [vmem:[%s9943_s6 + $0x640] sm:$0xff]  }
 0x1e5   : > { %v10525_v53 = vpop.f32.mrb[60].mxu0  ;;  %v10527_v28 = vpop.f32.mrb[60].mxu1 }
 0x1e6   : > { %11360 = vst [vmem:[#allocation75_spill] sm:$0xff] %v10525_v53  ;;  %11361 = vst [vmem:[#allocation76_spill] sm:$0xff] %v10527_v28  ;;  %v10529_v5 = vpop.f32.mrb[61].mxu0  ;;  %v10531_v52 = vpop.f32.mrb[61].mxu1 }
 0x1e7   : > { %11362 = vst [vmem:[#allocation77_spill] sm:$0xff] %v10529_v5  ;;  %11363 = vst [vmem:[#allocation78_spill] sm:$0xff] %v10531_v52  ;;  %v10535_v29 = vpop.f32.mrb[62].mxu0  ;;  %v10537_v41 = vpop.f32.mrb[62].mxu1  ;;  %v9340_v5 = vld [vmem:[%s9943_s6 + $0x2b8] sm:$0xff]  }
 0x1e8   : > { %11364 = vst [vmem:[#allocation79_spill] sm:$0xff] %v10535_v29  ;;  %11365 = vst [vmem:[#allocation80_spill] sm:$0xff] %v10537_v41  ;;  %v10541_v13 = vpop.f32.mrb[63].mxu0  ;;  %v10543_v53 = vpop.f32.mrb[63].mxu1 }
 0x1e9   : > { %11366 = vst [vmem:[#allocation81_spill] sm:$0xff] %v10541_v13  ;;  %11367 = vst [vmem:[#allocation82_spill] sm:$0xff] %v10543_v53  ;;  %v9341_v13 = vld [vmem:[%s9943_s6 + $0x648] sm:$0xff]  }
 0x1ea   : > { %8846 = vmatmul.mubr.msk.bf16.gmra.mrb[168].mxu0 %vm3647_vm2, %v9336_v0  ;;  %9074 = vmatmul.mubr.msk.bf16.gmra.mrb[168].mxu1 %vm3647_vm2, %v9337_v4  ;;  %v9342_v4 = vld [vmem:[%s9943_s6 + $0x2c0] sm:$0xff]  }
 0x1eb   : > { %8849 = vmatprep.mubr.msk.bf16.mxu0 %vm3647_vm2, %v9338_v1  ;;  %9077 = vmatprep.mubr.msk.bf16.mxu1 %vm3647_vm2, %v9339_v12  ;;  %v9343_v1 = vld [vmem:[%s9943_s6 + $0x650] sm:$0xff]  }
 0x1ed   : > { %v10549_v28 = vpop.f32.mrb[64].mxu0  ;;  %v10551_v29 = vpop.f32.mrb[64].mxu1 }
 0x1ee   : > { %11368 = vst [vmem:[#allocation83_spill] sm:$0xff] %v10549_v28  ;;  %11369 = vst [vmem:[#allocation84_spill] sm:$0xff] %v10551_v29  ;;  %v10553_v41 = vpop.f32.mrb[65].mxu0  ;;  %v10555_v52 = vpop.f32.mrb[65].mxu1 }
 0x1ef   : > { %11370 = vst [vmem:[#allocation85_spill] sm:$0xff] %v10553_v41  ;;  %11371 = vst [vmem:[#allocation86_spill] sm:$0xff] %v10555_v52  ;;  %v10559_v53 = vpop.f32.mrb[66].mxu0  ;;  %v10561_v0 = vpop.f32.mrb[66].mxu1  ;;  %v9344_v41 = vld [vmem:[%s9943_s6 + $0x2c8] sm:$0xff]  }
 0x1f0   : > { %11372 = vst [vmem:[#allocation87_spill] sm:$0xff] %v10559_v53  ;;  %11373 = vst [vmem:[#allocation88_spill] sm:$0xff] %v10561_v0  ;;  %v10565_v12 = vpop.f32.mrb[67].mxu0  ;;  %v10567_v28 = vpop.f32.mrb[67].mxu1 }
 0x1f1   : > { %11374 = vst [vmem:[#allocation89_spill] sm:$0xff] %v10565_v12  ;;  %11375 = vst [vmem:[#allocation90_spill] sm:$0xff] %v10567_v28  ;;  %v9345_v12 = vld [vmem:[%s9943_s6 + $0x658] sm:$0xff]  }
 0x1f2   : > { %8850 = vmatmul.mubr.msk.bf16.gmra.mrb[172].mxu0 %vm3647_vm2, %v9340_v5  ;;  %9078 = vmatmul.mubr.msk.bf16.gmra.mrb[172].mxu1 %vm3647_vm2, %v9341_v13  ;;  %v9346_v13 = vld [vmem:[%s9943_s6 + $0x2d0] sm:$0xff]  }
 0x1f3   : > { %8853 = vmatprep.mubr.msk.bf16.mxu0 %vm3647_vm2, %v9342_v4  ;;  %9081 = vmatprep.mubr.msk.bf16.mxu1 %vm3647_vm2, %v9343_v1  ;;  %v9347_v4 = vld [vmem:[%s9943_s6 + $0x660] sm:$0xff]  }
 0x1f5   : > { %v10573_v29 = vpop.f32.mrb[68].mxu0  ;;  %v10575_v53 = vpop.f32.mrb[68].mxu1 }
 0x1f6   : > { %11376 = vst [vmem:[#allocation91_spill] sm:$0xff] %v10573_v29  ;;  %11377 = vst [vmem:[#allocation92_spill] sm:$0xff] %v10575_v53  ;;  %v10577_v0 = vpop.f32.mrb[69].mxu0  ;;  %v10579_v52 = vpop.f32.mrb[69].mxu1 }
 0x1f7   : > { %11378 = vst [vmem:[#allocation93_spill] sm:$0xff] %v10577_v0  ;;  %11379 = vst [vmem:[#allocation94_spill] sm:$0xff] %v10579_v52  ;;  %v10583_v28 = vpop.f32.mrb[70].mxu0  ;;  %v10585_v5 = vpop.f32.mrb[70].mxu1  ;;  %v9348_v0 = vld [vmem:[%s9943_s6 + $0x2d8] sm:$0xff]  }
 0x1f8   : > { %11380 = vst [vmem:[#allocation95_spill] sm:$0xff] %v10583_v28  ;;  %11381 = vst [vmem:[#allocation96_spill] sm:$0xff] %v10585_v5  ;;  %v10589_v1 = vpop.f32.mrb[71].mxu0  ;;  %v10591_v29 = vpop.f32.mrb[71].mxu1 }
 0x1f9   : > { %11382 = vst [vmem:[#allocation97_spill] sm:$0xff] %v10589_v1  ;;  %11383 = vst [vmem:[#allocation98_spill] sm:$0xff] %v10591_v29  ;;  %v9349_v1 = vld [vmem:[%s9943_s6 + $0x668] sm:$0xff]  }
 0x1fa   : > { %8854 = vmatmul.mubr.msk.bf16.gmra.mrb[176].mxu0 %vm3647_vm2, %v9344_v41  ;;  %9082 = vmatmul.mubr.msk.bf16.gmra.mrb[176].mxu1 %vm3647_vm2, %v9345_v12  ;;  %v9350_v12 = vld [vmem:[%s9943_s6 + $0x2e0] sm:$0xff]  }
 0x1fb   : > { %8857 = vmatprep.mubr.msk.bf16.mxu0 %vm3647_vm2, %v9346_v13  ;;  %9085 = vmatprep.mubr.msk.bf16.mxu1 %vm3647_vm2, %v9347_v4  ;;  %v9351_v13 = vld [vmem:[%s9943_s6 + $0x670] sm:$0xff]  }
 0x1fd   : > { %v10597_v53 = vpop.f32.mrb[72].mxu0  ;;  %v10599_v28 = vpop.f32.mrb[72].mxu1 }
 0x1fe   : > { %11384 = vst [vmem:[#allocation99_spill] sm:$0xff] %v10597_v53  ;;  %11385 = vst [vmem:[#allocation100_spill] sm:$0xff] %v10599_v28  ;;  %v10601_v5 = vpop.f32.mrb[73].mxu0  ;;  %v10603_v52 = vpop.f32.mrb[73].mxu1 }
 0x1ff   : > { %11386 = vst [vmem:[#allocation101_spill] sm:$0xff] %v10601_v5  ;;  %11387 = vst [vmem:[#allocation102_spill] sm:$0xff] %v10603_v52  ;;  %v10607_v29 = vpop.f32.mrb[74].mxu0  ;;  %v10609_v41 = vpop.f32.mrb[74].mxu1  ;;  %v9352_v5 = vld [vmem:[%s9943_s6 + $0x2e8] sm:$0xff]  }
 0x200   : > { %11388 = vst [vmem:[#allocation103_spill] sm:$0xff] %v10607_v29  ;;  %11389 = vst [vmem:[#allocation104_spill] sm:$0xff] %v10609_v41  ;;  %v10613_v4 = vpop.f32.mrb[75].mxu0  ;;  %v10615_v53 = vpop.f32.mrb[75].mxu1 }
 0x201   : > { %11390 = vst [vmem:[#allocation105_spill] sm:$0xff] %v10613_v4  ;;  %11391 = vst [vmem:[#allocation106_spill] sm:$0xff] %v10615_v53  ;;  %v9353_v4 = vld [vmem:[%s9943_s6 + $0x678] sm:$0xff]  }
 0x202   : > { %8858 = vmatmul.mubr.msk.bf16.gmra.mrb[180].mxu0 %vm3647_vm2, %v9348_v0  ;;  %9086 = vmatmul.mubr.msk.bf16.gmra.mrb[180].mxu1 %vm3647_vm2, %v9349_v1  ;;  %v9354_v1 = vld [vmem:[%s9943_s6 + $0x2f0] sm:$0xff]  }
 0x203   : > { %8861 = vmatprep.mubr.msk.bf16.mxu0 %vm3647_vm2, %v9350_v12  ;;  %9089 = vmatprep.mubr.msk.bf16.mxu1 %vm3647_vm2, %v9351_v13  ;;  %v9355_v12 = vld [vmem:[%s9943_s6 + $0x680] sm:$0xff]  }
 0x205   : > { %v10621_v28 = vpop.f32.mrb[76].mxu0  ;;  %v10623_v29 = vpop.f32.mrb[76].mxu1 }
 0x206   : > { %11392 = vst [vmem:[#allocation107_spill] sm:$0xff] %v10621_v28  ;;  %11393 = vst [vmem:[#allocation108_spill] sm:$0xff] %v10623_v29  ;;  %v10625_v41 = vpop.f32.mrb[77].mxu0  ;;  %v10627_v52 = vpop.f32.mrb[77].mxu1 }
 0x207   : > { %11394 = vst [vmem:[#allocation109_spill] sm:$0xff] %v10625_v41  ;;  %11395 = vst [vmem:[#allocation110_spill] sm:$0xff] %v10627_v52  ;;  %v10631_v53 = vpop.f32.mrb[78].mxu0  ;;  %v10633_v0 = vpop.f32.mrb[78].mxu1  ;;  %v9356_v41 = vld [vmem:[%s9943_s6 + $0x2f8] sm:$0xff]  }
 0x208   : > { %11396 = vst [vmem:[#allocation111_spill] sm:$0xff] %v10631_v53  ;;  %11397 = vst [vmem:[#allocation112_spill] sm:$0xff] %v10633_v0  ;;  %v10637_v13 = vpop.f32.mrb[79].mxu0  ;;  %v10639_v28 = vpop.f32.mrb[79].mxu1 }
 0x209   : > { %11398 = vst [vmem:[#allocation113_spill] sm:$0xff] %v10637_v13  ;;  %11399 = vst [vmem:[#allocation114_spill] sm:$0xff] %v10639_v28  ;;  %v9357_v13 = vld [vmem:[%s9943_s6 + $0x688] sm:$0xff]  }
 0x20a   : > { %8862 = vmatmul.mubr.msk.bf16.gmra.mrb[184].mxu0 %vm3647_vm2, %v9352_v5  ;;  %9090 = vmatmul.mubr.msk.bf16.gmra.mrb[184].mxu1 %vm3647_vm2, %v9353_v4  ;;  %v9358_v4 = vld [vmem:[%s9943_s6 + $0x300] sm:$0xff]  }
 0x20b   : > { %8865 = vmatprep.mubr.msk.bf16.mxu0 %vm3647_vm2, %v9354_v1  ;;  %9093 = vmatprep.mubr.msk.bf16.mxu1 %vm3647_vm2, %v9355_v12  ;;  %v9359_v1 = vld [vmem:[%s9943_s6 + $0x690] sm:$0xff]  }
 0x20d   : > { %v10645_v29 = vpop.f32.mrb[80].mxu0  ;;  %v10647_v53 = vpop.f32.mrb[80].mxu1 }
 0x20e   : > { %11400 = vst [vmem:[#allocation115_spill] sm:$0xff] %v10645_v29  ;;  %11401 = vst [vmem:[#allocation116_spill] sm:$0xff] %v10647_v53  ;;  %v10649_v0 = vpop.f32.mrb[81].mxu0  ;;  %v10651_v52 = vpop.f32.mrb[81].mxu1 }
 0x20f   : > { %11402 = vst [vmem:[#allocation117_spill] sm:$0xff] %v10649_v0  ;;  %11403 = vst [vmem:[#allocation118_spill] sm:$0xff] %v10651_v52  ;;  %v10655_v28 = vpop.f32.mrb[82].mxu0  ;;  %v10657_v5 = vpop.f32.mrb[82].mxu1  ;;  %v9360_v0 = vld [vmem:[%s9943_s6 + $0x308] sm:$0xff]  }
 0x210   : > { %11404 = vst [vmem:[#allocation119_spill] sm:$0xff] %v10655_v28  ;;  %11405 = vst [vmem:[#allocation120_spill] sm:$0xff] %v10657_v5  ;;  %v10661_v12 = vpop.f32.mrb[83].mxu0  ;;  %v10663_v29 = vpop.f32.mrb[83].mxu1 }
 0x211   : > { %11406 = vst [vmem:[#allocation121_spill] sm:$0xff] %v10661_v12  ;;  %11407 = vst [vmem:[#allocation122_spill] sm:$0xff] %v10663_v29  ;;  %v9361_v12 = vld [vmem:[%s9943_s6 + $0x698] sm:$0xff]  }
 0x212   : > { %8866 = vmatmul.mubr.msk.bf16.gmra.mrb[188].mxu0 %vm3647_vm2, %v9356_v41  ;;  %9094 = vmatmul.mubr.msk.bf16.gmra.mrb[188].mxu1 %vm3647_vm2, %v9357_v13  ;;  %v9362_v13 = vld [vmem:[%s9943_s6 + $0x310] sm:$0xff]  }
 0x213   : > { %8869 = vmatprep.mubr.msk.bf16.mxu0 %vm3647_vm2, %v9358_v4  ;;  %9097 = vmatprep.mubr.msk.bf16.mxu1 %vm3647_vm2, %v9359_v1  ;;  %v9363_v4 = vld [vmem:[%s9943_s6 + $0x6a0] sm:$0xff]  }
 0x215   : > { %v10669_v53 = vpop.f32.mrb[84].mxu0  ;;  %v10671_v28 = vpop.f32.mrb[84].mxu1 }
 0x216   : > { %11408 = vst [vmem:[#allocation123_spill] sm:$0xff] %v10669_v53  ;;  %11409 = vst [vmem:[#allocation124_spill] sm:$0xff] %v10671_v28  ;;  %v10673_v5 = vpop.f32.mrb[85].mxu0  ;;  %v10675_v52 = vpop.f32.mrb[85].mxu1 }
 0x217   : > { %11410 = vst [vmem:[#allocation125_spill] sm:$0xff] %v10673_v5  ;;  %11411 = vst [vmem:[#allocation126_spill] sm:$0xff] %v10675_v52  ;;  %v10679_v29 = vpop.f32.mrb[86].mxu0  ;;  %v10681_v41 = vpop.f32.mrb[86].mxu1  ;;  %v9364_v5 = vld [vmem:[%s9943_s6 + $0x318] sm:$0xff]  }
 0x218   : > { %11412 = vst [vmem:[#allocation127_spill] sm:$0xff] %v10679_v29  ;;  %11413 = vst [vmem:[#allocation128_spill] sm:$0xff] %v10681_v41  ;;  %v10685_v1 = vpop.f32.mrb[87].mxu0  ;;  %v10687_v53 = vpop.f32.mrb[87].mxu1 }
 0x219   : > { %11414 = vst [vmem:[#allocation129_spill] sm:$0xff] %v10685_v1  ;;  %11415 = vst [vmem:[#allocation130_spill] sm:$0xff] %v10687_v53  ;;  %v9365_v1 = vld [vmem:[%s9943_s6 + $0x6a8] sm:$0xff]  }
 0x21a   : > { %8870 = vmatmul.mubr.msk.bf16.gmra.mrb[192].mxu0 %vm3647_vm2, %v9360_v0  ;;  %9098 = vmatmul.mubr.msk.bf16.gmra.mrb[192].mxu1 %vm3647_vm2, %v9361_v12  ;;  %v9366_v12 = vld [vmem:[%s9943_s6 + $0x320] sm:$0xff]  }
 0x21b   : > { %8873 = vmatprep.mubr.msk.bf16.mxu0 %vm3647_vm2, %v9362_v13  ;;  %9101 = vmatprep.mubr.msk.bf16.mxu1 %vm3647_vm2, %v9363_v4  ;;  %v9367_v13 = vld [vmem:[%s9943_s6 + $0x6b0] sm:$0xff]  }
 0x21d   : > { %v10693_v28 = vpop.f32.mrb[88].mxu0  ;;  %v10695_v29 = vpop.f32.mrb[88].mxu1 }
 0x21e   : > { %11416 = vst [vmem:[#allocation131_spill] sm:$0xff] %v10693_v28  ;;  %11417 = vst [vmem:[#allocation132_spill] sm:$0xff] %v10695_v29  ;;  %v10697_v41 = vpop.f32.mrb[89].mxu0  ;;  %v10699_v52 = vpop.f32.mrb[89].mxu1 }
 0x21f   : > { %11418 = vst [vmem:[#allocation133_spill] sm:$0xff] %v10697_v41  ;;  %11419 = vst [vmem:[#allocation134_spill] sm:$0xff] %v10699_v52  ;;  %v10703_v53 = vpop.f32.mrb[90].mxu0  ;;  %v10705_v0 = vpop.f32.mrb[90].mxu1  ;;  %v9368_v41 = vld [vmem:[%s9943_s6 + $0x328] sm:$0xff]  }
 0x220   : > { %11420 = vst [vmem:[#allocation135_spill] sm:$0xff] %v10703_v53  ;;  %11421 = vst [vmem:[#allocation136_spill] sm:$0xff] %v10705_v0  ;;  %v10709_v4 = vpop.f32.mrb[91].mxu0  ;;  %v10711_v28 = vpop.f32.mrb[91].mxu1 }
 0x221   : > { %11422 = vst [vmem:[#allocation137_spill] sm:$0xff] %v10709_v4  ;;  %11423 = vst [vmem:[#allocation138_spill] sm:$0xff] %v10711_v28  ;;  %v9369_v4 = vld [vmem:[%s9943_s6 + $0x6b8] sm:$0xff]  }
 0x222   : > { %8874 = vmatmul.mubr.msk.bf16.gmra.mrb[196].mxu0 %vm3647_vm2, %v9364_v5  ;;  %9102 = vmatmul.mubr.msk.bf16.gmra.mrb[196].mxu1 %vm3647_vm2, %v9365_v1  ;;  %v9370_v1 = vld [vmem:[%s9943_s6 + $0x330] sm:$0xff]  }
 0x223   : > { %8877 = vmatprep.mubr.msk.bf16.mxu0 %vm3647_vm2, %v9366_v12  ;;  %9105 = vmatprep.mubr.msk.bf16.mxu1 %vm3647_vm2, %v9367_v13  ;;  %v9371_v12 = vld [vmem:[%s9943_s6 + $0x6c0] sm:$0xff]  }
 0x225   : > { %v10717_v29 = vpop.f32.mrb[92].mxu0  ;;  %v10719_v53 = vpop.f32.mrb[92].mxu1 }
 0x226   : > { %11424 = vst [vmem:[#allocation139_spill] sm:$0xff] %v10717_v29  ;;  %11425 = vst [vmem:[#allocation140_spill] sm:$0xff] %v10719_v53  ;;  %v10721_v0 = vpop.f32.mrb[93].mxu0  ;;  %v10723_v52 = vpop.f32.mrb[93].mxu1 }
 0x227   : > { %11426 = vst [vmem:[#allocation141_spill] sm:$0xff] %v10721_v0  ;;  %11427 = vst [vmem:[#allocation142_spill] sm:$0xff] %v10723_v52  ;;  %v10727_v28 = vpop.f32.mrb[94].mxu0  ;;  %v10729_v5 = vpop.f32.mrb[94].mxu1  ;;  %v9372_v0 = vld [vmem:[%s9943_s6 + $0x338] sm:$0xff]  }
 0x228   : > { %11428 = vst [vmem:[#allocation143_spill] sm:$0xff] %v10727_v28  ;;  %11429 = vst [vmem:[#allocation144_spill] sm:$0xff] %v10729_v5  ;;  %v10733_v13 = vpop.f32.mrb[95].mxu0  ;;  %v10735_v29 = vpop.f32.mrb[95].mxu1 }
 0x229   : > { %11430 = vst [vmem:[#allocation145_spill] sm:$0xff] %v10733_v13  ;;  %11431 = vst [vmem:[#allocation146_spill] sm:$0xff] %v10735_v29  ;;  %v9373_v13 = vld [vmem:[%s9943_s6 + $0x6c8] sm:$0xff]  }
 0x22a   : > { %8878 = vmatmul.mubr.msk.bf16.gmra.mrb[200].mxu0 %vm3647_vm2, %v9368_v41  ;;  %9106 = vmatmul.mubr.msk.bf16.gmra.mrb[200].mxu1 %vm3647_vm2, %v9369_v4  ;;  %v9374_v4 = vld [vmem:[%s9943_s6 + $0x340] sm:$0xff]  }
 0x22b   : > { %8881 = vmatprep.mubr.msk.bf16.mxu0 %vm3647_vm2, %v9370_v1  ;;  %9109 = vmatprep.mubr.msk.bf16.mxu1 %vm3647_vm2, %v9371_v12  ;;  %v9375_v1 = vld [vmem:[%s9943_s6 + $0x6d0] sm:$0xff]  }
 0x22d   : > { %v10741_v53 = vpop.f32.mrb[96].mxu0  ;;  %v10743_v28 = vpop.f32.mrb[96].mxu1 }
 0x22e   : > { %11432 = vst [vmem:[#allocation147_spill] sm:$0xff] %v10741_v53  ;;  %11433 = vst [vmem:[#allocation148_spill] sm:$0xff] %v10743_v28  ;;  %v10745_v5 = vpop.f32.mrb[97].mxu0  ;;  %v10747_v52 = vpop.f32.mrb[97].mxu1 }
 0x22f   : > { %11434 = vst [vmem:[#allocation149_spill] sm:$0xff] %v10745_v5  ;;  %11435 = vst [vmem:[#allocation150_spill] sm:$0xff] %v10747_v52  ;;  %v10751_v29 = vpop.f32.mrb[98].mxu0  ;;  %v10753_v41 = vpop.f32.mrb[98].mxu1  ;;  %v9376_v5 = vld [vmem:[%s9943_s6 + $0x348] sm:$0xff]  }
 0x230   : > { %11436 = vst [vmem:[#allocation151_spill] sm:$0xff] %v10751_v29  ;;  %11437 = vst [vmem:[#allocation152_spill] sm:$0xff] %v10753_v41  ;;  %v10757_v12 = vpop.f32.mrb[99].mxu0  ;;  %v10759_v53 = vpop.f32.mrb[99].mxu1 }
 0x231   : > { %11438 = vst [vmem:[#allocation153_spill] sm:$0xff] %v10757_v12  ;;  %11439 = vst [vmem:[#allocation154_spill] sm:$0xff] %v10759_v53  ;;  %v9377_v12 = vld [vmem:[%s9943_s6 + $0x6d8] sm:$0xff]  }
 0x232   : > { %8882 = vmatmul.mubr.msk.bf16.gmra.mrb[204].mxu0 %vm3647_vm2, %v9372_v0  ;;  %9110 = vmatmul.mubr.msk.bf16.gmra.mrb[204].mxu1 %vm3647_vm2, %v9373_v13  ;;  %v9378_v13 = vld [vmem:[%s9943_s6 + $0x350] sm:$0xff]  }
 0x233   : > { %8885 = vmatprep.mubr.msk.bf16.mxu0 %vm3647_vm2, %v9374_v4  ;;  %9113 = vmatprep.mubr.msk.bf16.mxu1 %vm3647_vm2, %v9375_v1  ;;  %v9379_v4 = vld [vmem:[%s9943_s6 + $0x6e0] sm:$0xff]  }
 0x235   : > { %v10765_v28 = vpop.f32.mrb[100].mxu0  ;;  %v10767_v29 = vpop.f32.mrb[100].mxu1 }
 0x236   : > { %11440 = vst [vmem:[#allocation155_spill] sm:$0xff] %v10765_v28  ;;  %11441 = vst [vmem:[#allocation156_spill] sm:$0xff] %v10767_v29  ;;  %v10769_v41 = vpop.f32.mrb[101].mxu0  ;;  %v10771_v52 = vpop.f32.mrb[101].mxu1 }
 0x237   : > { %11442 = vst [vmem:[#allocation157_spill] sm:$0xff] %v10769_v41  ;;  %11443 = vst [vmem:[#allocation158_spill] sm:$0xff] %v10771_v52  ;;  %v10775_v53 = vpop.f32.mrb[102].mxu0  ;;  %v10777_v0 = vpop.f32.mrb[102].mxu1  ;;  %v9380_v41 = vld [vmem:[%s9943_s6 + $0x358] sm:$0xff]  }
 0x238   : > { %11444 = vst [vmem:[#allocation159_spill] sm:$0xff] %v10775_v53  ;;  %11445 = vst [vmem:[#allocation160_spill] sm:$0xff] %v10777_v0  ;;  %v10781_v1 = vpop.f32.mrb[103].mxu0  ;;  %v10783_v28 = vpop.f32.mrb[103].mxu1 }
 0x239   : > { %11446 = vst [vmem:[#allocation161_spill] sm:$0xff] %v10781_v1  ;;  %11447 = vst [vmem:[#allocation162_spill] sm:$0xff] %v10783_v28  ;;  %v9381_v1 = vld [vmem:[%s9943_s6 + $0x6e8] sm:$0xff]  }
 0x23a   : > { %8886 = vmatmul.mubr.msk.bf16.gmra.mrb[208].mxu0 %vm3647_vm2, %v9376_v5  ;;  %9114 = vmatmul.mubr.msk.bf16.gmra.mrb[208].mxu1 %vm3647_vm2, %v9377_v12  ;;  %v9382_v12 = vld [vmem:[%s9943_s6 + $0x360] sm:$0xff]  }
 0x23b   : > { %8889 = vmatprep.mubr.msk.bf16.mxu0 %vm3647_vm2, %v9378_v13  ;;  %9117 = vmatprep.mubr.msk.bf16.mxu1 %vm3647_vm2, %v9379_v4  ;;  %v9383_v13 = vld [vmem:[%s9943_s6 + $0x6f0] sm:$0xff]  }
 0x23d   : > { %v10789_v29 = vpop.f32.mrb[104].mxu0  ;;  %v10791_v53 = vpop.f32.mrb[104].mxu1 }
 0x23e   : > { %11448 = vst [vmem:[#allocation163_spill] sm:$0xff] %v10789_v29  ;;  %11449 = vst [vmem:[#allocation164_spill] sm:$0xff] %v10791_v53  ;;  %v10793_v0 = vpop.f32.mrb[105].mxu0  ;;  %v10795_v52 = vpop.f32.mrb[105].mxu1 }
 0x23f   : > { %11450 = vst [vmem:[#allocation165_spill] sm:$0xff] %v10793_v0  ;;  %11451 = vst [vmem:[#allocation166_spill] sm:$0xff] %v10795_v52  ;;  %v10799_v28 = vpop.f32.mrb[106].mxu0  ;;  %v10801_v5 = vpop.f32.mrb[106].mxu1  ;;  %v9385_v0 = vld [vmem:[%s9943_s6 + $0x6f8] sm:$0xff]  }
 0x240   : > { %11452 = vst [vmem:[#allocation167_spill] sm:$0xff] %v10799_v28  ;;  %11453 = vst [vmem:[#allocation168_spill] sm:$0xff] %v10801_v5  ;;  %v10805_v4 = vpop.f32.mrb[107].mxu0  ;;  %v10807_v29 = vpop.f32.mrb[107].mxu1 }
 0x241   : > { %11454 = vst [vmem:[#allocation169_spill] sm:$0xff] %v10805_v4  ;;  %11455 = vst [vmem:[#allocation170_spill] sm:$0xff] %v10807_v29  ;;  %v9384_v4 = vld [vmem:[%s9943_s6 + $0x368] sm:$0xff]  }
 0x242   : > { %8890 = vmatmul.mubr.msk.bf16.gmra.mrb[212].mxu0 %vm3647_vm2, %v9380_v41  ;;  %9118 = vmatmul.mubr.msk.bf16.gmra.mrb[212].mxu1 %vm3647_vm2, %v9381_v1  ;;  %v9387_v1 = vld [vmem:[%s9943_s6 + $0x700] sm:$0xff]  }
 0x243   : > { %8893 = vmatprep.mubr.msk.bf16.mxu0 %vm3647_vm2, %v9382_v12  ;;  %9121 = vmatprep.mubr.msk.bf16.mxu1 %vm3647_vm2, %v9383_v13 }
 0x245   : > { %v10813_v28 = vpop.f32.mrb[108].mxu0  ;;  %v10815_v5 = vpop.f32.mrb[108].mxu1 }
 0x246   : > { %11456 = vst [vmem:[#allocation171_spill] sm:$0xff] %v10813_v28  ;;  %11457 = vst [vmem:[#allocation172_spill] sm:$0xff] %v10815_v5  ;;  %v10817_v53 = vpop.f32.mrb[109].mxu0  ;;  %v10819_v52 = vpop.f32.mrb[109].mxu1 }
 0x247   : > { %11458 = vst [vmem:[#allocation173_spill] sm:$0xff] %v10817_v53  ;;  %11459 = vst [vmem:[#allocation174_spill] sm:$0xff] %v10819_v52  ;;  %v10823_v29 = vpop.f32.mrb[110].mxu0  ;;  %v10825_v41 = vpop.f32.mrb[110].mxu1  ;;  %v9389_v52 = vld [vmem:[%s9943_s6 + $0x708] sm:$0xff]   ;;  %v9390_v53 = vld [vmem:[%s9943_s6 + $0x380] sm:$0xff]  }
 0x248   : > { %11460 = vst [vmem:[#allocation175_spill] sm:$0xff] %v10823_v29  ;;  %11461 = vst [vmem:[#allocation176_spill] sm:$0xff] %v10825_v41  ;;  %v10829_v12 = vpop.f32.mrb[111].mxu0  ;;  %v10831_v13 = vpop.f32.mrb[111].mxu1 }
 0x249   : > { %11462 = vst [vmem:[#allocation177_spill] sm:$0xff] %v10829_v12  ;;  %11463 = vst [vmem:[#allocation178_spill] sm:$0xff] %v10831_v13 }
 0x24a   : > { %8894 = vmatmul.mubr.msk.bf16.gmra.mrb[216].mxu0 %vm3647_vm2, %v9384_v4  ;;  %9122 = vmatmul.mubr.msk.bf16.gmra.mrb[216].mxu1 %vm3647_vm2, %v9385_v0  ;;  %v9388_v4 = vld [vmem:[%s9943_s6 + $0x378] sm:$0xff]   ;;  %v10850_v0 = vld [vmem:[%s11286_s2] ss:$0 sm:$0xff] }
 0x24b   : > { %8897 = vmatprep.mubr.msk.bf16.mxu0 %vm3647_vm2, %v9386_v40  ;;  %9125 = vmatprep.mubr.msk.bf16.mxu1 %vm3647_vm2, %v9387_v1 }
 0x24d   : > { %v8791_v41 = vpop.f32.mrb[112].mxu0  ;;  %v9019_v29 = vpop.f32.mrb[112].mxu1 }
 0x24e   : > { %v6196_v5 = vmax.f32 %v10169_v26, %v8791_v41  ;;  %v6310_v28 = vmax.f32 %v10171_v27, %v9019_v29  ;;  %v10841_v13 = vpop.f32.mrb[113].mxu0  ;;  %v10843_v12 = vpop.f32.mrb[113].mxu1 }
 0x24f   : > { %11464 = vst [vmem:[#allocation179_spill] sm:$0xff] %v10841_v13  ;;  %11465 = vst [vmem:[#allocation180_spill] sm:$0xff] %v10843_v12  ;;  %v8792_v40 = vpop.f32.mrb[114].mxu0  ;;  %v9020_v1 = vpop.f32.mrb[114].mxu1 }
 0x250   : > { %v6424_v32 = vmax.f32 %v6196_v5, %v6310_v28  ;;  %v6197_v26 = vmax.f32 %v10181_v34, %v8792_v40  ;;  %v6311_v27 = vmax.f32 %v10183_v35, %v9020_v1  ;;  %v10857_v29 = vpop.f32.mrb[115].mxu0  ;;  %v10859_v41 = vpop.f32.mrb[115].mxu1 }
 0x251   : > { %11466 = vst [vmem:[#allocation181_spill] sm:$0xff] %v10857_v29  ;;  %11467 = vst [vmem:[#allocation182_spill] sm:$0xff] %v10859_v41  ;;  %v9393_v41 = vld [vmem:[%s9943_s6 + $0x718] sm:$0xff]  }
 0x252   : > { %v6545_v12 = vadd.f32 %v10850_v0, %v6424_v32  ;;  %v6425_v13 = vmax.f32 %v6197_v26, %v6311_v27  ;;  %8898 = vmatmul.mubr.msk.bf16.gmra.mrb[220].mxu0 %vm3647_vm2, %v9388_v4  ;;  %9126 = vmatmul.mubr.msk.bf16.gmra.mrb[220].mxu1 %vm3647_vm2, %v9389_v52  ;;  %v9392_v4 = vld [vmem:[%s9943_s6 + $0x388] sm:$0xff]  }
 0x253   : > { %8901 = vmatprep.mubr.msk.bf16.mxu0 %vm3647_vm2, %v9390_v53  ;;  %9129 = vmatprep.mubr.msk.bf16.mxu1 %vm3647_vm2, %v9391_v33 }
 0x254   : > { %v6546_v34 = vadd.f32 %v10850_v0, %v6425_v13  ;;  %v6659_v5 = vmax.f32 %v6545_v12, 0.0 }
 0x255   : > { %v8795_v35 = vpop.f32.mrb[116].mxu0  ;;  %v9023_v28 = vpop.f32.mrb[116].mxu1 }
 0x256   : > { %v6660_v40 = vmax.f32 %v6546_v34, 0.0  ;;  %v6200_v32 = vmax.f32 %v10193_v38, %v8795_v35  ;;  %v6314_v1 = vmax.f32 %v10195_v39, %v9023_v28  ;;  %v4837_v26 = vpop.f32.mrb[117].mxu0  ;;  %v5749_v27 = vpop.f32.mrb[117].mxu1 }
 0x257   : > { %v6198_v33 = vmax.f32 %v10165_v24, %v4837_v26  ;;  %v6312_v52 = vmax.f32 %v10167_v25, %v5749_v27  ;;  %v8796_v53 = vpop.f32.mrb[118].mxu0  ;;  %v9024_v12 = vpop.f32.mrb[118].mxu1 }
 0x258   : > { %v8105_v13 = vpack.c.bf16 %v6660_v40, %v6659_v5  ;;  %v6428_v38 = vmax.f32 %v6200_v32, %v6314_v1  ;;  %v6201_v39 = vmax.f32 %v10205_v46, %v8796_v53  ;;  %v6315_v34 = vmax.f32 %v10207_v47, %v9024_v12  ;;  %v4840_v35 = vpop.f32.mrb[119].mxu0  ;;  %v5752_v28 = vpop.f32.mrb[119].mxu1 }
 0x259   : > { %v6426_v29 = vmax.f32 %v6198_v33, %v6312_v52  ;;  %v6199_v17 = vmax.f32 %v10175_v30, %v4840_v35  ;;  %v6313_v16 = vmax.f32 %v10177_v31, %v5752_v28 }
 0x25a   : > { %8106 = vst [vmem:[%s10874_s14] sm:$0xff] %v8105_v13   ;;  %v6549_v24 = vadd.f32 %v10850_v0, %v6428_v38  ;;  %v6429_v26 = vmax.f32 %v6201_v39, %v6315_v34  ;;  %8902 = vmatmul.mubr.msk.bf16.gmra.mrb[224].mxu0 %vm3647_vm2, %v9392_v4  ;;  %9130 = vmatmul.mubr.msk.bf16.gmra.mrb[224].mxu1 %vm3647_vm2, %v9393_v41 }
 0x25b   : > { %v6547_v25 = vadd.f32 %v10850_v0, %v6426_v29  ;;  %v6427_v46 = vmax.f32 %v6199_v17, %v6313_v16 }
 0x25c   : > { %v6550_v47 = vadd.f32 %v10850_v0, %v6429_v26  ;;  %v6663_v30 = vmax.f32 %v6549_v24, 0.0 }
 0x25d   : > { %v6548_v5 = vadd.f32 %v10850_v0, %v6427_v46  ;;  %v8799_v40 = vpop.f32.mrb[120].mxu0  ;;  %v9027_v32 = vpop.f32.mrb[120].mxu1  ;;  %v6661_v4 = vmax.f32 %v6547_v25, 0.0 }
 0x25e   : > { %v6664_v1 = vmax.f32 %v6550_v47, 0.0  ;;  %v6204_v31 = vmax.f32 %v10217_v50, %v8799_v40  ;;  %v6318_v27 = vmax.f32 %v10219_v51, %v9027_v32  ;;  %v4853_v33 = vpop.f32.mrb[121].mxu0  ;;  %v5765_v52 = vpop.f32.mrb[121].mxu1 }
 0x25f   : > { %v6662_v41 = vmax.f32 %v6548_v5, 0.0  ;;  %v6202_v29 = vmax.f32 %v10189_v36, %v4853_v33  ;;  %v6316_v16 = vmax.f32 %v10191_v37, %v5765_v52  ;;  %v8800_v17 = vpop.f32.mrb[122].mxu0  ;;  %v9028_v53 = vpop.f32.mrb[122].mxu1 }
 0x260   : > { %v8115_v12 = vpack.c.bf16 %v6664_v1, %v6663_v30  ;;  %v6432_v13 = vmax.f32 %v6204_v31, %v6318_v27  ;;  %v6205_v38 = vmax.f32 %v10229_v58, %v8800_v17  ;;  %v6319_v50 = vmax.f32 %v10231_v59, %v9028_v53  ;;  %v4856_v39 = vpop.f32.mrb[123].mxu0  ;;  %v5768_v51 = vpop.f32.mrb[123].mxu1 }
 0x261   : > { %v8110_v34 = vpack.c.bf16 %v6662_v41, %v6661_v4  ;;  %v6430_v35 = vmax.f32 %v6202_v29, %v6316_v16  ;;  %v6203_v28 = vmax.f32 %v10199_v42, %v4856_v39  ;;  %v6317_v24 = vmax.f32 %v10201_v43, %v5768_v51 }
 0x262   : > { %8388 = vst [vmem:[%s10874_s14 + $0x10] sm:$0xff] %v8115_v12   ;;  %v6553_v36 = vadd.f32 %v10850_v0, %v6432_v13  ;;  %v6433_v37 = vmax.f32 %v6205_v38, %v6319_v50 }
 0x263   : > { %8387 = vst [vmem:[%s10874_s14 + $0x8] sm:$0xff] %v8110_v34   ;;  %v6551_v26 = vadd.f32 %v10850_v0, %v6430_v35  ;;  %v6431_v25 = vmax.f32 %v6203_v28, %v6317_v24 }
 0x264   : > { %v6554_v58 = vadd.f32 %v10850_v0, %v6433_v37  ;;  %v6667_v5 = vmax.f32 %v6553_v36, 0.0 }
 0x265   : > { %v6552_v59 = vadd.f32 %v10850_v0, %v6431_v25  ;;  %v8803_v46 = vpop.f32.mrb[124].mxu0  ;;  %v9031_v47 = vpop.f32.mrb[124].mxu1  ;;  %v6665_v1 = vmax.f32 %v6551_v26, 0.0 }
 0x266   : > { %v6668_v40 = vmax.f32 %v6554_v58, 0.0  ;;  %v6208_v42 = vmax.f32 %v10241_v62, %v8803_v46  ;;  %v6322_v43 = vmax.f32 %v10243_v63, %v9031_v47  ;;  %v4869_v32 = vpop.f32.mrb[125].mxu0  ;;  %v5781_v30 = vpop.f32.mrb[125].mxu1 }
 0x267   : > { %v6666_v31 = vmax.f32 %v6552_v59, 0.0  ;;  %v6206_v27 = vmax.f32 %v10213_v48, %v4869_v32  ;;  %v6320_v33 = vmax.f32 %v10215_v49, %v5781_v30  ;;  %v8804_v52 = vpop.f32.mrb[126].mxu0  ;;  %v9032_v4 = vpop.f32.mrb[126].mxu1 }
 0x268   : > { %v8125_v41 = vpack.c.bf16 %v6668_v40, %v6667_v5  ;;  %v6436_v29 = vmax.f32 %v6208_v42, %v6322_v43  ;;  %v6209_v16 = vmax.f32 %v10253_v6, %v8804_v52  ;;  %v6323_v62 = vmax.f32 %v10255_v7, %v9032_v4  ;;  %v4872_v17 = vpop.f32.mrb[127].mxu0  ;;  %v5784_v63 = vpop.f32.mrb[127].mxu1 }
 0x269   : > { %v8120_v53 = vpack.c.bf16 %v6666_v31, %v6665_v1  ;;  %v6434_v12 = vmax.f32 %v6206_v27, %v6320_v33  ;;  %v6207_v13 = vmax.f32 %v10223_v54, %v4872_v17  ;;  %v6321_v38 = vmax.f32 %v10225_v55, %v5784_v63 }
 0x26a   : > { %8390 = vst [vmem:[%s10874_s14 + $0x20] sm:$0xff] %v8125_v41   ;;  %v6557_v48 = vadd.f32 %v10850_v0, %v6436_v29  ;;  %v6437_v49 = vmax.f32 %v6209_v16, %v6323_v62 }
 0x26b   : > { %8389 = vst [vmem:[%s10874_s14 + $0x18] sm:$0xff] %v8120_v53   ;;  %v6555_v50 = vadd.f32 %v10850_v0, %v6434_v12  ;;  %v6435_v39 = vmax.f32 %v6207_v13, %v6321_v38 }
 0x26c   : > { %v6558_v6 = vadd.f32 %v10850_v0, %v6437_v49  ;;  %v6671_v35 = vmax.f32 %v6557_v48, 0.0 }
 0x26d   : > { %v6556_v7 = vadd.f32 %v10850_v0, %v6435_v39  ;;  %v8807_v51 = vpop.f32.mrb[128].mxu0  ;;  %v9035_v34 = vpop.f32.mrb[128].mxu1  ;;  %v6669_v37 = vmax.f32 %v6555_v50, 0.0 }
 0x26e   : > { %v6672_v28 = vmax.f32 %v6558_v6, 0.0  ;;  %v6212_v54 = vmax.f32 %v10265_v10, %v8807_v51  ;;  %v6326_v55 = vmax.f32 %v10267_v11, %v9035_v34  ;;  %v4885_v24 = vpop.f32.mrb[129].mxu0  ;;  %v5797_v36 = vpop.f32.mrb[129].mxu1 }
 0x26f   : > { %v6670_v26 = vmax.f32 %v6556_v7, 0.0  ;;  %v6210_v25 = vmax.f32 %v10237_v60, %v4885_v24  ;;  %v6324_v58 = vmax.f32 %v10239_v61, %v5797_v36  ;;  %v8808_v59 = vpop.f32.mrb[130].mxu0  ;;  %v9036_v46 = vpop.f32.mrb[130].mxu1 }
 0x270   : > { %v8135_v47 = vpack.c.bf16 %v6672_v28, %v6671_v35  ;;  %v6440_v5 = vmax.f32 %v6212_v54, %v6326_v55  ;;  %v6213_v40 = vmax.f32 %v10277_v18, %v8808_v59  ;;  %v6327_v10 = vmax.f32 %v10279_v19, %v9036_v46  ;;  %v4888_v42 = vpop.f32.mrb[131].mxu0  ;;  %v5800_v11 = vpop.f32.mrb[131].mxu1 }
 0x271   : > { %v8130_v43 = vpack.c.bf16 %v6670_v26, %v6669_v37  ;;  %v6438_v32 = vmax.f32 %v6210_v25, %v6324_v58  ;;  %v6211_v30 = vmax.f32 %v10247_v2, %v4888_v42  ;;  %v6325_v1 = vmax.f32 %v10249_v3, %v5800_v11  ;;  %v11469_v11 = vld [vmem:[#allocation10_spill] sm:$0xff] }
 0x272   : > { %8392 = vst [vmem:[%s10874_s14 + $0x30] sm:$0xff] %v8135_v47   ;;  %v6561_v60 = vadd.f32 %v10850_v0, %v6440_v5  ;;  %v6441_v61 = vmax.f32 %v6213_v40, %v6327_v10  ;;  %v11468_v10 = vld [vmem:[#allocation9_spill] sm:$0xff] }
 0x273   : > { %8391 = vst [vmem:[%s10874_s14 + $0x28] sm:$0xff] %v8130_v43   ;;  %v6559_v31 = vadd.f32 %v10850_v0, %v6438_v32  ;;  %v6439_v27 = vmax.f32 %v6211_v30, %v6325_v1  ;;  %v11470_v1 = vld [vmem:[#allocation3_spill] sm:$0xff] }
 0x274   : > { %v6562_v18 = vadd.f32 %v10850_v0, %v6441_v61  ;;  %v6675_v4 = vmax.f32 %v6561_v60, 0.0  ;;  %v11471_v61 = vld [vmem:[#allocation4_spill] sm:$0xff] }
 0x275   : > { %v6560_v19 = vadd.f32 %v10850_v0, %v6439_v27  ;;  %v8811_v33 = vpop.f32.mrb[132].mxu0  ;;  %v9039_v52 = vpop.f32.mrb[132].mxu1  ;;  %v6673_v62 = vmax.f32 %v6559_v31, 0.0 }
 0x276   : > { %v6676_v41 = vmax.f32 %v6562_v18, 0.0  ;;  %v6216_v2 = vmax.f32 %v10289_v22, %v8811_v33  ;;  %v6330_v3 = vmax.f32 %v10291_v23, %v9039_v52  ;;  %v4901_v29 = vpop.f32.mrb[133].mxu0  ;;  %v5813_v16 = vpop.f32.mrb[133].mxu1 }
 0x277   : > { %v6674_v17 = vmax.f32 %v6560_v19, 0.0  ;;  %v6214_v63 = vmax.f32 %v10261_v8, %v4901_v29  ;;  %v6328_v53 = vmax.f32 %v10263_v9, %v5813_v16  ;;  %v8812_v12 = vpop.f32.mrb[134].mxu0  ;;  %v9040_v13 = vpop.f32.mrb[134].mxu1  ;;  %v11473_v16 = vld [vmem:[#allocation14_spill] sm:$0xff] }
 0x278   : > { %v8145_v38 = vpack.c.bf16 %v6676_v41, %v6675_v4  ;;  %v6444_v48 = vmax.f32 %v6216_v2, %v6330_v3  ;;  %v6217_v49 = vmax.f32 %v10301_v44, %v8812_v12  ;;  %v6331_v22 = vmax.f32 %v10303_v45, %v9040_v13  ;;  %v4904_v50 = vpop.f32.mrb[135].mxu0  ;;  %v5816_v23 = vpop.f32.mrb[135].mxu1  ;;  %v11472_v3 = vld [vmem:[#allocation13_spill] sm:$0xff] }
 0x279   : > { %v8140_v39 = vpack.c.bf16 %v6674_v17, %v6673_v62  ;;  %v6442_v6 = vmax.f32 %v6214_v63, %v6328_v53  ;;  %v6215_v7 = vmax.f32 %v10271_v14, %v4904_v50  ;;  %v6329_v51 = vmax.f32 %v10273_v15, %v5816_v23  ;;  %v11474_v13 = vld [vmem:[#allocation5_spill] sm:$0xff] }
 0x27a   : > { %8394 = vst [vmem:[%s10874_s14 + $0x40] sm:$0xff] %v8145_v38   ;;  %v6565_v8 = vadd.f32 %v10850_v0, %v6444_v48  ;;  %v6445_v9 = vmax.f32 %v6217_v49, %v6331_v22  ;;  %v11475_v48 = vld [vmem:[#allocation6_spill] sm:$0xff] }
 0x27b   : > { %8393 = vst [vmem:[%s10874_s14 + $0x38] sm:$0xff] %v8140_v39   ;;  %v6563_v34 = vadd.f32 %v10850_v0, %v6442_v6  ;;  %v6443_v35 = vmax.f32 %v6215_v7, %v6329_v51  ;;  %v11476_v6 = vld [vmem:[#allocation17_spill] sm:$0xff]  ;;  %v11477_v51 = vld [vmem:[#allocation18_spill] sm:$0xff] }
 0x27c   : > { %v6566_v44 = vadd.f32 %v10850_v0, %v6445_v9  ;;  %v6679_v55 = vmax.f32 %v6565_v8, 0.0 }
 0x27d   : > { %v6564_v45 = vadd.f32 %v10850_v0, %v6443_v35  ;;  %v8815_v28 = vpop.f32.mrb[136].mxu0  ;;  %v9043_v54 = vpop.f32.mrb[136].mxu1  ;;  %v6677_v26 = vmax.f32 %v6563_v34, 0.0 }
 0x27e   : > { %v6680_v24 = vmax.f32 %v6566_v44, 0.0  ;;  %v6220_v14 = vmax.f32 %v10313_v56, %v8815_v28  ;;  %v6334_v15 = vmax.f32 %v10315_v57, %v9043_v54  ;;  %v4917_v36 = vpop.f32.mrb[137].mxu0  ;;  %v5829_v37 = vpop.f32.mrb[137].mxu1  ;;  %v11479_v54 = vld [vmem:[#allocation8_spill] sm:$0xff] }
 0x27f   : > { %v6678_v25 = vmax.f32 %v6564_v45, 0.0  ;;  %v6218_v58 = vmax.f32 %v10285_v20, %v4917_v36  ;;  %v6332_v59 = vmax.f32 %v10287_v21, %v5829_v37  ;;  %v8816_v46 = vpop.f32.mrb[138].mxu0  ;;  %v9044_v47 = vpop.f32.mrb[138].mxu1  ;;  %v11478_v45 = vld [vmem:[#allocation7_spill] sm:$0xff] }
 0x280   : > { %v8155_v5 = vpack.c.bf16 %v6680_v24, %v6679_v55  ;;  %v6448_v40 = vmax.f32 %v6220_v14, %v6334_v15  ;;  %v6221_v42 = vmax.f32 %v11468_v10, %v8816_v46  ;;  %v6335_v56 = vmax.f32 %v11469_v11, %v9044_v47  ;;  %v4920_v43 = vpop.f32.mrb[139].mxu0  ;;  %v5832_v57 = vpop.f32.mrb[139].mxu1  ;;  %v11480_v47 = vld [vmem:[#allocation21_spill] sm:$0xff] }
 0x281   : > { %v8150_v32 = vpack.c.bf16 %v6678_v25, %v6677_v26  ;;  %v6446_v30 = vmax.f32 %v6218_v58, %v6332_v59  ;;  %v6219_v60 = vmax.f32 %v11470_v1, %v4920_v43  ;;  %v6333_v31 = vmax.f32 %v11471_v61, %v5832_v57  ;;  %v11482_v57 = vld [vmem:[#allocation11_spill] sm:$0xff] }
 0x282   : > { %8396 = vst [vmem:[%s10874_s14 + $0x50] sm:$0xff] %v8155_v5   ;;  %v6569_v20 = vadd.f32 %v10850_v0, %v6448_v40  ;;  %v6449_v21 = vmax.f32 %v6221_v42, %v6335_v56  ;;  %v11481_v40 = vld [vmem:[#allocation22_spill] sm:$0xff] }
 0x283   : > { %8395 = vst [vmem:[%s10874_s14 + $0x48] sm:$0xff] %v8150_v32   ;;  %v6567_v27 = vadd.f32 %v10850_v0, %v6446_v30  ;;  %v6447_v18 = vmax.f32 %v6219_v60, %v6333_v31  ;;  %v11483_v30 = vld [vmem:[#allocation12_spill] sm:$0xff] }
 0x284   : > { %v6570_v19 = vadd.f32 %v10850_v0, %v6449_v21  ;;  %v6683_v41 = vmax.f32 %v6569_v20, 0.0  ;;  %v11484_v21 = vld [vmem:[#allocation25_spill] sm:$0xff] }
 0x285   : > { %v6568_v33 = vadd.f32 %v10850_v0, %v6447_v18  ;;  %v8819_v52 = vpop.f32.mrb[140].mxu0  ;;  %v9047_v4 = vpop.f32.mrb[140].mxu1  ;;  %v6681_v53 = vmax.f32 %v6567_v27, 0.0  ;;  %v11485_v18 = vld [vmem:[#allocation26_spill] sm:$0xff] }
 0x286   : > { %v6684_v2 = vmax.f32 %v6570_v19, 0.0  ;;  %v6224_v29 = vmax.f32 %v11472_v3, %v8819_v52  ;;  %v6338_v62 = vmax.f32 %v11473_v16, %v9047_v4  ;;  %v4933_v17 = vpop.f32.mrb[141].mxu0  ;;  %v5845_v63 = vpop.f32.mrb[141].mxu1 }
 0x287   : > { %v6682_v12 = vmax.f32 %v6568_v33, 0.0  ;;  %v6222_v38 = vmax.f32 %v11474_v13, %v4933_v17  ;;  %v6336_v49 = vmax.f32 %v11475_v48, %v5845_v63  ;;  %v8820_v22 = vpop.f32.mrb[142].mxu0  ;;  %v9048_v50 = vpop.f32.mrb[142].mxu1 }
 0x288   : > { %v8165_v23 = vpack.c.bf16 %v6684_v2, %v6683_v41  ;;  %v6452_v39 = vmax.f32 %v6224_v29, %v6338_v62  ;;  %v6225_v7 = vmax.f32 %v11476_v6, %v8820_v22  ;;  %v6339_v8 = vmax.f32 %v11477_v51, %v9048_v50  ;;  %v4936_v9 = vpop.f32.mrb[143].mxu0  ;;  %v5848_v34 = vpop.f32.mrb[143].mxu1  ;;  %v11486_v2 = vld [vmem:[#allocation15_spill] sm:$0xff]  ;;  %v11487_v29 = vld [vmem:[#allocation16_spill] sm:$0xff]  ;;  %v11488_v50 = vld [vmem:[#allocation29_spill] sm:$0xff] }
 0x289   : > { %v8160_v35 = vpack.c.bf16 %v6682_v12, %v6681_v53  ;;  %v6450_v44 = vmax.f32 %v6222_v38, %v6336_v49  ;;  %v6223_v28 = vmax.f32 %v11478_v45, %v4936_v9  ;;  %v6337_v55 = vmax.f32 %v11479_v54, %v5848_v34  ;;  %v11490_v34 = vld [vmem:[#allocation19_spill] sm:$0xff] }
 0x28a   : > { %8398 = vst [vmem:[%s10874_s14 + $0x60] sm:$0xff] %v8165_v23   ;;  %v6573_v24 = vadd.f32 %v10850_v0, %v6452_v39  ;;  %v6453_v14 = vmax.f32 %v6225_v7, %v6339_v8  ;;  %v11489_v39 = vld [vmem:[#allocation30_spill] sm:$0xff] }
 0x28b   : > { %8397 = vst [vmem:[%s10874_s14 + $0x58] sm:$0xff] %v8160_v35   ;;  %v6571_v15 = vadd.f32 %v10850_v0, %v6450_v44  ;;  %v6451_v36 = vmax.f32 %v6223_v28, %v6337_v55  ;;  %v11491_v44 = vld [vmem:[#allocation20_spill] sm:$0xff] }
 0x28c   : > { %v6574_v37 = vadd.f32 %v10850_v0, %v6453_v14  ;;  %v6687_v59 = vmax.f32 %v6573_v24, 0.0  ;;  %v11492_v14 = vld [vmem:[#allocation33_spill] sm:$0xff] }
 0x28d   : > { %v6572_v26 = vadd.f32 %v10850_v0, %v6451_v36  ;;  %v8823_v25 = vpop.f32.mrb[144].mxu0  ;;  %v9051_v58 = vpop.f32.mrb[144].mxu1  ;;  %v6685_v56 = vmax.f32 %v6571_v15, 0.0  ;;  %v11493_v36 = vld [vmem:[#allocation34_spill] sm:$0xff] }
 0x28e   : > { %v6688_v46 = vmax.f32 %v6574_v37, 0.0  ;;  %v6228_v5 = vmax.f32 %v11480_v47, %v8823_v25  ;;  %v6342_v10 = vmax.f32 %v11481_v40, %v9051_v58  ;;  %v4949_v42 = vpop.f32.mrb[145].mxu0  ;;  %v5861_v11 = vpop.f32.mrb[145].mxu1 }
 0x28f   : > { %v6686_v43 = vmax.f32 %v6572_v26, 0.0  ;;  %v6226_v32 = vmax.f32 %v11482_v57, %v4949_v42  ;;  %v6340_v1 = vmax.f32 %v11483_v30, %v5861_v11  ;;  %v8824_v60 = vpop.f32.mrb[146].mxu0  ;;  %v9052_v61 = vpop.f32.mrb[146].mxu1 }
 0x290   : > { %v8175_v31 = vpack.c.bf16 %v6688_v46, %v6687_v59  ;;  %v6456_v20 = vmax.f32 %v6228_v5, %v6342_v10  ;;  %v6229_v27 = vmax.f32 %v11484_v21, %v8824_v60  ;;  %v6343_v19 = vmax.f32 %v11485_v18, %v9052_v61  ;;  %v4952_v33 = vpop.f32.mrb[147].mxu0  ;;  %v5864_v52 = vpop.f32.mrb[147].mxu1  ;;  %v11494_v46 = vld [vmem:[#allocation23_spill] sm:$0xff]  ;;  %v11495_v5 = vld [vmem:[#allocation24_spill] sm:$0xff]  ;;  %v11496_v61 = vld [vmem:[#allocation37_spill] sm:$0xff] }
 0x291   : > { %v8170_v4 = vpack.c.bf16 %v6686_v43, %v6685_v56  ;;  %v6454_v41 = vmax.f32 %v6226_v32, %v6340_v1  ;;  %v6227_v3 = vmax.f32 %v11486_v2, %v4952_v33  ;;  %v6341_v16 = vmax.f32 %v11487_v29, %v5864_v52  ;;  %v11498_v52 = vld [vmem:[#allocation27_spill] sm:$0xff] }
 0x292   : > { %8400 = vst [vmem:[%s10874_s14 + $0x70] sm:$0xff] %v8175_v31   ;;  %v6577_v62 = vadd.f32 %v10850_v0, %v6456_v20  ;;  %v6457_v17 = vmax.f32 %v6229_v27, %v6343_v19  ;;  %v11497_v20 = vld [vmem:[#allocation38_spill] sm:$0xff] }
 0x293   : > { %8399 = vst [vmem:[%s10874_s14 + $0x68] sm:$0xff] %v8170_v4   ;;  %v6575_v63 = vadd.f32 %v10850_v0, %v6454_v41  ;;  %v6455_v53 = vmax.f32 %v6227_v3, %v6341_v16  ;;  %v11499_v41 = vld [vmem:[#allocation28_spill] sm:$0xff] }
 0x294   : > { %v6578_v12 = vadd.f32 %v10850_v0, %v6457_v17  ;;  %v6691_v49 = vmax.f32 %v6577_v62, 0.0  ;;  %v11500_v17 = vld [vmem:[#allocation41_spill] sm:$0xff] }
 0x295   : > { %v6576_v13 = vadd.f32 %v10850_v0, %v6455_v53  ;;  %v8827_v38 = vpop.f32.mrb[148].mxu0  ;;  %v9055_v48 = vpop.f32.mrb[148].mxu1  ;;  %v6689_v8 = vmax.f32 %v6575_v63, 0.0  ;;  %v11501_v53 = vld [vmem:[#allocation42_spill] sm:$0xff] }
 0x296   : > { %v6692_v22 = vmax.f32 %v6578_v12, 0.0  ;;  %v6232_v23 = vmax.f32 %v11488_v50, %v8827_v38  ;;  %v6346_v6 = vmax.f32 %v11489_v39, %v9055_v48  ;;  %v4965_v7 = vpop.f32.mrb[149].mxu0  ;;  %v5877_v51 = vpop.f32.mrb[149].mxu1 }
 0x297   : > { %v6690_v9 = vmax.f32 %v6576_v13, 0.0  ;;  %v6230_v35 = vmax.f32 %v11490_v34, %v4965_v7  ;;  %v6344_v45 = vmax.f32 %v11491_v44, %v5877_v51  ;;  %v8828_v28 = vpop.f32.mrb[150].mxu0  ;;  %v9056_v54 = vpop.f32.mrb[150].mxu1 }
 0x298   : > { %v8185_v55 = vpack.c.bf16 %v6692_v22, %v6691_v49  ;;  %v6460_v24 = vmax.f32 %v6232_v23, %v6346_v6  ;;  %v6233_v15 = vmax.f32 %v11492_v14, %v8828_v28  ;;  %v6347_v37 = vmax.f32 %v11493_v36, %v9056_v54  ;;  %v4968_v26 = vpop.f32.mrb[151].mxu0  ;;  %v5880_v25 = vpop.f32.mrb[151].mxu1  ;;  %v11502_v22 = vld [vmem:[#allocation31_spill] sm:$0xff]  ;;  %v11503_v23 = vld [vmem:[#allocation32_spill] sm:$0xff]  ;;  %v11504_v54 = vld [vmem:[#allocation45_spill] sm:$0xff] }
 0x299   : > { %v8180_v58 = vpack.c.bf16 %v6690_v9, %v6689_v8  ;;  %v6458_v59 = vmax.f32 %v6230_v35, %v6344_v45  ;;  %v6231_v47 = vmax.f32 %v11494_v46, %v4968_v26  ;;  %v6345_v40 = vmax.f32 %v11495_v5, %v5880_v25  ;;  %v11506_v25 = vld [vmem:[#allocation35_spill] sm:$0xff] }
 0x29a   : > { %8402 = vst [vmem:[%s10874_s14 + $0x80] sm:$0xff] %v8185_v55   ;;  %v6581_v10 = vadd.f32 %v10850_v0, %v6460_v24  ;;  %v6461_v42 = vmax.f32 %v6233_v15, %v6347_v37  ;;  %v11505_v24 = vld [vmem:[#allocation46_spill] sm:$0xff] }
 0x29b   : > { %8401 = vst [vmem:[%s10874_s14 + $0x78] sm:$0xff] %v8180_v58   ;;  %v6579_v11 = vadd.f32 %v10850_v0, %v6458_v59  ;;  %v6459_v56 = vmax.f32 %v6231_v47, %v6345_v40  ;;  %v11507_v59 = vld [vmem:[#allocation36_spill] sm:$0xff] }
 0x29c   : > { %v6582_v43 = vadd.f32 %v10850_v0, %v6461_v42  ;;  %v6695_v1 = vmax.f32 %v6581_v10, 0.0  ;;  %v11508_v42 = vld [vmem:[#allocation49_spill] sm:$0xff] }
 0x29d   : > { %v6580_v57 = vadd.f32 %v10850_v0, %v6459_v56  ;;  %v8831_v32 = vpop.f32.mrb[152].mxu0  ;;  %v9059_v30 = vpop.f32.mrb[152].mxu1  ;;  %v6693_v19 = vmax.f32 %v6579_v11, 0.0  ;;  %v11509_v56 = vld [vmem:[#allocation50_spill] sm:$0xff] }
 0x29e   : > { %v6696_v60 = vmax.f32 %v6582_v43, 0.0  ;;  %v6236_v31 = vmax.f32 %v11496_v61, %v8831_v32  ;;  %v6350_v21 = vmax.f32 %v11497_v20, %v9059_v30  ;;  %v4981_v27 = vpop.f32.mrb[153].mxu0  ;;  %v5893_v18 = vpop.f32.mrb[153].mxu1 }
 0x29f   : > { %v6694_v33 = vmax.f32 %v6580_v57, 0.0  ;;  %v6234_v4 = vmax.f32 %v11498_v52, %v4981_v27  ;;  %v6348_v2 = vmax.f32 %v11499_v41, %v5893_v18  ;;  %v8832_v3 = vpop.f32.mrb[154].mxu0  ;;  %v9060_v29 = vpop.f32.mrb[154].mxu1 }
 0x2a0   : > { %v8195_v16 = vpack.c.bf16 %v6696_v60, %v6695_v1  ;;  %v6464_v62 = vmax.f32 %v6236_v31, %v6350_v21  ;;  %v6237_v63 = vmax.f32 %v11500_v17, %v8832_v3  ;;  %v6351_v12 = vmax.f32 %v11501_v53, %v9060_v29  ;;  %v4984_v13 = vpop.f32.mrb[155].mxu0  ;;  %v5896_v38 = vpop.f32.mrb[155].mxu1  ;;  %v11510_v60 = vld [vmem:[#allocation39_spill] sm:$0xff]  ;;  %v11511_v31 = vld [vmem:[#allocation40_spill] sm:$0xff]  ;;  %v11512_v29 = vld [vmem:[#allocation53_spill] sm:$0xff] }
 0x2a1   : > { %v8190_v48 = vpack.c.bf16 %v6694_v33, %v6693_v19  ;;  %v6462_v49 = vmax.f32 %v6234_v4, %v6348_v2  ;;  %v6235_v50 = vmax.f32 %v11502_v22, %v4984_v13  ;;  %v6349_v39 = vmax.f32 %v11503_v23, %v5896_v38  ;;  %v11514_v38 = vld [vmem:[#allocation43_spill] sm:$0xff] }
 0x2a2   : > { %8404 = vst [vmem:[%s10874_s14 + $0x90] sm:$0xff] %v8195_v16   ;;  %v6585_v6 = vadd.f32 %v10850_v0, %v6464_v62  ;;  %v6465_v7 = vmax.f32 %v6237_v63, %v6351_v12  ;;  %v11513_v62 = vld [vmem:[#allocation54_spill] sm:$0xff] }
 0x2a3   : > { %8403 = vst [vmem:[%s10874_s14 + $0x88] sm:$0xff] %v8190_v48   ;;  %v6583_v51 = vadd.f32 %v10850_v0, %v6462_v49  ;;  %v6463_v8 = vmax.f32 %v6235_v50, %v6349_v39  ;;  %v11515_v49 = vld [vmem:[#allocation44_spill] sm:$0xff] }
 0x2a4   : > { %v6586_v9 = vadd.f32 %v10850_v0, %v6465_v7  ;;  %v6699_v45 = vmax.f32 %v6585_v6, 0.0  ;;  %v11516_v7 = vld [vmem:[#allocation57_spill] sm:$0xff] }
 0x2a5   : > { %v6584_v34 = vadd.f32 %v10850_v0, %v6463_v8  ;;  %v8835_v35 = vpop.f32.mrb[156].mxu0  ;;  %v9063_v44 = vpop.f32.mrb[156].mxu1  ;;  %v6697_v37 = vmax.f32 %v6583_v51, 0.0  ;;  %v11517_v8 = vld [vmem:[#allocation58_spill] sm:$0xff] }
 0x2a6   : > { %v6700_v28 = vmax.f32 %v6586_v9, 0.0  ;;  %v6240_v55 = vmax.f32 %v11504_v54, %v8835_v35  ;;  %v6354_v14 = vmax.f32 %v11505_v24, %v9063_v44  ;;  %v4997_v15 = vpop.f32.mrb[157].mxu0  ;;  %v5909_v36 = vpop.f32.mrb[157].mxu1 }
 0x2a7   : > { %v6698_v26 = vmax.f32 %v6584_v34, 0.0  ;;  %v6238_v58 = vmax.f32 %v11506_v25, %v4997_v15  ;;  %v6352_v46 = vmax.f32 %v11507_v59, %v5909_v36  ;;  %v8836_v47 = vpop.f32.mrb[158].mxu0  ;;  %v9064_v5 = vpop.f32.mrb[158].mxu1 }
 0x2a8   : > { %v8205_v40 = vpack.c.bf16 %v6700_v28, %v6699_v45  ;;  %v6468_v10 = vmax.f32 %v6240_v55, %v6354_v14  ;;  %v6241_v11 = vmax.f32 %v11508_v42, %v8836_v47  ;;  %v6355_v43 = vmax.f32 %v11509_v56, %v9064_v5  ;;  %v5000_v57 = vpop.f32.mrb[159].mxu0  ;;  %v5912_v32 = vpop.f32.mrb[159].mxu1  ;;  %v11518_v28 = vld [vmem:[#allocation47_spill] sm:$0xff]  ;;  %v11519_v55 = vld [vmem:[#allocation48_spill] sm:$0xff]  ;;  %v11520_v5 = vld [vmem:[#allocation61_spill] sm:$0xff] }
 0x2a9   : > { %v8200_v30 = vpack.c.bf16 %v6698_v26, %v6697_v37  ;;  %v6466_v1 = vmax.f32 %v6238_v58, %v6352_v46  ;;  %v6239_v61 = vmax.f32 %v11510_v60, %v5000_v57  ;;  %v6353_v20 = vmax.f32 %v11511_v31, %v5912_v32  ;;  %v11522_v32 = vld [vmem:[#allocation51_spill] sm:$0xff] }
 0x2aa   : > { %8406 = vst [vmem:[%s10874_s14 + $0xa0] sm:$0xff] %v8205_v40   ;;  %v6589_v21 = vadd.f32 %v10850_v0, %v6468_v10  ;;  %v6469_v27 = vmax.f32 %v6241_v11, %v6355_v43  ;;  %v11521_v10 = vld [vmem:[#allocation62_spill] sm:$0xff] }
 0x2ab   : > { %8405 = vst [vmem:[%s10874_s14 + $0x98] sm:$0xff] %v8200_v30   ;;  %v6587_v18 = vadd.f32 %v10850_v0, %v6466_v1  ;;  %v6467_v19 = vmax.f32 %v6239_v61, %v6353_v20  ;;  %v11523_v1 = vld [vmem:[#allocation52_spill] sm:$0xff] }
 0x2ac   : > { %v6590_v33 = vadd.f32 %v10850_v0, %v6469_v27  ;;  %v6703_v2 = vmax.f32 %v6589_v21, 0.0  ;;  %v11524_v27 = vld [vmem:[#allocation65_spill] sm:$0xff] }
 0x2ad   : > { %v6588_v52 = vadd.f32 %v10850_v0, %v6467_v19  ;;  %v8839_v4 = vpop.f32.mrb[160].mxu0  ;;  %v9067_v41 = vpop.f32.mrb[160].mxu1  ;;  %v6701_v12 = vmax.f32 %v6587_v18, 0.0  ;;  %v11525_v19 = vld [vmem:[#allocation66_spill] sm:$0xff] }
 0x2ae   : > { %v6704_v3 = vmax.f32 %v6590_v33, 0.0  ;;  %v6244_v16 = vmax.f32 %v11512_v29, %v8839_v4  ;;  %v6358_v17 = vmax.f32 %v11513_v62, %v9067_v41  ;;  %v5013_v63 = vpop.f32.mrb[161].mxu0  ;;  %v5925_v53 = vpop.f32.mrb[161].mxu1 }
 0x2af   : > { %v6702_v13 = vmax.f32 %v6588_v52, 0.0  ;;  %v6242_v48 = vmax.f32 %v11514_v38, %v5013_v63  ;;  %v6356_v22 = vmax.f32 %v11515_v49, %v5925_v53  ;;  %v8840_v50 = vpop.f32.mrb[162].mxu0  ;;  %v9068_v23 = vpop.f32.mrb[162].mxu1 }
 0x2b0   : > { %v8215_v39 = vpack.c.bf16 %v6704_v3, %v6703_v2  ;;  %v6472_v6 = vmax.f32 %v6244_v16, %v6358_v17  ;;  %v6245_v51 = vmax.f32 %v11516_v7, %v8840_v50  ;;  %v6359_v9 = vmax.f32 %v11517_v8, %v9068_v23  ;;  %v5016_v34 = vpop.f32.mrb[163].mxu0  ;;  %v5928_v35 = vpop.f32.mrb[163].mxu1  ;;  %v11526_v3 = vld [vmem:[#allocation55_spill] sm:$0xff]  ;;  %v11527_v16 = vld [vmem:[#allocation56_spill] sm:$0xff]  ;;  %v11528_v23 = vld [vmem:[#allocation69_spill] sm:$0xff] }
 0x2b1   : > { %v8210_v44 = vpack.c.bf16 %v6702_v13, %v6701_v12  ;;  %v6470_v45 = vmax.f32 %v6242_v48, %v6356_v22  ;;  %v6243_v54 = vmax.f32 %v11518_v28, %v5016_v34  ;;  %v6357_v24 = vmax.f32 %v11519_v55, %v5928_v35  ;;  %v11530_v35 = vld [vmem:[#allocation59_spill] sm:$0xff] }
 0x2b2   : > { %8408 = vst [vmem:[%s10874_s14 + $0xb0] sm:$0xff] %v8215_v39   ;;  %v6593_v14 = vadd.f32 %v10850_v0, %v6472_v6  ;;  %v6473_v15 = vmax.f32 %v6245_v51, %v6359_v9  ;;  %v11529_v6 = vld [vmem:[#allocation70_spill] sm:$0xff] }
 0x2b3   : > { %8407 = vst [vmem:[%s10874_s14 + $0xa8] sm:$0xff] %v8210_v44   ;;  %v6591_v36 = vadd.f32 %v10850_v0, %v6470_v45  ;;  %v6471_v37 = vmax.f32 %v6243_v54, %v6357_v24  ;;  %v11531_v45 = vld [vmem:[#allocation60_spill] sm:$0xff] }
 0x2b4   : > { %v6594_v26 = vadd.f32 %v10850_v0, %v6473_v15  ;;  %v6707_v46 = vmax.f32 %v6593_v14, 0.0  ;;  %v11532_v15 = vld [vmem:[#allocation73_spill] sm:$0xff] }
 0x2b5   : > { %v6592_v25 = vadd.f32 %v10850_v0, %v6471_v37  ;;  %v8843_v58 = vpop.f32.mrb[164].mxu0  ;;  %v9071_v59 = vpop.f32.mrb[164].mxu1  ;;  %v6705_v43 = vmax.f32 %v6591_v36, 0.0  ;;  %v11533_v37 = vld [vmem:[#allocation74_spill] sm:$0xff] }
 0x2b6   : > { %v6708_v47 = vmax.f32 %v6594_v26, 0.0  ;;  %v6248_v40 = vmax.f32 %v11520_v5, %v8843_v58  ;;  %v6362_v42 = vmax.f32 %v11521_v10, %v9071_v59  ;;  %v5029_v11 = vpop.f32.mrb[165].mxu0  ;;  %v5941_v56 = vpop.f32.mrb[165].mxu1 }
 0x2b7   : > { %v6706_v57 = vmax.f32 %v6592_v25, 0.0  ;;  %v6246_v30 = vmax.f32 %v11522_v32, %v5029_v11  ;;  %v6360_v60 = vmax.f32 %v11523_v1, %v5941_v56  ;;  %v8844_v61 = vpop.f32.mrb[166].mxu0  ;;  %v9072_v31 = vpop.f32.mrb[166].mxu1 }
 0x2b8   : > { %v8225_v20 = vpack.c.bf16 %v6708_v47, %v6707_v46  ;;  %v6476_v21 = vmax.f32 %v6248_v40, %v6362_v42  ;;  %v6249_v18 = vmax.f32 %v11524_v27, %v8844_v61  ;;  %v6363_v33 = vmax.f32 %v11525_v19, %v9072_v31  ;;  %v5032_v52 = vpop.f32.mrb[167].mxu0  ;;  %v5944_v4 = vpop.f32.mrb[167].mxu1  ;;  %v11534_v47 = vld [vmem:[#allocation63_spill] sm:$0xff]  ;;  %v11535_v40 = vld [vmem:[#allocation64_spill] sm:$0xff]  ;;  %v11536_v31 = vld [vmem:[#allocation77_spill] sm:$0xff] }
 0x2b9   : > { %v8220_v41 = vpack.c.bf16 %v6706_v57, %v6705_v43  ;;  %v6474_v2 = vmax.f32 %v6246_v30, %v6360_v60  ;;  %v6247_v29 = vmax.f32 %v11526_v3, %v5032_v52  ;;  %v6361_v62 = vmax.f32 %v11527_v16, %v5944_v4  ;;  %v11538_v4 = vld [vmem:[#allocation67_spill] sm:$0xff] }
 0x2ba   : > { %8410 = vst [vmem:[%s10874_s14 + $0xc0] sm:$0xff] %v8225_v20   ;;  %v6597_v17 = vadd.f32 %v10850_v0, %v6476_v21  ;;  %v6477_v63 = vmax.f32 %v6249_v18, %v6363_v33  ;;  %v11537_v21 = vld [vmem:[#allocation78_spill] sm:$0xff] }
 0x2bb   : > { %8409 = vst [vmem:[%s10874_s14 + $0xb8] sm:$0xff] %v8220_v41   ;;  %v6595_v53 = vadd.f32 %v10850_v0, %v6474_v2  ;;  %v6475_v12 = vmax.f32 %v6247_v29, %v6361_v62  ;;  %v11539_v2 = vld [vmem:[#allocation68_spill] sm:$0xff] }
 0x2bc   : > { %v6598_v13 = vadd.f32 %v10850_v0, %v6477_v63  ;;  %v6711_v22 = vmax.f32 %v6597_v17, 0.0  ;;  %v11540_v63 = vld [vmem:[#allocation81_spill] sm:$0xff] }
 0x2bd   : > { %v6596_v38 = vadd.f32 %v10850_v0, %v6475_v12  ;;  %v8847_v48 = vpop.f32.mrb[168].mxu0  ;;  %v9075_v49 = vpop.f32.mrb[168].mxu1  ;;  %v6709_v9 = vmax.f32 %v6595_v53, 0.0  ;;  %v11541_v12 = vld [vmem:[#allocation82_spill] sm:$0xff] }
 0x2be   : > { %v6712_v50 = vmax.f32 %v6598_v13, 0.0  ;;  %v6252_v39 = vmax.f32 %v11528_v23, %v8847_v48  ;;  %v6366_v7 = vmax.f32 %v11529_v6, %v9075_v49  ;;  %v5045_v51 = vpop.f32.mrb[169].mxu0  ;;  %v5957_v8 = vpop.f32.mrb[169].mxu1 }
 0x2bf   : > { %v6710_v34 = vmax.f32 %v6596_v38, 0.0  ;;  %v6250_v44 = vmax.f32 %v11530_v35, %v5045_v51  ;;  %v6364_v28 = vmax.f32 %v11531_v45, %v5957_v8  ;;  %v8848_v54 = vpop.f32.mrb[170].mxu0  ;;  %v9076_v55 = vpop.f32.mrb[170].mxu1 }
 0x2c0   : > { %v8235_v24 = vpack.c.bf16 %v6712_v50, %v6711_v22  ;;  %v6480_v14 = vmax.f32 %v6252_v39, %v6366_v7  ;;  %v6253_v36 = vmax.f32 %v11532_v15, %v8848_v54  ;;  %v6367_v26 = vmax.f32 %v11533_v37, %v9076_v55  ;;  %v5048_v25 = vpop.f32.mrb[171].mxu0  ;;  %v5960_v58 = vpop.f32.mrb[171].mxu1  ;;  %v11542_v50 = vld [vmem:[#allocation71_spill] sm:$0xff]  ;;  %v11543_v39 = vld [vmem:[#allocation72_spill] sm:$0xff]  ;;  %v11544_v55 = vld [vmem:[#allocation85_spill] sm:$0xff] }
 0x2c1   : > { %v8230_v59 = vpack.c.bf16 %v6710_v34, %v6709_v9  ;;  %v6478_v46 = vmax.f32 %v6250_v44, %v6364_v28  ;;  %v6251_v5 = vmax.f32 %v11534_v47, %v5048_v25  ;;  %v6365_v10 = vmax.f32 %v11535_v40, %v5960_v58  ;;  %v11546_v58 = vld [vmem:[#allocation75_spill] sm:$0xff] }
 0x2c2   : > { %8412 = vst [vmem:[%s10874_s14 + $0xd0] sm:$0xff] %v8235_v24   ;;  %v6601_v42 = vadd.f32 %v10850_v0, %v6480_v14  ;;  %v6481_v11 = vmax.f32 %v6253_v36, %v6367_v26  ;;  %v11545_v14 = vld [vmem:[#allocation86_spill] sm:$0xff] }
 0x2c3   : > { %8411 = vst [vmem:[%s10874_s14 + $0xc8] sm:$0xff] %v8230_v59   ;;  %v6599_v56 = vadd.f32 %v10850_v0, %v6478_v46  ;;  %v6479_v43 = vmax.f32 %v6251_v5, %v6365_v10  ;;  %v11547_v46 = vld [vmem:[#allocation76_spill] sm:$0xff] }
 0x2c4   : > { %v6602_v57 = vadd.f32 %v10850_v0, %v6481_v11  ;;  %v6715_v60 = vmax.f32 %v6601_v42, 0.0  ;;  %v11548_v42 = vld [vmem:[#allocation89_spill] sm:$0xff] }
 0x2c5   : > { %v6600_v32 = vadd.f32 %v10850_v0, %v6479_v43  ;;  %v8851_v30 = vpop.f32.mrb[172].mxu0  ;;  %v9079_v1 = vpop.f32.mrb[172].mxu1  ;;  %v6713_v33 = vmax.f32 %v6599_v56, 0.0  ;;  %v11549_v56 = vld [vmem:[#allocation90_spill] sm:$0xff] }
 0x2c6   : > { %v6716_v61 = vmax.f32 %v6602_v57, 0.0  ;;  %v6256_v20 = vmax.f32 %v11536_v31, %v8851_v30  ;;  %v6370_v27 = vmax.f32 %v11537_v21, %v9079_v1  ;;  %v5061_v18 = vpop.f32.mrb[173].mxu0  ;;  %v5973_v19 = vpop.f32.mrb[173].mxu1  ;;  %v11551_v31 = vld [vmem:[#allocation80_spill] sm:$0xff]  ;;  %v11097_v21 = vld [vmem:[%s11286_s2] ss:$0 sm:$0xff] }
 0x2c7   : > { %v6714_v52 = vmax.f32 %v6600_v32, 0.0  ;;  %v6254_v41 = vmax.f32 %v11538_v4, %v5061_v18  ;;  %v6368_v3 = vmax.f32 %v11539_v2, %v5973_v19  ;;  %v8852_v29 = vpop.f32.mrb[174].mxu0  ;;  %v9080_v16 = vpop.f32.mrb[174].mxu1 }
 0x2c8   : > { %v8245_v62 = vpack.c.bf16 %v6716_v61, %v6715_v60  ;;  %v6484_v17 = vmax.f32 %v6256_v20, %v6370_v27  ;;  %v6257_v53 = vmax.f32 %v11540_v63, %v8852_v29  ;;  %v6371_v13 = vmax.f32 %v11541_v12, %v9080_v16  ;;  %v5064_v38 = vpop.f32.mrb[175].mxu0  ;;  %v5976_v48 = vpop.f32.mrb[175].mxu1  ;;  %v11550_v60 = vld [vmem:[#allocation79_spill] sm:$0xff]  ;;  %v11552_v16 = vld [vmem:[#allocation93_spill] sm:$0xff] }
 0x2c9   : > { %v8240_v49 = vpack.c.bf16 %v6714_v52, %v6713_v33  ;;  %v6482_v22 = vmax.f32 %v6254_v41, %v6368_v3  ;;  %v6255_v23 = vmax.f32 %v11542_v50, %v5064_v38  ;;  %v6369_v6 = vmax.f32 %v11543_v39, %v5976_v48  ;;  %v11554_v48 = vld [vmem:[#allocation83_spill] sm:$0xff] }
 0x2ca   : > { %8414 = vst [vmem:[%s10874_s14 + $0xe0] sm:$0xff] %v8245_v62   ;;  %v6605_v7 = vadd.f32 %v10850_v0, %v6484_v17  ;;  %v6485_v51 = vmax.f32 %v6257_v53, %v6371_v13  ;;  %v11553_v17 = vld [vmem:[#allocation94_spill] sm:$0xff] }
 0x2cb   : > { %8413 = vst [vmem:[%s10874_s14 + $0xd8] sm:$0xff] %v8240_v49   ;;  %v6603_v8 = vadd.f32 %v10850_v0, %v6482_v22  ;;  %v6483_v9 = vmax.f32 %v6255_v23, %v6369_v6  ;;  %v11555_v22 = vld [vmem:[#allocation84_spill] sm:$0xff] }
 0x2cc   : > { %v6606_v34 = vadd.f32 %v10850_v0, %v6485_v51  ;;  %v6719_v28 = vmax.f32 %v6605_v7, 0.0  ;;  %v11556_v51 = vld [vmem:[#allocation97_spill] sm:$0xff] }
 0x2cd   : > { %v6604_v35 = vadd.f32 %v10850_v0, %v6483_v9  ;;  %v8855_v44 = vpop.f32.mrb[176].mxu0  ;;  %v9083_v45 = vpop.f32.mrb[176].mxu1  ;;  %v6717_v26 = vmax.f32 %v6603_v8, 0.0  ;;  %v11557_v9 = vld [vmem:[#allocation98_spill] sm:$0xff] }
 0x2ce   : > { %v6720_v54 = vmax.f32 %v6606_v34, 0.0  ;;  %v6260_v24 = vmax.f32 %v11544_v55, %v8855_v44  ;;  %v6374_v15 = vmax.f32 %v11545_v14, %v9083_v45  ;;  %v5077_v36 = vpop.f32.mrb[177].mxu0  ;;  %v5989_v37 = vpop.f32.mrb[177].mxu1 }
 0x2cf   : > { %v6718_v25 = vmax.f32 %v6604_v35, 0.0  ;;  %v6258_v59 = vmax.f32 %v11546_v58, %v5077_v36  ;;  %v6372_v47 = vmax.f32 %v11547_v46, %v5989_v37  ;;  %v8856_v5 = vpop.f32.mrb[178].mxu0  ;;  %v9084_v0 = vpop.f32.mrb[178].mxu1 }
 0x2d0   : > { %v8255_v40 = vpack.c.bf16 %v6720_v54, %v6719_v28  ;;  %v6488_v10 = vmax.f32 %v6260_v24, %v6374_v15  ;;  %v6261_v11 = vmax.f32 %v11548_v42, %v8856_v5  ;;  %v6375_v43 = vmax.f32 %v11549_v56, %v9084_v0  ;;  %v5080_v57 = vpop.f32.mrb[179].mxu0  ;;  %v5992_v32 = vpop.f32.mrb[179].mxu1  ;;  %v11558_v54 = vld [vmem:[#allocation87_spill] sm:$0xff]  ;;  %v11559_v24 = vld [vmem:[#allocation88_spill] sm:$0xff]  ;;  %v11560_v0 = vld [vmem:[#allocation101_spill] sm:$0xff] }
 0x2d1   : > { %v8250_v30 = vpack.c.bf16 %v6718_v25, %v6717_v26  ;;  %v6486_v1 = vmax.f32 %v6258_v59, %v6372_v47  ;;  %v6259_v61 = vmax.f32 %v11550_v60, %v5080_v57  ;;  %v6373_v20 = vmax.f32 %v11551_v31, %v5992_v32  ;;  %v11562_v32 = vld [vmem:[#allocation91_spill] sm:$0xff] }
 0x2d2   : > { %8416 = vst [vmem:[%s10874_s14 + $0xf0] sm:$0xff] %v8255_v40   ;;  %v6609_v27 = vadd.f32 %v11097_v21, %v6488_v10  ;;  %v6489_v18 = vmax.f32 %v6261_v11, %v6375_v43  ;;  %v11561_v10 = vld [vmem:[#allocation102_spill] sm:$0xff] }
 0x2d3   : > { %8415 = vst [vmem:[%s10874_s14 + $0xe8] sm:$0xff] %v8250_v30   ;;  %v6607_v19 = vadd.f32 %v11097_v21, %v6486_v1  ;;  %v6487_v33 = vmax.f32 %v6259_v61, %v6373_v20  ;;  %v11563_v1 = vld [vmem:[#allocation92_spill] sm:$0xff] }
 0x2d4   : > { %v6610_v52 = vadd.f32 %v11097_v21, %v6489_v18  ;;  %v6723_v3 = vmax.f32 %v6609_v27, 0.0  ;;  %v11564_v18 = vld [vmem:[#allocation105_spill] sm:$0xff] }
 0x2d5   : > { %v6608_v4 = vadd.f32 %v11097_v21, %v6487_v33  ;;  %v8859_v41 = vpop.f32.mrb[180].mxu0  ;;  %v9087_v2 = vpop.f32.mrb[180].mxu1  ;;  %v6721_v13 = vmax.f32 %v6607_v19, 0.0  ;;  %v11565_v33 = vld [vmem:[#allocation106_spill] sm:$0xff] }
 0x2d6   : > { %v6724_v29 = vmax.f32 %v6610_v52, 0.0  ;;  %v6264_v62 = vmax.f32 %v11552_v16, %v8859_v41  ;;  %v6378_v63 = vmax.f32 %v11553_v17, %v9087_v2  ;;  %v5093_v53 = vpop.f32.mrb[181].mxu0  ;;  %v6005_v12 = vpop.f32.mrb[181].mxu1 }
 0x2d7   : > { %v6722_v38 = vmax.f32 %v6608_v4, 0.0  ;;  %v6262_v49 = vmax.f32 %v11554_v48, %v5093_v53  ;;  %v6376_v50 = vmax.f32 %v11555_v22, %v6005_v12  ;;  %v8860_v23 = vpop.f32.mrb[182].mxu0  ;;  %v9088_v39 = vpop.f32.mrb[182].mxu1 }
 0x2d8   : > { %v8265_v6 = vpack.c.bf16 %v6724_v29, %v6723_v3  ;;  %v6492_v7 = vmax.f32 %v6264_v62, %v6378_v63  ;;  %v6265_v8 = vmax.f32 %v11556_v51, %v8860_v23  ;;  %v6379_v34 = vmax.f32 %v11557_v9, %v9088_v39  ;;  %v5096_v35 = vpop.f32.mrb[183].mxu0  ;;  %v6008_v44 = vpop.f32.mrb[183].mxu1  ;;  %v11566_v29 = vld [vmem:[#allocation95_spill] sm:$0xff]  ;;  %v11567_v62 = vld [vmem:[#allocation96_spill] sm:$0xff]  ;;  %v11568_v39 = vld [vmem:[#allocation109_spill] sm:$0xff] }
 0x2d9   : > { %v8260_v45 = vpack.c.bf16 %v6722_v38, %v6721_v13  ;;  %v6490_v28 = vmax.f32 %v6262_v49, %v6376_v50  ;;  %v6263_v55 = vmax.f32 %v11558_v54, %v5096_v35  ;;  %v6377_v14 = vmax.f32 %v11559_v24, %v6008_v44  ;;  %v11570_v44 = vld [vmem:[#allocation99_spill] sm:$0xff] }
 0x2da   : > { %8418 = vst [vmem:[%s10874_s14 + $0x100] sm:$0xff] %v8265_v6   ;;  %v6613_v15 = vadd.f32 %v11097_v21, %v6492_v7  ;;  %v6493_v36 = vmax.f32 %v6265_v8, %v6379_v34  ;;  %v11569_v7 = vld [vmem:[#allocation110_spill] sm:$0xff] }
 0x2db   : > { %8417 = vst [vmem:[%s10874_s14 + $0xf8] sm:$0xff] %v8260_v45   ;;  %v6611_v37 = vadd.f32 %v11097_v21, %v6490_v28  ;;  %v6491_v26 = vmax.f32 %v6263_v55, %v6377_v14  ;;  %v11571_v28 = vld [vmem:[#allocation100_spill] sm:$0xff] }
 0x2dc   : > { %v6614_v25 = vadd.f32 %v11097_v21, %v6493_v36  ;;  %v6727_v47 = vmax.f32 %v6613_v15, 0.0  ;;  %v11572_v36 = vld [vmem:[#allocation113_spill] sm:$0xff] }
 0x2dd   : > { %v6612_v58 = vadd.f32 %v11097_v21, %v6491_v26  ;;  %v8863_v59 = vpop.f32.mrb[184].mxu0  ;;  %v9091_v46 = vpop.f32.mrb[184].mxu1  ;;  %v6725_v43 = vmax.f32 %v6611_v37, 0.0  ;;  %v11573_v26 = vld [vmem:[#allocation114_spill] sm:$0xff] }
 0x2de   : > { %v6728_v5 = vmax.f32 %v6614_v25, 0.0  ;;  %v6268_v40 = vmax.f32 %v11560_v0, %v8863_v59  ;;  %v6382_v42 = vmax.f32 %v11561_v10, %v9091_v46  ;;  %v5109_v11 = vpop.f32.mrb[185].mxu0  ;;  %v6021_v56 = vpop.f32.mrb[185].mxu1 }
 0x2df   : > { %v6726_v57 = vmax.f32 %v6612_v58, 0.0  ;;  %v6266_v30 = vmax.f32 %v11562_v32, %v5109_v11  ;;  %v6380_v60 = vmax.f32 %v11563_v1, %v6021_v56  ;;  %v8864_v61 = vpop.f32.mrb[186].mxu0  ;;  %v9092_v31 = vpop.f32.mrb[186].mxu1 }
 0x2e0   : > { %v8275_v20 = vpack.c.bf16 %v6728_v5, %v6727_v47  ;;  %v6496_v27 = vmax.f32 %v6268_v40, %v6382_v42  ;;  %v6269_v19 = vmax.f32 %v11564_v18, %v8864_v61  ;;  %v6383_v52 = vmax.f32 %v11565_v33, %v9092_v31  ;;  %v5112_v4 = vpop.f32.mrb[187].mxu0  ;;  %v6024_v41 = vpop.f32.mrb[187].mxu1  ;;  %v11574_v5 = vld [vmem:[#allocation103_spill] sm:$0xff]  ;;  %v11575_v40 = vld [vmem:[#allocation104_spill] sm:$0xff]  ;;  %v11576_v31 = vld [vmem:[#allocation117_spill] sm:$0xff] }
 0x2e1   : > { %v8270_v2 = vpack.c.bf16 %v6726_v57, %v6725_v43  ;;  %v6494_v3 = vmax.f32 %v6266_v30, %v6380_v60  ;;  %v6267_v16 = vmax.f32 %v11566_v29, %v5112_v4  ;;  %v6381_v17 = vmax.f32 %v11567_v62, %v6024_v41  ;;  %v11578_v41 = vld [vmem:[#allocation107_spill] sm:$0xff] }
 0x2e2   : > { %8420 = vst [vmem:[%s10874_s14 + $0x110] sm:$0xff] %v8275_v20   ;;  %v6617_v63 = vadd.f32 %v11097_v21, %v6496_v27  ;;  %v6497_v53 = vmax.f32 %v6269_v19, %v6383_v52  ;;  %v11577_v27 = vld [vmem:[#allocation118_spill] sm:$0xff] }
 0x2e3   : > { %8419 = vst [vmem:[%s10874_s14 + $0x108] sm:$0xff] %v8270_v2   ;;  %v6615_v12 = vadd.f32 %v11097_v21, %v6494_v3  ;;  %v6495_v13 = vmax.f32 %v6267_v16, %v6381_v17  ;;  %v11579_v3 = vld [vmem:[#allocation108_spill] sm:$0xff] }
 0x2e4   : > { %v6618_v38 = vadd.f32 %v11097_v21, %v6497_v53  ;;  %v6731_v50 = vmax.f32 %v6617_v63, 0.0  ;;  %v11580_v53 = vld [vmem:[#allocation121_spill] sm:$0xff] }
 0x2e5   : > { %v6616_v48 = vadd.f32 %v11097_v21, %v6495_v13  ;;  %v8867_v49 = vpop.f32.mrb[188].mxu0  ;;  %v9095_v22 = vpop.f32.mrb[188].mxu1  ;;  %v6729_v34 = vmax.f32 %v6615_v12, 0.0  ;;  %v11581_v13 = vld [vmem:[#allocation122_spill] sm:$0xff] }
 0x2e6   : > { %v6732_v23 = vmax.f32 %v6618_v38, 0.0  ;;  %v6272_v6 = vmax.f32 %v11568_v39, %v8867_v49  ;;  %v6386_v51 = vmax.f32 %v11569_v7, %v9095_v22  ;;  %v5125_v8 = vpop.f32.mrb[189].mxu0  ;;  %v6037_v9 = vpop.f32.mrb[189].mxu1 }
 0x2e7   : > { %v6730_v35 = vmax.f32 %v6616_v48, 0.0  ;;  %v6270_v45 = vmax.f32 %v11570_v44, %v5125_v8  ;;  %v6384_v54 = vmax.f32 %v11571_v28, %v6037_v9  ;;  %v8868_v55 = vpop.f32.mrb[190].mxu0  ;;  %v9096_v24 = vpop.f32.mrb[190].mxu1 }
 0x2e8   : > { %v8285_v14 = vpack.c.bf16 %v6732_v23, %v6731_v50  ;;  %v6500_v15 = vmax.f32 %v6272_v6, %v6386_v51  ;;  %v6273_v37 = vmax.f32 %v11572_v36, %v8868_v55  ;;  %v6387_v25 = vmax.f32 %v11573_v26, %v9096_v24  ;;  %v5128_v58 = vpop.f32.mrb[191].mxu0  ;;  %v6040_v59 = vpop.f32.mrb[191].mxu1  ;;  %v11582_v23 = vld [vmem:[#allocation111_spill] sm:$0xff]  ;;  %v11583_v6 = vld [vmem:[#allocation112_spill] sm:$0xff]  ;;  %v11584_v24 = vld [vmem:[#allocation125_spill] sm:$0xff] }
 0x2e9   : > { %v8280_v46 = vpack.c.bf16 %v6730_v35, %v6729_v34  ;;  %v6498_v47 = vmax.f32 %v6270_v45, %v6384_v54  ;;  %v6271_v0 = vmax.f32 %v11574_v5, %v5128_v58  ;;  %v6385_v10 = vmax.f32 %v11575_v40, %v6040_v59  ;;  %v11586_v59 = vld [vmem:[#allocation115_spill] sm:$0xff] }
 0x2ea   : > { %8422 = vst [vmem:[%s10874_s14 + $0x120] sm:$0xff] %v8285_v14   ;;  %v6621_v42 = vadd.f32 %v11097_v21, %v6500_v15  ;;  %v6501_v11 = vmax.f32 %v6273_v37, %v6387_v25  ;;  %v11585_v15 = vld [vmem:[#allocation126_spill] sm:$0xff] }
 0x2eb   : > { %8421 = vst [vmem:[%s10874_s14 + $0x118] sm:$0xff] %v8280_v46   ;;  %v6619_v56 = vadd.f32 %v11097_v21, %v6498_v47  ;;  %v6499_v43 = vmax.f32 %v6271_v0, %v6385_v10  ;;  %v11587_v47 = vld [vmem:[#allocation116_spill] sm:$0xff] }
 0x2ec   : > { %v6622_v57 = vadd.f32 %v11097_v21, %v6501_v11  ;;  %v6735_v60 = vmax.f32 %v6621_v42, 0.0  ;;  %v11588_v11 = vld [vmem:[#allocation129_spill] sm:$0xff] }
 0x2ed   : > { %v6620_v32 = vadd.f32 %v11097_v21, %v6499_v43  ;;  %v8871_v30 = vpop.f32.mrb[192].mxu0  ;;  %v9099_v1 = vpop.f32.mrb[192].mxu1  ;;  %v6733_v52 = vmax.f32 %v6619_v56, 0.0  ;;  %v11589_v43 = vld [vmem:[#allocation130_spill] sm:$0xff] }
 0x2ee   : > { %v6736_v61 = vmax.f32 %v6622_v57, 0.0  ;;  %v6276_v20 = vmax.f32 %v11576_v31, %v8871_v30  ;;  %v6390_v18 = vmax.f32 %v11577_v27, %v9099_v1  ;;  %v5141_v19 = vpop.f32.mrb[193].mxu0  ;;  %v6053_v33 = vpop.f32.mrb[193].mxu1 }
 0x2ef   : > { %v6734_v4 = vmax.f32 %v6620_v32, 0.0  ;;  %v6274_v2 = vmax.f32 %v11578_v41, %v5141_v19  ;;  %v6388_v29 = vmax.f32 %v11579_v3, %v6053_v33  ;;  %v8872_v16 = vpop.f32.mrb[194].mxu0  ;;  %v9100_v62 = vpop.f32.mrb[194].mxu1 }
 0x2f0   : > { %v8295_v17 = vpack.c.bf16 %v6736_v61, %v6735_v60  ;;  %v6504_v63 = vmax.f32 %v6276_v20, %v6390_v18  ;;  %v6277_v12 = vmax.f32 %v11580_v53, %v8872_v16  ;;  %v6391_v38 = vmax.f32 %v11581_v13, %v9100_v62  ;;  %v5144_v48 = vpop.f32.mrb[195].mxu0  ;;  %v6056_v49 = vpop.f32.mrb[195].mxu1  ;;  %v11590_v61 = vld [vmem:[#allocation119_spill] sm:$0xff]  ;;  %v11591_v20 = vld [vmem:[#allocation120_spill] sm:$0xff]  ;;  %v11592_v62 = vld [vmem:[#allocation133_spill] sm:$0xff] }
 0x2f1   : > { %v8290_v22 = vpack.c.bf16 %v6734_v4, %v6733_v52  ;;  %v6502_v50 = vmax.f32 %v6274_v2, %v6388_v29  ;;  %v6275_v39 = vmax.f32 %v11582_v23, %v5144_v48  ;;  %v6389_v7 = vmax.f32 %v11583_v6, %v6056_v49  ;;  %v11594_v49 = vld [vmem:[#allocation123_spill] sm:$0xff] }
 0x2f2   : > { %8424 = vst [vmem:[%s10874_s14 + $0x130] sm:$0xff] %v8295_v17   ;;  %v6625_v51 = vadd.f32 %v11097_v21, %v6504_v63  ;;  %v6505_v8 = vmax.f32 %v6277_v12, %v6391_v38  ;;  %v11593_v63 = vld [vmem:[#allocation134_spill] sm:$0xff] }
 0x2f3   : > { %8423 = vst [vmem:[%s10874_s14 + $0x128] sm:$0xff] %v8290_v22   ;;  %v6623_v9 = vadd.f32 %v11097_v21, %v6502_v50  ;;  %v6503_v34 = vmax.f32 %v6275_v39, %v6389_v7  ;;  %v11595_v50 = vld [vmem:[#allocation124_spill] sm:$0xff] }
 0x2f4   : > { %v6626_v35 = vadd.f32 %v11097_v21, %v6505_v8  ;;  %v6739_v54 = vmax.f32 %v6625_v51, 0.0  ;;  %v11596_v8 = vld [vmem:[#allocation137_spill] sm:$0xff] }
 0x2f5   : > { %v6624_v44 = vadd.f32 %v11097_v21, %v6503_v34  ;;  %v8875_v45 = vpop.f32.mrb[196].mxu0  ;;  %v9103_v28 = vpop.f32.mrb[196].mxu1  ;;  %v6737_v25 = vmax.f32 %v6623_v9, 0.0  ;;  %v11597_v34 = vld [vmem:[#allocation138_spill] sm:$0xff] }
 0x2f6   : > { %v6740_v55 = vmax.f32 %v6626_v35, 0.0  ;;  %v6280_v14 = vmax.f32 %v11584_v24, %v8875_v45  ;;  %v6394_v36 = vmax.f32 %v11585_v15, %v9103_v28  ;;  %v5157_v37 = vpop.f32.mrb[197].mxu0  ;;  %v6069_v26 = vpop.f32.mrb[197].mxu1 }
 0x2f7   : > { %v6738_v58 = vmax.f32 %v6624_v44, 0.0  ;;  %v6278_v46 = vmax.f32 %v11586_v59, %v5157_v37  ;;  %v6392_v5 = vmax.f32 %v11587_v47, %v6069_v26  ;;  %v8876_v0 = vpop.f32.mrb[198].mxu0  ;;  %v9104_v40 = vpop.f32.mrb[198].mxu1 }
 0x2f8   : > { %v8305_v10 = vpack.c.bf16 %v6740_v55, %v6739_v54  ;;  %v6508_v42 = vmax.f32 %v6280_v14, %v6394_v36  ;;  %v6281_v56 = vmax.f32 %v11588_v11, %v8876_v0  ;;  %v6395_v57 = vmax.f32 %v11589_v43, %v9104_v40  ;;  %v5160_v32 = vpop.f32.mrb[199].mxu0  ;;  %v6072_v30 = vpop.f32.mrb[199].mxu1  ;;  %v11598_v55 = vld [vmem:[#allocation127_spill] sm:$0xff]  ;;  %v11599_v14 = vld [vmem:[#allocation128_spill] sm:$0xff]  ;;  %v11600_v40 = vld [vmem:[#allocation141_spill] sm:$0xff] }
 0x2f9   : > { %v8300_v1 = vpack.c.bf16 %v6738_v58, %v6737_v25  ;;  %v6506_v60 = vmax.f32 %v6278_v46, %v6392_v5  ;;  %v6279_v31 = vmax.f32 %v11590_v61, %v5160_v32  ;;  %v6393_v27 = vmax.f32 %v11591_v20, %v6072_v30  ;;  %v11602_v30 = vld [vmem:[#allocation131_spill] sm:$0xff] }
 0x2fa   : > { %8426 = vst [vmem:[%s10874_s14 + $0x140] sm:$0xff] %v8305_v10   ;;  %v6629_v18 = vadd.f32 %v11097_v21, %v6508_v42  ;;  %v6509_v19 = vmax.f32 %v6281_v56, %v6395_v57  ;;  %v11601_v42 = vld [vmem:[#allocation142_spill] sm:$0xff] }
 0x2fb   : > { %8425 = vst [vmem:[%s10874_s14 + $0x138] sm:$0xff] %v8300_v1   ;;  %v6627_v33 = vadd.f32 %v11097_v21, %v6506_v60  ;;  %v6507_v52 = vmax.f32 %v6279_v31, %v6393_v27  ;;  %v11603_v60 = vld [vmem:[#allocation132_spill] sm:$0xff] }
 0x2fc   : > { %v6630_v4 = vadd.f32 %v11097_v21, %v6509_v19  ;;  %v6743_v29 = vmax.f32 %v6629_v18, 0.0  ;;  %v11604_v19 = vld [vmem:[#allocation145_spill] sm:$0xff] }
 0x2fd   : > { %v6628_v41 = vadd.f32 %v11097_v21, %v6507_v52  ;;  %v8879_v2 = vpop.f32.mrb[200].mxu0  ;;  %v9107_v3 = vpop.f32.mrb[200].mxu1  ;;  %v6741_v38 = vmax.f32 %v6627_v33, 0.0  ;;  %v11605_v52 = vld [vmem:[#allocation146_spill] sm:$0xff] }
 0x2fe   : > { %v6744_v16 = vmax.f32 %v6630_v4, 0.0  ;;  %v6284_v17 = vmax.f32 %v11592_v62, %v8879_v2  ;;  %v6398_v53 = vmax.f32 %v11593_v63, %v9107_v3  ;;  %v5173_v12 = vpop.f32.mrb[201].mxu0  ;;  %v6085_v13 = vpop.f32.mrb[201].mxu1 }
 0x2ff   : > { %v6742_v48 = vmax.f32 %v6628_v41, 0.0  ;;  %v6282_v22 = vmax.f32 %v11594_v49, %v5173_v12  ;;  %v6396_v23 = vmax.f32 %v11595_v50, %v6085_v13  ;;  %v8880_v39 = vpop.f32.mrb[202].mxu0  ;;  %v9108_v6 = vpop.f32.mrb[202].mxu1 }
 0x300   : > { %v8315_v7 = vpack.c.bf16 %v6744_v16, %v6743_v29  ;;  %v6512_v51 = vmax.f32 %v6284_v17, %v6398_v53  ;;  %v6285_v9 = vmax.f32 %v11596_v8, %v8880_v39  ;;  %v6399_v35 = vmax.f32 %v11597_v34, %v9108_v6  ;;  %v5176_v44 = vpop.f32.mrb[203].mxu0  ;;  %v6088_v45 = vpop.f32.mrb[203].mxu1  ;;  %v11606_v16 = vld [vmem:[#allocation135_spill] sm:$0xff]  ;;  %v11607_v17 = vld [vmem:[#allocation136_spill] sm:$0xff]  ;;  %v11608_v6 = vld [vmem:[#allocation149_spill] sm:$0xff] }
 0x301   : > { %v8310_v28 = vpack.c.bf16 %v6742_v48, %v6741_v38  ;;  %v6510_v54 = vmax.f32 %v6282_v22, %v6396_v23  ;;  %v6283_v24 = vmax.f32 %v11598_v55, %v5176_v44  ;;  %v6397_v15 = vmax.f32 %v11599_v14, %v6088_v45  ;;  %v11610_v45 = vld [vmem:[#allocation139_spill] sm:$0xff] }
 0x302   : > { %8428 = vst [vmem:[%s10874_s14 + $0x150] sm:$0xff] %v8315_v7   ;;  %v6633_v36 = vadd.f32 %v11097_v21, %v6512_v51  ;;  %v6513_v37 = vmax.f32 %v6285_v9, %v6399_v35  ;;  %v11609_v51 = vld [vmem:[#allocation150_spill] sm:$0xff] }
 0x303   : > { %8427 = vst [vmem:[%s10874_s14 + $0x148] sm:$0xff] %v8310_v28   ;;  %v6631_v26 = vadd.f32 %v11097_v21, %v6510_v54  ;;  %v6511_v25 = vmax.f32 %v6283_v24, %v6397_v15  ;;  %v11611_v54 = vld [vmem:[#allocation140_spill] sm:$0xff] }
 0x304   : > { %v6634_v58 = vadd.f32 %v11097_v21, %v6513_v37  ;;  %v6747_v5 = vmax.f32 %v6633_v36, 0.0  ;;  %v11612_v37 = vld [vmem:[#allocation153_spill] sm:$0xff] }
 0x305   : > { %v6632_v59 = vadd.f32 %v11097_v21, %v6511_v25  ;;  %v8883_v46 = vpop.f32.mrb[204].mxu0  ;;  %v9111_v47 = vpop.f32.mrb[204].mxu1  ;;  %v6745_v57 = vmax.f32 %v6631_v26, 0.0  ;;  %v11613_v25 = vld [vmem:[#allocation154_spill] sm:$0xff] }
 0x306   : > { %v6748_v0 = vmax.f32 %v6634_v58, 0.0  ;;  %v6288_v10 = vmax.f32 %v11600_v40, %v8883_v46  ;;  %v6402_v11 = vmax.f32 %v11601_v42, %v9111_v47  ;;  %v5189_v56 = vpop.f32.mrb[205].mxu0  ;;  %v6101_v43 = vpop.f32.mrb[205].mxu1 }
 0x307   : > { %v6746_v32 = vmax.f32 %v6632_v59, 0.0  ;;  %v6286_v1 = vmax.f32 %v11602_v30, %v5189_v56  ;;  %v6400_v61 = vmax.f32 %v11603_v60, %v6101_v43  ;;  %v8884_v31 = vpop.f32.mrb[206].mxu0  ;;  %v9112_v20 = vpop.f32.mrb[206].mxu1 }
 0x308   : > { %v8325_v27 = vpack.c.bf16 %v6748_v0, %v6747_v5  ;;  %v6516_v18 = vmax.f32 %v6288_v10, %v6402_v11  ;;  %v6289_v33 = vmax.f32 %v11604_v19, %v8884_v31  ;;  %v6403_v4 = vmax.f32 %v11605_v52, %v9112_v20  ;;  %v5192_v41 = vpop.f32.mrb[207].mxu0  ;;  %v6104_v2 = vpop.f32.mrb[207].mxu1  ;;  %v11614_v0 = vld [vmem:[#allocation143_spill] sm:$0xff]  ;;  %v11615_v10 = vld [vmem:[#allocation144_spill] sm:$0xff]  ;;  %v11616_v20 = vld [vmem:[#allocation157_spill] sm:$0xff] }
 0x309   : > { %v8320_v3 = vpack.c.bf16 %v6746_v32, %v6745_v57  ;;  %v6514_v29 = vmax.f32 %v6286_v1, %v6400_v61  ;;  %v6287_v62 = vmax.f32 %v11606_v16, %v5192_v41  ;;  %v6401_v63 = vmax.f32 %v11607_v17, %v6104_v2  ;;  %v11618_v2 = vld [vmem:[#allocation147_spill] sm:$0xff] }
 0x30a   : > { %8430 = vst [vmem:[%s10874_s14 + $0x160] sm:$0xff] %v8325_v27   ;;  %v6637_v53 = vadd.f32 %v11097_v21, %v6516_v18  ;;  %v6517_v12 = vmax.f32 %v6289_v33, %v6403_v4  ;;  %v11617_v18 = vld [vmem:[#allocation158_spill] sm:$0xff] }
 0x30b   : > { %8429 = vst [vmem:[%s10874_s14 + $0x158] sm:$0xff] %v8320_v3   ;;  %v6635_v13 = vadd.f32 %v11097_v21, %v6514_v29  ;;  %v6515_v38 = vmax.f32 %v6287_v62, %v6401_v63  ;;  %v11619_v29 = vld [vmem:[#allocation148_spill] sm:$0xff] }
 0x30c   : > { %v6638_v48 = vadd.f32 %v11097_v21, %v6517_v12  ;;  %v6751_v23 = vmax.f32 %v6637_v53, 0.0  ;;  %v11620_v12 = vld [vmem:[#allocation161_spill] sm:$0xff] }
 0x30d   : > { %v6636_v49 = vadd.f32 %v11097_v21, %v6515_v38  ;;  %v8887_v22 = vpop.f32.mrb[208].mxu0  ;;  %v9115_v50 = vpop.f32.mrb[208].mxu1  ;;  %v6749_v35 = vmax.f32 %v6635_v13, 0.0  ;;  %v11621_v38 = vld [vmem:[#allocation162_spill] sm:$0xff] }
 0x30e   : > { %v6752_v39 = vmax.f32 %v6638_v48, 0.0  ;;  %v6292_v7 = vmax.f32 %v11608_v6, %v8887_v22  ;;  %v6406_v8 = vmax.f32 %v11609_v51, %v9115_v50  ;;  %v5205_v9 = vpop.f32.mrb[209].mxu0  ;;  %v6117_v34 = vpop.f32.mrb[209].mxu1 }
 0x30f   : > { %v6750_v44 = vmax.f32 %v6636_v49, 0.0  ;;  %v6290_v28 = vmax.f32 %v11610_v45, %v5205_v9  ;;  %v6404_v55 = vmax.f32 %v11611_v54, %v6117_v34  ;;  %v8888_v24 = vpop.f32.mrb[210].mxu0  ;;  %v9116_v14 = vpop.f32.mrb[210].mxu1 }
 0x310   : > { %v8335_v15 = vpack.c.bf16 %v6752_v39, %v6751_v23  ;;  %v6520_v36 = vmax.f32 %v6292_v7, %v6406_v8  ;;  %v6293_v26 = vmax.f32 %v11612_v37, %v8888_v24  ;;  %v6407_v58 = vmax.f32 %v11613_v25, %v9116_v14  ;;  %v5208_v59 = vpop.f32.mrb[211].mxu0  ;;  %v6120_v46 = vpop.f32.mrb[211].mxu1  ;;  %v11622_v39 = vld [vmem:[#allocation151_spill] sm:$0xff]  ;;  %v11623_v7 = vld [vmem:[#allocation152_spill] sm:$0xff]  ;;  %v11624_v14 = vld [vmem:[#allocation165_spill] sm:$0xff] }
 0x311   : > { %v8330_v47 = vpack.c.bf16 %v6750_v44, %v6749_v35  ;;  %v6518_v5 = vmax.f32 %v6290_v28, %v6404_v55  ;;  %v6291_v40 = vmax.f32 %v11614_v0, %v5208_v59  ;;  %v6405_v42 = vmax.f32 %v11615_v10, %v6120_v46  ;;  %v11626_v46 = vld [vmem:[#allocation155_spill] sm:$0xff] }
 0x312   : > { %8432 = vst [vmem:[%s10874_s14 + $0x170] sm:$0xff] %v8335_v15   ;;  %v6641_v11 = vadd.f32 %v11097_v21, %v6520_v36  ;;  %v6521_v56 = vmax.f32 %v6293_v26, %v6407_v58  ;;  %v11625_v36 = vld [vmem:[#allocation166_spill] sm:$0xff] }
 0x313   : > { %8431 = vst [vmem:[%s10874_s14 + $0x168] sm:$0xff] %v8330_v47   ;;  %v6639_v43 = vadd.f32 %v11097_v21, %v6518_v5  ;;  %v6519_v57 = vmax.f32 %v6291_v40, %v6405_v42  ;;  %v11627_v5 = vld [vmem:[#allocation156_spill] sm:$0xff] }
 0x314   : > { %v6642_v32 = vadd.f32 %v11097_v21, %v6521_v56  ;;  %v6755_v61 = vmax.f32 %v6641_v11, 0.0  ;;  %v11628_v56 = vld [vmem:[#allocation169_spill] sm:$0xff] }
 0x315   : > { %v6640_v30 = vadd.f32 %v11097_v21, %v6519_v57  ;;  %v8891_v1 = vpop.f32.mrb[212].mxu0  ;;  %v9119_v60 = vpop.f32.mrb[212].mxu1  ;;  %v6753_v4 = vmax.f32 %v6639_v43, 0.0  ;;  %v11629_v57 = vld [vmem:[#allocation170_spill] sm:$0xff] }
 0x316   : > { %v6756_v31 = vmax.f32 %v6642_v32, 0.0  ;;  %v6296_v27 = vmax.f32 %v11616_v20, %v8891_v1  ;;  %v6410_v19 = vmax.f32 %v11617_v18, %v9119_v60  ;;  %v5221_v33 = vpop.f32.mrb[213].mxu0  ;;  %v6133_v52 = vpop.f32.mrb[213].mxu1 }
 0x317   : > { %v6754_v41 = vmax.f32 %v6640_v30, 0.0  ;;  %v6294_v3 = vmax.f32 %v11618_v2, %v5221_v33  ;;  %v6408_v16 = vmax.f32 %v11619_v29, %v6133_v52  ;;  %v8892_v62 = vpop.f32.mrb[214].mxu0  ;;  %v9120_v17 = vpop.f32.mrb[214].mxu1 }
 0x318   : > { %v8345_v63 = vpack.c.bf16 %v6756_v31, %v6755_v61  ;;  %v6524_v53 = vmax.f32 %v6296_v27, %v6410_v19  ;;  %v6297_v13 = vmax.f32 %v11620_v12, %v8892_v62  ;;  %v6411_v48 = vmax.f32 %v11621_v38, %v9120_v17  ;;  %v5224_v49 = vpop.f32.mrb[215].mxu0  ;;  %v6136_v22 = vpop.f32.mrb[215].mxu1  ;;  %v11630_v31 = vld [vmem:[#allocation159_spill] sm:$0xff]  ;;  %v11631_v27 = vld [vmem:[#allocation160_spill] sm:$0xff]  ;;  %v11632_v17 = vld [vmem:[#allocation173_spill] sm:$0xff] }
 0x319   : > { %v8340_v50 = vpack.c.bf16 %v6754_v41, %v6753_v4  ;;  %v6522_v23 = vmax.f32 %v6294_v3, %v6408_v16  ;;  %v6295_v6 = vmax.f32 %v11622_v39, %v5224_v49  ;;  %v6409_v51 = vmax.f32 %v11623_v7, %v6136_v22  ;;  %v11634_v22 = vld [vmem:[#allocation163_spill] sm:$0xff] }
 0x31a   : > { %8434 = vst [vmem:[%s10874_s14 + $0x180] sm:$0xff] %v8345_v63   ;;  %v6645_v8 = vadd.f32 %v11097_v21, %v6524_v53  ;;  %v6525_v9 = vmax.f32 %v6297_v13, %v6411_v48  ;;  %v11633_v53 = vld [vmem:[#allocation174_spill] sm:$0xff] }
 0x31b   : > { %8433 = vst [vmem:[%s10874_s14 + $0x178] sm:$0xff] %v8340_v50   ;;  %v6643_v34 = vadd.f32 %v11097_v21, %v6522_v23  ;;  %v6523_v35 = vmax.f32 %v6295_v6, %v6409_v51  ;;  %v11635_v23 = vld [vmem:[#allocation164_spill] sm:$0xff] }
 0x31c   : > { %v6646_v44 = vadd.f32 %v11097_v21, %v6525_v9  ;;  %v6759_v55 = vmax.f32 %v6645_v8, 0.0  ;;  %v11636_v9 = vld [vmem:[#allocation177_spill] sm:$0xff] }
 0x31d   : > { %v6644_v45 = vadd.f32 %v11097_v21, %v6523_v35  ;;  %v8895_v28 = vpop.f32.mrb[216].mxu0  ;;  %v9123_v54 = vpop.f32.mrb[216].mxu1  ;;  %v6757_v58 = vmax.f32 %v6643_v34, 0.0  ;;  %v11637_v35 = vld [vmem:[#allocation178_spill] sm:$0xff] }
 0x31e   : > { %v6760_v24 = vmax.f32 %v6646_v44, 0.0  ;;  %v6300_v15 = vmax.f32 %v11624_v14, %v8895_v28  ;;  %v6414_v37 = vmax.f32 %v11625_v36, %v9123_v54  ;;  %v5237_v26 = vpop.f32.mrb[217].mxu0  ;;  %v6149_v25 = vpop.f32.mrb[217].mxu1 }
 0x31f   : > { %v6758_v59 = vmax.f32 %v6644_v45, 0.0  ;;  %v6298_v47 = vmax.f32 %v11626_v46, %v5237_v26  ;;  %v6412_v0 = vmax.f32 %v11627_v5, %v6149_v25  ;;  %v8896_v40 = vpop.f32.mrb[218].mxu0  ;;  %v9124_v10 = vpop.f32.mrb[218].mxu1 }
 0x320   : > { %v8355_v42 = vpack.c.bf16 %v6760_v24, %v6759_v55  ;;  %v6528_v11 = vmax.f32 %v6300_v15, %v6414_v37  ;;  %v6301_v43 = vmax.f32 %v11628_v56, %v8896_v40  ;;  %v6415_v32 = vmax.f32 %v11629_v57, %v9124_v10  ;;  %v5240_v30 = vpop.f32.mrb[219].mxu0  ;;  %v6152_v1 = vpop.f32.mrb[219].mxu1  ;;  %v11638_v24 = vld [vmem:[#allocation167_spill] sm:$0xff]  ;;  %v11639_v15 = vld [vmem:[#allocation168_spill] sm:$0xff] }
 0x321   : > { %v8350_v60 = vpack.c.bf16 %v6758_v59, %v6757_v58  ;;  %v6526_v61 = vmax.f32 %v6298_v47, %v6412_v0  ;;  %v6299_v20 = vmax.f32 %v11630_v31, %v5240_v30  ;;  %v6413_v18 = vmax.f32 %v11631_v27, %v6152_v1  ;;  %v11640_v10 = vld [vmem:[#allocation179_spill] sm:$0xff] }
 0x322   : > { %8436 = vst [vmem:[%s10874_s14 + $0x190] sm:$0xff] %v8355_v42   ;;  %v6649_v19 = vadd.f32 %v11097_v21, %v6528_v11  ;;  %v6529_v33 = vmax.f32 %v6301_v43, %v6415_v32  ;;  %v11641_v11 = vld [vmem:[#allocation180_spill] sm:$0xff]  ;;  %v11642_v1 = vld [vmem:[#allocation171_spill] sm:$0xff] }
 0x323   : > { %8435 = vst [vmem:[%s10874_s14 + $0x188] sm:$0xff] %v8350_v60   ;;  %v6647_v52 = vadd.f32 %v11097_v21, %v6526_v61  ;;  %v6527_v4 = vmax.f32 %v6299_v20, %v6413_v18  ;;  %v11643_v61 = vld [vmem:[#allocation172_spill] sm:$0xff] }
 0x324   : > { %v6650_v41 = vadd.f32 %v11097_v21, %v6529_v33  ;;  %v6763_v16 = vmax.f32 %v6649_v19, 0.0  ;;  %v11644_v33 = vld [vmem:[#allocation181_spill] sm:$0xff] }
 0x325   : > { %v6648_v2 = vadd.f32 %v11097_v21, %v6527_v4  ;;  %v8899_v3 = vpop.f32.mrb[220].mxu0  ;;  %v9127_v29 = vpop.f32.mrb[220].mxu1  ;;  %v6761_v48 = vmax.f32 %v6647_v52, 0.0  ;;  %v11645_v4 = vld [vmem:[#allocation182_spill] sm:$0xff] }
 0x326   : > { %v6764_v62 = vmax.f32 %v6650_v41, 0.0  ;;  %v6304_v63 = vmax.f32 %v11632_v17, %v8899_v3  ;;  %v6418_v12 = vmax.f32 %v11633_v53, %v9127_v29  ;;  %v5253_v13 = vpop.f32.mrb[221].mxu0  ;;  %v6165_v38 = vpop.f32.mrb[221].mxu1 }
 0x327   : > { %v6762_v49 = vmax.f32 %v6648_v2, 0.0  ;;  %v6302_v50 = vmax.f32 %v11634_v22, %v5253_v13  ;;  %v6416_v39 = vmax.f32 %v11635_v23, %v6165_v38  ;;  %v8900_v6 = vpop.f32.mrb[222].mxu0  ;;  %v9128_v7 = vpop.f32.mrb[222].mxu1 }
 0x328   : > { %v8365_v51 = vpack.c.bf16 %v6764_v62, %v6763_v16  ;;  %v6532_v8 = vmax.f32 %v6304_v63, %v6418_v12  ;;  %v6305_v34 = vmax.f32 %v11636_v9, %v8900_v6  ;;  %v6419_v44 = vmax.f32 %v11637_v35, %v9128_v7  ;;  %v5256_v45 = vpop.f32.mrb[223].mxu0  ;;  %v6168_v28 = vpop.f32.mrb[223].mxu1  ;;  %v11646_v62 = vld [vmem:[#allocation175_spill] sm:$0xff]  ;;  %v11647_v63 = vld [vmem:[#allocation176_spill] sm:$0xff] }
 0x329   : > { %v8360_v54 = vpack.c.bf16 %v6762_v49, %v6761_v48  ;;  %v6530_v55 = vmax.f32 %v6302_v50, %v6416_v39  ;;  %v6303_v14 = vmax.f32 %v11638_v24, %v5256_v45  ;;  %v6417_v36 = vmax.f32 %v11639_v15, %v6168_v28 }
 0x32a   : > { %8438 = vst [vmem:[%s10874_s14 + $0x1a0] sm:$0xff] %v8365_v51   ;;  %v6653_v37 = vadd.f32 %v11097_v21, %v6532_v8  ;;  %v6533_v26 = vmax.f32 %v6305_v34, %v6419_v44 }
 0x32b   : > { %8437 = vst [vmem:[%s10874_s14 + $0x198] sm:$0xff] %v8360_v54   ;;  %v6651_v25 = vadd.f32 %v11097_v21, %v6530_v55  ;;  %v6531_v58 = vmax.f32 %v6303_v14, %v6417_v36 }
 0x32c   : > { %v6654_v59 = vadd.f32 %v11097_v21, %v6533_v26  ;;  %v6767_v0 = vmax.f32 %v6653_v37, 0.0 }
 0x32d   : > { %v6652_v46 = vadd.f32 %v11097_v21, %v6531_v58  ;;  %v8903_v47 = vpop.f32.mrb[224].mxu0  ;;  %v9131_v5 = vpop.f32.mrb[224].mxu1  ;;  %v6765_v32 = vmax.f32 %v6651_v25, 0.0 }
 0x32e   : > { %v6768_v40 = vmax.f32 %v6654_v59, 0.0  ;;  %v6308_v42 = vmax.f32 %v11640_v10, %v8903_v47  ;;  %v6422_v56 = vmax.f32 %v11641_v11, %v9131_v5  ;;  %v5269_v43 = vpop.f32.mrb[225].mxu0  ;;  %v6181_v57 = vpop.f32.mrb[225].mxu1 }
 0x32f   : > { %v6766_v30 = vmax.f32 %v6652_v46, 0.0  ;;  %v6306_v60 = vmax.f32 %v11642_v1, %v5269_v43  ;;  %v6420_v31 = vmax.f32 %v11643_v61, %v6181_v57  ;;  %v8904_v20 = vpop.f32.mrb[226].mxu0  ;;  %v9132_v27 = vpop.f32.mrb[226].mxu1 }
 0x330   : > { %v8375_v18 = vpack.c.bf16 %v6768_v40, %v6767_v0  ;;  %v6536_v19 = vmax.f32 %v6308_v42, %v6422_v56  ;;  %v6309_v52 = vmax.f32 %v11644_v33, %v8904_v20  ;;  %v6423_v41 = vmax.f32 %v11645_v4, %v9132_v27  ;;  %v5272_v2 = vpop.f32.mrb[227].mxu0  ;;  %v6184_v3 = vpop.f32.mrb[227].mxu1 }
 0x331   : > { %v8370_v29 = vpack.c.bf16 %v6766_v30, %v6765_v32  ;;  %v6534_v16 = vmax.f32 %v6306_v60, %v6420_v31  ;;  %v6307_v17 = vmax.f32 %v11646_v62, %v5272_v2  ;;  %v6421_v53 = vmax.f32 %v11647_v63, %v6184_v3 }
 0x332   : > { %8440 = vst [vmem:[%s10874_s14 + $0x1b0] sm:$0xff] %v8375_v18   ;;  %v6657_v12 = vadd.f32 %v11097_v21, %v6536_v19  ;;  %v6537_v13 = vmax.f32 %v6309_v52, %v6423_v41 }
 0x333   : > { %8439 = vst [vmem:[%s10874_s14 + $0x1a8] sm:$0xff] %v8370_v29   ;;  %v6655_v38 = vadd.f32 %v11097_v21, %v6534_v16  ;;  %v6535_v48 = vmax.f32 %v6307_v17, %v6421_v53 }
 0x334   : > { %v6658_v49 = vadd.f32 %v11097_v21, %v6537_v13  ;;  %v6771_v50 = vmax.f32 %v6657_v12, 0.0 }
 0x335   : > { %v6656_v22 = vadd.f32 %v11097_v21, %v6535_v48  ;;  %v6769_v39 = vmax.f32 %v6655_v38, 0.0 }
 0x336   : > { %v6772_v23 = vmax.f32 %v6658_v49, 0.0 }
 0x337   : > { %v6770_v6 = vmax.f32 %v6656_v22, 0.0 }
 0x338   : > { %v8385_v7 = vpack.c.bf16 %v6772_v23, %v6771_v50 }
 0x339   : > { %v8380_v51 = vpack.c.bf16 %v6770_v6, %v6769_v39 }
 0x33a   : > { %8442 = vst [vmem:[%s10874_s14 + $0x1c0] sm:$0xff] %v8385_v7  }
 0x33b   : > { %8441 = vst [vmem:[%s10874_s14 + $0x1b8] sm:$0xff] %v8380_v51  }
 0x33c PF: > { %p10_p9 = scmp.ge.s32.totalorder %s9457_s16, 4   ;;  %s11648_s12 = smov %s9413_s13 }
 0x33d   : > { %s11649_s13 = smov %s9466_s19  ;;  %s11650_s14 = smov %s9457_s16 }
 0x33e   :  { %12 = sbr.rel (!%p10_p9) target bundleno = 2 (0x2), region = 108 }

// kernel: neuralnet_forward.4
= control target key start
LH: loop header
LB: loop body
LE: loop exit
PB: predicated region body
PF: predicated region fallthrough
CT: control target
= control target key end

     0   :  { %s2428_s12 = smov 0   ;;  %s2430_s13 = smov 0   ;;  %s2996_s0 = inlined_call_operand.vmem [shape: bf16[4,352,150], index: 0, kind: input, shape index: {}]   ;;  %s2997_s1 = inlined_call_operand.vmem [shape: bf16[150,128], index: 1, kind: input, shape index: {}]   ;;  %s2998_s2 = inlined_call_operand.vmem [shape: f32[1,128], index: 2, kind: input, shape index: {}]   ;;  %s2999_s3 = inlined_call_operand.vmem [shape: bf16[352,128], index: 3, kind: output, shape index: {}]  }
   0x1   :  { %s2432_s14 = smov 0  }
   0x2 LB: > { %s1929_s15 = sadd.s32 4294967295, %s2405_s14   ;;  %s2445_s16 = sadd.s32 1, %s2405_s14   ;;  %s2405_s14 = sphi %s2432_s14, %s3002_s14   ;;  %s2401_s13 = sphi %s2430_s13, %s3001_s13   ;;  %s2397_s12 = sphi %s2428_s12, %s3000_s12  }
   0x3   : > { %s17_s17 = ssub.s32 %s2405_s14, %s2445_s16  ;;  %s20_s18 = sadd.s32 1, %s2401_s13 }
   0x4   : > { %p18_p0 = scmp.eq.s32.totalorder %s17_s17, 0  ;;  %p27_p1 = scmp.ne.s32.totalorder %s2401_s13, %s2397_s12 }
   0x5   : > { %p28_p2 = scmp.eq.s32.totalorder %s2405_s14, 0  ;;  %p1932_p4 = scmp.ge.s32.totalorder %s2405_s14, 2 }
   0x6   : > { %s2454_s19 = scalar_select %p18_p0, %s2401_s13, %s20_s18  }
   0x7   : > { %p29_p3 = por %p28_p2, %p27_p1  ;;  %127 = sbr.rel (%p1932_p4) target bundleno = 63 (0x3f), region = 24 }
   0xe   : > { %130 = sbr.rel (!%p29_p3) target bundleno = 63 (0x3f), region = 28  ;;  %s132_s20 = sand.u32 (%p29_p3), 1, %s2401_s13  }
   0xf   : > { %s2183_s21 = smul.u32 (%p29_p3), 176, %s2405_s14 }
  0x10   : > { %s2214_s22 = smul.u32 (%p29_p3), 704, %s132_s20 }
  0x11   : > { %s2462_s25 = scalar_lea.vmem (%p29_p3), %s2996_s0, %s2183_s21 }
  0x12   : > { %v340_v0 = vld [vmem:[%s2462_s25] sm:$0xff] (%p29_p3)  ;;  %v342_v1 = vld [vmem:[%s2462_s25 + $0x8] sm:$0xff] (%p29_p3)  ;;  %v344_v2 = vld [vmem:[%s2462_s25 + $0x10] sm:$0xff] (%p29_p3)  ;;  %s2467_s26 = scalar_lea.vmem (%p29_p3), [#allocation2], %s2214_s22 }
  0x13   : > { %341 = vst [vmem:[%s2467_s26] sm:$0xff] (%p29_p3), %v340_v0  ;;  %343 = vst [vmem:[%s2467_s26 + $0x8] sm:$0xff] (%p29_p3), %v342_v1  ;;  %v346_v3 = vld [vmem:[%s2462_s25 + $0x18] sm:$0xff] (%p29_p3)  ;;  %v348_v4 = vld [vmem:[%s2462_s25 + $0x20] sm:$0xff] (%p29_p3) }
  0x14   : > { %345 = vst [vmem:[%s2467_s26 + $0x10] sm:$0xff] (%p29_p3), %v344_v2  ;;  %v350_v5 = vld [vmem:[%s2462_s25 + $0x28] sm:$0xff] (%p29_p3)  ;;  %347 = vst [vmem:[%s2467_s26 + $0x18] sm:$0xff] (%p29_p3), %v346_v3  ;;  %v352_v6 = vld [vmem:[%s2462_s25 + $0x30] sm:$0xff] (%p29_p3) }
  0x15   : > { %349 = vst [vmem:[%s2467_s26 + $0x20] sm:$0xff] %v348_v4  ;;  %351 = vst [vmem:[%s2467_s26 + $0x28] sm:$0xff] %v350_v5  ;;  %v354_v7 = vld [vmem:[%s2462_s25 + $0x38] sm:$0xff]  ;;  %v356_v8 = vld [vmem:[%s2462_s25 + $0x40] sm:$0xff] }
  0x16   : > { %353 = vst [vmem:[%s2467_s26 + $0x30] sm:$0xff] %v352_v6  ;;  %355 = vst [vmem:[%s2467_s26 + $0x38] sm:$0xff] %v354_v7  ;;  %v358_v9 = vld [vmem:[%s2462_s25 + $0x48] sm:$0xff]  ;;  %v360_v10 = vld [vmem:[%s2462_s25 + $0x50] sm:$0xff] }
  0x17   : > { %357 = vst [vmem:[%s2467_s26 + $0x40] sm:$0xff] %v356_v8  ;;  %v362_v11 = vld [vmem:[%s2462_s25 + $0x58] sm:$0xff]  ;;  %359 = vst [vmem:[%s2467_s26 + $0x48] sm:$0xff] %v358_v9  ;;  %v364_v12 = vld [vmem:[%s2462_s25 + $0x60] sm:$0xff] }
  0x18   : > { %361 = vst [vmem:[%s2467_s26 + $0x50] sm:$0xff] %v360_v10  ;;  %363 = vst [vmem:[%s2467_s26 + $0x58] sm:$0xff] %v362_v11  ;;  %v366_v13 = vld [vmem:[%s2462_s25 + $0x68] sm:$0xff]  ;;  %v368_v14 = vld [vmem:[%s2462_s25 + $0x70] sm:$0xff] }
  0x19   : > { %365 = vst [vmem:[%s2467_s26 + $0x60] sm:$0xff] %v364_v12  ;;  %367 = vst [vmem:[%s2467_s26 + $0x68] sm:$0xff] %v366_v13  ;;  %v370_v15 = vld [vmem:[%s2462_s25 + $0x78] sm:$0xff]  ;;  %v372_v16 = vld [vmem:[%s2462_s25 + $0x80] sm:$0xff] }
  0x1a   : > { %369 = vst [vmem:[%s2467_s26 + $0x70] sm:$0xff] %v368_v14  ;;  %v374_v17 = vld [vmem:[%s2462_s25 + $0x88] sm:$0xff]  ;;  %371 = vst [vmem:[%s2467_s26 + $0x78] sm:$0xff] %v370_v15  ;;  %v376_v18 = vld [vmem:[%s2462_s25 + $0x90] sm:$0xff] }
  0x1b   : > { %373 = vst [vmem:[%s2467_s26 + $0x80] sm:$0xff] %v372_v16  ;;  %375 = vst [vmem:[%s2467_s26 + $0x88] sm:$0xff] %v374_v17  ;;  %v378_v19 = vld [vmem:[%s2462_s25 + $0x98] sm:$0xff]  ;;  %v380_v20 = vld [vmem:[%s2462_s25 + $0xa0] sm:$0xff] }
  0x1c   : > { %377 = vst [vmem:[%s2467_s26 + $0x90] sm:$0xff] %v376_v18  ;;  %379 = vst [vmem:[%s2467_s26 + $0x98] sm:$0xff] %v378_v19  ;;  %v382_v21 = vld [vmem:[%s2462_s25 + $0xa8] sm:$0xff]  ;;  %v384_v22 = vld [vmem:[%s2462_s25 + $0x160] sm:$0xff] }
  0x1d   : > { %381 = vst [vmem:[%s2467_s26 + $0xa0] sm:$0xff] %v380_v20  ;;  %v386_v23 = vld [vmem:[%s2462_s25 + $0x168] sm:$0xff]  ;;  %383 = vst [vmem:[%s2467_s26 + $0xa8] sm:$0xff] %v382_v21  ;;  %v388_v24 = vld [vmem:[%s2462_s25 + $0x170] sm:$0xff] }
  0x1e   : > { %385 = vst [vmem:[%s2467_s26 + $0xb0] sm:$0xff] %v384_v22  ;;  %387 = vst [vmem:[%s2467_s26 + $0xb8] sm:$0xff] %v386_v23  ;;  %v390_v25 = vld [vmem:[%s2462_s25 + $0x178] sm:$0xff]  ;;  %v392_v26 = vld [vmem:[%s2462_s25 + $0x180] sm:$0xff] }
  0x1f   : > { %389 = vst [vmem:[%s2467_s26 + $0xc0] sm:$0xff] %v388_v24  ;;  %391 = vst [vmem:[%s2467_s26 + $0xc8] sm:$0xff] %v390_v25  ;;  %v394_v27 = vld [vmem:[%s2462_s25 + $0x188] sm:$0xff]  ;;  %v396_v28 = vld [vmem:[%s2462_s25 + $0x190] sm:$0xff] }
  0x20   : > { %393 = vst [vmem:[%s2467_s26 + $0xd0] sm:$0xff] %v392_v26  ;;  %v398_v29 = vld [vmem:[%s2462_s25 + $0x198] sm:$0xff]  ;;  %395 = vst [vmem:[%s2467_s26 + $0xd8] sm:$0xff] %v394_v27  ;;  %v400_v30 = vld [vmem:[%s2462_s25 + $0x1a0] sm:$0xff] }
  0x21   : > { %397 = vst [vmem:[%s2467_s26 + $0xe0] sm:$0xff] %v396_v28  ;;  %399 = vst [vmem:[%s2467_s26 + $0xe8] sm:$0xff] %v398_v29  ;;  %v402_v31 = vld [vmem:[%s2462_s25 + $0x1a8] sm:$0xff]  ;;  %v404_v32 = vld [vmem:[%s2462_s25 + $0x1b0] sm:$0xff] }
  0x22   : > { %401 = vst [vmem:[%s2467_s26 + $0xf0] sm:$0xff] %v400_v30  ;;  %403 = vst [vmem:[%s2467_s26 + $0xf8] sm:$0xff] %v402_v31  ;;  %v406_v33 = vld [vmem:[%s2462_s25 + $0x1b8] sm:$0xff]  ;;  %v408_v34 = vld [vmem:[%s2462_s25 + $0x1c0] sm:$0xff] }
  0x23   : > { %405 = vst [vmem:[%s2467_s26 + $0x100] sm:$0xff] %v404_v32  ;;  %v410_v35 = vld [vmem:[%s2462_s25 + $0x1c8] sm:$0xff]  ;;  %407 = vst [vmem:[%s2467_s26 + $0x108] sm:$0xff] %v406_v33  ;;  %v412_v36 = vld [vmem:[%s2462_s25 + $0x1d0] sm:$0xff] }
  0x24   : > { %409 = vst [vmem:[%s2467_s26 + $0x110] sm:$0xff] %v408_v34  ;;  %411 = vst [vmem:[%s2467_s26 + $0x118] sm:$0xff] %v410_v35  ;;  %v414_v37 = vld [vmem:[%s2462_s25 + $0x1d8] sm:$0xff]  ;;  %v416_v38 = vld [vmem:[%s2462_s25 + $0x1e0] sm:$0xff] }
  0x25   : > { %413 = vst [vmem:[%s2467_s26 + $0x120] sm:$0xff] %v412_v36  ;;  %415 = vst [vmem:[%s2467_s26 + $0x128] sm:$0xff] %v414_v37  ;;  %v418_v39 = vld [vmem:[%s2462_s25 + $0x1e8] sm:$0xff]  ;;  %v420_v40 = vld [vmem:[%s2462_s25 + $0x1f0] sm:$0xff] }
  0x26   : > { %417 = vst [vmem:[%s2467_s26 + $0x130] sm:$0xff] %v416_v38  ;;  %v422_v41 = vld [vmem:[%s2462_s25 + $0x1f8] sm:$0xff]  ;;  %419 = vst [vmem:[%s2467_s26 + $0x138] sm:$0xff] %v418_v39  ;;  %v424_v42 = vld [vmem:[%s2462_s25 + $0x200] sm:$0xff] }
  0x27   : > { %421 = vst [vmem:[%s2467_s26 + $0x140] sm:$0xff] %v420_v40  ;;  %423 = vst [vmem:[%s2467_s26 + $0x148] sm:$0xff] %v422_v41  ;;  %v426_v43 = vld [vmem:[%s2462_s25 + $0x208] sm:$0xff]  ;;  %v428_v44 = vld [vmem:[%s2462_s25 + $0x2c0] sm:$0xff] }
  0x28   : > { %425 = vst [vmem:[%s2467_s26 + $0x150] sm:$0xff] %v424_v42  ;;  %427 = vst [vmem:[%s2467_s26 + $0x158] sm:$0xff] %v426_v43  ;;  %v430_v45 = vld [vmem:[%s2462_s25 + $0x2c8] sm:$0xff]  ;;  %v432_v46 = vld [vmem:[%s2462_s25 + $0x2d0] sm:$0xff] }
  0x29   : > { %429 = vst [vmem:[%s2467_s26 + $0x160] sm:$0xff] %v428_v44  ;;  %v434_v47 = vld [vmem:[%s2462_s25 + $0x2d8] sm:$0xff]  ;;  %431 = vst [vmem:[%s2467_s26 + $0x168] sm:$0xff] %v430_v45  ;;  %v436_v48 = vld [vmem:[%s2462_s25 + $0x2e0] sm:$0xff] }
  0x2a   : > { %433 = vst [vmem:[%s2467_s26 + $0x170] sm:$0xff] %v432_v46  ;;  %435 = vst [vmem:[%s2467_s26 + $0x178] sm:$0xff] %v434_v47  ;;  %v438_v49 = vld [vmem:[%s2462_s25 + $0x2e8] sm:$0xff]  ;;  %v440_v50 = vld [vmem:[%s2462_s25 + $0x2f0] sm:$0xff] }
  0x2b   : > { %437 = vst [vmem:[%s2467_s26 + $0x180] sm:$0xff] %v436_v48  ;;  %439 = vst [vmem:[%s2467_s26 + $0x188] sm:$0xff] %v438_v49  ;;  %v442_v51 = vld [vmem:[%s2462_s25 + $0x2f8] sm:$0xff]  ;;  %v444_v52 = vld [vmem:[%s2462_s25 + $0x300] sm:$0xff] }
  0x2c   : > { %441 = vst [vmem:[%s2467_s26 + $0x190] sm:$0xff] %v440_v50  ;;  %v446_v53 = vld [vmem:[%s2462_s25 + $0x308] sm:$0xff]  ;;  %443 = vst [vmem:[%s2467_s26 + $0x198] sm:$0xff] %v442_v51  ;;  %v448_v54 = vld [vmem:[%s2462_s25 + $0x310] sm:$0xff] }
  0x2d   : > { %445 = vst [vmem:[%s2467_s26 + $0x1a0] sm:$0xff] %v444_v52  ;;  %447 = vst [vmem:[%s2467_s26 + $0x1a8] sm:$0xff] %v446_v53  ;;  %v450_v55 = vld [vmem:[%s2462_s25 + $0x318] sm:$0xff]  ;;  %v452_v56 = vld [vmem:[%s2462_s25 + $0x320] sm:$0xff] }
  0x2e   : > { %449 = vst [vmem:[%s2467_s26 + $0x1b0] sm:$0xff] %v448_v54  ;;  %451 = vst [vmem:[%s2467_s26 + $0x1b8] sm:$0xff] %v450_v55  ;;  %v454_v57 = vld [vmem:[%s2462_s25 + $0x328] sm:$0xff]  ;;  %v456_v58 = vld [vmem:[%s2462_s25 + $0x330] sm:$0xff] }
  0x2f   : > { %453 = vst [vmem:[%s2467_s26 + $0x1c0] sm:$0xff] %v452_v56  ;;  %v458_v59 = vld [vmem:[%s2462_s25 + $0x338] sm:$0xff]  ;;  %455 = vst [vmem:[%s2467_s26 + $0x1c8] sm:$0xff] %v454_v57  ;;  %v460_v60 = vld [vmem:[%s2462_s25 + $0x340] sm:$0xff] }
  0x30   : > { %457 = vst [vmem:[%s2467_s26 + $0x1d0] sm:$0xff] %v456_v58  ;;  %459 = vst [vmem:[%s2467_s26 + $0x1d8] sm:$0xff] %v458_v59  ;;  %v462_v61 = vld [vmem:[%s2462_s25 + $0x348] sm:$0xff]  ;;  %v464_v62 = vld [vmem:[%s2462_s25 + $0x350] sm:$0xff] }
  0x31   : > { %461 = vst [vmem:[%s2467_s26 + $0x1e0] sm:$0xff] %v460_v60  ;;  %463 = vst [vmem:[%s2467_s26 + $0x1e8] sm:$0xff] %v462_v61  ;;  %v466_v63 = vld [vmem:[%s2462_s25 + $0x358] sm:$0xff]  ;;  %v468_v0 = vld [vmem:[%s2462_s25 + $0x360] sm:$0xff] }
  0x32   : > { %465 = vst [vmem:[%s2467_s26 + $0x1f0] sm:$0xff] %v464_v62  ;;  %v470_v1 = vld [vmem:[%s2462_s25 + $0x368] sm:$0xff]  ;;  %467 = vst [vmem:[%s2467_s26 + $0x1f8] sm:$0xff] %v466_v63  ;;  %v472_v2 = vld [vmem:[%s2462_s25 + $0x420] sm:$0xff] }
  0x33   : > { %469 = vst [vmem:[%s2467_s26 + $0x200] sm:$0xff] %v468_v0  ;;  %471 = vst [vmem:[%s2467_s26 + $0x208] sm:$0xff] %v470_v1  ;;  %v474_v3 = vld [vmem:[%s2462_s25 + $0x428] sm:$0xff]  ;;  %v476_v4 = vld [vmem:[%s2462_s25 + $0x430] sm:$0xff] }
  0x34   : > { %473 = vst [vmem:[%s2467_s26 + $0x210] sm:$0xff] %v472_v2  ;;  %475 = vst [vmem:[%s2467_s26 + $0x218] sm:$0xff] %v474_v3  ;;  %v478_v5 = vld [vmem:[%s2462_s25 + $0x438] sm:$0xff]  ;;  %v480_v6 = vld [vmem:[%s2462_s25 + $0x440] sm:$0xff] }
  0x35   : > { %477 = vst [vmem:[%s2467_s26 + $0x220] sm:$0xff] %v476_v4  ;;  %v482_v7 = vld [vmem:[%s2462_s25 + $0x448] sm:$0xff]  ;;  %479 = vst [vmem:[%s2467_s26 + $0x228] sm:$0xff] %v478_v5  ;;  %v484_v8 = vld [vmem:[%s2462_s25 + $0x450] sm:$0xff] }
  0x36   : > { %481 = vst [vmem:[%s2467_s26 + $0x230] sm:$0xff] %v480_v6  ;;  %483 = vst [vmem:[%s2467_s26 + $0x238] sm:$0xff] %v482_v7  ;;  %v486_v9 = vld [vmem:[%s2462_s25 + $0x458] sm:$0xff]  ;;  %v488_v10 = vld [vmem:[%s2462_s25 + $0x460] sm:$0xff] }
  0x37   : > { %485 = vst [vmem:[%s2467_s26 + $0x240] sm:$0xff] %v484_v8  ;;  %487 = vst [vmem:[%s2467_s26 + $0x248] sm:$0xff] %v486_v9  ;;  %v490_v11 = vld [vmem:[%s2462_s25 + $0x468] sm:$0xff]  ;;  %v492_v12 = vld [vmem:[%s2462_s25 + $0x470] sm:$0xff] }
  0x38   : > { %489 = vst [vmem:[%s2467_s26 + $0x250] sm:$0xff] %v488_v10  ;;  %v494_v13 = vld [vmem:[%s2462_s25 + $0x478] sm:$0xff]  ;;  %491 = vst [vmem:[%s2467_s26 + $0x258] sm:$0xff] %v490_v11  ;;  %v496_v14 = vld [vmem:[%s2462_s25 + $0x480] sm:$0xff] }
  0x39   : > { %493 = vst [vmem:[%s2467_s26 + $0x260] sm:$0xff] %v492_v12  ;;  %495 = vst [vmem:[%s2467_s26 + $0x268] sm:$0xff] %v494_v13  ;;  %v498_v15 = vld [vmem:[%s2462_s25 + $0x488] sm:$0xff]  ;;  %v500_v16 = vld [vmem:[%s2462_s25 + $0x490] sm:$0xff] }
  0x3a   : > { %497 = vst [vmem:[%s2467_s26 + $0x270] sm:$0xff] %v496_v14  ;;  %499 = vst [vmem:[%s2467_s26 + $0x278] sm:$0xff] %v498_v15  ;;  %v502_v17 = vld [vmem:[%s2462_s25 + $0x498] sm:$0xff]  ;;  %v504_v18 = vld [vmem:[%s2462_s25 + $0x4a0] sm:$0xff] }
  0x3b   : > { %501 = vst [vmem:[%s2467_s26 + $0x280] sm:$0xff] %v500_v16  ;;  %v506_v19 = vld [vmem:[%s2462_s25 + $0x4a8] sm:$0xff]  ;;  %503 = vst [vmem:[%s2467_s26 + $0x288] sm:$0xff] %v502_v17  ;;  %v508_v20 = vld [vmem:[%s2462_s25 + $0x4b0] sm:$0xff] }
  0x3c   : > { %505 = vst [vmem:[%s2467_s26 + $0x290] sm:$0xff] %v504_v18  ;;  %507 = vst [vmem:[%s2467_s26 + $0x298] sm:$0xff] %v506_v19  ;;  %v510_v21 = vld [vmem:[%s2462_s25 + $0x4b8] sm:$0xff]  ;;  %v512_v22 = vld [vmem:[%s2462_s25 + $0x4c0] sm:$0xff] }
  0x3d   : > { %509 = vst [vmem:[%s2467_s26 + $0x2a0] sm:$0xff] %v508_v20  ;;  %511 = vst [vmem:[%s2467_s26 + $0x2a8] sm:$0xff] %v510_v21  ;;  %v514_v23 = vld [vmem:[%s2462_s25 + $0x4c8] sm:$0xff] }
  0x3e   : > { %513 = vst [vmem:[%s2467_s26 + $0x2b0] sm:$0xff] %v512_v22  ;;  %515 = vst [vmem:[%s2467_s26 + $0x2b8] sm:$0xff] %v514_v23 }
  0x3f PF: > { %p1935_p5 = scmp.ge.s32.totalorder %s2405_s14, 1  ;;  %p520_p6 = scmp.lt.s32.totalorder %s2405_s14, 3 }
  0x41   : > { %p521_p7 = pnand %p1935_p5, %p520_p6 }
  0x42   : > { %v2241_v24 = vld [vmem:[%s2997_s1] sm:$0xff] (!%p521_p7)   ;;  %v2407_v25 = vmov (!%p521_p7), 0   ;;  %v2242_v26 = vld [vmem:[%s2997_s1 + $0x8] sm:$0xff] (!%p521_p7)   ;;  %s527_s4 = sand.u32 (!%p521_p7), 1, %s2397_s12   ;;  %v2243_v27 = vld [vmem:[%s2997_s1 + $0x10] sm:$0xff] (!%p521_p7)   ;;  %vm1118_vm0 = vcmask (!%p521_p7), 179200  }
  0x43   : > { %524 = sbr.rel (%p521_p7) target bundleno = 500 (0x1f4), region = 66  ;;  %1255 = vmatprep.subr.bf16.mxu0 (!%p521_p7), %v2407_v25  ;;  %2194 = vmatprep.subr.bf16.mxu1 (!%p521_p7), %v2407_v25  ;;  %v2244_v28 = vld [vmem:[%s2997_s1 + $0x18] sm:$0xff] (!%p521_p7)   ;;  %v2245_v31 = vld [vmem:[%s2997_s1 + $0x20] sm:$0xff] (!%p521_p7)   ;;  %v2246_v32 = vld [vmem:[%s2997_s1 + $0x28] sm:$0xff] (!%p521_p7)   ;;  %vm1251_vm1 = vcmask (!%p521_p7), 1042432  }
  0x44   : > { %1256 = vmatpush1.bf16.msra.mxu0 (!%p521_p7), %v2241_v24  ;;  %2204 = vmatpush1.bf16.msra.mxu1 (!%p521_p7), %v2241_v24  ;;  %s2215_s5 = smul.u32 (!%p521_p7), 704, %s527_s4  ;;  %v2247_v33 = vld [vmem:[%s2997_s1 + $0x30] sm:$0xff] (!%p521_p7)   ;;  %v2248_v34 = vld [vmem:[%s2997_s1 + $0x38] sm:$0xff] (!%p521_p7)   ;;  %v2249_v35 = vld [vmem:[%s2997_s1 + $0x40] sm:$0xff] (!%p521_p7)  }
  0x45   : > { %1257 = vmatprep.subr.bf16.mxu0 (!%p521_p7), %v2407_v25  ;;  %2195 = vmatprep.subr.bf16.mxu1 (!%p521_p7), %v2407_v25  ;;  %v2250_v36 = vld [vmem:[%s2997_s1 + $0x48] ss:$0 sps:$4 sm:$0x77] (!%p521_p7)   ;;  %s551_s28 = smul.u32 (!%p521_p7), 22, %s1929_s15 }
  0x46   : > { %s2654_s8 = scalar_lea.vmem (!%p521_p7), [#allocation2], %s2215_s5  ;;  %v1253_v37 = vsel (!%p521_p7), %vm1251_vm1, %v2250_v36, 0 }
  0x47   : > { %v2253_v29 = vld [vmem:[%s2654_s8 + $0x4] ss:$8 sps:$4 sm:$0xff] (!%p521_p7)   ;;  %v2251_v38 = vld [vmem:[%s2654_s8] ss:$8 sps:$4 sm:$0xff] (!%p521_p7)   ;;  %v2257_v40 = vld [vmem:[%s2654_s8 + $0x14] ss:$8 sps:$4 sm:$0xff] (!%p521_p7)  }
  0x48   : > { %1258 = vmatpush1.bf16.msra.mxu0 (!%p521_p7), %v2242_v26  ;;  %2205 = vmatpush1.bf16.msra.mxu1 (!%p521_p7), %v2242_v26  ;;  %v2256_v30 = vld [vmem:[%s2654_s8 + $0x164] ss:$8 sps:$4 sm:$0xff] (!%p521_p7)   ;;  %v2254_v39 = vld [vmem:[%s2654_s8 + $0x160] ss:$8 sps:$4 sm:$0xff] (!%p521_p7)   ;;  %v2259_v41 = vld [vmem:[%s2654_s8 + $0x174] ss:$8 sps:$4 sm:$0xff] (!%p521_p7)  }
  0x49   : > { %1259 = vmatprep.subr.bf16.mxu0 (!%p521_p7), %v2407_v25  ;;  %2196 = vmatprep.subr.bf16.mxu1 (!%p521_p7), %v2407_v25  ;;  %v2261_v42 = vld [vmem:[%s2654_s8 + $0x10] ss:$8 sps:$4 sm:$0xff] (!%p521_p7)   ;;  %v2263_v44 = vld [vmem:[%s2654_s8 + $0x24] ss:$8 sps:$4 sm:$0xff] (!%p521_p7)   ;;  %v2267_v46 = vld [vmem:[%s2654_s8 + $0x20] ss:$8 sps:$4 sm:$0xff] (!%p521_p7)  }
  0x4a   : > { %2035 = vmatprep.mubr.msk.bf16.mxu0 %vm1118_vm0, %v2253_v29  ;;  %2057 = vmatprep.mubr.msk.bf16.mxu1 %vm1118_vm0, %v2256_v30  ;;  %v2262_v43 = vld [vmem:[%s2654_s8 + $0x170] ss:$8 sps:$4 sm:$0xff]   ;;  %v2265_v45 = vld [vmem:[%s2654_s8 + $0x184] ss:$8 sps:$4 sm:$0xff]   ;;  %v2268_v47 = vld [vmem:[%s2654_s8 + $0x180] ss:$8 sps:$4 sm:$0xff]  }
  0x4b   : > { %v2269_v48 = vld [vmem:[%s2654_s8 + $0x34] ss:$8 sps:$4 sm:$0xff]   ;;  %v2273_v50 = vld [vmem:[%s2654_s8 + $0x30] ss:$8 sps:$4 sm:$0xff]   ;;  %v2275_v52 = vld [vmem:[%s2654_s8 + $0x44] ss:$8 sps:$4 sm:$0xff]  }
  0x4c   : > { %1260 = vmatpush1.bf16.msra.mxu0 %v2243_v27  ;;  %2206 = vmatpush1.bf16.msra.mxu1 %v2243_v27  ;;  %v2271_v49 = vld [vmem:[%s2654_s8 + $0x194] ss:$8 sps:$4 sm:$0xff]   ;;  %v2274_v51 = vld [vmem:[%s2654_s8 + $0x190] ss:$8 sps:$4 sm:$0xff]   ;;  %v2277_v53 = vld [vmem:[%s2654_s8 + $0x1a4] ss:$8 sps:$4 sm:$0xff]  }
  0x4d   : > { %1261 = vmatprep.subr.bf16.mxu0 %v2407_v25  ;;  %2197 = vmatprep.subr.bf16.mxu1 %v2407_v25  ;;  %v2279_v54 = vld [vmem:[%s2654_s8 + $0x40] ss:$8 sps:$4 sm:$0xff]   ;;  %v2281_v56 = vld [vmem:[%s2654_s8 + $0x54] ss:$8 sps:$4 sm:$0xff]   ;;  %v2285_v58 = vld [vmem:[%s2654_s8 + $0x50] ss:$8 sps:$4 sm:$0xff]  }
  0x4e   : > { %v2280_v55 = vld [vmem:[%s2654_s8 + $0x1a0] ss:$8 sps:$4 sm:$0xff]   ;;  %v2283_v57 = vld [vmem:[%s2654_s8 + $0x1b4] ss:$8 sps:$4 sm:$0xff]   ;;  %v2286_v59 = vld [vmem:[%s2654_s8 + $0x1b0] ss:$8 sps:$4 sm:$0xff]  }
  0x4f   : > { %v2287_v60 = vld [vmem:[%s2654_s8 + $0x64] ss:$8 sps:$4 sm:$0xff]   ;;  %v2291_v62 = vld [vmem:[%s2654_s8 + $0x60] ss:$8 sps:$4 sm:$0xff]   ;;  %v2293_v0 = vld [vmem:[%s2654_s8 + $0x74] ss:$8 sps:$4 sm:$0xff]  }
  0x50   : > { %1262 = vmatpush1.bf16.msra.mxu0 %v2244_v28  ;;  %2207 = vmatpush1.bf16.msra.mxu1 %v2244_v28  ;;  %v2289_v61 = vld [vmem:[%s2654_s8 + $0x1c4] ss:$8 sps:$4 sm:$0xff]   ;;  %v2292_v63 = vld [vmem:[%s2654_s8 + $0x1c0] ss:$8 sps:$4 sm:$0xff]   ;;  %v2295_v1 = vld [vmem:[%s2654_s8 + $0x1d4] ss:$8 sps:$4 sm:$0xff]  }
  0x51   : > { %1263 = vmatprep.subr.bf16.mxu0 %v2407_v25  ;;  %2198 = vmatprep.subr.bf16.mxu1 %v2407_v25  ;;  %v2297_v2 = vld [vmem:[%s2654_s8 + $0x70] ss:$8 sps:$4 sm:$0xff]   ;;  %v2299_v4 = vld [vmem:[%s2654_s8 + $0x84] ss:$8 sps:$4 sm:$0xff]   ;;  %v2303_v6 = vld [vmem:[%s2654_s8 + $0x80] ss:$8 sps:$4 sm:$0xff]  }
  0x52   : > { %v2298_v3 = vld [vmem:[%s2654_s8 + $0x1d0] ss:$8 sps:$4 sm:$0xff]   ;;  %v2301_v5 = vld [vmem:[%s2654_s8 + $0x1e4] ss:$8 sps:$4 sm:$0xff]   ;;  %v2304_v7 = vld [vmem:[%s2654_s8 + $0x1e0] ss:$8 sps:$4 sm:$0xff]  }
  0x53   : > { %v2305_v8 = vld [vmem:[%s2654_s8 + $0x94] ss:$8 sps:$4 sm:$0xff]   ;;  %v2309_v10 = vld [vmem:[%s2654_s8 + $0x90] ss:$8 sps:$4 sm:$0xff]   ;;  %v2311_v12 = vld [vmem:[%s2654_s8 + $0xa4] ss:$8 sps:$4 sm:$0xff]  }
  0x54   : > { %1264 = vmatpush1.bf16.msra.mxu0 %v2245_v31  ;;  %2208 = vmatpush1.bf16.msra.mxu1 %v2245_v31  ;;  %v2307_v9 = vld [vmem:[%s2654_s8 + $0x1f4] ss:$8 sps:$4 sm:$0xff]   ;;  %v2310_v11 = vld [vmem:[%s2654_s8 + $0x1f0] ss:$8 sps:$4 sm:$0xff]   ;;  %v2313_v13 = vld [vmem:[%s2654_s8 + $0x204] ss:$8 sps:$4 sm:$0xff]  }
  0x55   : > { %1265 = vmatprep.subr.bf16.mxu0 %v2407_v25  ;;  %2199 = vmatprep.subr.bf16.mxu1 %v2407_v25  ;;  %v2315_v14 = vld [vmem:[%s2654_s8 + $0xa0] ss:$8 sps:$4 sm:$0xff]   ;;  %v2317_v16 = vld [vmem:[%s2654_s8 + $0xb4] ss:$8 sps:$4 sm:$0xff]   ;;  %v2321_v18 = vld [vmem:[%s2654_s8 + $0xb0] ss:$8 sps:$4 sm:$0xff]  }
  0x56   : > { %v2316_v15 = vld [vmem:[%s2654_s8 + $0x200] ss:$8 sps:$4 sm:$0xff]   ;;  %v2319_v17 = vld [vmem:[%s2654_s8 + $0x214] ss:$8 sps:$4 sm:$0xff]   ;;  %v2322_v19 = vld [vmem:[%s2654_s8 + $0x210] ss:$8 sps:$4 sm:$0xff]  }
  0x57   : > { %v2323_v20 = vld [vmem:[%s2654_s8 + $0xc4] ss:$8 sps:$4 sm:$0xff]   ;;  %v2327_v22 = vld [vmem:[%s2654_s8 + $0xc0] ss:$8 sps:$4 sm:$0xff]   ;;  %v2329_v24 = vld [vmem:[%s2654_s8 + $0xd4] ss:$8 sps:$4 sm:$0xff]  }
  0x58   : > { %1266 = vmatpush1.bf16.msra.mxu0 %v2246_v32  ;;  %2209 = vmatpush1.bf16.msra.mxu1 %v2246_v32  ;;  %v2325_v21 = vld [vmem:[%s2654_s8 + $0x224] ss:$8 sps:$4 sm:$0xff]   ;;  %v2328_v23 = vld [vmem:[%s2654_s8 + $0x220] ss:$8 sps:$4 sm:$0xff]   ;;  %v2333_v26 = vld [vmem:[%s2654_s8 + $0xd0] ss:$8 sps:$4 sm:$0xff]  }
  0x59   : > { %1267 = vmatprep.subr.bf16.mxu0 %v2407_v25  ;;  %2200 = vmatprep.subr.bf16.mxu1 %v2407_v25  ;;  %v2334_v27 = vld [vmem:[%s2654_s8 + $0x230] ss:$8 sps:$4 sm:$0xff]   ;;  %v2335_v28 = vld [vmem:[%s2654_s8 + $0xe4] ss:$8 sps:$4 sm:$0xff]   ;;  %v2339_v30 = vld [vmem:[%s2654_s8 + $0xe0] ss:$8 sps:$4 sm:$0xff]  }
  0x5a   : > { %v2337_v29 = vld [vmem:[%s2654_s8 + $0x244] ss:$8 sps:$4 sm:$0xff]   ;;  %v2340_v31 = vld [vmem:[%s2654_s8 + $0x240] ss:$8 sps:$4 sm:$0xff]   ;;  %v2341_v32 = vld [vmem:[%s2654_s8 + $0xf4] ss:$8 sps:$4 sm:$0xff]  }
  0x5b   : > { %v2347_v36 = vld [vmem:[%s2654_s8 + $0x104] ss:$8 sps:$4 sm:$0xff]   ;;  %p552_p8 = scmp.lt.s32.totalorder %s551_s28, 43 }
  0x5c   : > { %1268 = vmatpush1.bf16.msra.mxu0 %v2247_v33  ;;  %2210 = vmatpush1.bf16.msra.mxu1 %v2247_v33  ;;  %v2343_v33 = vld [vmem:[%s2654_s8 + $0x254] ss:$8 sps:$4 sm:$0xff]  }
  0x5d   : > { %1269 = vmatprep.subr.bf16.mxu0 %v2407_v25  ;;  %2201 = vmatprep.subr.bf16.mxu1 %v2407_v25  ;;  %s3004_s28 = smov (!%p552_p8, %s551_s28), 43 }
  0x5e   : > { %s1936_s14 = sshll.u32 %s3004_s28, 2 }
  0x5f   : > { %s2915_s5 = scalar_lea.vmem %s2999_s3, %s1936_s14 }
  0x60   : > { %1270 = vmatpush1.bf16.msra.mxu0 %v2248_v34  ;;  %2211 = vmatpush1.bf16.msra.mxu1 %v2248_v34  ;;  %v2345_v34 = vld [vmem:[%s2654_s8 + $0xf0] ss:$8 sps:$4 sm:$0xff]  }
  0x61   : > { %1271 = vmatprep.subr.bf16.mxu0 %v2407_v25  ;;  %2202 = vmatprep.subr.bf16.mxu1 %v2407_v25 }
  0x64   : > { %1272 = vmatpush1.bf16.msra.mxu0 %v2249_v35  ;;  %2212 = vmatpush1.bf16.msra.mxu1 %v2249_v35  ;;  %v2346_v35 = vld [vmem:[%s2654_s8 + $0x250] ss:$8 sps:$4 sm:$0xff]  }
  0x65   : > { %1273 = vmatprep.subr.bf16.mxu0 %v2407_v25  ;;  %2203 = vmatprep.subr.bf16.mxu1 %v2407_v25  ;;  %v2331_v25 = vld [vmem:[%s2654_s8 + $0x234] ss:$8 sps:$4 sm:$0xff]  }
  0x68   : > { %1274 = vmatpush1.bf16.msra.mxu0 %v1253_v37  ;;  %2213 = vmatpush1.bf16.msra.mxu1 %v1253_v37  ;;  %v2349_v37 = vld [vmem:[%s2654_s8 + $0x264] ss:$8 sps:$4 sm:$0xff]  }
  0x6b   : > { %1288 = vmatmul.mubr.bf16.vlgmr.msra.gmra.mrb[0].mxu0 %v2251_v38  ;;  %1464 = vmatmul.mubr.bf16.vlgmr.msra.gmra.mrb[0].mxu1 %v2254_v39  ;;  %v2351_v38 = vld [vmem:[%s2654_s8 + $0x100] ss:$8 sps:$4 sm:$0xff]  }
  0x6c   : > { %2036 = vmatprep.mubr.msk.bf16.mxu0 %vm1118_vm0, %v2257_v40  ;;  %2058 = vmatprep.mubr.msk.bf16.mxu1 %vm1118_vm0, %v2259_v41  ;;  %v2352_v39 = vld [vmem:[%s2654_s8 + $0x260] ss:$8 sps:$4 sm:$0xff]   ;;  %v2353_v40 = vld [vmem:[%s2654_s8 + $0x114] ss:$8 sps:$4 sm:$0xff]  }
  0x6d   : > { %v2355_v41 = vld [vmem:[%s2654_s8 + $0x274] ss:$8 sps:$4 sm:$0xff]  }
  0x73   : > { %1296 = vmatmul.mubr.bf16.gmra.mrb[4].mxu0 %v2261_v42  ;;  %1472 = vmatmul.mubr.bf16.gmra.mrb[4].mxu1 %v2262_v43  ;;  %v2357_v42 = vld [vmem:[%s2654_s8 + $0x110] ss:$8 sps:$4 sm:$0xff]  }
  0x74   : > { %2037 = vmatprep.mubr.msk.bf16.mxu0 %vm1118_vm0, %v2263_v44  ;;  %2059 = vmatprep.mubr.msk.bf16.mxu1 %vm1118_vm0, %v2265_v45  ;;  %v2358_v43 = vld [vmem:[%s2654_s8 + $0x270] ss:$8 sps:$4 sm:$0xff]   ;;  %v2359_v44 = vld [vmem:[%s2654_s8 + $0x124] ss:$8 sps:$4 sm:$0xff]  }
  0x75   : > { %v2361_v45 = vld [vmem:[%s2654_s8 + $0x284] ss:$8 sps:$4 sm:$0xff]  }
  0x7b   : > { %1304 = vmatmul.mubr.bf16.gmra.mrb[8].mxu0 %v2267_v46  ;;  %1480 = vmatmul.mubr.bf16.gmra.mrb[8].mxu1 %v2268_v47  ;;  %v2363_v46 = vld [vmem:[%s2654_s8 + $0x120] ss:$8 sps:$4 sm:$0xff]  }
  0x7c   : > { %2038 = vmatprep.mubr.msk.bf16.mxu0 %vm1118_vm0, %v2269_v48  ;;  %2060 = vmatprep.mubr.msk.bf16.mxu1 %vm1118_vm0, %v2271_v49  ;;  %v2364_v47 = vld [vmem:[%s2654_s8 + $0x280] ss:$8 sps:$4 sm:$0xff]   ;;  %v2365_v48 = vld [vmem:[%s2654_s8 + $0x134] ss:$8 sps:$4 sm:$0xff]  }
  0x7d   : > { %v2367_v49 = vld [vmem:[%s2654_s8 + $0x294] ss:$8 sps:$4 sm:$0xff]  }
  0x83   : > { %1312 = vmatmul.mubr.bf16.gmra.mrb[12].mxu0 %v2273_v50  ;;  %1488 = vmatmul.mubr.bf16.gmra.mrb[12].mxu1 %v2274_v51  ;;  %v2369_v50 = vld [vmem:[%s2654_s8 + $0x130] ss:$8 sps:$4 sm:$0xff]  }
  0x84   : > { %2039 = vmatprep.mubr.msk.bf16.mxu0 %vm1118_vm0, %v2275_v52  ;;  %2061 = vmatprep.mubr.msk.bf16.mxu1 %vm1118_vm0, %v2277_v53  ;;  %v2370_v51 = vld [vmem:[%s2654_s8 + $0x290] ss:$8 sps:$4 sm:$0xff]   ;;  %v2371_v52 = vld [vmem:[%s2654_s8 + $0x144] ss:$8 sps:$4 sm:$0xff]  }
  0x85   : > { %v2373_v53 = vld [vmem:[%s2654_s8 + $0x2a4] ss:$8 sps:$4 sm:$0xff]  }
  0x8b   : > { %1320 = vmatmul.mubr.bf16.gmra.mrb[16].mxu0 %v2279_v54  ;;  %1496 = vmatmul.mubr.bf16.gmra.mrb[16].mxu1 %v2280_v55  ;;  %v2375_v54 = vld [vmem:[%s2654_s8 + $0x140] ss:$8 sps:$4 sm:$0xff]  }
  0x8c   : > { %2040 = vmatprep.mubr.msk.bf16.mxu0 %vm1118_vm0, %v2281_v56  ;;  %2062 = vmatprep.mubr.msk.bf16.mxu1 %vm1118_vm0, %v2283_v57  ;;  %v2376_v55 = vld [vmem:[%s2654_s8 + $0x2a0] ss:$8 sps:$4 sm:$0xff]   ;;  %v2377_v56 = vld [vmem:[%s2654_s8 + $0x154] ss:$8 sps:$4 sm:$0xff]  }
  0x8d   : > { %v2379_v57 = vld [vmem:[%s2654_s8 + $0x2b4] ss:$8 sps:$4 sm:$0xff]  }
  0x93   : > { %1328 = vmatmul.mubr.bf16.gmra.mrb[20].mxu0 %v2285_v58  ;;  %1504 = vmatmul.mubr.bf16.gmra.mrb[20].mxu1 %v2286_v59  ;;  %v2381_v58 = vld [vmem:[%s2654_s8 + $0x150] ss:$8 sps:$4 sm:$0xff]  }
  0x94   : > { %2041 = vmatprep.mubr.msk.bf16.mxu0 %vm1118_vm0, %v2287_v60  ;;  %2063 = vmatprep.mubr.msk.bf16.mxu1 %vm1118_vm0, %v2289_v61  ;;  %v2382_v59 = vld [vmem:[%s2654_s8 + $0x2b0] ss:$8 sps:$4 sm:$0xff]  }
  0x9b   : > { %1336 = vmatmul.mubr.bf16.gmra.mrb[24].mxu0 %v2291_v62  ;;  %1512 = vmatmul.mubr.bf16.gmra.mrb[24].mxu1 %v2292_v63 }
  0x9c   : > { %2042 = vmatprep.mubr.msk.bf16.mxu0 %vm1118_vm0, %v2293_v0  ;;  %2064 = vmatprep.mubr.msk.bf16.mxu1 %vm1118_vm0, %v2295_v1 }
  0xa3   : > { %1344 = vmatmul.mubr.bf16.gmra.mrb[28].mxu0 %v2297_v2  ;;  %1520 = vmatmul.mubr.bf16.gmra.mrb[28].mxu1 %v2298_v3 }
  0xa4   : > { %2043 = vmatprep.mubr.msk.bf16.mxu0 %vm1118_vm0, %v2299_v4  ;;  %2065 = vmatprep.mubr.msk.bf16.mxu1 %vm1118_vm0, %v2301_v5 }
  0xab   : > { %1352 = vmatmul.mubr.bf16.gmra.mrb[32].mxu0 %v2303_v6  ;;  %1528 = vmatmul.mubr.bf16.gmra.mrb[32].mxu1 %v2304_v7 }
  0xac   : > { %2044 = vmatprep.mubr.msk.bf16.mxu0 %vm1118_vm0, %v2305_v8  ;;  %2066 = vmatprep.mubr.msk.bf16.mxu1 %vm1118_vm0, %v2307_v9 }
  0xb3   : > { %1360 = vmatmul.mubr.bf16.gmra.mrb[36].mxu0 %v2309_v10  ;;  %1536 = vmatmul.mubr.bf16.gmra.mrb[36].mxu1 %v2310_v11 }
  0xb4   : > { %2045 = vmatprep.mubr.msk.bf16.mxu0 %vm1118_vm0, %v2311_v12  ;;  %2067 = vmatprep.mubr.msk.bf16.mxu1 %vm1118_vm0, %v2313_v13 }
  0xbb   : > { %1368 = vmatmul.mubr.bf16.gmra.mrb[40].mxu0 %v2315_v14  ;;  %1544 = vmatmul.mubr.bf16.gmra.mrb[40].mxu1 %v2316_v15 }
  0xbc   : > { %2046 = vmatprep.mubr.msk.bf16.mxu0 %vm1118_vm0, %v2317_v16  ;;  %2068 = vmatprep.mubr.msk.bf16.mxu1 %vm1118_vm0, %v2319_v17 }
  0xc3   : > { %1376 = vmatmul.mubr.bf16.gmra.mrb[44].mxu0 %v2321_v18  ;;  %1552 = vmatmul.mubr.bf16.gmra.mrb[44].mxu1 %v2322_v19 }
  0xc4   : > { %2047 = vmatprep.mubr.msk.bf16.mxu0 %vm1118_vm0, %v2323_v20  ;;  %2069 = vmatprep.mubr.msk.bf16.mxu1 %vm1118_vm0, %v2325_v21 }
  0xcb   : > { %1384 = vmatmul.mubr.bf16.gmra.mrb[48].mxu0 %v2327_v22  ;;  %1560 = vmatmul.mubr.bf16.gmra.mrb[48].mxu1 %v2328_v23 }
  0xcc   : > { %2048 = vmatprep.mubr.msk.bf16.mxu0 %vm1118_vm0, %v2329_v24  ;;  %2070 = vmatprep.mubr.msk.bf16.mxu1 %vm1118_vm0, %v2331_v25 }
  0xd3   : > { %1392 = vmatmul.mubr.bf16.gmra.mrb[52].mxu0 %v2333_v26  ;;  %1568 = vmatmul.mubr.bf16.gmra.mrb[52].mxu1 %v2334_v27 }
  0xd4   : > { %2049 = vmatprep.mubr.msk.bf16.mxu0 %vm1118_vm0, %v2335_v28  ;;  %2071 = vmatprep.mubr.msk.bf16.mxu1 %vm1118_vm0, %v2337_v29 }
  0xdb   : > { %1400 = vmatmul.mubr.bf16.gmra.mrb[56].mxu0 %v2339_v30  ;;  %1576 = vmatmul.mubr.bf16.gmra.mrb[56].mxu1 %v2340_v31 }
  0xdc   : > { %2050 = vmatprep.mubr.msk.bf16.mxu0 %vm1118_vm0, %v2341_v32  ;;  %2072 = vmatprep.mubr.msk.bf16.mxu1 %vm1118_vm0, %v2343_v33 }
  0xe3   : > { %1408 = vmatmul.mubr.bf16.gmra.mrb[60].mxu0 %v2345_v34  ;;  %1584 = vmatmul.mubr.bf16.gmra.mrb[60].mxu1 %v2346_v35 }
  0xe4   : > { %2051 = vmatprep.mubr.msk.bf16.mxu0 %vm1118_vm0, %v2347_v36  ;;  %2073 = vmatprep.mubr.msk.bf16.mxu1 %vm1118_vm0, %v2349_v37 }
  0xeb   : > { %1416 = vmatmul.mubr.bf16.gmra.mrb[64].mxu0 %v2351_v38  ;;  %1592 = vmatmul.mubr.bf16.gmra.mrb[64].mxu1 %v2352_v39 }
  0xec   : > { %2052 = vmatprep.mubr.msk.bf16.mxu0 %vm1118_vm0, %v2353_v40  ;;  %2074 = vmatprep.mubr.msk.bf16.mxu1 %vm1118_vm0, %v2355_v41 }
  0xf3   : > { %1424 = vmatmul.mubr.bf16.gmra.mrb[68].mxu0 %v2357_v42  ;;  %1600 = vmatmul.mubr.bf16.gmra.mrb[68].mxu1 %v2358_v43 }
  0xf4   : > { %2053 = vmatprep.mubr.msk.bf16.mxu0 %vm1118_vm0, %v2359_v44  ;;  %2075 = vmatprep.mubr.msk.bf16.mxu1 %vm1118_vm0, %v2361_v45 }
  0xfb   : > { %1432 = vmatmul.mubr.bf16.gmra.mrb[72].mxu0 %v2363_v46  ;;  %1608 = vmatmul.mubr.bf16.gmra.mrb[72].mxu1 %v2364_v47 }
  0xfc   : > { %2054 = vmatprep.mubr.msk.bf16.mxu0 %vm1118_vm0, %v2365_v48  ;;  %2076 = vmatprep.mubr.msk.bf16.mxu1 %vm1118_vm0, %v2367_v49 }
 0x103   : > { %1440 = vmatmul.mubr.bf16.gmra.mrb[76].mxu0 %v2369_v50  ;;  %1616 = vmatmul.mubr.bf16.gmra.mrb[76].mxu1 %v2370_v51 }
 0x104   : > { %2055 = vmatprep.mubr.msk.bf16.mxu0 %vm1118_vm0, %v2371_v52  ;;  %2077 = vmatprep.mubr.msk.bf16.mxu1 %vm1118_vm0, %v2373_v53 }
 0x10b   : > { %1448 = vmatmul.mubr.bf16.gmra.mrb[80].mxu0 %v2375_v54  ;;  %1624 = vmatmul.mubr.bf16.gmra.mrb[80].mxu1 %v2376_v55 }
 0x10c   : > { %2056 = vmatprep.mubr.msk.bf16.mxu0 %vm1118_vm0, %v2377_v56  ;;  %2078 = vmatprep.mubr.msk.bf16.mxu1 %vm1118_vm0, %v2379_v57 }
 0x113   : > { %1456 = vmatmul.mubr.bf16.gmra.mrb[84].mxu0 %v2381_v58  ;;  %1632 = vmatmul.mubr.bf16.gmra.mrb[84].mxu1 %v2382_v59 }
 0x13e   : > { %v2809_v60 = vpop.f32.mrb[0].mxu0  ;;  %v2811_v61 = vpop.f32.mrb[0].mxu1 }
 0x13f   : > { %v1291_v62 = vpop.f32.mrb[1].mxu0  ;;  %v1467_v63 = vpop.f32.mrb[1].mxu1 }
 0x140   : > { %v2813_v0 = vpop.f32.mrb[2].mxu0  ;;  %v2815_v1 = vpop.f32.mrb[2].mxu1 }
 0x141   : > { %v1294_v2 = vpop.f32.mrb[3].mxu0  ;;  %v1470_v3 = vpop.f32.mrb[3].mxu1 }
 0x146   : > { %v2817_v4 = vpop.f32.mrb[4].mxu0  ;;  %v2819_v5 = vpop.f32.mrb[4].mxu1 }
 0x147   : > { %v1299_v6 = vpop.f32.mrb[5].mxu0  ;;  %v1475_v7 = vpop.f32.mrb[5].mxu1 }
 0x148   : > { %v2821_v8 = vpop.f32.mrb[6].mxu0  ;;  %v2823_v9 = vpop.f32.mrb[6].mxu1 }
 0x149   : > { %v1302_v10 = vpop.f32.mrb[7].mxu0  ;;  %v1478_v11 = vpop.f32.mrb[7].mxu1 }
 0x14e   : > { %v2825_v12 = vpop.f32.mrb[8].mxu0  ;;  %v2827_v13 = vpop.f32.mrb[8].mxu1 }
 0x14f   : > { %v1307_v14 = vpop.f32.mrb[9].mxu0  ;;  %v1483_v15 = vpop.f32.mrb[9].mxu1 }
 0x150   : > { %v2829_v16 = vpop.f32.mrb[10].mxu0  ;;  %v2831_v17 = vpop.f32.mrb[10].mxu1 }
 0x151   : > { %v1310_v18 = vpop.f32.mrb[11].mxu0  ;;  %v1486_v19 = vpop.f32.mrb[11].mxu1 }
 0x156   : > { %v2833_v20 = vpop.f32.mrb[12].mxu0  ;;  %v2835_v21 = vpop.f32.mrb[12].mxu1 }
 0x157   : > { %v1315_v22 = vpop.f32.mrb[13].mxu0  ;;  %v1491_v23 = vpop.f32.mrb[13].mxu1 }
 0x158   : > { %v2837_v24 = vpop.f32.mrb[14].mxu0  ;;  %v2839_v25 = vpop.f32.mrb[14].mxu1 }
 0x159   : > { %v1318_v26 = vpop.f32.mrb[15].mxu0  ;;  %v1494_v27 = vpop.f32.mrb[15].mxu1 }
 0x15e   : > { %v2841_v28 = vpop.f32.mrb[16].mxu0  ;;  %v2843_v29 = vpop.f32.mrb[16].mxu1 }
 0x15f   : > { %v1323_v30 = vpop.f32.mrb[17].mxu0  ;;  %v1499_v31 = vpop.f32.mrb[17].mxu1 }
 0x160   : > { %v2845_v32 = vpop.f32.mrb[18].mxu0  ;;  %v2847_v33 = vpop.f32.mrb[18].mxu1 }
 0x161   : > { %v1326_v34 = vpop.f32.mrb[19].mxu0  ;;  %v1502_v35 = vpop.f32.mrb[19].mxu1 }
 0x166   : > { %v2849_v36 = vpop.f32.mrb[20].mxu0  ;;  %v2851_v37 = vpop.f32.mrb[20].mxu1 }
 0x167   : > { %v1331_v38 = vpop.f32.mrb[21].mxu0  ;;  %v1507_v39 = vpop.f32.mrb[21].mxu1 }
 0x168   : > { %v2853_v40 = vpop.f32.mrb[22].mxu0  ;;  %v2855_v41 = vpop.f32.mrb[22].mxu1 }
 0x169   : > { %v1334_v42 = vpop.f32.mrb[23].mxu0  ;;  %v1510_v43 = vpop.f32.mrb[23].mxu1 }
 0x16e   : > { %v2857_v44 = vpop.f32.mrb[24].mxu0  ;;  %v2859_v45 = vpop.f32.mrb[24].mxu1 }
 0x16f   : > { %v1339_v46 = vpop.f32.mrb[25].mxu0  ;;  %v1515_v47 = vpop.f32.mrb[25].mxu1 }
 0x170   : > { %v2861_v48 = vpop.f32.mrb[26].mxu0  ;;  %v2863_v49 = vpop.f32.mrb[26].mxu1 }
 0x171   : > { %v1342_v50 = vpop.f32.mrb[27].mxu0  ;;  %v1518_v51 = vpop.f32.mrb[27].mxu1 }
 0x176   : > { %v2865_v52 = vpop.f32.mrb[28].mxu0  ;;  %v2867_v53 = vpop.f32.mrb[28].mxu1 }
 0x177   : > { %v1347_v54 = vpop.f32.mrb[29].mxu0  ;;  %v1523_v55 = vpop.f32.mrb[29].mxu1 }
 0x178   : > { %v2869_v56 = vpop.f32.mrb[30].mxu0  ;;  %v2871_v57 = vpop.f32.mrb[30].mxu1 }
 0x179   : > { %v1350_v58 = vpop.f32.mrb[31].mxu0  ;;  %v1526_v59 = vpop.f32.mrb[31].mxu1 }
 0x17a   : > { %v2904_v58 = vld [vmem:[%s2998_s2] ss:$0 sm:$0xff] }
 0x17e   : > { %v2873_v62 = vpop.f32.mrb[32].mxu0  ;;  %v2875_v63 = vpop.f32.mrb[32].mxu1 }
 0x17f   : > { %v1355_v2 = vpop.f32.mrb[33].mxu0  ;;  %v1531_v3 = vpop.f32.mrb[33].mxu1 }
 0x180   : > { %v2877_v6 = vpop.f32.mrb[34].mxu0  ;;  %v2879_v7 = vpop.f32.mrb[34].mxu1 }
 0x181   : > { %v1358_v10 = vpop.f32.mrb[35].mxu0  ;;  %v1534_v11 = vpop.f32.mrb[35].mxu1 }
 0x186   : > { %v2881_v14 = vpop.f32.mrb[36].mxu0  ;;  %v2883_v15 = vpop.f32.mrb[36].mxu1 }
 0x187   : > { %v1363_v18 = vpop.f32.mrb[37].mxu0  ;;  %v1539_v19 = vpop.f32.mrb[37].mxu1 }
 0x188   : > { %v2885_v22 = vpop.f32.mrb[38].mxu0  ;;  %v2887_v23 = vpop.f32.mrb[38].mxu1 }
 0x189   : > { %v1366_v26 = vpop.f32.mrb[39].mxu0  ;;  %v1542_v27 = vpop.f32.mrb[39].mxu1 }
 0x18e   : > { %v2889_v30 = vpop.f32.mrb[40].mxu0  ;;  %v2891_v31 = vpop.f32.mrb[40].mxu1 }
 0x18f   : > { %v1371_v34 = vpop.f32.mrb[41].mxu0  ;;  %v1547_v35 = vpop.f32.mrb[41].mxu1 }
 0x190   : > { %v2893_v38 = vpop.f32.mrb[42].mxu0  ;;  %v2895_v39 = vpop.f32.mrb[42].mxu1 }
 0x191   : > { %v1374_v42 = vpop.f32.mrb[43].mxu0  ;;  %v1550_v43 = vpop.f32.mrb[43].mxu1 }
 0x196   : > { %v1377_v46 = vpop.f32.mrb[44].mxu0  ;;  %v1553_v47 = vpop.f32.mrb[44].mxu1 }
 0x197   : > { %v1640_v50 = vmax.f32 %v2809_v60, %v1377_v46  ;;  %v1662_v51 = vmax.f32 %v2811_v61, %v1553_v47  ;;  %v1379_v54 = vpop.f32.mrb[45].mxu0  ;;  %v1555_v55 = vpop.f32.mrb[45].mxu1 }
 0x198   : > { %v1380_v59 = vpop.f32.mrb[46].mxu0  ;;  %v1556_v2 = vpop.f32.mrb[46].mxu1 }
 0x199   : > { %v1684_v3 = vmax.f32 %v1640_v50, %v1662_v51  ;;  %v1641_v10 = vmax.f32 %v2813_v0, %v1380_v59  ;;  %v1663_v11 = vmax.f32 %v2815_v1, %v1556_v2  ;;  %v1382_v18 = vpop.f32.mrb[47].mxu0  ;;  %v1558_v19 = vpop.f32.mrb[47].mxu1 }
 0x19b   : > { %v1713_v60 = vadd.f32 %v2904_v58, %v1684_v3  ;;  %v1685_v61 = vmax.f32 %v1641_v10, %v1663_v11 }
 0x19d   : > { %v1714_v26 = vadd.f32 %v2904_v58, %v1685_v61  ;;  %v1735_v35 = vmax.f32 %v1713_v60, 0.0 }
 0x19e   : > { %v1385_v27 = vpop.f32.mrb[48].mxu0  ;;  %v1561_v34 = vpop.f32.mrb[48].mxu1 }
 0x19f   : > { %v1736_v42 = vmax.f32 %v1714_v26, 0.0  ;;  %v1642_v43 = vmax.f32 %v2817_v4, %v1385_v27  ;;  %v1664_v46 = vmax.f32 %v2819_v5, %v1561_v34  ;;  %v1387_v0 = vpop.f32.mrb[49].mxu0  ;;  %v1563_v47 = vpop.f32.mrb[49].mxu1 }
 0x1a0   : > { %v1388_v1 = vpop.f32.mrb[50].mxu0  ;;  %v1564_v50 = vpop.f32.mrb[50].mxu1 }
 0x1a1   : > { %v2131_v51 = vpack.c.bf16 %v1736_v42, %v1735_v35  ;;  %v1686_v54 = vmax.f32 %v1642_v43, %v1664_v46  ;;  %v1643_v55 = vmax.f32 %v2821_v8, %v1388_v1  ;;  %v1665_v59 = vmax.f32 %v2823_v9, %v1564_v50  ;;  %v1390_v2 = vpop.f32.mrb[51].mxu0  ;;  %v1566_v4 = vpop.f32.mrb[51].mxu1 }
 0x1a3   : > { %2132 = vst [vmem:[%s2915_s5] sm:$0xff] %v2131_v51   ;;  %v1715_v5 = vadd.f32 %v2904_v58, %v1686_v54  ;;  %v1687_v3 = vmax.f32 %v1643_v55, %v1665_v59 }
 0x1a5   : > { %v1716_v10 = vadd.f32 %v2904_v58, %v1687_v3  ;;  %v1737_v19 = vmax.f32 %v1715_v5, 0.0 }
 0x1a6   : > { %v1393_v11 = vpop.f32.mrb[52].mxu0  ;;  %v1569_v18 = vpop.f32.mrb[52].mxu1 }
 0x1a7   : > { %v1738_v60 = vmax.f32 %v1716_v10, 0.0  ;;  %v1644_v61 = vmax.f32 %v2825_v12, %v1393_v11  ;;  %v1666_v26 = vmax.f32 %v2827_v13, %v1569_v18  ;;  %v1395_v8 = vpop.f32.mrb[53].mxu0  ;;  %v1571_v27 = vpop.f32.mrb[53].mxu1 }
 0x1a8   : > { %v1396_v9 = vpop.f32.mrb[54].mxu0  ;;  %v1572_v34 = vpop.f32.mrb[54].mxu1 }
 0x1a9   : > { %v2136_v35 = vpack.c.bf16 %v1738_v60, %v1737_v19  ;;  %v1688_v42 = vmax.f32 %v1644_v61, %v1666_v26  ;;  %v1645_v43 = vmax.f32 %v2829_v16, %v1396_v9  ;;  %v1667_v46 = vmax.f32 %v2831_v17, %v1572_v34  ;;  %v1398_v0 = vpop.f32.mrb[55].mxu0  ;;  %v1574_v47 = vpop.f32.mrb[55].mxu1 }
 0x1ab   : > { %2184 = vst [vmem:[%s2915_s5 + $0x8] sm:$0xff] %v2136_v35   ;;  %v1717_v1 = vadd.f32 %v2904_v58, %v1688_v42  ;;  %v1689_v50 = vmax.f32 %v1645_v43, %v1667_v46 }
 0x1ad   : > { %v1718_v12 = vadd.f32 %v2904_v58, %v1689_v50  ;;  %v1739_v54 = vmax.f32 %v1717_v1, 0.0 }
 0x1ae   : > { %v1401_v51 = vpop.f32.mrb[56].mxu0  ;;  %v1577_v13 = vpop.f32.mrb[56].mxu1 }
 0x1af   : > { %v1740_v55 = vmax.f32 %v1718_v12, 0.0  ;;  %v1646_v59 = vmax.f32 %v2833_v20, %v1401_v51  ;;  %v1668_v2 = vmax.f32 %v2835_v21, %v1577_v13  ;;  %v1403_v16 = vpop.f32.mrb[57].mxu0  ;;  %v1579_v4 = vpop.f32.mrb[57].mxu1 }
 0x1b0   : > { %v1404_v17 = vpop.f32.mrb[58].mxu0  ;;  %v1580_v5 = vpop.f32.mrb[58].mxu1 }
 0x1b1   : > { %v2141_v3 = vpack.c.bf16 %v1740_v55, %v1739_v54  ;;  %v1690_v10 = vmax.f32 %v1646_v59, %v1668_v2  ;;  %v1647_v11 = vmax.f32 %v2837_v24, %v1404_v17  ;;  %v1669_v18 = vmax.f32 %v2839_v25, %v1580_v5  ;;  %v1406_v19 = vpop.f32.mrb[59].mxu0  ;;  %v1582_v60 = vpop.f32.mrb[59].mxu1 }
 0x1b3   : > { %2185 = vst [vmem:[%s2915_s5 + $0x10] sm:$0xff] %v2141_v3   ;;  %v1719_v61 = vadd.f32 %v2904_v58, %v1690_v10  ;;  %v1691_v26 = vmax.f32 %v1647_v11, %v1669_v18 }
 0x1b5   : > { %v1720_v20 = vadd.f32 %v2904_v58, %v1691_v26  ;;  %v1741_v27 = vmax.f32 %v1719_v61, 0.0 }
 0x1b6   : > { %v1409_v8 = vpop.f32.mrb[60].mxu0  ;;  %v1585_v21 = vpop.f32.mrb[60].mxu1 }
 0x1b7   : > { %v1742_v9 = vmax.f32 %v1720_v20, 0.0  ;;  %v1648_v34 = vmax.f32 %v2841_v28, %v1409_v8  ;;  %v1670_v35 = vmax.f32 %v2843_v29, %v1585_v21  ;;  %v1411_v24 = vpop.f32.mrb[61].mxu0  ;;  %v1587_v42 = vpop.f32.mrb[61].mxu1 }
 0x1b8   : > { %v1412_v25 = vpop.f32.mrb[62].mxu0  ;;  %v1588_v43 = vpop.f32.mrb[62].mxu1 }
 0x1b9   : > { %v2146_v46 = vpack.c.bf16 %v1742_v9, %v1741_v27  ;;  %v1692_v0 = vmax.f32 %v1648_v34, %v1670_v35  ;;  %v1649_v47 = vmax.f32 %v2845_v32, %v1412_v25  ;;  %v1671_v1 = vmax.f32 %v2847_v33, %v1588_v43  ;;  %v1414_v50 = vpop.f32.mrb[63].mxu0  ;;  %v1590_v12 = vpop.f32.mrb[63].mxu1 }
 0x1bb   : > { %2186 = vst [vmem:[%s2915_s5 + $0x18] sm:$0xff] %v2146_v46   ;;  %v1721_v51 = vadd.f32 %v2904_v58, %v1692_v0  ;;  %v1693_v13 = vmax.f32 %v1649_v47, %v1671_v1 }
 0x1bd   : > { %v1722_v28 = vadd.f32 %v2904_v58, %v1693_v13  ;;  %v1743_v55 = vmax.f32 %v1721_v51, 0.0 }
 0x1be   : > { %v1417_v54 = vpop.f32.mrb[64].mxu0  ;;  %v1593_v29 = vpop.f32.mrb[64].mxu1 }
 0x1bf   : > { %v1744_v59 = vmax.f32 %v1722_v28, 0.0  ;;  %v1650_v2 = vmax.f32 %v2849_v36, %v1417_v54  ;;  %v1672_v16 = vmax.f32 %v2851_v37, %v1593_v29  ;;  %v1419_v32 = vpop.f32.mrb[65].mxu0  ;;  %v1595_v4 = vpop.f32.mrb[65].mxu1 }
 0x1c0   : > { %v1420_v33 = vpop.f32.mrb[66].mxu0  ;;  %v1596_v17 = vpop.f32.mrb[66].mxu1 }
 0x1c1   : > { %v2151_v5 = vpack.c.bf16 %v1744_v59, %v1743_v55  ;;  %v1694_v3 = vmax.f32 %v1650_v2, %v1672_v16  ;;  %v1651_v10 = vmax.f32 %v2853_v40, %v1420_v33  ;;  %v1673_v11 = vmax.f32 %v2855_v41, %v1596_v17  ;;  %v1422_v18 = vpop.f32.mrb[67].mxu0  ;;  %v1598_v19 = vpop.f32.mrb[67].mxu1 }
 0x1c3   : > { %2187 = vst [vmem:[%s2915_s5 + $0x20] sm:$0xff] %v2151_v5   ;;  %v1723_v60 = vadd.f32 %v2904_v58, %v1694_v3  ;;  %v1695_v61 = vmax.f32 %v1651_v10, %v1673_v11 }
 0x1c5   : > { %v1724_v36 = vadd.f32 %v2904_v58, %v1695_v61  ;;  %v1745_v20 = vmax.f32 %v1723_v60, 0.0 }
 0x1c6   : > { %v1425_v26 = vpop.f32.mrb[68].mxu0  ;;  %v1601_v37 = vpop.f32.mrb[68].mxu1 }
 0x1c7   : > { %v1746_v8 = vmax.f32 %v1724_v36, 0.0  ;;  %v1652_v21 = vmax.f32 %v2857_v44, %v1425_v26  ;;  %v1674_v27 = vmax.f32 %v2859_v45, %v1601_v37  ;;  %v1427_v40 = vpop.f32.mrb[69].mxu0  ;;  %v1603_v9 = vpop.f32.mrb[69].mxu1 }
 0x1c8   : > { %v1428_v41 = vpop.f32.mrb[70].mxu0  ;;  %v1604_v34 = vpop.f32.mrb[70].mxu1 }
 0x1c9   : > { %v2156_v35 = vpack.c.bf16 %v1746_v8, %v1745_v20  ;;  %v1696_v24 = vmax.f32 %v1652_v21, %v1674_v27  ;;  %v1653_v42 = vmax.f32 %v2861_v48, %v1428_v41  ;;  %v1675_v25 = vmax.f32 %v2863_v49, %v1604_v34  ;;  %v1430_v43 = vpop.f32.mrb[71].mxu0  ;;  %v1606_v46 = vpop.f32.mrb[71].mxu1 }
 0x1cb   : > { %2188 = vst [vmem:[%s2915_s5 + $0x28] sm:$0xff] %v2156_v35   ;;  %v1725_v0 = vadd.f32 %v2904_v58, %v1696_v24  ;;  %v1697_v47 = vmax.f32 %v1653_v42, %v1675_v25 }
 0x1cd   : > { %v1726_v44 = vadd.f32 %v2904_v58, %v1697_v47  ;;  %v1747_v50 = vmax.f32 %v1725_v0, 0.0 }
 0x1ce   : > { %v1433_v1 = vpop.f32.mrb[72].mxu0  ;;  %v1609_v45 = vpop.f32.mrb[72].mxu1 }
 0x1cf   : > { %v1748_v12 = vmax.f32 %v1726_v44, 0.0  ;;  %v1654_v51 = vmax.f32 %v2865_v52, %v1433_v1  ;;  %v1676_v13 = vmax.f32 %v2867_v53, %v1609_v45  ;;  %v1435_v48 = vpop.f32.mrb[73].mxu0  ;;  %v1611_v28 = vpop.f32.mrb[73].mxu1 }
 0x1d0   : > { %v1436_v49 = vpop.f32.mrb[74].mxu0  ;;  %v1612_v54 = vpop.f32.mrb[74].mxu1 }
 0x1d1   : > { %v2161_v29 = vpack.c.bf16 %v1748_v12, %v1747_v50  ;;  %v1698_v55 = vmax.f32 %v1654_v51, %v1676_v13  ;;  %v1655_v59 = vmax.f32 %v2869_v56, %v1436_v49  ;;  %v1677_v2 = vmax.f32 %v2871_v57, %v1612_v54  ;;  %v1438_v16 = vpop.f32.mrb[75].mxu0  ;;  %v1614_v32 = vpop.f32.mrb[75].mxu1 }
 0x1d3   : > { %2189 = vst [vmem:[%s2915_s5 + $0x30] sm:$0xff] %v2161_v29   ;;  %v1727_v4 = vadd.f32 %v2904_v58, %v1698_v55  ;;  %v1699_v33 = vmax.f32 %v1655_v59, %v1677_v2 }
 0x1d5   : > { %v1728_v52 = vadd.f32 %v2904_v58, %v1699_v33  ;;  %v1749_v5 = vmax.f32 %v1727_v4, 0.0 }
 0x1d6   : > { %v1441_v17 = vpop.f32.mrb[76].mxu0  ;;  %v1617_v53 = vpop.f32.mrb[76].mxu1 }
 0x1d7   : > { %v1750_v3 = vmax.f32 %v1728_v52, 0.0  ;;  %v1656_v10 = vmax.f32 %v2873_v62, %v1441_v17  ;;  %v1678_v11 = vmax.f32 %v2875_v63, %v1617_v53  ;;  %v1443_v56 = vpop.f32.mrb[77].mxu0  ;;  %v1619_v18 = vpop.f32.mrb[77].mxu1 }
 0x1d8   : > { %v1444_v57 = vpop.f32.mrb[78].mxu0  ;;  %v1620_v19 = vpop.f32.mrb[78].mxu1 }
 0x1d9   : > { %v2166_v60 = vpack.c.bf16 %v1750_v3, %v1749_v5  ;;  %v1700_v61 = vmax.f32 %v1656_v10, %v1678_v11  ;;  %v1657_v36 = vmax.f32 %v2877_v6, %v1444_v57  ;;  %v1679_v26 = vmax.f32 %v2879_v7, %v1620_v19  ;;  %v1446_v37 = vpop.f32.mrb[79].mxu0  ;;  %v1622_v20 = vpop.f32.mrb[79].mxu1 }
 0x1db   : > { %2190 = vst [vmem:[%s2915_s5 + $0x38] sm:$0xff] %v2166_v60   ;;  %v1729_v8 = vadd.f32 %v2904_v58, %v1700_v61  ;;  %v1701_v21 = vmax.f32 %v1657_v36, %v1679_v26 }
 0x1dd   : > { %v1730_v62 = vadd.f32 %v2904_v58, %v1701_v21  ;;  %v1751_v40 = vmax.f32 %v1729_v8, 0.0 }
 0x1de   : > { %v1449_v27 = vpop.f32.mrb[80].mxu0  ;;  %v1625_v63 = vpop.f32.mrb[80].mxu1 }
 0x1df   : > { %v1752_v9 = vmax.f32 %v1730_v62, 0.0  ;;  %v1658_v41 = vmax.f32 %v2881_v14, %v1449_v27  ;;  %v1680_v34 = vmax.f32 %v2883_v15, %v1625_v63  ;;  %v1451_v6 = vpop.f32.mrb[81].mxu0  ;;  %v1627_v35 = vpop.f32.mrb[81].mxu1 }
 0x1e0   : > { %v1452_v7 = vpop.f32.mrb[82].mxu0  ;;  %v1628_v24 = vpop.f32.mrb[82].mxu1 }
 0x1e1   : > { %v2171_v42 = vpack.c.bf16 %v1752_v9, %v1751_v40  ;;  %v1702_v25 = vmax.f32 %v1658_v41, %v1680_v34  ;;  %v1659_v43 = vmax.f32 %v2885_v22, %v1452_v7  ;;  %v1681_v46 = vmax.f32 %v2887_v23, %v1628_v24  ;;  %v1454_v0 = vpop.f32.mrb[83].mxu0  ;;  %v1630_v47 = vpop.f32.mrb[83].mxu1 }
 0x1e3   : > { %2191 = vst [vmem:[%s2915_s5 + $0x40] sm:$0xff] %v2171_v42   ;;  %v1731_v44 = vadd.f32 %v2904_v58, %v1702_v25  ;;  %v1703_v1 = vmax.f32 %v1659_v43, %v1681_v46 }
 0x1e5   : > { %v1732_v14 = vadd.f32 %v2904_v58, %v1703_v1  ;;  %v1753_v50 = vmax.f32 %v1731_v44, 0.0 }
 0x1e6   : > { %v1457_v45 = vpop.f32.mrb[84].mxu0  ;;  %v1633_v15 = vpop.f32.mrb[84].mxu1 }
 0x1e7   : > { %v1754_v12 = vmax.f32 %v1732_v14, 0.0  ;;  %v1660_v51 = vmax.f32 %v2889_v30, %v1457_v45  ;;  %v1682_v13 = vmax.f32 %v2891_v31, %v1633_v15  ;;  %v1459_v22 = vpop.f32.mrb[85].mxu0  ;;  %v1635_v48 = vpop.f32.mrb[85].mxu1 }
 0x1e8   : > { %v1460_v23 = vpop.f32.mrb[86].mxu0  ;;  %v1636_v28 = vpop.f32.mrb[86].mxu1 }
 0x1e9   : > { %v2176_v49 = vpack.c.bf16 %v1754_v12, %v1753_v50  ;;  %v1704_v54 = vmax.f32 %v1660_v51, %v1682_v13  ;;  %v1661_v29 = vmax.f32 %v2893_v38, %v1460_v23  ;;  %v1683_v55 = vmax.f32 %v2895_v39, %v1636_v28  ;;  %v1462_v59 = vpop.f32.mrb[87].mxu0  ;;  %v1638_v2 = vpop.f32.mrb[87].mxu1 }
 0x1eb   : > { %2192 = vst [vmem:[%s2915_s5 + $0x48] sm:$0xff] %v2176_v49   ;;  %v1733_v16 = vadd.f32 %v2904_v58, %v1704_v54  ;;  %v1705_v32 = vmax.f32 %v1661_v29, %v1683_v55 }
 0x1ed   : > { %v1734_v30 = vadd.f32 %v2904_v58, %v1705_v32  ;;  %v1755_v31 = vmax.f32 %v1733_v16, 0.0 }
 0x1ef   : > { %v1756_v4 = vmax.f32 %v1734_v30, 0.0 }
 0x1f1   : > { %v2181_v33 = vpack.c.bf16 %v1756_v4, %v1755_v31 }
 0x1f3   : > { %2193 = vst [vmem:[%s2915_s5 + $0x50] sm:$0xff] %v2181_v33  }
 0x1f4 PF: > { %p10_p9 = scmp.ge.s32.totalorder %s2445_s16, 4   ;;  %s3000_s12 = smov %s2401_s13 }
 0x1f5   : > { %s3001_s13 = smov %s2454_s19  ;;  %s3002_s14 = smov %s2445_s16 }
 0x1f6   :  { %12 = sbr.rel (!%p10_p9) target bundleno = 2 (0x2), region = 105 }

// kernel: neuralnet_forward.5
= control target key start
LH: loop header
LB: loop body
LE: loop exit
PB: predicated region body
PF: predicated region fallthrough
CT: control target
= control target key end

     0   :  { %vm1517_vm0 = vcmask 130048   ;;  %vm2920_vm1 = vmmov 0   ;;  %s3617_s1 = inlined_call_operand.vmem [shape: bf16[2704,128], index: 1, kind: input, shape index: {}]   ;;  %s3618_s0 = inlined_call_operand.vmem [shape: bf16[16,2704], index: 0, kind: input, shape index: {}]   ;;  %s3619_s2 = inlined_call_operand.vmem [shape: f32[1,128], index: 2, kind: input, shape index: {}]   ;;  %s3620_s3 = inlined_call_operand.vmem [shape: bf16[128,128], index: 3, kind: input, shape index: {}]   ;;  %s3621_s5 = inlined_call_operand.vmem [shape: bf16[128,128], index: 5, kind: input, shape index: {}]   ;;  %s3622_s4 = inlined_call_operand.vmem [shape: f32[1,128], index: 4, kind: input, shape index: {}]   ;;  %s3623_s6 = inlined_call_operand.vmem [shape: f32[1,128], index: 6, kind: input, shape index: {}]   ;;  %s3624_s7 = inlined_call_operand.vmem [shape: f32[16,128], index: 7, kind: output, shape index: {}]  }
   0x1   :  { %v2700_v0 = vld [vmem:[%s3617_s1 + $0x40] sm:$0xff]   ;;  %v2704_v4 = vld [vmem:[%s3617_s1 + $0x48] sm:$0xff]   ;;  %v2708_v8 = vld [vmem:[%s3617_s1 + $0x50] sm:$0xff]  }
   0x2   :  { %v2701_v1 = vld [vmem:[%s3617_s1] sm:$0xff]   ;;  %2419 = vmatprep.subr.bf16.mxu0 %v2700_v0  ;;  %v2705_v5 = vld [vmem:[%s3617_s1 + $0x8] sm:$0xff]   ;;  %v2709_v9 = vld [vmem:[%s3617_s1 + $0x10] sm:$0xff]  }
   0x3   :  { %v2702_v2 = vld [vmem:[%s3617_s1 + $0xc0] sm:$0xff]   ;;  %2420 = vmatpush3.bf16.msra.mxu0 %v2701_v1  ;;  %v2706_v6 = vld [vmem:[%s3617_s1 + $0xc8] sm:$0xff]   ;;  %v2710_v10 = vld [vmem:[%s3617_s1 + $0xd0] sm:$0xff]  }
   0x4   :  { %v2703_v3 = vld [vmem:[%s3617_s1 + $0x80] sm:$0xff]   ;;  %2441 = vmatprep.subr.bf16.mxu1 %v2702_v2  ;;  %2421 = vmatprep.subr.bf16.mxu0 %v2704_v4  ;;  %v2707_v7 = vld [vmem:[%s3617_s1 + $0x88] sm:$0xff]   ;;  %v2711_v11 = vld [vmem:[%s3617_s1 + $0x90] sm:$0xff]  }
   0x5   :  { %2442 = vmatpush3.bf16.msra.mxu1 %v2703_v3  ;;  %v2712_v12 = vld [vmem:[%s3617_s1 + $0x58] sm:$0xff]   ;;  %v2716_v16 = vld [vmem:[%s3617_s1 + $0x60] sm:$0xff]   ;;  %v2720_v20 = vld [vmem:[%s3617_s1 + $0x68] sm:$0xff]  }
   0x6   :  { %2443 = vmatprep.subr.bf16.mxu1 %v2706_v6  ;;  %v2713_v13 = vld [vmem:[%s3617_s1 + $0x18] sm:$0xff]   ;;  %v2717_v17 = vld [vmem:[%s3617_s1 + $0x20] sm:$0xff]   ;;  %v2721_v21 = vld [vmem:[%s3617_s1 + $0x28] sm:$0xff]  }
   0x7   :  { %2422 = vmatpush3.bf16.msra.mxu0 %v2705_v5  ;;  %v2714_v14 = vld [vmem:[%s3617_s1 + $0xd8] sm:$0xff]   ;;  %v2718_v18 = vld [vmem:[%s3617_s1 + $0xe0] sm:$0xff]   ;;  %v2722_v22 = vld [vmem:[%s3617_s1 + $0xe8] sm:$0xff]  }
   0x8   :  { %2423 = vmatprep.subr.bf16.mxu0 %v2708_v8  ;;  %v2715_v15 = vld [vmem:[%s3617_s1 + $0x98] sm:$0xff]   ;;  %v2719_v19 = vld [vmem:[%s3617_s1 + $0xa0] sm:$0xff]   ;;  %v2723_v23 = vld [vmem:[%s3617_s1 + $0xa8] sm:$0xff]  }
   0x9   :  { %2444 = vmatpush3.bf16.msra.mxu1 %v2707_v7  ;;  %v2724_v24 = vld [vmem:[%s3617_s1 + $0x70] sm:$0xff]   ;;  %v2728_v28 = vld [vmem:[%s3617_s1 + $0x78] sm:$0xff]   ;;  %v2735_v34 = vld [vmem:[%s3617_s1 + $0x140] sm:$0xff]  }
   0xa   :  { %2445 = vmatprep.subr.bf16.mxu1 %v2710_v10  ;;  %v2725_v25 = vld [vmem:[%s3617_s1 + $0x30] sm:$0xff]   ;;  %v2729_v29 = vld [vmem:[%s3617_s1 + $0x38] sm:$0xff]   ;;  %v2736_v35 = vld [vmem:[%s3618_s0 + $0x8] ss:$88 sps:$4 sm:$0xff]  }
   0xb   :  { %2424 = vmatpush3.bf16.msra.mxu0 %v2709_v9  ;;  %v2726_v26 = vld [vmem:[%s3617_s1 + $0xf0] sm:$0xff]   ;;  %v2730_v30 = vld [vmem:[%s3617_s1 + $0xf8] sm:$0xff]   ;;  %v2738_v36 = vld [vmem:[%s3618_s0 + $0xc] ss:$88 sps:$4 sm:$0xff]  }
   0xc   :  { %2425 = vmatprep.subr.bf16.mxu0 %v2712_v12  ;;  %v2727_v27 = vld [vmem:[%s3617_s1 + $0xb0] sm:$0xff]   ;;  %v2731_v31 = vld [vmem:[%s3618_s0] ss:$88 sps:$4 sm:$0xff]   ;;  %v2733_v32 = vld [vmem:[%s3618_s0 + $0x4] ss:$88 sps:$4 sm:$0xff]   ;;  %1594 = vmatprep.mubr.bf16.mxu1 %v2738_v36 }
   0xd   :  { %2446 = vmatpush3.bf16.msra.mxu1 %v2711_v11  ;;  %v2734_v33 = vld [vmem:[%s3617_s1 + $0xb8] sm:$0xff]   ;;  %1553 = vmatprep.mubr.bf16.mxu0 %v2733_v32  ;;  %v2739_v37 = vld [vmem:[%s3617_s1 + $0x100] sm:$0xff]   ;;  %v2742_v40 = vld [vmem:[%s3617_s1 + $0x148] sm:$0xff]  }
   0xe   :  { %2447 = vmatprep.subr.bf16.mxu1 %v2714_v14  ;;  %v2740_v38 = vld [vmem:[%s3617_s1 + $0x1c0] sm:$0xff]   ;;  %v2743_v41 = vld [vmem:[%s3617_s1 + $0x108] sm:$0xff]   ;;  %v2746_v44 = vld [vmem:[%s3617_s1 + $0x150] sm:$0xff]  }
   0xf   :  { %2426 = vmatpush3.bf16.msra.mxu0 %v2713_v13  ;;  %v2741_v39 = vld [vmem:[%s3617_s1 + $0x180] sm:$0xff]   ;;  %v2744_v42 = vld [vmem:[%s3617_s1 + $0x1c8] sm:$0xff]   ;;  %v2747_v45 = vld [vmem:[%s3617_s1 + $0x110] sm:$0xff]  }
  0x10   :  { %2427 = vmatprep.subr.bf16.mxu0 %v2716_v16  ;;  %v2745_v43 = vld [vmem:[%s3617_s1 + $0x188] sm:$0xff]   ;;  %v2748_v46 = vld [vmem:[%s3617_s1 + $0x1d0] sm:$0xff]   ;;  %v2750_v48 = vld [vmem:[%s3617_s1 + $0x158] sm:$0xff]  }
  0x11   :  { %2448 = vmatpush3.bf16.msra.mxu1 %v2715_v15  ;;  %v2749_v47 = vld [vmem:[%s3617_s1 + $0x190] sm:$0xff]   ;;  %v2751_v49 = vld [vmem:[%s3617_s1 + $0x118] sm:$0xff]   ;;  %v2754_v52 = vld [vmem:[%s3617_s1 + $0x160] sm:$0xff]  }
  0x12   :  { %2449 = vmatprep.subr.bf16.mxu1 %v2718_v18  ;;  %v2752_v50 = vld [vmem:[%s3617_s1 + $0x1d8] sm:$0xff]   ;;  %v2755_v53 = vld [vmem:[%s3617_s1 + $0x120] sm:$0xff]   ;;  %v2758_v56 = vld [vmem:[%s3617_s1 + $0x168] sm:$0xff]  }
  0x13   :  { %2428 = vmatpush3.bf16.msra.mxu0 %v2717_v17  ;;  %v2753_v51 = vld [vmem:[%s3617_s1 + $0x198] sm:$0xff]   ;;  %v2756_v54 = vld [vmem:[%s3617_s1 + $0x1e0] sm:$0xff]   ;;  %v2759_v57 = vld [vmem:[%s3617_s1 + $0x128] sm:$0xff]  }
  0x14   :  { %2429 = vmatprep.subr.bf16.mxu0 %v2720_v20  ;;  %v2757_v55 = vld [vmem:[%s3617_s1 + $0x1a0] sm:$0xff]   ;;  %v2760_v58 = vld [vmem:[%s3617_s1 + $0x1e8] sm:$0xff]   ;;  %v2762_v60 = vld [vmem:[%s3617_s1 + $0x170] sm:$0xff]  }
  0x15   :  { %2450 = vmatpush3.bf16.msra.mxu1 %v2719_v19  ;;  %v2761_v59 = vld [vmem:[%s3617_s1 + $0x1a8] sm:$0xff]   ;;  %v2763_v61 = vld [vmem:[%s3617_s1 + $0x130] sm:$0xff]   ;;  %v2766_v0 = vld [vmem:[%s3617_s1 + $0x178] sm:$0xff]  }
  0x16   :  { %2451 = vmatprep.subr.bf16.mxu1 %v2722_v22  ;;  %v2764_v62 = vld [vmem:[%s3617_s1 + $0x1f0] sm:$0xff]   ;;  %v2767_v1 = vld [vmem:[%s3617_s1 + $0x138] sm:$0xff]   ;;  %v2773_v6 = vld [vmem:[%s3617_s1 + $0x240] sm:$0xff]  }
  0x17   :  { %2430 = vmatpush3.bf16.msra.mxu0 %v2721_v21  ;;  %v2765_v63 = vld [vmem:[%s3617_s1 + $0x1b0] sm:$0xff]   ;;  %v2768_v2 = vld [vmem:[%s3617_s1 + $0x1f8] sm:$0xff]   ;;  %v2777_v9 = vld [vmem:[%s3617_s1 + $0x200] sm:$0xff]  }
  0x18   :  { %2431 = vmatprep.subr.bf16.mxu0 %v2724_v24  ;;  %v2769_v3 = vld [vmem:[%s3618_s0 + $0x10] ss:$88 sps:$4 sm:$0xff]   ;;  %v2771_v4 = vld [vmem:[%s3618_s0 + $0x14] ss:$88 sps:$4 sm:$0xff]   ;;  %v2772_v5 = vld [vmem:[%s3617_s1 + $0x1b8] sm:$0xff]  }
  0x19   :  { %2452 = vmatpush3.bf16.msra.mxu1 %v2723_v23  ;;  %v2774_v7 = vld [vmem:[%s3618_s0 + $0x18] ss:$88 sps:$4 sm:$0xff]   ;;  %v2776_v8 = vld [vmem:[%s3618_s0 + $0x1c] ss:$88 sps:$4 sm:$0xff]   ;;  %v2778_v10 = vld [vmem:[%s3617_s1 + $0x2c0] sm:$0xff]  }
  0x1a   :  { %2453 = vmatprep.subr.bf16.mxu1 %v2726_v26  ;;  %v2779_v11 = vld [vmem:[%s3617_s1 + $0x280] sm:$0xff]   ;;  %v2780_v12 = vld [vmem:[%s3617_s1 + $0x248] sm:$0xff]   ;;  %v2784_v16 = vld [vmem:[%s3617_s1 + $0x250] sm:$0xff]  }
  0x1b   :  { %2432 = vmatpush3.bf16.msra.mxu0 %v2725_v25  ;;  %v2781_v13 = vld [vmem:[%s3617_s1 + $0x208] sm:$0xff]   ;;  %v2785_v17 = vld [vmem:[%s3617_s1 + $0x210] sm:$0xff]   ;;  %v2788_v20 = vld [vmem:[%s3617_s1 + $0x258] sm:$0xff]  }
  0x1c   :  { %2433 = vmatprep.subr.bf16.mxu0 %v2728_v28  ;;  %v2782_v14 = vld [vmem:[%s3617_s1 + $0x2c8] sm:$0xff]   ;;  %v2786_v18 = vld [vmem:[%s3617_s1 + $0x2d0] sm:$0xff]   ;;  %v2789_v21 = vld [vmem:[%s3617_s1 + $0x218] sm:$0xff]  }
  0x1d   :  { %2454 = vmatpush3.bf16.msra.mxu1 %v2727_v27  ;;  %v2783_v15 = vld [vmem:[%s3617_s1 + $0x288] sm:$0xff]   ;;  %v2787_v19 = vld [vmem:[%s3617_s1 + $0x290] sm:$0xff]   ;;  %v2790_v22 = vld [vmem:[%s3617_s1 + $0x2d8] sm:$0xff]  }
  0x1e   :  { %2455 = vmatprep.subr.bf16.mxu1 %v2730_v30  ;;  %v2791_v23 = vld [vmem:[%s3617_s1 + $0x298] sm:$0xff]   ;;  %v2792_v24 = vld [vmem:[%s3617_s1 + $0x260] sm:$0xff]   ;;  %v2796_v28 = vld [vmem:[%s3617_s1 + $0x268] sm:$0xff]  }
  0x1f   :  { %2434 = vmatpush3.bf16.msra.mxu0 %v2729_v29  ;;  %v2793_v25 = vld [vmem:[%s3617_s1 + $0x220] sm:$0xff]   ;;  %v2797_v29 = vld [vmem:[%s3617_s1 + $0x228] sm:$0xff]   ;;  %v2800_v32 = vld [vmem:[%s3617_s1 + $0x270] sm:$0xff]  }
  0x20   :  { %2463 = vmatprep.subr.bf16.mxu0 %v2735_v34  ;;  %v2794_v26 = vld [vmem:[%s3617_s1 + $0x2e0] sm:$0xff]   ;;  %v2798_v30 = vld [vmem:[%s3617_s1 + $0x2e8] sm:$0xff]   ;;  %v2802_v34 = vld [vmem:[%s3617_s1 + $0x2f0] sm:$0xff]  }
  0x21   :  { %2456 = vmatpush3.bf16.msra.mxu1 %v2734_v33  ;;  %v2795_v27 = vld [vmem:[%s3617_s1 + $0x2a0] sm:$0xff]   ;;  %v2801_v33 = vld [vmem:[%s3617_s1 + $0x230] sm:$0xff]   ;;  %v2804_v36 = vld [vmem:[%s3617_s1 + $0x278] sm:$0xff]  }
  0x22   :  { %1554 = vmatmul.mubr.bf16.vlgmr.msra.gmra.mrb[0].mxu0 %v2731_v31  ;;  %2485 = vmatprep.subr.bf16.mxu1 %v2740_v38  ;;  %v2799_v31 = vld [vmem:[%s3617_s1 + $0x2a8] sm:$0xff]   ;;  %v2806_v38 = vld [vmem:[%s3617_s1 + $0x2f8] sm:$0xff]  }
  0x23   :  { %2464 = vmatpush3.bf16.msra.mxu0 %v2739_v37  ;;  %1635 = vmatprep.mubr.bf16.mxu0 %v2771_v4  ;;  %v2805_v37 = vld [vmem:[%s3617_s1 + $0x238] sm:$0xff]   ;;  %v2838_v4 = vld [vmem:[%s3617_s1 + $0x370] sm:$0xff]  }
  0x24   :  { %1595 = vmatmul.mubr.bf16.vlgmr.msra.gmra.mrb[0].mxu1 %v2736_v35  ;;  %2465 = vmatprep.subr.bf16.mxu0 %v2742_v40  ;;  %v2803_v35 = vld [vmem:[%s3617_s1 + $0x2b0] sm:$0xff]   ;;  %v2809_v40 = vld [vmem:[%s3618_s0 + $0x24] ss:$88 sps:$4 sm:$0xff]  }
  0x25   :  { %2486 = vmatpush3.bf16.msra.mxu1 %v2741_v39  ;;  %1676 = vmatprep.mubr.bf16.mxu1 %v2776_v8  ;;  %v2807_v39 = vld [vmem:[%s3618_s0 + $0x20] ss:$88 sps:$4 sm:$0xff]  }
  0x26   :  { %2487 = vmatprep.subr.bf16.mxu1 %v2744_v42  ;;  %v2811_v42 = vld [vmem:[%s3617_s1 + $0x340] sm:$0xff]   ;;  %v2842_v8 = vld [vmem:[%s3617_s1 + $0x378] sm:$0xff]  }
  0x27   :  { %2466 = vmatpush3.bf16.msra.mxu0 %v2743_v41  ;;  %v2810_v41 = vld [vmem:[%s3617_s1 + $0x2b8] sm:$0xff]  }
  0x28   :  { %2467 = vmatprep.subr.bf16.mxu0 %v2746_v44  ;;  %v2814_v44 = vld [vmem:[%s3618_s0 + $0x2c] ss:$88 sps:$4 sm:$0xff]  }
  0x29   :  { %2488 = vmatpush3.bf16.msra.mxu1 %v2745_v43  ;;  %v2812_v43 = vld [vmem:[%s3618_s0 + $0x28] ss:$88 sps:$4 sm:$0xff]  }
  0x2a   :  { %2489 = vmatprep.subr.bf16.mxu1 %v2748_v46  ;;  %v2816_v46 = vld [vmem:[%s3617_s1 + $0x3c0] sm:$0xff]  }
  0x2b   :  { %2468 = vmatpush3.bf16.msra.mxu0 %v2747_v45  ;;  %v2815_v45 = vld [vmem:[%s3617_s1 + $0x300] sm:$0xff]  }
  0x2c   :  { %2469 = vmatprep.subr.bf16.mxu0 %v2750_v48  ;;  %v2818_v48 = vld [vmem:[%s3617_s1 + $0x348] sm:$0xff]  }
  0x2d   :  { %2490 = vmatpush3.bf16.msra.mxu1 %v2749_v47  ;;  %v2817_v47 = vld [vmem:[%s3617_s1 + $0x380] sm:$0xff]  }
  0x2e   :  { %2491 = vmatprep.subr.bf16.mxu1 %v2752_v50  ;;  %v2820_v50 = vld [vmem:[%s3617_s1 + $0x3c8] sm:$0xff]  }
  0x2f   :  { %2470 = vmatpush3.bf16.msra.mxu0 %v2751_v49  ;;  %v2819_v49 = vld [vmem:[%s3617_s1 + $0x308] sm:$0xff]  }
  0x30   :  { %2471 = vmatprep.subr.bf16.mxu0 %v2754_v52  ;;  %v2822_v52 = vld [vmem:[%s3617_s1 + $0x350] sm:$0xff]  }
  0x31   :  { %2492 = vmatpush3.bf16.msra.mxu1 %v2753_v51  ;;  %v2821_v51 = vld [vmem:[%s3617_s1 + $0x388] sm:$0xff]  }
  0x32   :  { %2493 = vmatprep.subr.bf16.mxu1 %v2756_v54  ;;  %v2824_v54 = vld [vmem:[%s3617_s1 + $0x3d0] sm:$0xff]  }
  0x33   :  { %2472 = vmatpush3.bf16.msra.mxu0 %v2755_v53  ;;  %v2823_v53 = vld [vmem:[%s3617_s1 + $0x310] sm:$0xff]  }
  0x34   :  { %2473 = vmatprep.subr.bf16.mxu0 %v2758_v56  ;;  %v2826_v56 = vld [vmem:[%s3617_s1 + $0x358] sm:$0xff]  }
  0x35   :  { %2494 = vmatpush3.bf16.msra.mxu1 %v2757_v55  ;;  %v2825_v55 = vld [vmem:[%s3617_s1 + $0x390] sm:$0xff]  }
  0x36   :  { %2495 = vmatprep.subr.bf16.mxu1 %v2760_v58  ;;  %v2828_v58 = vld [vmem:[%s3617_s1 + $0x3d8] sm:$0xff]  }
  0x37   :  { %2474 = vmatpush3.bf16.msra.mxu0 %v2759_v57  ;;  %v2827_v57 = vld [vmem:[%s3617_s1 + $0x318] sm:$0xff]  }
  0x38   :  { %2475 = vmatprep.subr.bf16.mxu0 %v2762_v60  ;;  %v2830_v60 = vld [vmem:[%s3617_s1 + $0x360] sm:$0xff]  }
  0x39   :  { %2496 = vmatpush3.bf16.msra.mxu1 %v2761_v59  ;;  %v2829_v59 = vld [vmem:[%s3617_s1 + $0x398] sm:$0xff]  }
  0x3a   :  { %2497 = vmatprep.subr.bf16.mxu1 %v2764_v62  ;;  %v2832_v62 = vld [vmem:[%s3617_s1 + $0x3e0] sm:$0xff]  }
  0x3b   :  { %2476 = vmatpush3.bf16.msra.mxu0 %v2763_v61  ;;  %v2831_v61 = vld [vmem:[%s3617_s1 + $0x320] sm:$0xff]  }
  0x3c   :  { %2477 = vmatprep.subr.bf16.mxu0 %v2766_v0  ;;  %v2834_v0 = vld [vmem:[%s3617_s1 + $0x368] sm:$0xff]  }
  0x3d   :  { %2498 = vmatpush3.bf16.msra.mxu1 %v2765_v63  ;;  %v2833_v63 = vld [vmem:[%s3617_s1 + $0x3a0] sm:$0xff]  }
  0x3e   :  { %2499 = vmatprep.subr.bf16.mxu1 %v2768_v2  ;;  %v2836_v2 = vld [vmem:[%s3617_s1 + $0x3e8] sm:$0xff]  }
  0x3f   :  { %2478 = vmatpush3.bf16.msra.mxu0 %v2767_v1  ;;  %v2835_v1 = vld [vmem:[%s3617_s1 + $0x328] sm:$0xff]  }
  0x40   :  { %2507 = vmatprep.subr.bf16.mxu0 %v2773_v6  ;;  %v2840_v6 = vld [vmem:[%s3617_s1 + $0x3f0] sm:$0xff]  }
  0x41   :  { %2500 = vmatpush3.bf16.msra.mxu1 %v2772_v5  ;;  %v2839_v5 = vld [vmem:[%s3617_s1 + $0x330] sm:$0xff]  }
  0x42   :  { %1636 = vmatmul.mubr.bf16.vlgmr.msra.gmra.mrb[4].mxu0 %v2769_v3  ;;  %2529 = vmatprep.subr.bf16.mxu1 %v2778_v10  ;;  %v2837_v3 = vld [vmem:[%s3617_s1 + $0x3a8] sm:$0xff]   ;;  %v2844_v10 = vld [vmem:[%s3617_s1 + $0x3f8] sm:$0xff]  }
  0x43   :  { %2508 = vmatpush3.bf16.msra.mxu0 %v2777_v9  ;;  %1717 = vmatprep.mubr.bf16.mxu0 %v2809_v40  ;;  %v2843_v9 = vld [vmem:[%s3617_s1 + $0x338] sm:$0xff]   ;;  %v2876_v40 = vld [vmem:[%s3617_s1 + $0x470] sm:$0xff]  }
  0x44   :  { %1677 = vmatmul.mubr.bf16.vlgmr.msra.gmra.mrb[4].mxu1 %v2774_v7  ;;  %2509 = vmatprep.subr.bf16.mxu0 %v2780_v12  ;;  %v2841_v7 = vld [vmem:[%s3617_s1 + $0x3b0] sm:$0xff]  }
  0x45   :  { %2530 = vmatpush3.bf16.msra.mxu1 %v2779_v11  ;;  %1758 = vmatprep.mubr.bf16.mxu1 %v2814_v44  ;;  %v2845_v11 = vld [vmem:[%s3618_s0 + $0x30] ss:$88 sps:$4 sm:$0xff]   ;;  %v2847_v12 = vld [vmem:[%s3618_s0 + $0x34] ss:$88 sps:$4 sm:$0xff]   ;;  %v2880_v44 = vld [vmem:[%s3617_s1 + $0x478] sm:$0xff]  }
  0x46   :  { %2531 = vmatprep.subr.bf16.mxu1 %v2782_v14  ;;  %v2849_v14 = vld [vmem:[%s3617_s1 + $0x440] sm:$0xff]  }
  0x47   :  { %2510 = vmatpush3.bf16.msra.mxu0 %v2781_v13  ;;  %v2848_v13 = vld [vmem:[%s3617_s1 + $0x3b8] sm:$0xff]  }
  0x48   :  { %2511 = vmatprep.subr.bf16.mxu0 %v2784_v16  ;;  %v2852_v16 = vld [vmem:[%s3618_s0 + $0x3c] ss:$88 sps:$4 sm:$0xff]  }
  0x49   :  { %2532 = vmatpush3.bf16.msra.mxu1 %v2783_v15  ;;  %v2850_v15 = vld [vmem:[%s3618_s0 + $0x38] ss:$88 sps:$4 sm:$0xff]  }
  0x4a   :  { %2533 = vmatprep.subr.bf16.mxu1 %v2786_v18  ;;  %v2854_v18 = vld [vmem:[%s3617_s1 + $0x4c0] sm:$0xff]  }
  0x4b   :  { %2512 = vmatpush3.bf16.msra.mxu0 %v2785_v17  ;;  %v2853_v17 = vld [vmem:[%s3617_s1 + $0x400] sm:$0xff]  }
  0x4c   :  { %2513 = vmatprep.subr.bf16.mxu0 %v2788_v20  ;;  %v2856_v20 = vld [vmem:[%s3617_s1 + $0x448] sm:$0xff]  }
  0x4d   :  { %2534 = vmatpush3.bf16.msra.mxu1 %v2787_v19  ;;  %v2855_v19 = vld [vmem:[%s3617_s1 + $0x480] sm:$0xff]  }
  0x4e   :  { %2535 = vmatprep.subr.bf16.mxu1 %v2790_v22  ;;  %v2858_v22 = vld [vmem:[%s3617_s1 + $0x4c8] sm:$0xff]  }
  0x4f   :  { %2514 = vmatpush3.bf16.msra.mxu0 %v2789_v21  ;;  %v2857_v21 = vld [vmem:[%s3617_s1 + $0x408] sm:$0xff]  }
  0x50   :  { %2515 = vmatprep.subr.bf16.mxu0 %v2792_v24  ;;  %v2860_v24 = vld [vmem:[%s3617_s1 + $0x450] sm:$0xff]  }
  0x51   :  { %2536 = vmatpush3.bf16.msra.mxu1 %v2791_v23  ;;  %v2859_v23 = vld [vmem:[%s3617_s1 + $0x488] sm:$0xff]  }
  0x52   :  { %2537 = vmatprep.subr.bf16.mxu1 %v2794_v26  ;;  %v2862_v26 = vld [vmem:[%s3617_s1 + $0x4d0] sm:$0xff]  }
  0x53   :  { %2516 = vmatpush3.bf16.msra.mxu0 %v2793_v25  ;;  %v2861_v25 = vld [vmem:[%s3617_s1 + $0x410] sm:$0xff]  }
  0x54   :  { %2517 = vmatprep.subr.bf16.mxu0 %v2796_v28  ;;  %v2864_v28 = vld [vmem:[%s3617_s1 + $0x458] sm:$0xff]  }
  0x55   :  { %2538 = vmatpush3.bf16.msra.mxu1 %v2795_v27  ;;  %v2863_v27 = vld [vmem:[%s3617_s1 + $0x490] sm:$0xff]  }
  0x56   :  { %2539 = vmatprep.subr.bf16.mxu1 %v2798_v30  ;;  %v2866_v30 = vld [vmem:[%s3617_s1 + $0x4d8] sm:$0xff]  }
  0x57   :  { %2518 = vmatpush3.bf16.msra.mxu0 %v2797_v29  ;;  %v2865_v29 = vld [vmem:[%s3617_s1 + $0x418] sm:$0xff]  }
  0x58   :  { %2519 = vmatprep.subr.bf16.mxu0 %v2800_v32  ;;  %v2868_v32 = vld [vmem:[%s3617_s1 + $0x460] sm:$0xff]  }
  0x59   :  { %2540 = vmatpush3.bf16.msra.mxu1 %v2799_v31  ;;  %v2867_v31 = vld [vmem:[%s3617_s1 + $0x498] sm:$0xff]  }
  0x5a   :  { %2541 = vmatprep.subr.bf16.mxu1 %v2802_v34  ;;  %v2870_v34 = vld [vmem:[%s3617_s1 + $0x4e0] sm:$0xff]  }
  0x5b   :  { %2520 = vmatpush3.bf16.msra.mxu0 %v2801_v33  ;;  %v2869_v33 = vld [vmem:[%s3617_s1 + $0x420] sm:$0xff]  }
  0x5c   :  { %2521 = vmatprep.subr.bf16.mxu0 %v2804_v36  ;;  %v2872_v36 = vld [vmem:[%s3617_s1 + $0x468] sm:$0xff]  }
  0x5d   :  { %2542 = vmatpush3.bf16.msra.mxu1 %v2803_v35  ;;  %v2871_v35 = vld [vmem:[%s3617_s1 + $0x4a0] sm:$0xff]  }
  0x5e   :  { %2543 = vmatprep.subr.bf16.mxu1 %v2806_v38  ;;  %v2874_v38 = vld [vmem:[%s3617_s1 + $0x4e8] sm:$0xff]  }
  0x5f   :  { %2522 = vmatpush3.bf16.msra.mxu0 %v2805_v37  ;;  %v2873_v37 = vld [vmem:[%s3617_s1 + $0x428] sm:$0xff]  }
  0x60   :  { %2551 = vmatprep.subr.bf16.mxu0 %v2811_v42  ;;  %v2878_v42 = vld [vmem:[%s3617_s1 + $0x4f0] sm:$0xff]  }
  0x61   :  { %2544 = vmatpush3.bf16.msra.mxu1 %v2810_v41  ;;  %v2877_v41 = vld [vmem:[%s3617_s1 + $0x430] sm:$0xff]  }
  0x62   :  { %1718 = vmatmul.mubr.bf16.vlgmr.msra.gmra.mrb[8].mxu0 %v2807_v39  ;;  %2573 = vmatprep.subr.bf16.mxu1 %v2816_v46  ;;  %v2875_v39 = vld [vmem:[%s3617_s1 + $0x4a8] sm:$0xff]   ;;  %v2882_v46 = vld [vmem:[%s3617_s1 + $0x4f8] sm:$0xff]  }
  0x63   :  { %2552 = vmatpush3.bf16.msra.mxu0 %v2815_v45  ;;  %1799 = vmatprep.mubr.bf16.mxu0 %v2847_v12  ;;  %v2881_v45 = vld [vmem:[%s3617_s1 + $0x438] sm:$0xff]  }
  0x64   :  { %1759 = vmatmul.mubr.bf16.vlgmr.msra.gmra.mrb[8].mxu1 %v2812_v43  ;;  %2553 = vmatprep.subr.bf16.mxu0 %v2818_v48  ;;  %v2879_v43 = vld [vmem:[%s3617_s1 + $0x4b0] sm:$0xff]   ;;  %v2885_v48 = vld [vmem:[%s3618_s0 + $0x44] ss:$88 sps:$4 sm:$0xff]  }
  0x65   :  { %2574 = vmatpush3.bf16.msra.mxu1 %v2817_v47  ;;  %1840 = vmatprep.mubr.bf16.mxu1 %v2852_v16  ;;  %v2883_v47 = vld [vmem:[%s3618_s0 + $0x40] ss:$88 sps:$4 sm:$0xff]  }
  0x66   :  { %2575 = vmatprep.subr.bf16.mxu1 %v2820_v50  ;;  %v2918_v50 = vmov 0  }
  0x67   :  { %2554 = vmatpush3.bf16.msra.mxu0 %v2819_v49  ;;  %v2886_v49 = vld [vmem:[%s3617_s1 + $0x4b8] sm:$0xff]  }
  0x68   :  { %2555 = vmatprep.subr.bf16.mxu0 %v2822_v52  ;;  %v2889_v52 = vld [vmem:[%s3618_s0 + $0x4c] ss:$88 sps:$4 sm:$0xff]  }
  0x69   :  { %2576 = vmatpush3.bf16.msra.mxu1 %v2821_v51  ;;  %v2887_v51 = vld [vmem:[%s3618_s0 + $0x48] ss:$88 sps:$4 sm:$0xff]  }
  0x6a   :  { %2577 = vmatprep.subr.bf16.mxu1 %v2824_v54  ;;  %v2891_v54 = vld [vmem:[%s3617_s1 + $0x508] sm:$0xff]  }
  0x6b   :  { %2556 = vmatpush3.bf16.msra.mxu0 %v2823_v53  ;;  %v2890_v53 = vld [vmem:[%s3617_s1 + $0x500] sm:$0xff]  }
  0x6c   :  { %2557 = vmatprep.subr.bf16.mxu0 %v2826_v56  ;;  %v2899_v56 = vld [vmem:[%s3618_s0 + $0x54] ss:$88 sps:$4 sm:$0xff]  }
  0x6d   :  { %2578 = vmatpush3.bf16.msra.mxu1 %v2825_v55  ;;  %v2892_v55 = vld [vmem:[%s3617_s1 + $0x510] sm:$0xff]  }
  0x6e   :  { %2579 = vmatprep.subr.bf16.mxu1 %v2828_v58  ;;  %v2894_v58 = vld [vmem:[%s3617_s1 + $0x520] sm:$0xff]  }
  0x6f   :  { %2558 = vmatpush3.bf16.msra.mxu0 %v2827_v57  ;;  %v2893_v57 = vld [vmem:[%s3617_s1 + $0x518] sm:$0xff]  }
  0x70   :  { %2559 = vmatprep.subr.bf16.mxu0 %v2830_v60  ;;  %v2896_v60 = vld [vmem:[%s3617_s1 + $0x530] sm:$0xff]  }
  0x71   :  { %2580 = vmatpush3.bf16.msra.mxu1 %v2829_v59  ;;  %v2895_v59 = vld [vmem:[%s3617_s1 + $0x528] sm:$0xff]  }
  0x72   :  { %2581 = vmatprep.subr.bf16.mxu1 %v2832_v62  ;;  %v2898_v62 = vld [vmem:[%s3617_s1 + $0x540] sm:$0xff]  }
  0x73   :  { %2560 = vmatpush3.bf16.msra.mxu0 %v2831_v61  ;;  %v2897_v61 = vld [vmem:[%s3617_s1 + $0x538] sm:$0xff]  }
  0x74   :  { %2561 = vmatprep.subr.bf16.mxu0 %v2834_v0 }
  0x75   :  { %2582 = vmatpush3.bf16.msra.mxu1 %v2833_v63  ;;  %v2901_v63 = vld [vmem:[%s3618_s0 + $0x50] ss:$88 sps:$4 sm:$0xff]  }
  0x76   :  { %2583 = vmatprep.subr.bf16.mxu1 %v2836_v2 }
  0x77   :  { %2562 = vmatpush3.bf16.msra.mxu0 %v2835_v1  ;;  %v2208_v1 = vld [vmem:[%s3619_s2] ss:$0 sm:$0xff] }
  0x78   :  { %2563 = vmatprep.subr.bf16.mxu0 %v2838_v4 }
  0x79   :  { %2584 = vmatpush3.bf16.msra.mxu1 %v2837_v3 }
  0x7a   :  { %2585 = vmatprep.subr.bf16.mxu1 %v2840_v6 }
  0x7b   :  { %2564 = vmatpush3.bf16.msra.mxu0 %v2839_v5 }
  0x7c   :  { %2565 = vmatprep.subr.bf16.mxu0 %v2842_v8 }
  0x7d   :  { %2586 = vmatpush3.bf16.msra.mxu1 %v2841_v7 }
  0x7e   :  { %2587 = vmatprep.subr.bf16.mxu1 %v2844_v10 }
  0x7f   :  { %2566 = vmatpush3.bf16.msra.mxu0 %v2843_v9 }
  0x80   :  { %2595 = vmatprep.subr.bf16.mxu0 %v2849_v14 }
  0x81   :  { %2588 = vmatpush3.bf16.msra.mxu1 %v2848_v13 }
  0x82   :  { %1800 = vmatmul.mubr.bf16.vlgmr.msra.gmra.mrb[12].mxu0 %v2845_v11  ;;  %2617 = vmatprep.subr.bf16.mxu1 %v2854_v18  ;;  %v2902_v18 = vld [vmem:[%s3620_s3] sm:$0xff]  }
  0x83   :  { %2596 = vmatpush3.bf16.msra.mxu0 %v2853_v17  ;;  %1881 = vmatprep.mubr.bf16.mxu0 %v2885_v48  ;;  %v2919_v17 = vmov 0.0  }
  0x84   :  { %1841 = vmatmul.mubr.bf16.vlgmr.msra.gmra.mrb[12].mxu1 %v2850_v15  ;;  %2597 = vmatprep.subr.bf16.mxu0 %v2856_v20  ;;  %v2904_v20 = vld [vmem:[%s3620_s3 + $0x10] sm:$0xff]  }
  0x85   :  { %2618 = vmatpush3.bf16.msra.mxu1 %v2855_v19  ;;  %1922 = vmatprep.mubr.bf16.mxu1 %v2889_v52  ;;  %v2903_v19 = vld [vmem:[%s3620_s3 + $0x8] sm:$0xff]  }
  0x86   :  { %2619 = vmatprep.subr.bf16.mxu1 %v2858_v22  ;;  %v2906_v22 = vld [vmem:[%s3620_s3 + $0x20] sm:$0xff]  }
  0x87   :  { %2598 = vmatpush3.bf16.msra.mxu0 %v2857_v21  ;;  %v2905_v21 = vld [vmem:[%s3620_s3 + $0x18] sm:$0xff]  }
  0x88   :  { %2599 = vmatprep.subr.bf16.mxu0 %v2860_v24 }
  0x89   :  { %2620 = vmatpush3.bf16.msra.mxu1 %v2859_v23 }
  0x8a   :  { %2621 = vmatprep.subr.bf16.mxu1 %v2862_v26 }
  0x8b   :  { %2600 = vmatpush3.bf16.msra.mxu0 %v2861_v25 }
  0x8c   :  { %2601 = vmatprep.subr.bf16.mxu0 %v2864_v28 }
  0x8d   :  { %2622 = vmatpush3.bf16.msra.mxu1 %v2863_v27  ;;  %v2907_v27 = vld [vmem:[%s3620_s3 + $0x28] sm:$0xff]  }
  0x8e   :  { %2623 = vmatprep.subr.bf16.mxu1 %v2866_v30 }
  0x8f   :  { %2602 = vmatpush3.bf16.msra.mxu0 %v2865_v29 }
  0x90   :  { %2603 = vmatprep.subr.bf16.mxu0 %v2868_v32 }
  0x91   :  { %2624 = vmatpush3.bf16.msra.mxu1 %v2867_v31 }
  0x92   :  { %2625 = vmatprep.subr.bf16.mxu1 %v2870_v34 }
  0x93   :  { %2604 = vmatpush3.bf16.msra.mxu0 %v2869_v33 }
  0x94   :  { %2605 = vmatprep.subr.bf16.mxu0 %v2872_v36 }
  0x95   :  { %2626 = vmatpush3.bf16.msra.mxu1 %v2871_v35 }
  0x96   :  { %2627 = vmatprep.subr.bf16.mxu1 %v2874_v38 }
  0x97   :  { %2606 = vmatpush3.bf16.msra.mxu0 %v2873_v37 }
  0x98   :  { %2607 = vmatprep.subr.bf16.mxu0 %v2876_v40  ;;  %v2908_v40 = vld [vmem:[%s3620_s3 + $0x30] sm:$0xff]  }
  0x99   :  { %2628 = vmatpush3.bf16.msra.mxu1 %v2875_v39 }
  0x9a   :  { %2629 = vmatprep.subr.bf16.mxu1 %v2878_v42 }
  0x9b   :  { %2608 = vmatpush3.bf16.msra.mxu0 %v2877_v41  ;;  %v2909_v41 = vld [vmem:[%s3620_s3 + $0x38] sm:$0xff]  }
  0x9c   :  { %2609 = vmatprep.subr.bf16.mxu0 %v2880_v44 }
  0x9d   :  { %2630 = vmatpush3.bf16.msra.mxu1 %v2879_v43 }
  0x9e   :  { %2631 = vmatprep.subr.bf16.mxu1 %v2882_v46 }
  0x9f   :  { %2610 = vmatpush3.bf16.msra.mxu0 %v2881_v45 }
  0xa0   :  { %1931 = vmatprep.subr.bf16.mxu0 %v2918_v50 }
  0xa1   :  { %2632 = vmatpush3.bf16.msra.mxu1 %v2886_v49 }
  0xa2   :  { %1882 = vmatmul.mubr.bf16.vlgmr.msra.gmra.mrb[16].mxu0 %v2883_v47  ;;  %2657 = vmatprep.subr.bf16.mxu1 %v2919_v17 }
  0xa3   :  { %1932 = vmatpush1.bf16.msra.mxu0 %v2890_v53  ;;  %2400 = vmatprep.mubr.msk.bf16.mxu0 %vm1517_vm0, %v2899_v56 }
  0xa4   :  { %1923 = vmatmul.mubr.bf16.vlgmr.msra.gmra.mrb[16].mxu1 %v2887_v51  ;;  %1933 = vmatprep.subr.bf16.mxu0 %v2918_v50 }
  0xa5   :  { %2658 = vmatpush3.bf16.msra.mxu1 %v2902_v18  ;;  %2673 = vmatprep.mubr.msk.bf16.mxu1 %vm2920_vm1, %v2919_v17 }
  0xa6   :  { %2659 = vmatprep.subr.bf16.mxu1 %v2919_v17 }
  0xa7   :  { %1934 = vmatpush1.bf16.msra.mxu0 %v2891_v54 }
  0xa8   :  { %1935 = vmatprep.subr.bf16.mxu0 %v2918_v50 }
  0xa9   :  { %2660 = vmatpush3.bf16.msra.mxu1 %v2903_v19 }
  0xaa   :  { %2661 = vmatprep.subr.bf16.mxu1 %v2919_v17 }
  0xab   :  { %1936 = vmatpush1.bf16.msra.mxu0 %v2892_v55 }
  0xac   :  { %1937 = vmatprep.subr.bf16.mxu0 %v2918_v50 }
  0xad   :  { %2662 = vmatpush3.bf16.msra.mxu1 %v2904_v20 }
  0xae   :  { %2663 = vmatprep.subr.bf16.mxu1 %v2919_v17 }
  0xaf   :  { %1938 = vmatpush1.bf16.msra.mxu0 %v2893_v57 }
  0xb0   :  { %1939 = vmatprep.subr.bf16.mxu0 %v2918_v50 }
  0xb1   :  { %2664 = vmatpush3.bf16.msra.mxu1 %v2905_v21 }
  0xb2   :  { %2665 = vmatprep.subr.bf16.mxu1 %v2919_v17 }
  0xb3   :  { %1940 = vmatpush1.bf16.msra.mxu0 %v2894_v58 }
  0xb4   :  { %1941 = vmatprep.subr.bf16.mxu0 %v2918_v50 }
  0xb5   :  { %2666 = vmatpush3.bf16.msra.mxu1 %v2906_v22 }
  0xb6   :  { %2667 = vmatprep.subr.bf16.mxu1 %v2919_v17 }
  0xb7   :  { %1942 = vmatpush1.bf16.msra.mxu0 %v2895_v59 }
  0xb8   :  { %1943 = vmatprep.subr.bf16.mxu0 %v2918_v50 }
  0xb9   :  { %2668 = vmatpush3.bf16.msra.mxu1 %v2907_v27 }
  0xba   :  { %2669 = vmatprep.subr.bf16.mxu1 %v2919_v17 }
  0xbb   :  { %1944 = vmatpush1.bf16.msra.mxu0 %v2896_v60 }
  0xbc   :  { %1945 = vmatprep.subr.bf16.mxu0 %v2918_v50 }
  0xbd   :  { %2670 = vmatpush3.bf16.msra.mxu1 %v2908_v40  ;;  %v2914_v40 = vld [vmem:[%s3621_s5 + $0x20] sm:$0xff]  }
  0xbe   :  { %2671 = vmatprep.subr.bf16.mxu1 %v2919_v17 }
  0xbf   :  { %1946 = vmatpush1.bf16.msra.mxu0 %v2897_v61 }
  0xc0   :  { %1947 = vmatprep.subr.bf16.mxu0 %v2918_v50 }
  0xc1   :  { %2672 = vmatpush3.bf16.msra.mxu1 %v2909_v41  ;;  %v2915_v41 = vld [vmem:[%s3621_s5 + $0x28] sm:$0xff]  }
  0xc2   :  { %2677 = vmatprep.subr.bf16.mxu1 %v2919_v17 }
  0xc3   :  { %1948 = vmatpush1.bf16.msra.mxu0 %v2898_v62 }
  0xc6   :  { %1964 = vmatmul.mubr.bf16.vlgmr.msra.gmra.mrb[20].mxu0 %v2901_v63 }
  0xf5   :  { %v2435_v0 = vpop.f32.mrb[0].mxu0 }
  0xf6   :  { %v2436_v2 = vpop.f32.mrb[1].mxu0 }
  0xf7   :  { %v2437_v3 = vadd.f32 %v2436_v2, %v2435_v0  ;;  %v2438_v4 = vpop.f32.mrb[2].mxu0  ;;  %v2457_v5 = vpop.f32.mrb[0].mxu1 }
  0xf8   :  { %v2439_v6 = vpop.f32.mrb[3].mxu0  ;;  %v2458_v9 = vpop.f32.mrb[1].mxu1 }
  0xf9   :  { %v1556_v7 = vadd.f32 %v2437_v3, %v2208_v1  ;;  %v2440_v8 = vadd.f32 %v2439_v6, %v2438_v4  ;;  %v2459_v10 = vadd.f32 %v2458_v9, %v2457_v5  ;;  %v2460_v11 = vpop.f32.mrb[2].mxu1 }
  0xfa   :  { %v2461_v13 = vpop.f32.mrb[3].mxu1 }
  0xfb   :  { %v1559_v12 = vadd.f32 %v2440_v8, %v2208_v1  ;;  %v1597_v14 = vadd.f32 %v2459_v10, %v1556_v7  ;;  %v2462_v15 = vadd.f32 %v2461_v13, %v2460_v11 }
  0xfd   :  { %v1600_v16 = vadd.f32 %v2462_v15, %v1559_v12 }
 0x115   :  { %v2479_v23 = vpop.f32.mrb[4].mxu0 }
 0x116   :  { %v2480_v24 = vpop.f32.mrb[5].mxu0 }
 0x117   :  { %v2481_v25 = vadd.f32 %v2480_v24, %v2479_v23  ;;  %v2482_v26 = vpop.f32.mrb[6].mxu0  ;;  %v2501_v30 = vpop.f32.mrb[4].mxu1 }
 0x118   :  { %v2483_v28 = vpop.f32.mrb[7].mxu0  ;;  %v2502_v32 = vpop.f32.mrb[5].mxu1 }
 0x119   :  { %v1638_v29 = vadd.f32 %v2481_v25, %v1597_v14  ;;  %v2484_v31 = vadd.f32 %v2483_v28, %v2482_v26  ;;  %v2503_v34 = vadd.f32 %v2502_v32, %v2501_v30  ;;  %v2504_v35 = vpop.f32.mrb[6].mxu1 }
 0x11a   :  { %v2505_v36 = vpop.f32.mrb[7].mxu1 }
 0x11b   :  { %v1641_v33 = vadd.f32 %v2484_v31, %v1600_v16  ;;  %v1679_v37 = vadd.f32 %v2503_v34, %v1638_v29  ;;  %v2506_v38 = vadd.f32 %v2505_v36, %v2504_v35  ;;  %v2910_v35 = vld [vmem:[%s3621_s5] sm:$0xff]  }
 0x11d   :  { %v1682_v39 = vadd.f32 %v2506_v38, %v1641_v33  ;;  %v2912_v38 = vld [vmem:[%s3621_s5 + $0x10] sm:$0xff]  }
 0x135   :  { %v2523_v42 = vpop.f32.mrb[8].mxu0 }
 0x136   :  { %v2524_v43 = vpop.f32.mrb[9].mxu0 }
 0x137   :  { %v2525_v44 = vadd.f32 %v2524_v43, %v2523_v42  ;;  %v2526_v45 = vpop.f32.mrb[10].mxu0  ;;  %v2545_v46 = vpop.f32.mrb[8].mxu1  ;;  %v2916_v42 = vld [vmem:[%s3621_s5 + $0x30] sm:$0xff]   ;;  %v2917_v43 = vld [vmem:[%s3621_s5 + $0x38] sm:$0xff]  }
 0x138   :  { %v2527_v47 = vpop.f32.mrb[11].mxu0  ;;  %v2546_v50 = vpop.f32.mrb[9].mxu1 }
 0x139   :  { %v1720_v48 = vadd.f32 %v2525_v44, %v1679_v37  ;;  %v2528_v49 = vadd.f32 %v2527_v47, %v2526_v45  ;;  %v2547_v51 = vadd.f32 %v2546_v50, %v2545_v46  ;;  %v2548_v52 = vpop.f32.mrb[10].mxu1  ;;  %v2911_v37 = vld [vmem:[%s3621_s5 + $0x8] sm:$0xff]   ;;  %v2401_v44 = vld [vmem:[%s3622_s4] ss:$0 sm:$0xff] }
 0x13a   :  { %v2549_v54 = vpop.f32.mrb[11].mxu1 }
 0x13b   :  { %v1723_v53 = vadd.f32 %v2528_v49, %v1682_v39  ;;  %v1761_v55 = vadd.f32 %v2547_v51, %v1720_v48  ;;  %v2550_v56 = vadd.f32 %v2549_v54, %v2548_v52  ;;  %v2913_v39 = vld [vmem:[%s3621_s5 + $0x18] sm:$0xff]  }
 0x13d   :  { %v1764_v57 = vadd.f32 %v2550_v56, %v1723_v53 }
 0x155   :  { %v2567_v58 = vpop.f32.mrb[12].mxu0 }
 0x156   :  { %v2568_v59 = vpop.f32.mrb[13].mxu0 }
 0x157   :  { %v2569_v60 = vadd.f32 %v2568_v59, %v2567_v58  ;;  %v2570_v61 = vpop.f32.mrb[14].mxu0  ;;  %v2589_v62 = vpop.f32.mrb[12].mxu1 }
 0x158   :  { %v2571_v63 = vpop.f32.mrb[15].mxu0  ;;  %v2590_v2 = vpop.f32.mrb[13].mxu1 }
 0x159   :  { %v1802_v0 = vadd.f32 %v2569_v60, %v1761_v55  ;;  %v2572_v1 = vadd.f32 %v2571_v63, %v2570_v61  ;;  %v2591_v3 = vadd.f32 %v2590_v2, %v2589_v62  ;;  %v2592_v4 = vpop.f32.mrb[14].mxu1 }
 0x15a   :  { %v2593_v6 = vpop.f32.mrb[15].mxu1 }
 0x15b   :  { %v1805_v5 = vadd.f32 %v2572_v1, %v1764_v57  ;;  %v1843_v7 = vadd.f32 %v2591_v3, %v1802_v0  ;;  %v2594_v8 = vadd.f32 %v2593_v6, %v2592_v4 }
 0x15d   :  { %v1846_v9 = vadd.f32 %v2594_v8, %v1805_v5 }
 0x175   :  { %v2611_v10 = vpop.f32.mrb[16].mxu0 }
 0x176   :  { %v2612_v11 = vpop.f32.mrb[17].mxu0 }
 0x177   :  { %v2613_v12 = vadd.f32 %v2612_v11, %v2611_v10  ;;  %v2614_v13 = vpop.f32.mrb[18].mxu0  ;;  %v2633_v14 = vpop.f32.mrb[16].mxu1 }
 0x178   :  { %v2615_v15 = vpop.f32.mrb[19].mxu0  ;;  %v2634_v19 = vpop.f32.mrb[17].mxu1 }
 0x179   :  { %v1884_v16 = vadd.f32 %v2613_v12, %v1843_v7  ;;  %v2616_v18 = vadd.f32 %v2615_v15, %v2614_v13  ;;  %v2635_v20 = vadd.f32 %v2634_v19, %v2633_v14  ;;  %v2636_v21 = vpop.f32.mrb[18].mxu1 }
 0x17a   :  { %v2637_v23 = vpop.f32.mrb[19].mxu1 }
 0x17b   :  { %v1887_v22 = vadd.f32 %v2616_v18, %v1846_v9  ;;  %v2638_v24 = vadd.f32 %v2637_v23, %v2636_v21  ;;  %v1925_v25 = vadd.f32 %v2635_v20, %v1884_v16 }
 0x17d   :  { %v1928_v26 = vadd.f32 %v2638_v24, %v1887_v22 }
 0x199   :  { %v1965_v27 = vpop.f32.mrb[20].mxu0 }
 0x19a   :  { %v1966_v28 = vadd.f32 %v1965_v27, %v1925_v25  ;;  %v1967_v29 = vpop.f32.mrb[21].mxu0 }
 0x19b   :  { %v1968_v30 = vpop.f32.mrb[22].mxu0 }
 0x19c   :  { %v1969_v31 = vadd.f32 %v1968_v30, %v1928_v26  ;;  %v1970_v32 = vpop.f32.mrb[23].mxu0  ;;  %v1972_v33 = vmax.f32 %v1966_v28, 0.0 }
 0x19e   :  { %v1973_v34 = vmax.f32 %v1969_v31, 0.0 }
 0x1a0   :  { %v1974_v36 = vpack.c.bf16 %v1973_v34, %v1972_v33 }
 0x1a2   :  { %2674 = vmatmul.mubr.bf16.vlgmr.msra.gmra.mrb[20].mxu1 %v1974_v36 }
 0x1a3   :  { %2678 = vmatpush3.bf16.msra.mxu1 %v2910_v35  ;;  %2693 = vmatprep.mubr.msk.bf16.mxu1 %vm2920_vm1, %v2919_v17 }
 0x1a4   :  { %2679 = vmatprep.subr.bf16.mxu1 %v2919_v17 }
 0x1a7   :  { %2680 = vmatpush3.bf16.msra.mxu1 %v2911_v37 }
 0x1a8   :  { %2681 = vmatprep.subr.bf16.mxu1 %v2919_v17 }
 0x1ab   :  { %2682 = vmatpush3.bf16.msra.mxu1 %v2912_v38 }
 0x1ac   :  { %2683 = vmatprep.subr.bf16.mxu1 %v2919_v17 }
 0x1af   :  { %2684 = vmatpush3.bf16.msra.mxu1 %v2913_v39 }
 0x1b0   :  { %2685 = vmatprep.subr.bf16.mxu1 %v2919_v17 }
 0x1b3   :  { %2686 = vmatpush3.bf16.msra.mxu1 %v2914_v40 }
 0x1b4   :  { %2687 = vmatprep.subr.bf16.mxu1 %v2919_v17 }
 0x1b7   :  { %2688 = vmatpush3.bf16.msra.mxu1 %v2915_v41 }
 0x1b8   :  { %2689 = vmatprep.subr.bf16.mxu1 %v2919_v17 }
 0x1bb   :  { %2690 = vmatpush3.bf16.msra.mxu1 %v2916_v42 }
 0x1bc   :  { %2691 = vmatprep.subr.bf16.mxu1 %v2919_v17  ;;  %v2410_v17 = vld [vmem:[%s3623_s6] ss:$0 sm:$0xff] }
 0x1bf   :  { %2692 = vmatpush3.bf16.msra.mxu1 %v2917_v43 }
 0x275   :  { %v2080_v45 = vpop.f32.mrb[20].mxu1 }
 0x276   :  { %v2081_v46 = vadd.f32 %v2401_v44, %v2080_v45  ;;  %v2675_v47 = vpop.f32.mrb[21].mxu1 }
 0x277   :  { %v2083_v48 = vpop.f32.mrb[22].mxu1 }
 0x278   :  { %v2084_v49 = vadd.f32 %v2401_v44, %v2083_v48  ;;  %v2676_v50 = vpop.f32.mrb[23].mxu1  ;;  %v2087_v51 = vmax.f32 %v2081_v46, 0.0 }
 0x27a   :  { %v2088_v52 = vmax.f32 %v2084_v49, 0.0 }
 0x27c   :  { %v2089_v53 = vpack.c.bf16 %v2088_v52, %v2087_v51 }
 0x27e   :  { %2694 = vmatmul.mubr.bf16.vlgmr.msra.gmra.mrb[24].mxu1 %v2089_v53 }
 0x351   :  { %v2195_v54 = vpop.f32.mrb[24].mxu1 }
 0x352   :  { %v2196_v55 = vadd.f32 %v2410_v17, %v2195_v54  ;;  %v2695_v56 = vpop.f32.mrb[25].mxu1 }
 0x353   :  { %v2198_v57 = vpop.f32.mrb[26].mxu1 }
 0x354   :  { %2202 = vst [vmem:[%s3624_s7] sm:$0xff] %v2196_v55  ;;  %v2199_v58 = vadd.f32 %v2410_v17, %v2198_v57  ;;  %v2696_v59 = vpop.f32.mrb[27].mxu1 }
 0x356   :  { %2203 = vst [vmem:[%s3624_s7 + $0x8] sm:$0xff] %v2199_v58 }

</bundles_post_ra>
